<compile_context>
chip_gen: v7x
topology: tpu7x:2x2x1
jax: 0.10.0
libtpu: 0.0.40
codegen_flags: <defaults>
</compile_context>

<pallas_src>
import functools
import math

import jax
import jax.numpy as jnp
from jax.experimental import pallas as pl
from jax.experimental.pallas import tpu as pltpu


def _h2gcn_fused_kernel(
    x_ref,       # (n_pad, in_c)    bf16
    a_ref,       # (n_pad, n_pad)   bf16  (D^-1/2 (A+I) D^-1/2, zero-padded)
    w1_ref,      # (in_c, hid)      bf16
    b1_ref,      # (1, hid)         f32
    w2_ref,      # (hid, out_c)     bf16
    b2_ref,      # (1, out_c)       f32
    wlx_ref,     # (in_c, c_pad)    bf16  W_lin[:, :in_c].T   (zero-padded cols)
    wlh1_ref,    # (hid, c_pad)     bf16
    wlh2_ref,    # (out_c, c_pad)   bf16
    bl_ref,      # (1, c_pad)       f32   (padded classes carry -1e30)
    o_ref,       # (tile_m, c_pad)  f32
    h1_scratch,    # VMEM (n_pad, hid)   bf16  -- persists across grid steps
    h1w2_scratch,  # VMEM (n_pad, out_c) bf16  -- persists across grid steps
    *,
    tile_m,
):
    i = pl.program_id(0)
    row0 = pl.multiple_of(i * tile_m, tile_m)

    # ---- Layer 1 over ALL nodes, computed once (grid step 0 only). --------
    # Grid axis is "arbitrary" (sequential), so the bf16 scratch written here
    # is visible to every later row-tile step.
    @pl.when(i == 0)
    def _():
        xw1 = jnp.dot(x_ref[...], w1_ref[...], preferred_element_type=jnp.float32)
        h1 = jnp.maximum(
            jnp.dot(a_ref[...], xw1.astype(jnp.bfloat16),
                    preferred_element_type=jnp.float32) + b1_ref[...],
            0.0,
        )
        # F.dropout(training=False) -> identity.
        h1_bf16 = h1.astype(jnp.bfloat16)
        h1_scratch[...] = h1_bf16
        h1w2_scratch[...] = jnp.dot(
            h1_bf16, w2_ref[...], preferred_element_type=jnp.float32
        ).astype(jnp.bfloat16)

    # ---- Layer-2 aggregation + head for THIS program's row tile only. -----
    a_tile = a_ref[pl.ds(row0, tile_m), :]
    h2_tile = (
        jnp.dot(a_tile, h1w2_scratch[...], preferred_element_type=jnp.float32)
        + b2_ref[...]
    )

    # "concat + linear" without concat: three partial matmuls into one f32 acc.
    x_tile = x_ref[pl.ds(row0, tile_m), :]
    h1_tile = h1_scratch[pl.ds(row0, tile_m), :]
    logits = (
        jnp.dot(x_tile, wlx_ref[...], preferred_element_type=jnp.float32)
        + jnp.dot(h1_tile, wlh1_ref[...], preferred_element_type=jnp.float32)
        + jnp.dot(h2_tile.astype(jnp.bfloat16), wlh2_ref[...],
                  preferred_element_type=jnp.float32)
        + bl_ref[...]
    )

    # ---- stable log_softmax over the lane-padded class dim (f32). ---------
    m = jnp.max(logits, axis=-1, keepdims=True)
    shifted = logits - m
    lse = jnp.log(jnp.sum(jnp.exp(shifted), axis=-1, keepdims=True))
    o_ref[...] = (shifted - lse).astype(o_ref.dtype)


def h2gcn_ego_prepare(x, a_hat, params, *, tile_m=256):
    """One-time preprocessing (pad / split / cast) -- keep OUT of the hot path."""
    n, in_c = x.shape
    hid = params["w1"].shape[1]
    out_c = params["w2"].shape[1]

    n_pad = pl.cdiv(n, tile_m) * tile_m
    c_pad = pl.cdiv(out_c, 128) * 128  # lane-dense output slab

    # Zero-pad nodes so any node count works; padded rows/cols are inert.
    x_p = jnp.pad(x.astype(jnp.float32), ((0, n_pad - n), (0, 0))).astype(jnp.bfloat16)
    a_p = jnp.pad(a_hat.astype(jnp.float32),
                  ((0, n_pad - n), (0, n_pad - n))).astype(jnp.bfloat16)

    w1 = params["w1"].astype(jnp.bfloat16)
    w2 = params["w2"].astype(jnp.bfloat16)
    b1 = params["b1"].reshape(1, hid).astype(jnp.float32)
    b2 = params["b2"].reshape(1, out_c).astype(jnp.float32)

    # Split W_lin (out_c, in_c+hid+out_c) into three column blocks, transpose,
    # zero-pad the class axis to c_pad; padded classes get a -1e30 bias so the
    # in-kernel (f32) log_softmax treats them as exp(.) = 0.
    w_lin = params["w_lin"].astype(jnp.float32)
    cpad = c_pad - out_c
    wlx = jnp.pad(w_lin[:, :in_c].T, ((0, 0), (0, cpad))).astype(jnp.bfloat16)
    wlh1 = jnp.pad(w_lin[:, in_c:in_c + hid].T, ((0, 0), (0, cpad))).astype(jnp.bfloat16)
    wlh2 = jnp.pad(w_lin[:, in_c + hid:].T, ((0, 0), (0, cpad))).astype(jnp.bfloat16)
    bl = jnp.pad(params["b_lin"].astype(jnp.float32), (0, cpad),
                 constant_values=-1e30).reshape(1, c_pad)

    operands = (x_p, a_p, w1, b1, w2, b2, wlx, wlh1, wlh2, bl)
    meta = dict(n=n, in_c=in_c, hid=hid, out_c=out_c,
                n_pad=n_pad, c_pad=c_pad, tile_m=tile_m)
    return operands, meta


def _run_fused(operands, meta, *, single_buffer_constants=True):
    n_pad, c_pad, tile_m = meta["n_pad"], meta["c_pad"], meta["tile_m"]
    in_c, hid, out_c = meta["in_c"], meta["hid"], meta["out_c"]

    # All inputs keep a constant block index across the grid -> single-buffer
    # them (halves the VMEM of the largest block, A_hat).
    pm = pl.Buffered(1) if single_buffer_constants else None
    const = lambda i: (0, 0)

    def cspec(shape):
        return pl.BlockSpec(shape, const, pipeline_mode=pm)

    in_specs = [
        cspec((n_pad, in_c)),    # x
        cspec((n_pad, n_pad)),   # a_hat
        cspec((in_c, hid)),      # w1
        cspec((1, hid)),         # b1
        cspec((hid, out_c)),     # w2
        cspec((1, out_c)),       # b2
        cspec((in_c, c_pad)),    # W_lin (x block)
        cspec((hid, c_pad)),     # W_lin (h1 block)
        cspec((out_c, c_pad)),   # W_lin (h2 block)
        cspec((1, c_pad)),       # b_lin (padded)
    ]

    # VMEM budget: actual footprint + generous headroom, capped at 48 MiB so
    # the same request also fits v7x's 64 MiB per-core VMEM.
    operand_bytes = sum(int(math.prod(o.shape)) * o.dtype.itemsize for o in operands)
    scratch_bytes = n_pad * hid * 2 + n_pad * out_c * 2          # bf16 scratch
    out_bytes = 2 * tile_m * c_pad * 4                           # dbl-buffered out tile
    est = operand_bytes + scratch_bytes + out_bytes
    vmem_limit = int(min(48 << 20, max(16 << 20, 2 * est + (8 << 20))))

    kernel = functools.partial(_h2gcn_fused_kernel, tile_m=tile_m)
    return pl.pallas_call(
        kernel,
        out_shape=jax.ShapeDtypeStruct((n_pad, c_pad), jnp.float32),
        grid_spec=pltpu.PrefetchScalarGridSpec(
            num_scalar_prefetch=0,
            grid=(n_pad // tile_m,),
            in_specs=in_specs,
            out_specs=pl.BlockSpec((tile_m, c_pad), lambda i: (i, 0)),
            scratch_shapes=[
                pltpu.VMEM((n_pad, hid), jnp.bfloat16),    # H1 (computed once)
                pltpu.VMEM((n_pad, out_c), jnp.bfloat16),  # H1 @ W2 (computed once)
            ],
        ),
        compiler_params=pltpu.CompilerParams(
            # "arbitrary": steps run sequentially on one core so the scratch
            # written at step 0 is carried to later steps (required for the
            # compute-H1-once pattern; "parallel" buys nothing on v5e/v6e).
            dimension_semantics=("arbitrary",),
            vmem_limit_bytes=vmem_limit,
        ),
    )(*operands)


def h2gcn_ego_forward_prepared(operands, meta):
    n, out_c = meta["n"], meta["out_c"]
    try:
        out_pad = jax.block_until_ready(
            _run_fused(operands, meta, single_buffer_constants=True))
    except Exception:
        # Fallback if this JAX build rejects pl.Buffered(1) single-buffering.
        out_pad = jax.block_until_ready(
            _run_fused(operands, meta, single_buffer_constants=False))
    return out_pad[:n, :out_c]


def h2gcn_ego_forward(x, a_hat, params, *, tile_m=256):
    """Convenience wrapper (prepare + run). For repeated calls, call
    h2gcn_ego_prepare once and reuse its output."""
    operands, meta = h2gcn_ego_prepare(x, a_hat, params, tile_m=tile_m)
    return h2gcn_ego_forward_prepared(operands, meta)


def _reference_forward(x, a_hat, params):
    """Pure-JAX f32 reference for correctness checking."""
    h1 = jnp.maximum(a_hat @ (x @ params["w1"]) + params["b1"], 0.0)
    h2 = a_hat @ (h1 @ params["w2"]) + params["b2"]
    cat = jnp.concatenate([x, h1, h2], axis=1)
    logits = cat @ params["w_lin"].T + params["b_lin"]
    return jax.nn.log_softmax(logits, axis=-1)


def _build_normalized_adjacency(key, n_nodes):
    """Random symmetric graph -> D^{-1/2}(A + I)D^{-1/2} (dense, float32)."""
    raw = jax.random.uniform(key, (n_nodes, n_nodes))
    adj = (raw < 0.05).astype(jnp.float32)
    adj = jnp.maximum(adj, adj.T)                  # symmetric
    adj = adj * (1.0 - jnp.eye(n_nodes))           # clear diag
    adj = adj + jnp.eye(n_nodes)                   # add self loops
    deg = jnp.sum(adj, axis=1)
    d_inv_sqrt = 1.0 / jnp.sqrt(deg)
    return adj * d_inv_sqrt[:, None] * d_inv_sqrt[None, :]


if __name__ == "__main__":
    # Small shapes consistent with the module.  n_nodes is deliberately not a
    # multiple of tile_m so both the padding path and the multi-step grid
    # (H1 computed once at step 0, reused at step 1) are exercised.
    n_nodes = 300
    in_channels = 32
    hidden_channels = 64
    out_channels = 16

    key = jax.random.PRNGKey(0)
    k_x, k_a, k_w1, k_w2, k_wl, k_bl = jax.random.split(key, 6)

    x = jax.random.normal(k_x, (n_nodes, in_channels), jnp.float32)
    a_hat = _build_normalized_adjacency(k_a, n_nodes)

    def glorot(k, shape):
        limit = jnp.sqrt(6.0 / (shape[0] + shape[1]))
        return jax.random.uniform(k, shape, jnp.float32, -limit, limit)

    params = {
        # GCNConv weights (in, out); GCNConv bias inits to zeros in PyG.
        "w1": glorot(k_w1, (in_channels, hidden_channels)),
        "b1": jnp.zeros((hidden_channels,), jnp.float32),
        "w2": glorot(k_w2, (hidden_channels, out_channels)),
        "b2": jnp.zeros((out_channels,), jnp.float32),
        # torch.nn.Linear: weight (out, in_total), bias (out,)
        "w_lin": glorot(k_wl, (out_channels,
                               in_channels + hidden_channels + out_channels)),
        "b_lin": 0.01 * jax.random.normal(k_bl, (out_channels,), jnp.float32),
    }

    # One-time prepare (pad / split / cast) hoisted out of the per-call path.
    operands, meta = h2gcn_ego_prepare(x, a_hat, params, tile_m=256)
    out = jax.block_until_ready(h2gcn_ego_forward_prepared(operands, meta))

    ref = _reference_forward(x, a_hat, params)
    assert out.shape == (n_nodes, out_channels)
    # bf16 MXU inputs + f32 accumulation -> small, bounded deviation from the
    # all-f32 reference.
    assert jnp.allclose(out, ref, atol=5e-2, rtol=5e-2)
    print("KERNEL_OK")
</pallas_src>

<mosaic_0001>
module attributes {stable_mosaic.version = 11 : i64} {
  func.func @_h2gcn_fused_kernel(%arg0: i32, %arg1: memref<512x32xbf16, #tpu.memory_space<vmem>>, %arg2: memref<512x512xbf16, #tpu.memory_space<vmem>>, %arg3: memref<32x64xbf16, #tpu.memory_space<vmem>>, %arg4: memref<1x64xf32, #tpu.memory_space<vmem>>, %arg5: memref<64x16xbf16, #tpu.memory_space<vmem>>, %arg6: memref<1x16xf32, #tpu.memory_space<vmem>>, %arg7: memref<32x128xbf16, #tpu.memory_space<vmem>>, %arg8: memref<64x128xbf16, #tpu.memory_space<vmem>>, %arg9: memref<16x128xbf16, #tpu.memory_space<vmem>>, %arg10: memref<1x128xf32, #tpu.memory_space<vmem>>, %arg11: memref<256x128xf32, #tpu.memory_space<vmem>>, %arg12: memref<512x64xbf16, #tpu.memory_space<vmem>>, %arg13: memref<512x16xbf16, #tpu.memory_space<vmem>>) attributes {dimension_semantics = [#tpu.dimension_semantics<arbitrary>], iteration_bounds = array<i64: 2>, scalar_prefetch = 0 : i64, scratch_operands = 2 : i64, tpu.core_type = #tpu.core_type<tc>, window_params = [{pipeline_mode = #tpu.pipeline_mode<synchronous>, transform_indices = @transform_0, window_bounds = array<i64: 512, 32>}, {pipeline_mode = #tpu.pipeline_mode<synchronous>, transform_indices = @transform_1, window_bounds = array<i64: 512, 512>}, {pipeline_mode = #tpu.pipeline_mode<synchronous>, transform_indices = @transform_2, window_bounds = array<i64: 32, 64>}, {pipeline_mode = #tpu.pipeline_mode<synchronous>, transform_indices = @transform_3, window_bounds = array<i64: 1, 64>}, {pipeline_mode = #tpu.pipeline_mode<synchronous>, transform_indices = @transform_4, window_bounds = array<i64: 64, 16>}, {pipeline_mode = #tpu.pipeline_mode<synchronous>, transform_indices = @transform_5, window_bounds = array<i64: 1, 16>}, {pipeline_mode = #tpu.pipeline_mode<synchronous>, transform_indices = @transform_6, window_bounds = array<i64: 32, 128>}, {pipeline_mode = #tpu.pipeline_mode<synchronous>, transform_indices = @transform_7, window_bounds = array<i64: 64, 128>}, {pipeline_mode = #tpu.pipeline_mode<synchronous>, transform_indices = @transform_8, window_bounds = array<i64: 16, 128>}, {pipeline_mode = #tpu.pipeline_mode<synchronous>, transform_indices = @transform_9, window_bounds = array<i64: 1, 128>}, {transform_indices = @transform_10, window_bounds = array<i64: 256, 128>}]} {
    %c256_i32 = arith.constant 256 : i32
    %0 = arith.muli %arg0, %c256_i32 : i32
    %1 = tpu.assume_multiple %0, 256 : i32
    %c0_i32 = arith.constant 0 : i32
    %2 = arith.cmpi eq, %arg0, %c0_i32 : i32
    %3 = arith.extui %2 : i1 to i32
    %c0_i32_0 = arith.constant 0 : i32
    %4 = arith.cmpi ne, %3, %c0_i32_0 : i32
    scf.if %4 {
      %c0_22 = arith.constant 0 : index
      %c0_23 = arith.constant 0 : index
      %39 = vector.load %arg1[%c0_22, %c0_23] : memref<512x32xbf16, #tpu.memory_space<vmem>>, vector<512x32xbf16>
      %c0_24 = arith.constant 0 : index
      %c0_25 = arith.constant 0 : index
      %40 = vector.load %arg3[%c0_24, %c0_25] : memref<32x64xbf16, #tpu.memory_space<vmem>>, vector<32x64xbf16>
      %cst_26 = arith.constant dense<0.000000e+00> : vector<512x64xf32>
      %41 = tpu.matmul %39, %40, %cst_26 {dimension_numbers = #tpu.dot_dimension_numbers<[1], [0], [0], [1], [0, 0, 1, 1], [], []>} : vector<512x32xbf16>, vector<32x64xbf16>, vector<512x64xf32> -> vector<512x64xf32>
      %c0_27 = arith.constant 0 : index
      %c0_28 = arith.constant 0 : index
      %42 = vector.load %arg2[%c0_27, %c0_28] : memref<512x512xbf16, #tpu.memory_space<vmem>>, vector<512x512xbf16>
      %43 = arith.truncf %41 : vector<512x64xf32> to vector<512x64xbf16>
      %cst_29 = arith.constant dense<0.000000e+00> : vector<512x64xf32>
      %44 = tpu.matmul %42, %43, %cst_29 {dimension_numbers = #tpu.dot_dimension_numbers<[1], [0], [0], [1], [0, 0, 1, 1], [], []>} : vector<512x512xbf16>, vector<512x64xbf16>, vector<512x64xf32> -> vector<512x64xf32>
      %c0_30 = arith.constant 0 : index
      %c0_31 = arith.constant 0 : index
      %45 = vector.load %arg4[%c0_30, %c0_31] : memref<1x64xf32, #tpu.memory_space<vmem>>, vector<1x64xf32>
      %46 = vector.broadcast %45 : vector<1x64xf32> to vector<512x64xf32>
      %47 = arith.addf %44, %46 : vector<512x64xf32>
      %cst_32 = arith.constant 0.000000e+00 : f32
      %48 = vector.broadcast %cst_32 : f32 to vector<512x64xf32>
      %49 = arith.maximumf %47, %48 : vector<512x64xf32>
      %50 = arith.truncf %49 : vector<512x64xf32> to vector<512x64xbf16>
      %c0_33 = arith.constant 0 : index
      %c0_34 = arith.constant 0 : index
      %51 = vector.load %arg12[%c0_33, %c0_34] : memref<512x64xbf16, #tpu.memory_space<vmem>>, vector<512x64xbf16>
      tpu.vector_store %arg12[%c0_33, %c0_34], %50 {strides = array<i32>} : memref<512x64xbf16, #tpu.memory_space<vmem>>, vector<512x64xbf16>,
      %c0_35 = arith.constant 0 : index
      %c0_36 = arith.constant 0 : index
      %52 = vector.load %arg5[%c0_35, %c0_36] : memref<64x16xbf16, #tpu.memory_space<vmem>>, vector<64x16xbf16>
      %cst_37 = arith.constant dense<0.000000e+00> : vector<512x16xf32>
      %53 = tpu.matmul %50, %52, %cst_37 {dimension_numbers = #tpu.dot_dimension_numbers<[1], [0], [0], [1], [0, 0, 1, 1], [], []>} : vector<512x64xbf16>, vector<64x16xbf16>, vector<512x16xf32> -> vector<512x16xf32>
      %54 = arith.truncf %53 : vector<512x16xf32> to vector<512x16xbf16>
      %c0_38 = arith.constant 0 : index
      %c0_39 = arith.constant 0 : index
      %55 = vector.load %arg13[%c0_38, %c0_39] : memref<512x16xbf16, #tpu.memory_space<vmem>>, vector<512x16xbf16>
      tpu.vector_store %arg13[%c0_38, %c0_39], %54 {strides = array<i32>} : memref<512x16xbf16, #tpu.memory_space<vmem>>, vector<512x16xbf16>,
    } else {
    }
    %5 = arith.index_cast %1 : i32 to index
    %c0 = arith.constant 0 : index
    %6 = vector.load %arg2[%5, %c0] : memref<512x512xbf16, #tpu.memory_space<vmem>>, vector<256x512xbf16>
    %c0_1 = arith.constant 0 : index
    %c0_2 = arith.constant 0 : index
    %7 = vector.load %arg13[%c0_1, %c0_2] : memref<512x16xbf16, #tpu.memory_space<vmem>>, vector<512x16xbf16>
    %cst = arith.constant dense<0.000000e+00> : vector<256x16xf32>
    %8 = tpu.matmul %6, %7, %cst {dimension_numbers = #tpu.dot_dimension_numbers<[1], [0], [0], [1], [0, 0, 1, 1], [], []>} : vector<256x512xbf16>, vector<512x16xbf16>, vector<256x16xf32> -> vector<256x16xf32>
    %c0_3 = arith.constant 0 : index
    %c0_4 = arith.constant 0 : index
    %9 = vector.load %arg6[%c0_3, %c0_4] : memref<1x16xf32, #tpu.memory_space<vmem>>, vector<1x16xf32>
    %10 = vector.broadcast %9 : vector<1x16xf32> to vector<256x16xf32>
    %11 = arith.addf %8, %10 : vector<256x16xf32>
    %12 = arith.index_cast %1 : i32 to index
    %c0_5 = arith.constant 0 : index
    %13 = vector.load %arg1[%12, %c0_5] : memref<512x32xbf16, #tpu.memory_space<vmem>>, vector<256x32xbf16>
    %14 = arith.index_cast %1 : i32 to index
    %c0_6 = arith.constant 0 : index
    %15 = vector.load %arg12[%14, %c0_6] : memref<512x64xbf16, #tpu.memory_space<vmem>>, vector<256x64xbf16>
    %c0_7 = arith.constant 0 : index
    %c0_8 = arith.constant 0 : index
    %16 = vector.load %arg7[%c0_7, %c0_8] : memref<32x128xbf16, #tpu.memory_space<vmem>>, vector<32x128xbf16>
    %cst_9 = arith.constant dense<0.000000e+00> : vector<256x128xf32>
    %17 = tpu.matmul %13, %16, %cst_9 {dimension_numbers = #tpu.dot_dimension_numbers<[1], [0], [0], [1], [0, 0, 1, 1], [], []>} : vector<256x32xbf16>, vector<32x128xbf16>, vector<256x128xf32> -> vector<256x128xf32>
    %c0_10 = arith.constant 0 : index
    %c0_11 = arith.constant 0 : index
    %18 = vector.load %arg8[%c0_10, %c0_11] : memref<64x128xbf16, #tpu.memory_space<vmem>>, vector<64x128xbf16>
    %cst_12 = arith.constant dense<0.000000e+00> : vector<256x128xf32>
    %19 = tpu.matmul %15, %18, %cst_12 {dimension_numbers = #tpu.dot_dimension_numbers<[1], [0], [0], [1], [0, 0, 1, 1], [], []>} : vector<256x64xbf16>, vector<64x128xbf16>, vector<256x128xf32> -> vector<256x128xf32>
    %20 = arith.addf %17, %19 : vector<256x128xf32>
    %21 = arith.truncf %11 : vector<256x16xf32> to vector<256x16xbf16>
    %c0_13 = arith.constant 0 : index
    %c0_14 = arith.constant 0 : index
    %22 = vector.load %arg9[%c0_13, %c0_14] : memref<16x128xbf16, #tpu.memory_space<vmem>>, vector<16x128xbf16>
    %cst_15 = arith.constant dense<0.000000e+00> : vector<256x128xf32>
    %23 = tpu.matmul %21, %22, %cst_15 {dimension_numbers = #tpu.dot_dimension_numbers<[1], [0], [0], [1], [0, 0, 1, 1], [], []>} : vector<256x16xbf16>, vector<16x128xbf16>, vector<256x128xf32> -> vector<256x128xf32>
    %24 = arith.addf %20, %23 : vector<256x128xf32>
    %c0_16 = arith.constant 0 : index
    %c0_17 = arith.constant 0 : index
    %25 = vector.load %arg10[%c0_16, %c0_17] : memref<1x128xf32, #tpu.memory_space<vmem>>, vector<1x128xf32>
    %26 = vector.broadcast %25 : vector<1x128xf32> to vector<256x128xf32>
    %27 = arith.addf %24, %26 : vector<256x128xf32>
    %cst_18 = arith.constant dense<0xFF800000> : vector<256xf32>
    %28 = vector.multi_reduction <maximumf>, %27, %cst_18 [1] : vector<256x128xf32> to vector<256xf32>
    %29 = vector.shape_cast %28 : vector<256xf32> to vector<256x1xf32>
    %30 = vector.broadcast %29 : vector<256x1xf32> to vector<256x128xf32>
    %31 = arith.subf %27, %30 : vector<256x128xf32>
    %32 = math.exp %31 : vector<256x128xf32>
    %cst_19 = arith.constant dense<0.000000e+00> : vector<256xf32>
    %33 = vector.multi_reduction <add>, %32, %cst_19 [1] : vector<256x128xf32> to vector<256xf32>
    %34 = vector.shape_cast %33 : vector<256xf32> to vector<256x1xf32>
    %35 = math.log %34 : vector<256x1xf32>
    %36 = vector.broadcast %35 : vector<256x1xf32> to vector<256x128xf32>
    %37 = arith.subf %31, %36 : vector<256x128xf32>
    %c0_20 = arith.constant 0 : index
    %c0_21 = arith.constant 0 : index
    %38 = vector.load %arg11[%c0_20, %c0_21] : memref<256x128xf32, #tpu.memory_space<vmem>>, vector<256x128xf32>
    tpu.vector_store %arg11[%c0_20, %c0_21], %37 {strides = array<i32>} : memref<256x128xf32, #tpu.memory_space<vmem>>, vector<256x128xf32>,
    return
  }
  func.func @transform_0(%arg0: i32) -> (i32, i32) {
    %c0_i32 = arith.constant 0 : i32
    %c0_i32_0 = arith.constant 0 : i32
    %c0_i32_1 = arith.constant 0 : i32
    return %c0_i32, %c0_i32_0 : i32, i32
  }
  func.func @transform_1(%arg0: i32) -> (i32, i32) {
    %c0_i32 = arith.constant 0 : i32
    %c0_i32_0 = arith.constant 0 : i32
    %c0_i32_1 = arith.constant 0 : i32
    return %c0_i32, %c0_i32_0 : i32, i32
  }
  func.func @transform_2(%arg0: i32) -> (i32, i32) {
    %c0_i32 = arith.constant 0 : i32
    %c0_i32_0 = arith.constant 0 : i32
    %c0_i32_1 = arith.constant 0 : i32
    return %c0_i32, %c0_i32_0 : i32, i32
  }
  func.func @transform_3(%arg0: i32) -> (i32, i32) {
    %c0_i32 = arith.constant 0 : i32
    %c0_i32_0 = arith.constant 0 : i32
    %c0_i32_1 = arith.constant 0 : i32
    return %c0_i32, %c0_i32_0 : i32, i32
  }
  func.func @transform_4(%arg0: i32) -> (i32, i32) {
    %c0_i32 = arith.constant 0 : i32
    %c0_i32_0 = arith.constant 0 : i32
    %c0_i32_1 = arith.constant 0 : i32
    return %c0_i32, %c0_i32_0 : i32, i32
  }
  func.func @transform_5(%arg0: i32) -> (i32, i32) {
    %c0_i32 = arith.constant 0 : i32
    %c0_i32_0 = arith.constant 0 : i32
    %c0_i32_1 = arith.constant 0 : i32
    return %c0_i32, %c0_i32_0 : i32, i32
  }
  func.func @transform_6(%arg0: i32) -> (i32, i32) {
    %c0_i32 = arith.constant 0 : i32
    %c0_i32_0 = arith.constant 0 : i32
    %c0_i32_1 = arith.constant 0 : i32
    return %c0_i32, %c0_i32_0 : i32, i32
  }
  func.func @transform_7(%arg0: i32) -> (i32, i32) {
    %c0_i32 = arith.constant 0 : i32
    %c0_i32_0 = arith.constant 0 : i32
    %c0_i32_1 = arith.constant 0 : i32
    return %c0_i32, %c0_i32_0 : i32, i32
  }
  func.func @transform_8(%arg0: i32) -> (i32, i32) {
    %c0_i32 = arith.constant 0 : i32
    %c0_i32_0 = arith.constant 0 : i32
    %c0_i32_1 = arith.constant 0 : i32
    return %c0_i32, %c0_i32_0 : i32, i32
  }
  func.func @transform_9(%arg0: i32) -> (i32, i32) {
    %c0_i32 = arith.constant 0 : i32
    %c0_i32_0 = arith.constant 0 : i32
    %c0_i32_1 = arith.constant 0 : i32
    return %c0_i32, %c0_i32_0 : i32, i32
  }
  func.func @transform_10(%arg0: i32) -> (i32, i32) {
    %c0_i32 = arith.constant 0 : i32
    %c0_i32_0 = arith.constant 0 : i32
    return %arg0, %c0_i32 : i32, i32
  }
}

module attributes {stable_mosaic.version = 11 : i64} {
  func.func @_h2gcn_fused_kernel(%arg0: i32, %arg1: memref<512x32xbf16, #tpu.memory_space<vmem>>, %arg2: memref<512x512xbf16, #tpu.memory_space<vmem>>, %arg3: memref<32x64xbf16, #tpu.memory_space<vmem>>, %arg4: memref<1x64xf32, #tpu.memory_space<vmem>>, %arg5: memref<64x16xbf16, #tpu.memory_space<vmem>>, %arg6: memref<1x16xf32, #tpu.memory_space<vmem>>, %arg7: memref<32x128xbf16, #tpu.memory_space<vmem>>, %arg8: memref<64x128xbf16, #tpu.memory_space<vmem>>, %arg9: memref<16x128xbf16, #tpu.memory_space<vmem>>, %arg10: memref<1x128xf32, #tpu.memory_space<vmem>>, %arg11: memref<256x128xf32, #tpu.memory_space<vmem>>, %arg12: memref<512x64xbf16, #tpu.memory_space<vmem>>, %arg13: memref<512x16xbf16, #tpu.memory_space<vmem>>) attributes {dimension_semantics = [#tpu.dimension_semantics<arbitrary>], iteration_bounds = array<i64: 2>, scalar_prefetch = 0 : i64, scratch_operands = 2 : i64, tpu.core_type = #tpu.core_type<tc>, window_params = [{pipeline_mode = #tpu.pipeline_mode<synchronous>, transform_indices = @transform_0, window_bounds = array<i64: 512, 32>}, {pipeline_mode = #tpu.pipeline_mode<synchronous>, transform_indices = @transform_1, window_bounds = array<i64: 512, 512>}, {pipeline_mode = #tpu.pipeline_mode<synchronous>, transform_indices = @transform_2, window_bounds = array<i64: 32, 64>}, {pipeline_mode = #tpu.pipeline_mode<synchronous>, transform_indices = @transform_3, window_bounds = array<i64: 1, 64>}, {pipeline_mode = #tpu.pipeline_mode<synchronous>, transform_indices = @transform_4, window_bounds = array<i64: 64, 16>}, {pipeline_mode = #tpu.pipeline_mode<synchronous>, transform_indices = @transform_5, window_bounds = array<i64: 1, 16>}, {pipeline_mode = #tpu.pipeline_mode<synchronous>, transform_indices = @transform_6, window_bounds = array<i64: 32, 128>}, {pipeline_mode = #tpu.pipeline_mode<synchronous>, transform_indices = @transform_7, window_bounds = array<i64: 64, 128>}, {pipeline_mode = #tpu.pipeline_mode<synchronous>, transform_indices = @transform_8, window_bounds = array<i64: 16, 128>}, {pipeline_mode = #tpu.pipeline_mode<synchronous>, transform_indices = @transform_9, window_bounds = array<i64: 1, 128>}, {transform_indices = @transform_10, window_bounds = array<i64: 256, 128>}]} {
    %c256_i32 = arith.constant 256 : i32
    %0 = arith.muli %arg0, %c256_i32 : i32
    %1 = tpu.assume_multiple %0, 256 : i32
    %c0_i32 = arith.constant 0 : i32
    %2 = arith.cmpi eq, %arg0, %c0_i32 : i32
    %3 = arith.extui %2 : i1 to i32
    %c0_i32_0 = arith.constant 0 : i32
    %4 = arith.cmpi ne, %3, %c0_i32_0 : i32
    scf.if %4 {
      %c0_22 = arith.constant 0 : index
      %c0_23 = arith.constant 0 : index
      %39 = vector.load %arg1[%c0_22, %c0_23] : memref<512x32xbf16, #tpu.memory_space<vmem>>, vector<512x32xbf16>
      %c0_24 = arith.constant 0 : index
      %c0_25 = arith.constant 0 : index
      %40 = vector.load %arg3[%c0_24, %c0_25] : memref<32x64xbf16, #tpu.memory_space<vmem>>, vector<32x64xbf16>
      %cst_26 = arith.constant dense<0.000000e+00> : vector<512x64xf32>
      %41 = tpu.matmul %39, %40, %cst_26 {dimension_numbers = #tpu.dot_dimension_numbers<[1], [0], [0], [1], [0, 0, 1, 1], [], []>} : vector<512x32xbf16>, vector<32x64xbf16>, vector<512x64xf32> -> vector<512x64xf32>
      %c0_27 = arith.constant 0 : index
      %c0_28 = arith.constant 0 : index
      %42 = vector.load %arg2[%c0_27, %c0_28] : memref<512x512xbf16, #tpu.memory_space<vmem>>, vector<512x512xbf16>
      %43 = arith.truncf %41 : vector<512x64xf32> to vector<512x64xbf16>
      %cst_29 = arith.constant dense<0.000000e+00> : vector<512x64xf32>
      %44 = tpu.matmul %42, %43, %cst_29 {dimension_numbers = #tpu.dot_dimension_numbers<[1], [0], [0], [1], [0, 0, 1, 1], [], []>} : vector<512x512xbf16>, vector<512x64xbf16>, vector<512x64xf32> -> vector<512x64xf32>
      %c0_30 = arith.constant 0 : index
      %c0_31 = arith.constant 0 : index
      %45 = vector.load %arg4[%c0_30, %c0_31] : memref<1x64xf32, #tpu.memory_space<vmem>>, vector<1x64xf32>
      %46 = vector.broadcast %45 : vector<1x64xf32> to vector<512x64xf32>
      %47 = arith.addf %44, %46 : vector<512x64xf32>
      %cst_32 = arith.constant 0.000000e+00 : f32
      %48 = vector.broadcast %cst_32 : f32 to vector<512x64xf32>
      %49 = arith.maximumf %47, %48 : vector<512x64xf32>
      %50 = arith.truncf %49 : vector<512x64xf32> to vector<512x64xbf16>
      %c0_33 = arith.constant 0 : index
      %c0_34 = arith.constant 0 : index
      %51 = vector.load %arg12[%c0_33, %c0_34] : memref<512x64xbf16, #tpu.memory_space<vmem>>, vector<512x64xbf16>
      tpu.vector_store %arg12[%c0_33, %c0_34], %50 {strides = array<i32>} : memref<512x64xbf16, #tpu.memory_space<vmem>>, vector<512x64xbf16>,
      %c0_35 = arith.constant 0 : index
      %c0_36 = arith.constant 0 : index
      %52 = vector.load %arg5[%c0_35, %c0_36] : memref<64x16xbf16, #tpu.memory_space<vmem>>, vector<64x16xbf16>
      %cst_37 = arith.constant dense<0.000000e+00> : vector<512x16xf32>
      %53 = tpu.matmul %50, %52, %cst_37 {dimension_numbers = #tpu.dot_dimension_numbers<[1], [0], [0], [1], [0, 0, 1, 1], [], []>} : vector<512x64xbf16>, vector<64x16xbf16>, vector<512x16xf32> -> vector<512x16xf32>
      %54 = arith.truncf %53 : vector<512x16xf32> to vector<512x16xbf16>
      %c0_38 = arith.constant 0 : index
      %c0_39 = arith.constant 0 : index
      %55 = vector.load %arg13[%c0_38, %c0_39] : memref<512x16xbf16, #tpu.memory_space<vmem>>, vector<512x16xbf16>
      tpu.vector_store %arg13[%c0_38, %c0_39], %54 {strides = array<i32>} : memref<512x16xbf16, #tpu.memory_space<vmem>>, vector<512x16xbf16>,
    } else {
    }
    %5 = arith.index_cast %1 : i32 to index
    %c0 = arith.constant 0 : index
    %6 = vector.load %arg2[%5, %c0] : memref<512x512xbf16, #tpu.memory_space<vmem>>, vector<256x512xbf16>
    %c0_1 = arith.constant 0 : index
    %c0_2 = arith.constant 0 : index
    %7 = vector.load %arg13[%c0_1, %c0_2] : memref<512x16xbf16, #tpu.memory_space<vmem>>, vector<512x16xbf16>
    %cst = arith.constant dense<0.000000e+00> : vector<256x16xf32>
    %8 = tpu.matmul %6, %7, %cst {dimension_numbers = #tpu.dot_dimension_numbers<[1], [0], [0], [1], [0, 0, 1, 1], [], []>} : vector<256x512xbf16>, vector<512x16xbf16>, vector<256x16xf32> -> vector<256x16xf32>
    %c0_3 = arith.constant 0 : index
    %c0_4 = arith.constant 0 : index
    %9 = vector.load %arg6[%c0_3, %c0_4] : memref<1x16xf32, #tpu.memory_space<vmem>>, vector<1x16xf32>
    %10 = vector.broadcast %9 : vector<1x16xf32> to vector<256x16xf32>
    %11 = arith.addf %8, %10 : vector<256x16xf32>
    %12 = arith.index_cast %1 : i32 to index
    %c0_5 = arith.constant 0 : index
    %13 = vector.load %arg1[%12, %c0_5] : memref<512x32xbf16, #tpu.memory_space<vmem>>, vector<256x32xbf16>
    %14 = arith.index_cast %1 : i32 to index
    %c0_6 = arith.constant 0 : index
    %15 = vector.load %arg12[%14, %c0_6] : memref<512x64xbf16, #tpu.memory_space<vmem>>, vector<256x64xbf16>
    %c0_7 = arith.constant 0 : index
    %c0_8 = arith.constant 0 : index
    %16 = vector.load %arg7[%c0_7, %c0_8] : memref<32x128xbf16, #tpu.memory_space<vmem>>, vector<32x128xbf16>
    %cst_9 = arith.constant dense<0.000000e+00> : vector<256x128xf32>
    %17 = tpu.matmul %13, %16, %cst_9 {dimension_numbers = #tpu.dot_dimension_numbers<[1], [0], [0], [1], [0, 0, 1, 1], [], []>} : vector<256x32xbf16>, vector<32x128xbf16>, vector<256x128xf32> -> vector<256x128xf32>
    %c0_10 = arith.constant 0 : index
    %c0_11 = arith.constant 0 : index
    %18 = vector.load %arg8[%c0_10, %c0_11] : memref<64x128xbf16, #tpu.memory_space<vmem>>, vector<64x128xbf16>
    %cst_12 = arith.constant dense<0.000000e+00> : vector<256x128xf32>
    %19 = tpu.matmul %15, %18, %cst_12 {dimension_numbers = #tpu.dot_dimension_numbers<[1], [0], [0], [1], [0, 0, 1, 1], [], []>} : vector<256x64xbf16>, vector<64x128xbf16>, vector<256x128xf32> -> vector<256x128xf32>
    %20 = arith.addf %17, %19 : vector<256x128xf32>
    %21 = arith.truncf %11 : vector<256x16xf32> to vector<256x16xbf16>
    %c0_13 = arith.constant 0 : index
    %c0_14 = arith.constant 0 : index
    %22 = vector.load %arg9[%c0_13, %c0_14] : memref<16x128xbf16, #tpu.memory_space<vmem>>, vector<16x128xbf16>
    %cst_15 = arith.constant dense<0.000000e+00> : vector<256x128xf32>
    %23 = tpu.matmul %21, %22, %cst_15 {dimension_numbers = #tpu.dot_dimension_numbers<[1], [0], [0], [1], [0, 0, 1, 1], [], []>} : vector<256x16xbf16>, vector<16x128xbf16>, vector<256x128xf32> -> vector<256x128xf32>
    %24 = arith.addf %20, %23 : vector<256x128xf32>
    %c0_16 = arith.constant 0 : index
    %c0_17 = arith.constant 0 : index
    %25 = vector.load %arg10[%c0_16, %c0_17] : memref<1x128xf32, #tpu.memory_space<vmem>>, vector<1x128xf32>
    %26 = vector.broadcast %25 : vector<1x128xf32> to vector<256x128xf32>
    %27 = arith.addf %24, %26 : vector<256x128xf32>
    %cst_18 = arith.constant dense<0xFF800000> : vector<256xf32>
    %28 = vector.multi_reduction <maximumf>, %27, %cst_18 [1] : vector<256x128xf32> to vector<256xf32>
    %29 = vector.shape_cast %28 : vector<256xf32> to vector<256x1xf32>
    %30 = vector.broadcast %29 : vector<256x1xf32> to vector<256x128xf32>
    %31 = arith.subf %27, %30 : vector<256x128xf32>
    %32 = math.exp %31 : vector<256x128xf32>
    %cst_19 = arith.constant dense<0.000000e+00> : vector<256xf32>
    %33 = vector.multi_reduction <add>, %32, %cst_19 [1] : vector<256x128xf32> to vector<256xf32>
    %34 = vector.shape_cast %33 : vector<256xf32> to vector<256x1xf32>
    %35 = math.log %34 : vector<256x1xf32>
    %36 = vector.broadcast %35 : vector<256x1xf32> to vector<256x128xf32>
    %37 = arith.subf %31, %36 : vector<256x128xf32>
    %c0_20 = arith.constant 0 : index
    %c0_21 = arith.constant 0 : index
    %38 = vector.load %arg11[%c0_20, %c0_21] : memref<256x128xf32, #tpu.memory_space<vmem>>, vector<256x128xf32>
    tpu.vector_store %arg11[%c0_20, %c0_21], %37 {strides = array<i32>} : memref<256x128xf32, #tpu.memory_space<vmem>>, vector<256x128xf32>,
    return
  }
  func.func @transform_0(%arg0: i32) -> (i32, i32) {
    %c0_i32 = arith.constant 0 : i32
    %c0_i32_0 = arith.constant 0 : i32
    %c0_i32_1 = arith.constant 0 : i32
    return %c0_i32, %c0_i32_0 : i32, i32
  }
  func.func @transform_1(%arg0: i32) -> (i32, i32) {
    %c0_i32 = arith.constant 0 : i32
    %c0_i32_0 = arith.constant 0 : i32
    %c0_i32_1 = arith.constant 0 : i32
    return %c0_i32, %c0_i32_0 : i32, i32
  }
  func.func @transform_2(%arg0: i32) -> (i32, i32) {
    %c0_i32 = arith.constant 0 : i32
    %c0_i32_0 = arith.constant 0 : i32
    %c0_i32_1 = arith.constant 0 : i32
    return %c0_i32, %c0_i32_0 : i32, i32
  }
  func.func @transform_3(%arg0: i32) -> (i32, i32) {
    %c0_i32 = arith.constant 0 : i32
    %c0_i32_0 = arith.constant 0 : i32
    %c0_i32_1 = arith.constant 0 : i32
    return %c0_i32, %c0_i32_0 : i32, i32
  }
  func.func @transform_4(%arg0: i32) -> (i32, i32) {
    %c0_i32 = arith.constant 0 : i32
    %c0_i32_0 = arith.constant 0 : i32
    %c0_i32_1 = arith.constant 0 : i32
    return %c0_i32, %c0_i32_0 : i32, i32
  }
  func.func @transform_5(%arg0: i32) -> (i32, i32) {
    %c0_i32 = arith.constant 0 : i32
    %c0_i32_0 = arith.constant 0 : i32
    %c0_i32_1 = arith.constant 0 : i32
    return %c0_i32, %c0_i32_0 : i32, i32
  }
  func.func @transform_6(%arg0: i32) -> (i32, i32) {
    %c0_i32 = arith.constant 0 : i32
    %c0_i32_0 = arith.constant 0 : i32
    %c0_i32_1 = arith.constant 0 : i32
    return %c0_i32, %c0_i32_0 : i32, i32
  }
  func.func @transform_7(%arg0: i32) -> (i32, i32) {
    %c0_i32 = arith.constant 0 : i32
    %c0_i32_0 = arith.constant 0 : i32
    %c0_i32_1 = arith.constant 0 : i32
    return %c0_i32, %c0_i32_0 : i32, i32
  }
  func.func @transform_8(%arg0: i32) -> (i32, i32) {
    %c0_i32 = arith.constant 0 : i32
    %c0_i32_0 = arith.constant 0 : i32
    %c0_i32_1 = arith.constant 0 : i32
    return %c0_i32, %c0_i32_0 : i32, i32
  }
  func.func @transform_9(%arg0: i32) -> (i32, i32) {
    %c0_i32 = arith.constant 0 : i32
    %c0_i32_0 = arith.constant 0 : i32
    %c0_i32_1 = arith.constant 0 : i32
    return %c0_i32, %c0_i32_0 : i32, i32
  }
  func.func @transform_10(%arg0: i32) -> (i32, i32) {
    %c0_i32 = arith.constant 0 : i32
    %c0_i32_0 = arith.constant 0 : i32
    return %arg0, %c0_i32 : i32, i32
  }
}

</mosaic_0001>

<bundles_post_ra>
// kernel: tpu_custom_call.1
= control target key start
LH: loop header
LB: loop body
LE: loop exit
PB: predicated region body
PF: predicated region fallthrough
CT: control target
= control target key end

     0   :  { %15 = vsyncpa [#allocation5], 0  ;;  %s8272_s0 = inlined_call_operand.vmem [shape: bf16[512,32], index: 0, kind: input, shape index: {}]   ;;  %s8273_s1 = inlined_call_operand.hbm [shape: bf16[512,512], index: 1, kind: input, shape index: {}]   ;;  %s8274_s2 = inlined_call_operand.vmem [shape: bf16[32,64], index: 2, kind: input, shape index: {}]   ;;  %s8275_s3 = inlined_call_operand.vmem [shape: f32[1,64], index: 3, kind: input, shape index: {}]   ;;  %s8276_s4 = inlined_call_operand.vmem [shape: bf16[64,16], index: 4, kind: input, shape index: {}]   ;;  %s8277_s5 = inlined_call_operand.vmem [shape: f32[1,16], index: 5, kind: input, shape index: {}]   ;;  %s8278_s6 = inlined_call_operand.vmem [shape: bf16[32,128], index: 6, kind: input, shape index: {}]   ;;  %s8279_s7 = inlined_call_operand.vmem [shape: bf16[64,128], index: 7, kind: input, shape index: {}]   ;;  %s8280_s8 = inlined_call_operand.vmem [shape: bf16[16,128], index: 8, kind: input, shape index: {}]   ;;  %s8281_s9 = inlined_call_operand.vmem [shape: f32[1,128], index: 9, kind: input, shape index: {}]   ;;  %s8282_s10 = inlined_call_operand.hbm [shape: f32[512,128], index: 10, kind: output, shape index: {}]  }
   0x1   :  { %16 = vsyncpa [#allocation6], 0 }
   0x2   :  { %18 = vsyncpa [#allocation6 + $0x1], 0  ;;  %s7015_s13 = smov 0   ;;  %s7017_s14 = smov 0  }
   0x3   :  { %s7019_s15 = smov 0   ;;  %s7021_s16 = smov 0  }
   0x4 LB: > { %s7036_s17 = sadd.s32 4294967295, %s6951_s16   ;;  %s5073_s18 = sadd.s32 4294967294, %s6951_s16   ;;  %s6951_s16 = sphi %s7021_s16, %s8299_s16   ;;  %s6947_s15 = sphi %s7019_s15, %s8298_s15   ;;  %s6943_s14 = sphi %s7017_s14, %s8297_s14   ;;  %s6939_s13 = sphi %s7015_s13, %s8296_s13  }
   0x5   : > { %s7040_s19 = sadd.s32 1, %s6951_s16   ;;  %s241_s20 = sadd.s32 1, %s6947_s15 }
   0x6   : > { %s238_s21 = ssub.s32 %s6951_s16, %s7040_s19  ;;  %p251_p0 = scmp.ne.s32.totalorder %s6947_s15, %s6943_s14 }
   0x7   : > { %p239_p1 = scmp.eq.s32.totalorder %s238_s21, 0  ;;  %p252_p2 = scmp.eq.s32.totalorder %s7036_s17, 1 }
   0x8   : > { %p257_p3 = scmp.ne.s32.totalorder %s6943_s14, %s6939_s13  ;;  %p258_p4 = scmp.eq.s32.totalorder %s5073_s18, 1 }
   0x9   : > { %s7051_s22 = scalar_select %p239_p1, %s6947_s15, %s241_s20  }
   0xa   : > { %p7053_p5 = por %p252_p2, %p251_p0  ;;  %p7057_p6 = por %p258_p4, %p257_p3 }
   0xb   : > { %p5074_p7 = scmp.ge.s32.totalorder %s6951_s16, 1  ;;  %p265_p8 = scmp.lt.s32.totalorder %s6951_s16, 3 }
   0xc   : > { %s8286_s23 = scalar_select %p7053_p5, 1, 0 }
   0xd   : > { %s8287_s24 = scalar_select %p7057_p6, 1, 0 }
   0xe   : > { %p8283_p10 = scmp.eq.s32.totalorder %s7036_s17, 0  ;;  %p7065_p11 = pnand %p5074_p7, %p265_p8 }
   0xf   : > { %s6953_s26 = smov [#allocation4]   ;;  %s6857_s11 = scalar_lea.hbm %s8273_s1, 16384 }
  0x10   : > { %s8288_s25 = scalar_select %p7065_p11, 1, 0 }
  0x11   : > { %s280_s27 = sshll.u32 %s6953_s26, 4  ;;  %p6331_p12 = pneg %p7065_p11  ;;  %s281_s27 = int_to_ptr.vmem [resolvable:$true] %s280_s27 }
  0x12   : > { %p6858_p0 = scmp.ne.s32.totalorder %s8273_s1, %s6857_s11  ;;  %p6864_p4 = scmp.lt.u32.totalorder %s6857_s11, %s8273_s1 }
  0x13   : > { %p7073_p13 = pnand %p8283_p10, %p6331_p12 }
  0x15   : > { %p6859_p1 = pneg %p7073_p13 }
  0x17   : > { %p6860_p2 = pnand %p6859_p1, %p6858_p0 }
  0x19   : > { %p6861_p3 = pneg %p6860_p2 }
  0x1b   : > { %p6866_p7 = pnand %p6864_p4, %p6861_p3 }
  0x1d   : > { %6869 = shalt.err (!%p6866_p7)
}
  0x1e   : > { %s6870_s26 = scalar_lea.vmem %s281_s27, 16384  ;;  %p6878_p10 = scmp.lt.s32.totalorder %s281_s27, %s281_s27 }
  0x1f   : > { %p6871_p8 = scmp.ne.s32.totalorder %s281_s27, %s6870_s26  ;;  %p6879_p6 = scmp.lt.s32.totalorder %s6870_s26, %s6870_s26 }
  0x21   : > { %p6873_p12 = pnand %p6871_p8, %p6859_p1  ;;  %p6880_p5 = por %p6879_p6, %p6878_p10 }
  0x23   : > { %p6874_p9 = pneg %p6873_p12 }
  0x25   : > { %p6881_p11 = pnand %p6880_p5, %p6874_p9 }
  0x27   : > { %6884 = shalt.err (!%p6881_p11)
}
  0x28   : > { %s6954_s29 = smov 256   ;;  %s6955_s30 = smov 16  }
  0x29   : > { %6334 = dma.hbm_to_vmem [thread:$0]  (!%p7073_p13), %s8273_s1, 16384, %s281_s27, [#allocation5], %s6954_s29, %s6954_s29, %s6955_s30  }
  0x2a   : > { %p8290_p0 = scmp.ne.s32.totalorder %s8288_s25, 0 }
  0x2b   : > { %p8291_p2 = scmp.eq.s32.totalorder (!%p8290_p0), %s7036_s17, 0 }
  0x2c   : > { %320 = sbr.rel (%p8290_p0) target bundleno = 2153 (0x869), region = 60 }
  0x33   : > { %6930 = dma.done.wait (%p8291_p2), [#allocation5], 16384   ;;  %p8292_p1 = pmov %p8291_p2 }
  0x34   : > { %s350_s11 = sand.u32 1, %s6943_s14   ;;  %s5079_s20 = sshll.u32 %s7036_s17, 8 }
  0x35   : > { %6932 = vsyncadd (%p8292_p1), [#allocation5], 4294950912  ;;  %s5078_s28 = sshll.u32 %s350_s11, 8  ;;  %p8293_p5 = scmp.ne.s32.totalorder %s7036_s17, 0 }
  0x36   : > { %s7103_s21 = scalar_lea.vmem [#allocation7], %s5078_s28  ;;  %v6380_v0 = vld [vmem:[%s8274_s2] sm:$0xff] (!%p8293_p5)   ;;  %v6381_v1 = vld [vmem:[%s8274_s2 + $0x8] sm:$0xff] (!%p8293_p5)   ;;  %vm600_vm0 = vcmask (!%p8293_p5), 261120   ;;  %v6384_v4 = vld [vmem:[%s8272_s0 + $0x10] sm:$0xff] (!%p8293_p5)   ;;  %v6956_v27 = vmov (!%p8293_p5), 0  }
  0x37   : > { %359 = sbr.rel (%p8293_p5) target bundleno = 1133 (0x46d), region = 68  ;;  %5809 = vmatprep.subr.bf16.mxu0 (!%p8293_p5), %v6380_v0  ;;  %v6382_v2 = vld [vmem:[%s8272_s0] sm:$0xff] (!%p8293_p5)   ;;  %v6383_v3 = vld [vmem:[%s8272_s0 + $0x8] sm:$0xff] (!%p8293_p5)   ;;  %v6385_v5 = vld [vmem:[%s8272_s0 + $0x18] sm:$0xff] (!%p8293_p5)   ;;  %6059 = vmatprep.subr.bf16.mxu1 (!%p8293_p5), %v6956_v27  ;;  %vm2467_vm1 = vcmask (!%p8293_p5), 523264   ;;  %vm2949_vm2 = vcmask (!%p8293_p5), 130048  }
  0x38   : > { %5810 = vmatpush3.bf16.msra.mxu0 (!%p8293_p5), %v6380_v0  ;;  %5813 = vmatprep.mubr.msk.bf16.mxu0 (!%p8293_p5), %vm600_vm0, %v6382_v2  ;;  %v6386_v6 = vld [vmem:[%s8272_s0 + $0x20] sm:$0xff] (!%p8293_p5)   ;;  %v6387_v7 = vld [vmem:[%s8272_s0 + $0x28] sm:$0xff] (!%p8293_p5)   ;;  %v6388_v8 = vld [vmem:[%s8272_s0 + $0x30] sm:$0xff] (!%p8293_p5)  }
  0x39   : > { %5811 = vmatprep.subr.bf16.mxu0 (!%p8293_p5), %v6381_v1  ;;  %v6389_v9 = vld [vmem:[%s8272_s0 + $0x38] sm:$0xff] (!%p8293_p5)   ;;  %v6390_v10 = vld [vmem:[%s8272_s0 + $0x40] sm:$0xff] (!%p8293_p5)   ;;  %v6391_v11 = vld [vmem:[%s8272_s0 + $0x48] sm:$0xff] (!%p8293_p5)  }
  0x3a   : > { %v6392_v12 = vld [vmem:[%s8272_s0 + $0x50] sm:$0xff] (!%p8293_p5)   ;;  %v6393_v13 = vld [vmem:[%s8272_s0 + $0x58] sm:$0xff] (!%p8293_p5)   ;;  %v6394_v14 = vld [vmem:[%s8272_s0 + $0x60] sm:$0xff] (!%p8293_p5)  }
  0x3b   : > { %v6395_v15 = vld [vmem:[%s8272_s0 + $0x68] sm:$0xff] (!%p8293_p5)   ;;  %v6396_v16 = vld [vmem:[%s8272_s0 + $0x70] sm:$0xff] (!%p8293_p5)   ;;  %v6397_v17 = vld [vmem:[%s8272_s0 + $0x78] sm:$0xff] (!%p8293_p5)  }
  0x3c   : > { %5812 = vmatpush3.bf16.msra.mxu0 (!%p8293_p5), %v6381_v1  ;;  %v6398_v18 = vld [vmem:[%s8272_s0 + $0x80] sm:$0xff] (!%p8293_p5)   ;;  %v6399_v19 = vld [vmem:[%s8272_s0 + $0x88] sm:$0xff] (!%p8293_p5)   ;;  %v6400_v20 = vld [vmem:[%s8272_s0 + $0x90] sm:$0xff] (!%p8293_p5)  }
  0x3d   : > { %v6401_v21 = vld [vmem:[%s8272_s0 + $0x98] sm:$0xff] (!%p8293_p5)   ;;  %v6402_v22 = vld [vmem:[%s8272_s0 + $0xa0] sm:$0xff] (!%p8293_p5)   ;;  %v6403_v23 = vld [vmem:[%s8272_s0 + $0xa8] sm:$0xff] (!%p8293_p5)   ;;  %1793 = vmatprep.subr.bf16.mxu0 (!%p8293_p5), %v6956_v27 }
  0x3e   : > { %v6404_v24 = vld [vmem:[%s8272_s0 + $0xb0] sm:$0xff]   ;;  %v6405_v25 = vld [vmem:[%s8272_s0 + $0xb8] sm:$0xff]   ;;  %v6406_v26 = vld [vmem:[%s8272_s0 + $0xc0] sm:$0xff]  }
  0x3f   : > { %5814 = vmatmul.mubr.msk.bf16.vlgmr.msra.gmra.mrb[0].mxu0 %vm600_vm0, %v6383_v3  ;;  %v6407_v28 = vld [vmem:[%s8272_s0 + $0xc8] sm:$0xff]   ;;  %v6408_v29 = vld [vmem:[%s8272_s0 + $0xd0] sm:$0xff]   ;;  %v6409_v30 = vld [vmem:[%s8272_s0 + $0xd8] sm:$0xff]  }
  0x40   : > { %5817 = vmatprep.mubr.msk.bf16.mxu0 %vm600_vm0, %v6384_v4  ;;  %v6410_v31 = vld [vmem:[%s8272_s0 + $0xe0] sm:$0xff]   ;;  %v6411_v32 = vld [vmem:[%s8272_s0 + $0xe8] sm:$0xff]   ;;  %v6412_v33 = vld [vmem:[%s8272_s0 + $0xf0] sm:$0xff]  }
  0x41   : > { %v6413_v34 = vld [vmem:[%s8272_s0 + $0xf8] sm:$0xff]   ;;  %v6416_v35 = vld [vmem:[#allocation4 + $0x264] ss:$16 sps:$4 sm:$0xff]  }
  0x42   : > { %1977 = vmatprep.mubr.bf16.mxu1 %v6416_v35  ;;  %v6455_v2 = vld [vmem:[#allocation4 + $0x4] ss:$16 sps:$4 sm:$0xff]   ;;  %v6461_v35 = vld [vmem:[#allocation4 + $0x20] ss:$16 sps:$4 sm:$0xff]  }
  0x47   : > { %5818 = vmatmul.mubr.msk.bf16.gmra.mrb[4].mxu0 %vm600_vm0, %v6385_v5 }
  0x48   : > { %5821 = vmatprep.mubr.msk.bf16.mxu0 %vm600_vm0, %v6386_v6 }
  0x4f   : > { %5822 = vmatmul.mubr.msk.bf16.gmra.mrb[8].mxu0 %vm600_vm0, %v6387_v7 }
  0x50   : > { %5825 = vmatprep.mubr.msk.bf16.mxu0 %vm600_vm0, %v6388_v8 }
  0x57   : > { %5826 = vmatmul.mubr.msk.bf16.gmra.mrb[12].mxu0 %vm600_vm0, %v6389_v9 }
  0x58   : > { %5829 = vmatprep.mubr.msk.bf16.mxu0 %vm600_vm0, %v6390_v10 }
  0x5f   : > { %5830 = vmatmul.mubr.msk.bf16.gmra.mrb[16].mxu0 %vm600_vm0, %v6391_v11 }
  0x60   : > { %5833 = vmatprep.mubr.msk.bf16.mxu0 %vm600_vm0, %v6392_v12 }
  0x67   : > { %5834 = vmatmul.mubr.msk.bf16.gmra.mrb[20].mxu0 %vm600_vm0, %v6393_v13 }
  0x68   : > { %5837 = vmatprep.mubr.msk.bf16.mxu0 %vm600_vm0, %v6394_v14 }
  0x6f   : > { %5838 = vmatmul.mubr.msk.bf16.gmra.mrb[24].mxu0 %vm600_vm0, %v6395_v15 }
  0x70   : > { %5841 = vmatprep.mubr.msk.bf16.mxu0 %vm600_vm0, %v6396_v16 }
  0x77   : > { %5842 = vmatmul.mubr.msk.bf16.gmra.mrb[28].mxu0 %vm600_vm0, %v6397_v17 }
  0x78   : > { %5845 = vmatprep.mubr.msk.bf16.mxu0 %vm600_vm0, %v6398_v18 }
  0x7f   : > { %5846 = vmatmul.mubr.msk.bf16.gmra.mrb[32].mxu0 %vm600_vm0, %v6399_v19 }
  0x80   : > { %5849 = vmatprep.mubr.msk.bf16.mxu0 %vm600_vm0, %v6400_v20 }
  0x87   : > { %5850 = vmatmul.mubr.msk.bf16.gmra.mrb[36].mxu0 %vm600_vm0, %v6401_v21 }
  0x88   : > { %5853 = vmatprep.mubr.msk.bf16.mxu0 %vm600_vm0, %v6402_v22 }
  0x8f   : > { %5854 = vmatmul.mubr.msk.bf16.gmra.mrb[40].mxu0 %vm600_vm0, %v6403_v23  ;;  %v6414_v23 = vld [vmem:[#allocation4 + $0x260] ss:$16 sps:$4 sm:$0xff]  }
  0x90   : > { %5857 = vmatprep.mubr.msk.bf16.mxu0 %vm600_vm0, %v6404_v24  ;;  %v6453_v24 = vld [vmem:[#allocation4] ss:$16 sps:$4 sm:$0xff]  }
  0x97   : > { %5858 = vmatmul.mubr.msk.bf16.gmra.mrb[44].mxu0 %vm600_vm0, %v6405_v25 }
  0x98   : > { %5861 = vmatprep.mubr.msk.bf16.mxu0 %vm600_vm0, %v6406_v26  ;;  %v6417_v26 = vld [vmem:[#allocation4 + $0x284] ss:$16 sps:$4 sm:$0xff]  }
  0x9f   : > { %5862 = vmatmul.mubr.msk.bf16.gmra.mrb[48].mxu0 %vm600_vm0, %v6407_v28 }
  0xa0   : > { %5865 = vmatprep.mubr.msk.bf16.mxu0 %vm600_vm0, %v6408_v29 }
  0xa7   : > { %5866 = vmatmul.mubr.msk.bf16.gmra.mrb[52].mxu0 %vm600_vm0, %v6409_v30  ;;  %v6459_v30 = vld [vmem:[#allocation4 + $0x24] ss:$16 sps:$4 sm:$0xff]  }
  0xa8   : > { %5869 = vmatprep.mubr.msk.bf16.mxu0 %vm600_vm0, %v6410_v31 }
  0xaf   : > { %5870 = vmatmul.mubr.msk.bf16.gmra.mrb[56].mxu0 %vm600_vm0, %v6411_v32 }
  0xb0   : > { %5873 = vmatprep.mubr.msk.bf16.mxu0 %vm600_vm0, %v6412_v33 }
  0xb7   : > { %5874 = vmatmul.mubr.msk.bf16.gmra.mrb[60].mxu0 %vm600_vm0, %v6413_v34  ;;  %v6419_v34 = vld [vmem:[#allocation4 + $0x280] ss:$16 sps:$4 sm:$0xff]  }
  0xb8   : > { %1825 = vmatprep.mubr.bf16.mxu0 %v6455_v2  ;;  %v6429_v2 = vld [vmem:[#allocation4 + $0x304] ss:$16 sps:$4 sm:$0xff]  }
 0x112   : > { %v5815_v36 = vpop.f32.mrb[0].mxu0 }
 0x113   : > { %v731_v37 = vpop.f32.mrb[1].mxu0 }
 0x114   : > { %v5816_v38 = vpop.f32.mrb[2].mxu0 }
 0x115   : > { %v1115_v39 = vpack.c.bf16 %v5816_v38, %v5815_v36  ;;  %v734_v40 = vpop.f32.mrb[3].mxu0 }
 0x116   : > { %v1114_v41 = vpack.c.bf16 %v734_v40, %v731_v37  ;;  %v6420_v37 = vld [vmem:[#allocation4 + $0x2a4] ss:$16 sps:$4 sm:$0xff]  }
 0x117   : > { %v6465_v40 = vld [vmem:[#allocation4 + $0x44] ss:$16 sps:$4 sm:$0xff]  }
 0x118   : > { %1794 = vmatpush1.bf16.msra.mxu0 %v1114_v41  ;;  %6075 = vmatpush1.bf16.msra.mxu1 %v1114_v41 }
 0x119   : > { %1795 = vmatprep.subr.bf16.mxu0 %v6956_v27  ;;  %6060 = vmatprep.subr.bf16.mxu1 %v6956_v27 }
 0x11a   : > { %v5819_v42 = vpop.f32.mrb[4].mxu0 }
 0x11b   : > { %v747_v43 = vpop.f32.mrb[5].mxu0 }
 0x11c   : > { %v5820_v44 = vpop.f32.mrb[6].mxu0  ;;  %1796 = vmatpush1.bf16.msra.mxu0 %v1115_v39  ;;  %6076 = vmatpush1.bf16.msra.mxu1 %v1115_v39 }
 0x11d   : > { %v1117_v45 = vpack.c.bf16 %v5820_v44, %v5819_v42  ;;  %v750_v46 = vpop.f32.mrb[7].mxu0  ;;  %1797 = vmatprep.subr.bf16.mxu0 %v6956_v27  ;;  %6061 = vmatprep.subr.bf16.mxu1 %v6956_v27  ;;  %v6422_v44 = vld [vmem:[#allocation4 + $0x2a0] ss:$16 sps:$4 sm:$0xff]  }
 0x11e   : > { %v1116_v47 = vpack.c.bf16 %v750_v46, %v747_v43 }
 0x120   : > { %1798 = vmatpush1.bf16.msra.mxu0 %v1116_v47  ;;  %6077 = vmatpush1.bf16.msra.mxu1 %v1116_v47  ;;  %v6423_v47 = vld [vmem:[#allocation4 + $0x2c4] ss:$16 sps:$4 sm:$0xff]  }
 0x121   : > { %1799 = vmatprep.subr.bf16.mxu0 %v6956_v27  ;;  %6062 = vmatprep.subr.bf16.mxu1 %v6956_v27 }
 0x122   : > { %v5823_v48 = vpop.f32.mrb[8].mxu0 }
 0x123   : > { %v763_v49 = vpop.f32.mrb[9].mxu0 }
 0x124   : > { %v5824_v50 = vpop.f32.mrb[10].mxu0  ;;  %1800 = vmatpush1.bf16.msra.mxu0 %v1117_v45  ;;  %6078 = vmatpush1.bf16.msra.mxu1 %v1117_v45  ;;  %v6467_v45 = vld [vmem:[#allocation4 + $0x40] ss:$16 sps:$4 sm:$0xff]  }
 0x125   : > { %v1119_v51 = vpack.c.bf16 %v5824_v50, %v5823_v48  ;;  %v766_v52 = vpop.f32.mrb[11].mxu0  ;;  %1801 = vmatprep.subr.bf16.mxu0 %v6956_v27  ;;  %6063 = vmatprep.subr.bf16.mxu1 %v6956_v27  ;;  %v6471_v50 = vld [vmem:[#allocation4 + $0x64] ss:$16 sps:$4 sm:$0xff]  }
 0x126   : > { %v1118_v53 = vpack.c.bf16 %v766_v52, %v763_v49 }
 0x128   : > { %1802 = vmatpush1.bf16.msra.mxu0 %v1118_v53  ;;  %6079 = vmatpush1.bf16.msra.mxu1 %v1118_v53  ;;  %v6425_v53 = vld [vmem:[#allocation4 + $0x2c0] ss:$16 sps:$4 sm:$0xff]  }
 0x129   : > { %1803 = vmatprep.subr.bf16.mxu0 %v6956_v27  ;;  %6064 = vmatprep.subr.bf16.mxu1 %v6956_v27 }
 0x12a   : > { %v5827_v54 = vpop.f32.mrb[12].mxu0 }
 0x12b   : > { %v779_v55 = vpop.f32.mrb[13].mxu0 }
 0x12c   : > { %v5828_v56 = vpop.f32.mrb[14].mxu0  ;;  %1804 = vmatpush1.bf16.msra.mxu0 %v1119_v51  ;;  %6080 = vmatpush1.bf16.msra.mxu1 %v1119_v51 }
 0x12d   : > { %v1121_v57 = vpack.c.bf16 %v5828_v56, %v5827_v54  ;;  %v782_v58 = vpop.f32.mrb[15].mxu0  ;;  %1805 = vmatprep.subr.bf16.mxu0 %v6956_v27  ;;  %6065 = vmatprep.subr.bf16.mxu1 %v6956_v27 }
 0x12e   : > { %v1120_v59 = vpack.c.bf16 %v782_v58, %v779_v55  ;;  %v6473_v55 = vld [vmem:[#allocation4 + $0x60] ss:$16 sps:$4 sm:$0xff]  }
 0x130   : > { %1806 = vmatpush1.bf16.msra.mxu0 %v1120_v59  ;;  %6081 = vmatpush1.bf16.msra.mxu1 %v1120_v59 }
 0x131   : > { %1807 = vmatprep.subr.bf16.mxu0 %v6956_v27  ;;  %6066 = vmatprep.subr.bf16.mxu1 %v6956_v27 }
 0x132   : > { %v5831_v60 = vpop.f32.mrb[16].mxu0 }
 0x133   : > { %v795_v61 = vpop.f32.mrb[17].mxu0 }
 0x134   : > { %v5832_v62 = vpop.f32.mrb[18].mxu0  ;;  %1808 = vmatpush1.bf16.msra.mxu0 %v1121_v57  ;;  %6082 = vmatpush1.bf16.msra.mxu1 %v1121_v57  ;;  %v6426_v57 = vld [vmem:[#allocation4 + $0x2e4] ss:$16 sps:$4 sm:$0xff]  }
 0x135   : > { %v1123_v63 = vpack.c.bf16 %v5832_v62, %v5831_v60  ;;  %v798_v0 = vpop.f32.mrb[19].mxu0  ;;  %1809 = vmatprep.subr.bf16.mxu0 %v6956_v27  ;;  %6067 = vmatprep.subr.bf16.mxu1 %v6956_v27  ;;  %v6477_v60 = vld [vmem:[#allocation4 + $0x84] ss:$16 sps:$4 sm:$0xff]  }
 0x136   : > { %v1122_v1 = vpack.c.bf16 %v798_v0, %v795_v61 }
 0x138   : > { %1810 = vmatpush1.bf16.msra.mxu0 %v1122_v1  ;;  %6083 = vmatpush1.bf16.msra.mxu1 %v1122_v1  ;;  %v6479_v1 = vld [vmem:[#allocation4 + $0x80] ss:$16 sps:$4 sm:$0xff]  }
 0x139   : > { %1811 = vmatprep.subr.bf16.mxu0 %v6956_v27  ;;  %6068 = vmatprep.subr.bf16.mxu1 %v6956_v27 }
 0x13a   : > { %v5835_v3 = vpop.f32.mrb[20].mxu0 }
 0x13b   : > { %v811_v4 = vpop.f32.mrb[21].mxu0 }
 0x13c   : > { %v5836_v5 = vpop.f32.mrb[22].mxu0  ;;  %1812 = vmatpush1.bf16.msra.mxu0 %v1123_v63  ;;  %6084 = vmatpush1.bf16.msra.mxu1 %v1123_v63  ;;  %v6428_v63 = vld [vmem:[#allocation4 + $0x2e0] ss:$16 sps:$4 sm:$0xff]  }
 0x13d   : > { %v1125_v6 = vpack.c.bf16 %v5836_v5, %v5835_v3  ;;  %v814_v7 = vpop.f32.mrb[23].mxu0  ;;  %1813 = vmatprep.subr.bf16.mxu0 %v6956_v27  ;;  %6069 = vmatprep.subr.bf16.mxu1 %v6956_v27 }
 0x13e   : > { %v1124_v8 = vpack.c.bf16 %v814_v7, %v811_v4 }
 0x140   : > { %1814 = vmatpush1.bf16.msra.mxu0 %v1124_v8  ;;  %6085 = vmatpush1.bf16.msra.mxu1 %v1124_v8 }
 0x141   : > { %1815 = vmatprep.subr.bf16.mxu0 %v6956_v27  ;;  %6070 = vmatprep.subr.bf16.mxu1 %v6956_v27 }
 0x142   : > { %v5839_v9 = vpop.f32.mrb[24].mxu0 }
 0x143   : > { %v827_v10 = vpop.f32.mrb[25].mxu0 }
 0x144   : > { %v5840_v11 = vpop.f32.mrb[26].mxu0  ;;  %1816 = vmatpush1.bf16.msra.mxu0 %v1125_v6  ;;  %6086 = vmatpush1.bf16.msra.mxu1 %v1125_v6  ;;  %v6483_v6 = vld [vmem:[#allocation4 + $0xa4] ss:$16 sps:$4 sm:$0xff]  }
 0x145   : > { %v1127_v12 = vpack.c.bf16 %v5840_v11, %v5839_v9  ;;  %v830_v13 = vpop.f32.mrb[27].mxu0  ;;  %1817 = vmatprep.subr.bf16.mxu0 %v6956_v27  ;;  %6071 = vmatprep.subr.bf16.mxu1 %v6956_v27  ;;  %v6431_v9 = vld [vmem:[#allocation4 + $0x300] ss:$16 sps:$4 sm:$0xff]  }
 0x146   : > { %v1126_v14 = vpack.c.bf16 %v830_v13, %v827_v10  ;;  %v6485_v11 = vld [vmem:[#allocation4 + $0xa0] ss:$16 sps:$4 sm:$0xff]  }
 0x148   : > { %1818 = vmatpush1.bf16.msra.mxu0 %v1126_v14  ;;  %6087 = vmatpush1.bf16.msra.mxu1 %v1126_v14 }
 0x149   : > { %1819 = vmatprep.subr.bf16.mxu0 %v6956_v27  ;;  %6072 = vmatprep.subr.bf16.mxu1 %v6956_v27 }
 0x14a   : > { %v5843_v15 = vpop.f32.mrb[28].mxu0 }
 0x14b   : > { %v843_v16 = vpop.f32.mrb[29].mxu0 }
 0x14c   : > { %v5844_v17 = vpop.f32.mrb[30].mxu0  ;;  %1820 = vmatpush1.bf16.msra.mxu0 %v1127_v12  ;;  %6088 = vmatpush1.bf16.msra.mxu1 %v1127_v12  ;;  %v6432_v12 = vld [vmem:[#allocation4 + $0x324] ss:$16 sps:$4 sm:$0xff]  }
 0x14d   : > { %v1129_v18 = vpack.c.bf16 %v5844_v17, %v5843_v15  ;;  %v846_v19 = vpop.f32.mrb[31].mxu0  ;;  %1821 = vmatprep.subr.bf16.mxu0 %v6956_v27  ;;  %6073 = vmatprep.subr.bf16.mxu1 %v6956_v27 }
 0x14e   : > { %v1128_v20 = vpack.c.bf16 %v846_v19, %v843_v16  ;;  %v6489_v16 = vld [vmem:[#allocation4 + $0xc4] ss:$16 sps:$4 sm:$0xff]   ;;  %v6434_v19 = vld [vmem:[#allocation4 + $0x320] ss:$16 sps:$4 sm:$0xff]  }
 0x150   : > { %1822 = vmatpush1.bf16.msra.mxu0 %v1128_v20  ;;  %6089 = vmatpush1.bf16.msra.mxu1 %v1128_v20 }
 0x151   : > { %1823 = vmatprep.subr.bf16.mxu0 %v6956_v27  ;;  %6074 = vmatprep.subr.bf16.mxu1 %v6956_v27 }
 0x152   : > { %v5847_v21 = vpop.f32.mrb[32].mxu0 }
 0x153   : > { %v859_v22 = vpop.f32.mrb[33].mxu0 }
 0x154   : > { %v5848_v25 = vpop.f32.mrb[34].mxu0  ;;  %1824 = vmatpush1.bf16.msra.mxu0 %v1129_v18  ;;  %6090 = vmatpush1.bf16.msra.mxu1 %v1129_v18 }
 0x155   : > { %v1131_v28 = vpack.c.bf16 %v5848_v25, %v5847_v21  ;;  %v862_v29 = vpop.f32.mrb[35].mxu0  ;;  %2082 = vmatprep.subr.bf16.mxu1 %v6956_v27  ;;  %v6491_v21 = vld [vmem:[#allocation4 + $0xc0] ss:$16 sps:$4 sm:$0xff]  }
 0x156   : > { %v1130_v31 = vpack.c.bf16 %v862_v29, %v859_v22  ;;  %v6435_v22 = vld [vmem:[#allocation4 + $0x344] ss:$16 sps:$4 sm:$0xff]  }
 0x157   : > { %1978 = vmatmul.mubr.bf16.vlgmr.msra.gmra.mrb[0].mxu1 %v6414_v23  ;;  %1826 = vmatmul.mubr.bf16.vlgmr.msra.gmra.mrb[64].mxu0 %v6453_v24 }
 0x158   : > { %2083 = vmatpush1.bf16.msra.mxu1 %v1130_v31  ;;  %1985 = vmatprep.mubr.bf16.mxu1 %v6417_v26  ;;  %v6495_v26 = vld [vmem:[#allocation4 + $0xe4] ss:$16 sps:$4 sm:$0xff]  }
 0x159   : > { %2084 = vmatprep.subr.bf16.mxu1 %v6956_v27  ;;  %1833 = vmatprep.mubr.bf16.mxu0 %v6459_v30  ;;  %v6437_v30 = vld [vmem:[#allocation4 + $0x340] ss:$16 sps:$4 sm:$0xff]  }
 0x15a   : > { %v5851_v32 = vpop.f32.mrb[36].mxu0 }
 0x15b   : > { %v875_v33 = vpop.f32.mrb[37].mxu0 }
 0x15c   : > { %v5852_v36 = vpop.f32.mrb[38].mxu0  ;;  %2085 = vmatpush1.bf16.msra.mxu1 %v1131_v28 }
 0x15d   : > { %v1133_v38 = vpack.c.bf16 %v5852_v36, %v5851_v32  ;;  %v878_v39 = vpop.f32.mrb[39].mxu0  ;;  %2086 = vmatprep.subr.bf16.mxu1 %v6956_v27  ;;  %v6497_v32 = vld [vmem:[#allocation4 + $0xe0] ss:$16 sps:$4 sm:$0xff]  }
 0x15e   : > { %v1132_v41 = vpack.c.bf16 %v878_v39, %v875_v33  ;;  %v6438_v33 = vld [vmem:[#allocation4 + $0x364] ss:$16 sps:$4 sm:$0xff]   ;;  %v6440_v39 = vld [vmem:[#allocation4 + $0x360] ss:$16 sps:$4 sm:$0xff]  }
 0x15f   : > { %1986 = vmatmul.mubr.bf16.gmra.mrb[4].mxu1 %v6419_v34  ;;  %1834 = vmatmul.mubr.bf16.gmra.mrb[68].mxu0 %v6461_v35 }
 0x160   : > { %2087 = vmatpush1.bf16.msra.mxu1 %v1132_v41  ;;  %1993 = vmatprep.mubr.bf16.mxu1 %v6420_v37  ;;  %v6501_v37 = vld [vmem:[#allocation4 + $0x104] ss:$16 sps:$4 sm:$0xff]  }
 0x161   : > { %2088 = vmatprep.subr.bf16.mxu1 %v6956_v27  ;;  %1841 = vmatprep.mubr.bf16.mxu0 %v6465_v40  ;;  %v6503_v40 = vld [vmem:[#allocation4 + $0x100] ss:$16 sps:$4 sm:$0xff]   ;;  %v6441_v41 = vld [vmem:[#allocation4 + $0x384] ss:$16 sps:$4 sm:$0xff]  }
 0x162   : > { %v5855_v42 = vpop.f32.mrb[40].mxu0 }
 0x163   : > { %v891_v43 = vpop.f32.mrb[41].mxu0 }
 0x164   : > { %2089 = vmatpush1.bf16.msra.mxu1 %v1133_v38  ;;  %v5856_v46 = vpop.f32.mrb[42].mxu0 }
 0x165   : > { %v1135_v48 = vpack.c.bf16 %v5856_v46, %v5855_v42  ;;  %v894_v49 = vpop.f32.mrb[43].mxu0  ;;  %2090 = vmatprep.subr.bf16.mxu1 %v6956_v27  ;;  %v6507_v42 = vld [vmem:[#allocation4 + $0x124] ss:$16 sps:$4 sm:$0xff]  }
 0x166   : > { %v1134_v51 = vpack.c.bf16 %v894_v49, %v891_v43  ;;  %v6443_v43 = vld [vmem:[#allocation4 + $0x380] ss:$16 sps:$4 sm:$0xff]   ;;  %v6513_v46 = vld [vmem:[#allocation4 + $0x144] ss:$16 sps:$4 sm:$0xff]  }
 0x167   : > { %1994 = vmatmul.mubr.bf16.gmra.mrb[8].mxu1 %v6422_v44  ;;  %1842 = vmatmul.mubr.bf16.gmra.mrb[72].mxu0 %v6467_v45  ;;  %v6509_v44 = vld [vmem:[#allocation4 + $0x120] ss:$16 sps:$4 sm:$0xff]   ;;  %v6444_v45 = vld [vmem:[#allocation4 + $0x3a4] ss:$16 sps:$4 sm:$0xff]  }
 0x168   : > { %2091 = vmatpush1.bf16.msra.mxu1 %v1134_v51  ;;  %2001 = vmatprep.mubr.bf16.mxu1 %v6423_v47  ;;  %v6446_v47 = vld [vmem:[#allocation4 + $0x3a0] ss:$16 sps:$4 sm:$0xff]   ;;  %v6519_v49 = vld [vmem:[#allocation4 + $0x164] ss:$16 sps:$4 sm:$0xff]  }
 0x169   : > { %2092 = vmatprep.subr.bf16.mxu1 %v6956_v27  ;;  %1849 = vmatprep.mubr.bf16.mxu0 %v6471_v50  ;;  %v6449_v50 = vld [vmem:[#allocation4 + $0x3c0] ss:$16 sps:$4 sm:$0xff]  }
 0x16a   : > { %v5859_v52 = vpop.f32.mrb[44].mxu0  ;;  %v6521_v51 = vld [vmem:[#allocation4 + $0x160] ss:$16 sps:$4 sm:$0xff]  }
 0x16b   : > { %v907_v54 = vpop.f32.mrb[45].mxu0 }
 0x16c   : > { %2093 = vmatpush1.bf16.msra.mxu1 %v1135_v48  ;;  %v5860_v56 = vpop.f32.mrb[46].mxu0  ;;  %v6447_v48 = vld [vmem:[#allocation4 + $0x3c4] ss:$16 sps:$4 sm:$0xff]  }
 0x16d   : > { %v1137_v58 = vpack.c.bf16 %v5860_v56, %v5859_v52  ;;  %v910_v59 = vpop.f32.mrb[47].mxu0  ;;  %2094 = vmatprep.subr.bf16.mxu1 %v6956_v27  ;;  %v6450_v52 = vld [vmem:[#allocation4 + $0x3e4] ss:$16 sps:$4 sm:$0xff]   ;;  %v6458_v56 = vld [vmem:[#allocation4 + $0xc] ss:$16 sps:$4 sm:$0xff]  }
 0x16e   : > { %v1136_v61 = vpack.c.bf16 %v910_v59, %v907_v54  ;;  %v6452_v54 = vld [vmem:[#allocation4 + $0x3e0] ss:$16 sps:$4 sm:$0xff]  }
 0x16f   : > { %2002 = vmatmul.mubr.bf16.gmra.mrb[12].mxu1 %v6425_v53  ;;  %1850 = vmatmul.mubr.bf16.gmra.mrb[76].mxu0 %v6473_v55  ;;  %v6525_v53 = vld [vmem:[#allocation4 + $0x184] ss:$16 sps:$4 sm:$0xff]   ;;  %v6527_v55 = vld [vmem:[#allocation4 + $0x180] ss:$16 sps:$4 sm:$0xff]  }
 0x170   : > { %2009 = vmatprep.mubr.bf16.mxu1 %v6426_v57  ;;  %2095 = vmatpush1.bf16.msra.mxu1 %v1136_v61  ;;  %v6531_v57 = vld [vmem:[#allocation4 + $0x1a4] ss:$16 sps:$4 sm:$0xff]   ;;  %v6533_v59 = vld [vmem:[#allocation4 + $0x1a0] ss:$16 sps:$4 sm:$0xff]  }
 0x171   : > { %2096 = vmatprep.subr.bf16.mxu1 %v6956_v27  ;;  %1857 = vmatprep.mubr.bf16.mxu0 %v6477_v60  ;;  %v6462_v60 = vld [vmem:[#allocation4 + $0x2c] ss:$16 sps:$4 sm:$0xff]   ;;  %v6537_v61 = vld [vmem:[#allocation4 + $0x1c4] ss:$16 sps:$4 sm:$0xff]  }
 0x172   : > { %v5863_v62 = vpop.f32.mrb[48].mxu0 }
 0x173   : > { %v923_v0 = vpop.f32.mrb[49].mxu0 }
 0x174   : > { %2097 = vmatpush1.bf16.msra.mxu1 %v1137_v58  ;;  %v5864_v3 = vpop.f32.mrb[50].mxu0  ;;  %v6456_v58 = vld [vmem:[#allocation4 + $0x8] ss:$16 sps:$4 sm:$0xff]  }
 0x175   : > { %v1139_v4 = vpack.c.bf16 %v5864_v3, %v5863_v62  ;;  %v926_v5 = vpop.f32.mrb[51].mxu0  ;;  %2098 = vmatprep.subr.bf16.mxu1 %v6956_v27  ;;  %v6464_v62 = vld [vmem:[#allocation4 + $0x28] ss:$16 sps:$4 sm:$0xff]   ;;  %v6545_v3 = vld [vmem:[#allocation4 + $0x1e0] ss:$16 sps:$4 sm:$0xff]  }
 0x176   : > { %v1138_v7 = vpack.c.bf16 %v926_v5, %v923_v0  ;;  %v6468_v0 = vld [vmem:[#allocation4 + $0x4c] ss:$16 sps:$4 sm:$0xff]   ;;  %v6549_v5 = vld [vmem:[#allocation4 + $0x204] ss:$16 sps:$4 sm:$0xff]  }
 0x177   : > { %2010 = vmatmul.mubr.bf16.gmra.mrb[16].mxu1 %v6428_v63  ;;  %1858 = vmatmul.mubr.bf16.gmra.mrb[80].mxu0 %v6479_v1  ;;  %v6539_v63 = vld [vmem:[#allocation4 + $0x1c0] ss:$16 sps:$4 sm:$0xff]   ;;  %v6543_v1 = vld [vmem:[#allocation4 + $0x1e4] ss:$16 sps:$4 sm:$0xff]  }
 0x178   : > { %2017 = vmatprep.mubr.bf16.mxu1 %v6429_v2  ;;  %2099 = vmatpush1.bf16.msra.mxu1 %v1138_v7  ;;  %v6470_v2 = vld [vmem:[#allocation4 + $0x48] ss:$16 sps:$4 sm:$0xff]   ;;  %v6551_v7 = vld [vmem:[#allocation4 + $0x200] ss:$16 sps:$4 sm:$0xff]  }
 0x179   : > { %2100 = vmatprep.subr.bf16.mxu1 %v6956_v27  ;;  %1865 = vmatprep.mubr.bf16.mxu0 %v6483_v6  ;;  %v6476_v6 = vld [vmem:[#allocation4 + $0x68] ss:$16 sps:$4 sm:$0xff]  }
 0x17a   : > { %v5867_v8 = vpop.f32.mrb[52].mxu0 }
 0x17b   : > { %v939_v10 = vpop.f32.mrb[53].mxu0 }
 0x17c   : > { %2101 = vmatpush1.bf16.msra.mxu1 %v1139_v4  ;;  %v5868_v13 = vpop.f32.mrb[54].mxu0  ;;  %v6474_v4 = vld [vmem:[#allocation4 + $0x6c] ss:$16 sps:$4 sm:$0xff]  }
 0x17d   : > { %v1141_v14 = vpack.c.bf16 %v5868_v13, %v5867_v8  ;;  %v942_v15 = vpop.f32.mrb[55].mxu0  ;;  %2102 = vmatprep.subr.bf16.mxu1 %v6956_v27  ;;  %v6480_v8 = vld [vmem:[#allocation4 + $0x8c] ss:$16 sps:$4 sm:$0xff]   ;;  %v6561_v13 = vld [vmem:[#allocation4 + $0x244] ss:$16 sps:$4 sm:$0xff]  }
 0x17e   : > { %v1140_v17 = vpack.c.bf16 %v942_v15, %v939_v10  ;;  %v6482_v10 = vld [vmem:[#allocation4 + $0x88] ss:$16 sps:$4 sm:$0xff]   ;;  %v6563_v15 = vld [vmem:[#allocation4 + $0x240] ss:$16 sps:$4 sm:$0xff]  }
 0x17f   : > { %2018 = vmatmul.mubr.bf16.gmra.mrb[20].mxu1 %v6431_v9  ;;  %1866 = vmatmul.mubr.bf16.gmra.mrb[84].mxu0 %v6485_v11  ;;  %v6555_v9 = vld [vmem:[#allocation4 + $0x224] ss:$16 sps:$4 sm:$0xff]   ;;  %v6557_v11 = vld [vmem:[#allocation4 + $0x220] ss:$16 sps:$4 sm:$0xff]  }
 0x180   : > { %2025 = vmatprep.mubr.bf16.mxu1 %v6432_v12  ;;  %2103 = vmatpush1.bf16.msra.mxu1 %v1140_v17  ;;  %v6486_v12 = vld [vmem:[#allocation4 + $0xac] ss:$16 sps:$4 sm:$0xff]   ;;  %v6494_v17 = vld [vmem:[#allocation4 + $0xc8] ss:$16 sps:$4 sm:$0xff]  }
 0x181   : > { %2104 = vmatprep.subr.bf16.mxu1 %v6956_v27  ;;  %1873 = vmatprep.mubr.bf16.mxu0 %v6489_v16  ;;  %v6492_v16 = vld [vmem:[#allocation4 + $0xcc] ss:$16 sps:$4 sm:$0xff]  }
 0x182   : > { %v5871_v18 = vpop.f32.mrb[56].mxu0 }
 0x183   : > { %v955_v20 = vpop.f32.mrb[57].mxu0 }
 0x184   : > { %2105 = vmatpush1.bf16.msra.mxu1 %v1141_v14  ;;  %v5872_v23 = vpop.f32.mrb[58].mxu0  ;;  %v6488_v14 = vld [vmem:[#allocation4 + $0xa8] ss:$16 sps:$4 sm:$0xff]  }
 0x185   : > { %v1143_v24 = vpack.c.bf16 %v5872_v23, %v5871_v18  ;;  %v958_v25 = vpop.f32.mrb[59].mxu0  ;;  %2106 = vmatprep.subr.bf16.mxu1 %v6956_v27  ;;  %v6498_v18 = vld [vmem:[#allocation4 + $0xec] ss:$16 sps:$4 sm:$0xff]   ;;  %v6585_v23 = vld [vmem:[%s8276_s4] sm:$0xff]  }
 0x186   : > { %v1142_v28 = vpack.c.bf16 %v958_v25, %v955_v20  ;;  %v6504_v20 = vld [vmem:[#allocation4 + $0x10c] ss:$16 sps:$4 sm:$0xff]   ;;  %5877 = vmatprep.subr.bf16.mxu0 %v6585_v23 }
 0x187   : > { %2026 = vmatmul.mubr.bf16.gmra.mrb[24].mxu1 %v6434_v19  ;;  %1874 = vmatmul.mubr.bf16.gmra.mrb[88].mxu0 %v6491_v21  ;;  %v6500_v19 = vld [vmem:[#allocation4 + $0xe8] ss:$16 sps:$4 sm:$0xff]   ;;  %v6516_v25 = vld [vmem:[#allocation4 + $0x14c] ss:$16 sps:$4 sm:$0xff]  }
 0x188   : > { %2033 = vmatprep.mubr.bf16.mxu1 %v6435_v22  ;;  %2107 = vmatpush1.bf16.msra.mxu1 %v1142_v28  ;;  %v6506_v21 = vld [vmem:[#allocation4 + $0x108] ss:$16 sps:$4 sm:$0xff]   ;;  %v6510_v22 = vld [vmem:[#allocation4 + $0x12c] ss:$16 sps:$4 sm:$0xff]  }
 0x189   : > { %2108 = vmatprep.subr.bf16.mxu1 %v6956_v27  ;;  %1881 = vmatprep.mubr.bf16.mxu0 %v6495_v26  ;;  %v6518_v26 = vld [vmem:[#allocation4 + $0x148] ss:$16 sps:$4 sm:$0xff]   ;;  %v6522_v28 = vld [vmem:[#allocation4 + $0x16c] ss:$16 sps:$4 sm:$0xff]  }
 0x18a   : > { %v5875_v29 = vpop.f32.mrb[60].mxu0  ;;  %5878 = vmatpush3.bf16.msra.mxu0 %v6585_v23 }
 0x18b   : > { %v971_v31 = vpop.f32.mrb[61].mxu0 }
 0x18c   : > { %2109 = vmatpush1.bf16.msra.mxu1 %v1143_v24  ;;  %v5876_v34 = vpop.f32.mrb[62].mxu0  ;;  %v6512_v24 = vld [vmem:[#allocation4 + $0x128] ss:$16 sps:$4 sm:$0xff]  }
 0x18d   : > { %v1145_v35 = vpack.c.bf16 %v5876_v34, %v5875_v29  ;;  %v974_v36 = vpop.f32.mrb[63].mxu0  ;;  %2110 = vmatprep.subr.bf16.mxu1 %v6956_v27  ;;  %v6524_v29 = vld [vmem:[#allocation4 + $0x168] ss:$16 sps:$4 sm:$0xff]   ;;  %v6534_v34 = vld [vmem:[#allocation4 + $0x1ac] ss:$16 sps:$4 sm:$0xff]  }
 0x18e   : > { %v1144_v38 = vpack.c.bf16 %v974_v36, %v971_v31  ;;  %v6595_v31 = vld [vmem:[%s8276_s4 + $0x8] sm:$0xff]  }
 0x18f   : > { %2034 = vmatmul.mubr.bf16.gmra.mrb[28].mxu1 %v6437_v30  ;;  %1882 = vmatmul.mubr.bf16.gmra.mrb[92].mxu0 %v6497_v32  ;;  %v6528_v30 = vld [vmem:[#allocation4 + $0x18c] ss:$16 sps:$4 sm:$0xff]   ;;  %v6596_v32 = vld [vmem:[%s8276_s4 + $0x10] sm:$0xff]   ;;  %v6536_v36 = vld [vmem:[#allocation4 + $0x1a8] ss:$16 sps:$4 sm:$0xff]  }
 0x190   : > { %2041 = vmatprep.mubr.bf16.mxu1 %v6438_v33  ;;  %2111 = vmatpush1.bf16.msra.mxu1 %v1144_v38  ;;  %v6530_v33 = vld [vmem:[#allocation4 + $0x188] ss:$16 sps:$4 sm:$0xff]  }
 0x191   : > { %2112 = vmatprep.subr.bf16.mxu1 %v6956_v27  ;;  %1889 = vmatprep.mubr.bf16.mxu0 %v6501_v37  ;;  %v6515_v27 = vld [vmem:[#allocation4 + $0x140] ss:$16 sps:$4 sm:$0xff]   ;;  %v6540_v37 = vld [vmem:[#allocation4 + $0x1cc] ss:$16 sps:$4 sm:$0xff]  }
 0x192   : > { %5879 = vmatprep.subr.bf16.mxu0 %v6595_v31 }
 0x193   : > { %5880 = vmatpush3.bf16.msra.mxu0 %v6595_v31  ;;  %v6582_v31 = vld [vmem:[#allocation4 + $0x30c] ss:$16 sps:$4 sm:$0xff]  }
 0x194   : > { %2113 = vmatpush1.bf16.msra.mxu1 %v1145_v35  ;;  %5881 = vmatprep.subr.bf16.mxu0 %v6596_v32  ;;  %v6600_v35 = vld [vmem:[%s8276_s4 + $0x18] sm:$0xff]  }
 0x197   : > { %2042 = vmatmul.mubr.bf16.gmra.mrb[32].mxu1 %v6440_v39  ;;  %1890 = vmatmul.mubr.bf16.gmra.mrb[96].mxu0 %v6503_v40  ;;  %v6542_v39 = vld [vmem:[#allocation4 + $0x1c8] ss:$16 sps:$4 sm:$0xff]  }
 0x198   : > { %2049 = vmatprep.mubr.bf16.mxu1 %v6441_v41  ;;  %1897 = vmatprep.mubr.bf16.mxu0 %v6507_v42  ;;  %v6546_v41 = vld [vmem:[#allocation4 + $0x1ec] ss:$16 sps:$4 sm:$0xff]  }
 0x199   : > { %5882 = vmatpush3.bf16.msra.mxu0 %v6596_v32 }
 0x19a   : > { %5883 = vmatprep.subr.bf16.mxu0 %v6600_v35 }
 0x19d   : > { %5884 = vmatpush3.bf16.msra.mxu0 %v6600_v35  ;;  %v6584_v35 = vld [vmem:[#allocation4 + $0x308] ss:$16 sps:$4 sm:$0xff]  }
 0x19f   : > { %2050 = vmatmul.mubr.bf16.gmra.mrb[36].mxu1 %v6443_v43  ;;  %1898 = vmatmul.mubr.bf16.gmra.mrb[100].mxu0 %v6509_v44 }
 0x1a0   : > { %2057 = vmatprep.mubr.bf16.mxu1 %v6444_v45  ;;  %1905 = vmatprep.mubr.bf16.mxu0 %v6513_v46  ;;  %v6548_v45 = vld [vmem:[#allocation4 + $0x1e8] ss:$16 sps:$4 sm:$0xff]  }
 0x1a7   : > { %2058 = vmatmul.mubr.bf16.gmra.mrb[40].mxu1 %v6446_v47  ;;  %1906 = vmatmul.mubr.bf16.gmra.mrb[104].mxu0 %v6515_v27  ;;  %v6552_v47 = vld [vmem:[#allocation4 + $0x20c] ss:$16 sps:$4 sm:$0xff]  }
 0x1a8   : > { %2065 = vmatprep.mubr.bf16.mxu1 %v6447_v48  ;;  %1913 = vmatprep.mubr.bf16.mxu0 %v6519_v49 }
 0x1af   : > { %2066 = vmatmul.mubr.bf16.gmra.mrb[44].mxu1 %v6449_v50  ;;  %1914 = vmatmul.mubr.bf16.gmra.mrb[108].mxu0 %v6521_v51  ;;  %v6554_v50 = vld [vmem:[#allocation4 + $0x208] ss:$16 sps:$4 sm:$0xff]  }
 0x1b0   : > { %2073 = vmatprep.mubr.bf16.mxu1 %v6450_v52  ;;  %1921 = vmatprep.mubr.bf16.mxu0 %v6525_v53  ;;  %v6558_v52 = vld [vmem:[#allocation4 + $0x22c] ss:$16 sps:$4 sm:$0xff]  }
 0x1b7   : > { %2074 = vmatmul.mubr.bf16.gmra.mrb[48].mxu1 %v6452_v54  ;;  %1922 = vmatmul.mubr.bf16.gmra.mrb[112].mxu0 %v6527_v55 }
 0x1b8   : > { %2114 = vmatprep.mubr.bf16.mxu1 %v6458_v56  ;;  %1929 = vmatprep.mubr.bf16.mxu0 %v6531_v57  ;;  %v6560_v56 = vld [vmem:[#allocation4 + $0x228] ss:$16 sps:$4 sm:$0xff]  }
 0x1bf   : > { %2115 = vmatmul.mubr.bf16.vlgmr.msra.gmra.mrb[52].mxu1 %v6456_v58  ;;  %1930 = vmatmul.mubr.bf16.gmra.mrb[116].mxu0 %v6533_v59  ;;  %v6564_v58 = vld [vmem:[#allocation4 + $0x24c] ss:$16 sps:$4 sm:$0xff]  }
 0x1c0   : > { %2122 = vmatprep.mubr.bf16.mxu1 %v6462_v60  ;;  %1937 = vmatprep.mubr.bf16.mxu0 %v6537_v61 }
 0x1c7   : > { %2123 = vmatmul.mubr.bf16.gmra.mrb[56].mxu1 %v6464_v62  ;;  %1938 = vmatmul.mubr.bf16.gmra.mrb[120].mxu0 %v6539_v63  ;;  %v6566_v62 = vld [vmem:[#allocation4 + $0x248] ss:$16 sps:$4 sm:$0xff]  }
 0x1c8   : > { %2130 = vmatprep.mubr.bf16.mxu1 %v6468_v0  ;;  %1945 = vmatprep.mubr.bf16.mxu0 %v6543_v1  ;;  %v6567_v0 = vld [vmem:[#allocation4 + $0x26c] ss:$16 sps:$4 sm:$0xff]  }
 0x1cf   : > { %2131 = vmatmul.mubr.bf16.gmra.mrb[60].mxu1 %v6470_v2  ;;  %1946 = vmatmul.mubr.bf16.gmra.mrb[124].mxu0 %v6545_v3 }
 0x1d0   : > { %2138 = vmatprep.mubr.bf16.mxu1 %v6474_v4  ;;  %1953 = vmatprep.mubr.bf16.mxu0 %v6549_v5  ;;  %v6569_v4 = vld [vmem:[#allocation4 + $0x268] ss:$16 sps:$4 sm:$0xff]  }
 0x1d7   : > { %2139 = vmatmul.mubr.bf16.gmra.mrb[64].mxu1 %v6476_v6  ;;  %1954 = vmatmul.mubr.bf16.gmra.mrb[128].mxu0 %v6551_v7  ;;  %v6570_v6 = vld [vmem:[#allocation4 + $0x28c] ss:$16 sps:$4 sm:$0xff]  }
 0x1d8   : > { %2146 = vmatprep.mubr.bf16.mxu1 %v6480_v8  ;;  %1961 = vmatprep.mubr.bf16.mxu0 %v6555_v9 }
 0x1df   : > { %2147 = vmatmul.mubr.bf16.gmra.mrb[68].mxu1 %v6482_v10  ;;  %1962 = vmatmul.mubr.bf16.gmra.mrb[132].mxu0 %v6557_v11  ;;  %v6572_v10 = vld [vmem:[#allocation4 + $0x288] ss:$16 sps:$4 sm:$0xff]  }
 0x1e0   : > { %2154 = vmatprep.mubr.bf16.mxu1 %v6486_v12  ;;  %1969 = vmatprep.mubr.bf16.mxu0 %v6561_v13  ;;  %v6573_v12 = vld [vmem:[#allocation4 + $0x2ac] ss:$16 sps:$4 sm:$0xff]  }
 0x1e7   : > { %2155 = vmatmul.mubr.bf16.gmra.mrb[72].mxu1 %v6488_v14  ;;  %1970 = vmatmul.mubr.bf16.gmra.mrb[136].mxu0 %v6563_v15 }
 0x1e8   : > { %2162 = vmatprep.mubr.bf16.mxu1 %v6492_v16  ;;  %v6575_v16 = vld [vmem:[#allocation4 + $0x2a8] ss:$16 sps:$4 sm:$0xff]  }
 0x1ef   : > { %2163 = vmatmul.mubr.bf16.gmra.mrb[76].mxu1 %v6494_v17 }
 0x1f0   : > { %2170 = vmatprep.mubr.bf16.mxu1 %v6498_v18  ;;  %v6576_v18 = vld [vmem:[#allocation4 + $0x2cc] ss:$16 sps:$4 sm:$0xff]  }
 0x1f7   : > { %2171 = vmatmul.mubr.bf16.gmra.mrb[80].mxu1 %v6500_v19 }
 0x1f8   : > { %2178 = vmatprep.mubr.bf16.mxu1 %v6504_v20 }
 0x1ff   : > { %2179 = vmatmul.mubr.bf16.gmra.mrb[84].mxu1 %v6506_v21 }
 0x200   : > { %2186 = vmatprep.mubr.bf16.mxu1 %v6510_v22  ;;  %v6578_v22 = vld [vmem:[#allocation4 + $0x2c8] ss:$16 sps:$4 sm:$0xff]  }
 0x207   : > { %2187 = vmatmul.mubr.bf16.gmra.mrb[88].mxu1 %v6512_v24  ;;  %v6579_v24 = vld [vmem:[#allocation4 + $0x2ec] ss:$16 sps:$4 sm:$0xff]  }
 0x208   : > { %2194 = vmatprep.mubr.bf16.mxu1 %v6516_v25 }
 0x20f   : > { %2195 = vmatmul.mubr.bf16.gmra.mrb[92].mxu1 %v6518_v26 }
 0x210   : > { %2202 = vmatprep.mubr.bf16.mxu1 %v6522_v28 }
 0x217   : > { %2203 = vmatmul.mubr.bf16.gmra.mrb[96].mxu1 %v6524_v29  ;;  %v6581_v29 = vld [vmem:[#allocation4 + $0x2e8] ss:$16 sps:$4 sm:$0xff]  }
 0x218   : > { %2210 = vmatprep.mubr.bf16.mxu1 %v6528_v30 }
 0x21f   : > { %2211 = vmatmul.mubr.bf16.gmra.mrb[100].mxu1 %v6530_v33 }
 0x220   : > { %2218 = vmatprep.mubr.bf16.mxu1 %v6534_v34 }
 0x227   : > { %2219 = vmatmul.mubr.bf16.gmra.mrb[104].mxu1 %v6536_v36 }
 0x228   : > { %2226 = vmatprep.mubr.bf16.mxu1 %v6540_v37  ;;  %v6586_v37 = vld [vmem:[#allocation4 + $0x32c] ss:$16 sps:$4 sm:$0xff]  }
 0x22a   : > { %v7301_v38 = vpop.f32.mrb[64].mxu0 }
 0x22b   : > { %v1829_v40 = vpop.f32.mrb[65].mxu0 }
 0x22c   : > { %v7303_v42 = vpop.f32.mrb[66].mxu0 }
 0x22d   : > { %v1832_v43 = vpop.f32.mrb[67].mxu0 }
 0x22e   : > { %v6588_v43 = vld [vmem:[#allocation4 + $0x328] ss:$16 sps:$4 sm:$0xff]  }
 0x22f   : > { %2227 = vmatmul.mubr.bf16.gmra.mrb[108].mxu1 %v6542_v39 }
 0x230   : > { %2234 = vmatprep.mubr.bf16.mxu1 %v6546_v41 }
 0x232   : > { %v7305_v44 = vpop.f32.mrb[68].mxu0 }
 0x233   : > { %v1837_v46 = vpop.f32.mrb[69].mxu0 }
 0x234   : > { %v7307_v27 = vpop.f32.mrb[70].mxu0  ;;  %v6589_v46 = vld [vmem:[#allocation4 + $0x34c] ss:$16 sps:$4 sm:$0xff]  }
 0x235   : > { %v1840_v48 = vpop.f32.mrb[71].mxu0 }
 0x237   : > { %2235 = vmatmul.mubr.bf16.gmra.mrb[112].mxu1 %v6548_v45 }
 0x238   : > { %2242 = vmatprep.mubr.bf16.mxu1 %v6552_v47 }
 0x23a   : > { %v7309_v49 = vpop.f32.mrb[72].mxu0 }
 0x23b   : > { %v1845_v51 = vpop.f32.mrb[73].mxu0 }
 0x23c   : > { %v7311_v53 = vpop.f32.mrb[74].mxu0  ;;  %v6591_v51 = vld [vmem:[#allocation4 + $0x348] ss:$16 sps:$4 sm:$0xff]  }
 0x23d   : > { %v1848_v54 = vpop.f32.mrb[75].mxu0 }
 0x23e   : > { %v7354_v54 = vld [vmem:[%s8275_s3] ss:$0 sm:$0xff] }
 0x23f   : > { %2243 = vmatmul.mubr.bf16.gmra.mrb[116].mxu1 %v6554_v50 }
 0x240   : > { %2250 = vmatprep.mubr.bf16.mxu1 %v6558_v52 }
 0x242   : > { %v7313_v55 = vpop.f32.mrb[76].mxu0 }
 0x243   : > { %v1853_v57 = vpop.f32.mrb[77].mxu0 }
 0x244   : > { %v7315_v59 = vpop.f32.mrb[78].mxu0 }
 0x245   : > { %v1856_v60 = vpop.f32.mrb[79].mxu0 }
 0x246   : > { %v1828_v60 = vadd.f32 %v7354_v54, %v7301_v38 }
 0x247   : > { %2251 = vmatmul.mubr.bf16.gmra.mrb[120].mxu1 %v6560_v56  ;;  %v6592_v56 = vld [vmem:[#allocation4 + $0x36c] ss:$16 sps:$4 sm:$0xff]  }
 0x248   : > { %2258 = vmatprep.mubr.bf16.mxu1 %v6564_v58 }
 0x24a   : > { %v7317_v61 = vpop.f32.mrb[80].mxu0 }
 0x24b   : > { %v1861_v63 = vpop.f32.mrb[81].mxu0 }
 0x24c   : > { %v7319_v1 = vpop.f32.mrb[82].mxu0 }
 0x24d   : > { %v1864_v2 = vpop.f32.mrb[83].mxu0 }
 0x24f   : > { %2259 = vmatmul.mubr.bf16.gmra.mrb[124].mxu1 %v6566_v62  ;;  %v1831_v62 = vadd.f32 %v7354_v54, %v7303_v42  ;;  %v1836_v42 = vadd.f32 %v7354_v54, %v7305_v44 }
 0x250   : > { %2266 = vmatprep.mubr.bf16.mxu1 %v6567_v0 }
 0x252   : > { %v7321_v3 = vpop.f32.mrb[84].mxu0 }
 0x253   : > { %v1869_v5 = vpop.f32.mrb[85].mxu0 }
 0x254   : > { %v7323_v7 = vpop.f32.mrb[86].mxu0  ;;  %v6594_v5 = vld [vmem:[#allocation4 + $0x368] ss:$16 sps:$4 sm:$0xff]  }
 0x255   : > { %v1872_v8 = vpop.f32.mrb[87].mxu0 }
 0x257   : > { %2267 = vmatmul.mubr.bf16.gmra.mrb[0].mxu1 %v6569_v4 }
 0x258   : > { %2274 = vmatprep.mubr.bf16.mxu1 %v6570_v6 }
 0x25a   : > { %v7325_v9 = vpop.f32.mrb[88].mxu0 }
 0x25b   : > { %v1877_v11 = vpop.f32.mrb[89].mxu0 }
 0x25c   : > { %v7327_v13 = vpop.f32.mrb[90].mxu0 }
 0x25d   : > { %v1880_v14 = vpop.f32.mrb[91].mxu0 }
 0x25f   : > { %2275 = vmatmul.mubr.bf16.gmra.mrb[4].mxu1 %v6572_v10  ;;  %v6597_v10 = vld [vmem:[#allocation4 + $0x38c] ss:$16 sps:$4 sm:$0xff]  }
 0x260   : > { %2282 = vmatprep.mubr.bf16.mxu1 %v6573_v12 }
 0x262   : > { %v7329_v15 = vpop.f32.mrb[92].mxu0 }
 0x263   : > { %v1885_v17 = vpop.f32.mrb[93].mxu0 }
 0x264   : > { %v7331_v19 = vpop.f32.mrb[94].mxu0 }
 0x265   : > { %v1888_v20 = vpop.f32.mrb[95].mxu0 }
 0x266   : > { %v1839_v20 = vadd.f32 %v7354_v54, %v7307_v27 }
 0x267   : > { %2283 = vmatmul.mubr.bf16.gmra.mrb[8].mxu1 %v6575_v16 }
 0x268   : > { %2290 = vmatprep.mubr.bf16.mxu1 %v6576_v18 }
 0x26a   : > { %v7333_v21 = vpop.f32.mrb[96].mxu0 }
 0x26b   : > { %v1893_v23 = vpop.f32.mrb[97].mxu0 }
 0x26c   : > { %v7335_v25 = vpop.f32.mrb[98].mxu0 }
 0x26d   : > { %v1896_v26 = vpop.f32.mrb[99].mxu0 }
 0x26f   : > { %2291 = vmatmul.mubr.bf16.gmra.mrb[12].mxu1 %v6578_v22 }
 0x270   : > { %2298 = vmatprep.mubr.bf16.mxu1 %v6579_v24 }
 0x272   : > { %v7337_v28 = vpop.f32.mrb[100].mxu0 }
 0x273   : > { %v1901_v30 = vpop.f32.mrb[101].mxu0 }
 0x274   : > { %v7339_v32 = vpop.f32.mrb[102].mxu0 }
 0x275   : > { %v1904_v33 = vpop.f32.mrb[103].mxu0 }
 0x276   : > { %v6601_v33 = vld [vmem:[#allocation4 + $0x3ac] ss:$16 sps:$4 sm:$0xff]  }
 0x277   : > { %2299 = vmatmul.mubr.bf16.gmra.mrb[16].mxu1 %v6581_v29  ;;  %v6599_v29 = vld [vmem:[#allocation4 + $0x388] ss:$16 sps:$4 sm:$0xff]  }
 0x278   : > { %2306 = vmatprep.mubr.bf16.mxu1 %v6582_v31 }
 0x27a   : > { %v7341_v34 = vpop.f32.mrb[104].mxu0 }
 0x27b   : > { %v1909_v36 = vpop.f32.mrb[105].mxu0 }
 0x27c   : > { %v7343_v39 = vpop.f32.mrb[106].mxu0 }
 0x27d   : > { %v1912_v40 = vpop.f32.mrb[107].mxu0 }
 0x27f   : > { %2307 = vmatmul.mubr.bf16.gmra.mrb[20].mxu1 %v6584_v35 }
 0x280   : > { %2314 = vmatprep.mubr.bf16.mxu1 %v6586_v37 }
 0x282   : > { %v7345_v41 = vpop.f32.mrb[108].mxu0 }
 0x283   : > { %v1917_v45 = vpop.f32.mrb[109].mxu0 }
 0x284   : > { %v7347_v47 = vpop.f32.mrb[110].mxu0 }
 0x285   : > { %v1920_v48 = vpop.f32.mrb[111].mxu0 }
 0x287   : > { %2315 = vmatmul.mubr.bf16.gmra.mrb[24].mxu1 %v6588_v43  ;;  %v1844_v43 = vadd.f32 %v7354_v54, %v7309_v49 }
 0x288   : > { %2322 = vmatprep.mubr.bf16.mxu1 %v6589_v46  ;;  %v1847_v46 = vadd.f32 %v7354_v54, %v7311_v53 }
 0x28a   : > { %v7349_v50 = vpop.f32.mrb[112].mxu0 }
 0x28b   : > { %v1925_v52 = vpop.f32.mrb[113].mxu0 }
 0x28c   : > { %v7356_v57 = vpop.f32.mrb[114].mxu0 }
 0x28d   : > { %v1928_v58 = vpop.f32.mrb[115].mxu0 }
 0x28e   : > { %v6603_v58 = vld [vmem:[#allocation4 + $0x3a8] ss:$16 sps:$4 sm:$0xff]  }
 0x28f   : > { %2323 = vmatmul.mubr.bf16.gmra.mrb[28].mxu1 %v6591_v51 }
 0x290   : > { %2330 = vmatprep.mubr.bf16.mxu1 %v6592_v56 }
 0x292   : > { %v2116_v63 = vpop.f32.mrb[52].mxu1  ;;  %v7362_v0 = vpop.f32.mrb[116].mxu0 }
 0x293   : > { %v2117_v2 = vadd.f32 %v2116_v63, %v1828_v60  ;;  %v2118_v4 = vpop.f32.mrb[53].mxu1  ;;  %v1933_v6 = vpop.f32.mrb[117].mxu0  ;;  %v6604_v63 = vld [vmem:[#allocation4 + $0x3cc] ss:$16 sps:$4 sm:$0xff]  }
 0x294   : > { %v2119_v8 = vpop.f32.mrb[54].mxu1  ;;  %v7364_v11 = vpop.f32.mrb[118].mxu0 }
 0x295   : > { %v2120_v12 = vadd.f32 %v2119_v8, %v1831_v62  ;;  %v2121_v14 = vpop.f32.mrb[55].mxu1  ;;  %v1936_v16 = vpop.f32.mrb[119].mxu0  ;;  %v2371_v17 = vmax.f32 %v2117_v2, 0.0  ;;  %v1852_v8 = vadd.f32 %v7354_v54, %v7313_v55 }
 0x297   : > { %v2372_v38 = vmax.f32 %v2120_v12, 0.0  ;;  %2331 = vmatmul.mubr.bf16.gmra.mrb[32].mxu1 %v6594_v5  ;;  %v1855_v12 = vadd.f32 %v7354_v54, %v7315_v59 }
 0x298   : > { %2338 = vmatprep.mubr.bf16.mxu1 %v6597_v10 }
 0x299   : > { %v2435_v18 = vpack.c.bf16 %v2372_v38, %v2371_v17 }
 0x29a   : > { %v2124_v22 = vpop.f32.mrb[56].mxu1  ;;  %v7370_v23 = vpop.f32.mrb[120].mxu0 }
 0x29b   : > { %2468 = vst.msk [vmem:[#allocation2] sm:$0xff] %vm2467_vm1, %v2435_v18  ;;  %v2125_v24 = vadd.f32 %v2124_v22, %v1836_v42  ;;  %v2126_v26 = vpop.f32.mrb[57].mxu1  ;;  %5885 = vmatprep.mubr.msk.bf16.mxu0 %vm2467_vm1, %v2435_v18  ;;  %v1941_v30 = vpop.f32.mrb[121].mxu0  ;;  %v6606_v42 = vld [vmem:[#allocation4 + $0x3c8] ss:$16 sps:$4 sm:$0xff]  }
 0x29c   : > { %v2127_v31 = vpop.f32.mrb[58].mxu1  ;;  %v7374_v44 = vpop.f32.mrb[122].mxu0  ;;  %v6607_v22 = vld [vmem:[#allocation4 + $0x3ec] ss:$16 sps:$4 sm:$0xff]  }
 0x29d   : > { %v2128_v35 = vadd.f32 %v2127_v31, %v1839_v20  ;;  %v2129_v36 = vpop.f32.mrb[59].mxu1  ;;  %v1944_v37 = vpop.f32.mrb[123].mxu0  ;;  %v2373_v40 = vmax.f32 %v2125_v24, 0.0  ;;  %v1860_v31 = vadd.f32 %v7354_v54, %v7317_v61 }
 0x29f   : > { %v2374_v27 = vmax.f32 %v2128_v35, 0.0  ;;  %2339 = vmatmul.mubr.bf16.gmra.mrb[36].mxu1 %v6599_v29  ;;  %v1863_v35 = vadd.f32 %v7354_v54, %v7319_v1  ;;  %v1868_v1 = vadd.f32 %v7354_v54, %v7321_v3 }
 0x2a0   : > { %2346 = vmatprep.mubr.bf16.mxu1 %v6601_v33 }
 0x2a1   : > { %v2436_v45 = vpack.c.bf16 %v2374_v27, %v2373_v40 }
 0x2a2   : > { %v2132_v48 = vpop.f32.mrb[60].mxu1  ;;  %v7380_v51 = vpop.f32.mrb[124].mxu0 }
 0x2a3   : > { %2469 = vst.msk [vmem:[#allocation2 + $0x8] sm:$0xff] %vm2467_vm1, %v2436_v45  ;;  %v2133_v52 = vadd.f32 %v2132_v48, %v1844_v43  ;;  %v2134_v56 = vpop.f32.mrb[61].mxu1  ;;  %5886 = vmatmul.mubr.msk.bf16.vlgmr.msra.gmra.mrb[140].mxu0 %vm2467_vm1, %v2436_v45  ;;  %v1949_v60 = vpop.f32.mrb[125].mxu0  ;;  %v6609_v43 = vld [vmem:[#allocation4 + $0x3e8] ss:$16 sps:$4 sm:$0xff]  }
 0x2a4   : > { %v2135_v62 = vpop.f32.mrb[62].mxu1  ;;  %v7384_v2 = vpop.f32.mrb[126].mxu0 }
 0x2a5   : > { %v2136_v49 = vadd.f32 %v2135_v62, %v1847_v46  ;;  %v2137_v4 = vpop.f32.mrb[63].mxu1  ;;  %v1952_v5 = vpop.f32.mrb[127].mxu0  ;;  %v2375_v6 = vmax.f32 %v2133_v52, 0.0 }
 0x2a7   : > { %v2376_v53 = vmax.f32 %v2136_v49, 0.0  ;;  %2347 = vmatmul.mubr.bf16.gmra.mrb[40].mxu1 %v6603_v58 }
 0x2a8   : > { %2354 = vmatprep.mubr.bf16.mxu1 %v6604_v63  ;;  %v1871_v63 = vadd.f32 %v7354_v54, %v7323_v7  ;;  %v1876_v7 = vadd.f32 %v7354_v54, %v7325_v9 }
 0x2a9   : > { %v2437_v10 = vpack.c.bf16 %v2376_v53, %v2375_v6 }
 0x2aa   : > { %v2140_v14 = vpop.f32.mrb[64].mxu1  ;;  %v7390_v16 = vpop.f32.mrb[128].mxu0 }
 0x2ab   : > { %2470 = vst.msk [vmem:[#allocation2 + $0x10] sm:$0xff] %vm2467_vm1, %v2437_v10  ;;  %v2141_v17 = vadd.f32 %v2140_v14, %v1852_v8  ;;  %v2142_v38 = vpop.f32.mrb[65].mxu1  ;;  %5889 = vmatprep.mubr.msk.bf16.mxu0 %vm2467_vm1, %v2437_v10  ;;  %v1957_v18 = vpop.f32.mrb[129].mxu0 }
 0x2ac   : > { %v2143_v20 = vpop.f32.mrb[66].mxu1  ;;  %v7394_v24 = vpop.f32.mrb[130].mxu0  ;;  %v1879_v18 = vadd.f32 %v7354_v54, %v7327_v13 }
 0x2ad   : > { %v2144_v55 = vadd.f32 %v2143_v20, %v1855_v12  ;;  %v2145_v26 = vpop.f32.mrb[67].mxu1  ;;  %v1960_v29 = vpop.f32.mrb[131].mxu0  ;;  %v2377_v30 = vmax.f32 %v2141_v17, 0.0 }
 0x2af   : > { %v2378_v59 = vmax.f32 %v2144_v55, 0.0  ;;  %2355 = vmatmul.mubr.bf16.gmra.mrb[44].mxu1 %v6606_v42 }
 0x2b0   : > { %2362 = vmatprep.mubr.bf16.mxu1 %v6607_v22 }
 0x2b1   : > { %v2438_v33 = vpack.c.bf16 %v2378_v59, %v2377_v30 }
 0x2b2   : > { %v2148_v36 = vpop.f32.mrb[68].mxu1  ;;  %v7400_v37 = vpop.f32.mrb[132].mxu0 }
 0x2b3   : > { %2471 = vst.msk [vmem:[#allocation2 + $0x18] sm:$0xff] %vm2467_vm1, %v2438_v33  ;;  %v2149_v40 = vadd.f32 %v2148_v36, %v1860_v31  ;;  %v2150_v27 = vpop.f32.mrb[69].mxu1  ;;  %5890 = vmatmul.mubr.msk.bf16.gmra.mrb[144].mxu0 %vm2467_vm1, %v2438_v33  ;;  %v1965_v45 = vpop.f32.mrb[133].mxu0  ;;  %v1884_v33 = vadd.f32 %v7354_v54, %v7329_v15 }
 0x2b4   : > { %v2151_v46 = vpop.f32.mrb[70].mxu1  ;;  %v7404_v48 = vpop.f32.mrb[134].mxu0 }
 0x2b5   : > { %v2152_v61 = vadd.f32 %v2151_v46, %v1863_v35  ;;  %v2153_v52 = vpop.f32.mrb[71].mxu1  ;;  %v1968_v56 = vpop.f32.mrb[135].mxu0  ;;  %v2379_v58 = vmax.f32 %v2149_v40, 0.0  ;;  %v1887_v35 = vadd.f32 %v7354_v54, %v7331_v19 }
 0x2b6   : > { %v1892_v52 = vadd.f32 %v7354_v54, %v7333_v21  ;;  %v1895_v56 = vadd.f32 %v7354_v54, %v7335_v25 }
 0x2b7   : > { %v2380_v60 = vmax.f32 %v2152_v61, 0.0  ;;  %2363 = vmatmul.mubr.bf16.gmra.mrb[48].mxu1 %v6609_v43 }
 0x2b9   : > { %v2439_v62 = vpack.c.bf16 %v2380_v60, %v2379_v58 }
 0x2ba   : > { %v2156_v49 = vpop.f32.mrb[72].mxu1  ;;  %v7410_v4 = vpop.f32.mrb[136].mxu0 }
 0x2bb   : > { %2472 = vst.msk [vmem:[#allocation2 + $0x20] sm:$0xff] %vm2467_vm1, %v2439_v62  ;;  %v2157_v5 = vadd.f32 %v2156_v49, %v1868_v1  ;;  %v2158_v6 = vpop.f32.mrb[73].mxu1  ;;  %5893 = vmatprep.mubr.msk.bf16.mxu0 %vm2467_vm1, %v2439_v62  ;;  %v1973_v53 = vpop.f32.mrb[137].mxu0 }
 0x2bc   : > { %v2159_v8 = vpop.f32.mrb[74].mxu1  ;;  %v7414_v10 = vpop.f32.mrb[138].mxu0  ;;  %v1900_v6 = vadd.f32 %v7354_v54, %v7337_v28  ;;  %v1903_v53 = vadd.f32 %v7354_v54, %v7339_v32 }
 0x2bd   : > { %v2160_v12 = vadd.f32 %v2159_v8, %v1871_v63  ;;  %v2161_v14 = vpop.f32.mrb[75].mxu1  ;;  %v1976_v3 = vpop.f32.mrb[139].mxu0  ;;  %v2381_v17 = vmax.f32 %v2157_v5, 0.0 }
 0x2bf   : > { %v2382_v38 = vmax.f32 %v2160_v12, 0.0 }
 0x2c1   : > { %v2440_v42 = vpack.c.bf16 %v2382_v38, %v2381_v17 }
 0x2c2   : > { %v2164_v20 = vpop.f32.mrb[76].mxu1 }
 0x2c3   : > { %2473 = vst.msk [vmem:[#allocation2 + $0x28] sm:$0xff] %vm2467_vm1, %v2440_v42  ;;  %v2165_v22 = vadd.f32 %v2164_v20, %v1876_v7  ;;  %v2166_v55 = vpop.f32.mrb[77].mxu1  ;;  %5894 = vmatmul.mubr.msk.bf16.gmra.mrb[148].mxu0 %vm2467_vm1, %v2440_v42  ;;  %v1908_v42 = vadd.f32 %v7354_v54, %v7341_v34 }
 0x2c4   : > { %v2167_v26 = vpop.f32.mrb[78].mxu1 }
 0x2c5   : > { %v2168_v29 = vadd.f32 %v2167_v26, %v1879_v18  ;;  %v2169_v30 = vpop.f32.mrb[79].mxu1  ;;  %v2383_v59 = vmax.f32 %v2165_v22, 0.0  ;;  %v1911_v18 = vadd.f32 %v7354_v54, %v7343_v39 }
 0x2c7   : > { %v2384_v31 = vmax.f32 %v2168_v29, 0.0 }
 0x2c9   : > { %v2441_v9 = vpack.c.bf16 %v2384_v31, %v2383_v59  ;;  %v1916_v31 = vadd.f32 %v7354_v54, %v7345_v41 }
 0x2ca   : > { %v2172_v13 = vpop.f32.mrb[80].mxu1 }
 0x2cb   : > { %2474 = vst.msk [vmem:[#allocation2 + $0x30] sm:$0xff] %vm2467_vm1, %v2441_v9  ;;  %v2173_v36 = vadd.f32 %v2172_v13, %v1884_v33  ;;  %v2174_v40 = vpop.f32.mrb[81].mxu1  ;;  %5897 = vmatprep.mubr.msk.bf16.mxu0 %vm2467_vm1, %v2441_v9  ;;  %v1919_v33 = vadd.f32 %v7354_v54, %v7347_v47 }
 0x2cc   : > { %v2175_v27 = vpop.f32.mrb[82].mxu1 }
 0x2cd   : > { %v2176_v43 = vadd.f32 %v2175_v27, %v1887_v35  ;;  %v2177_v45 = vpop.f32.mrb[83].mxu1  ;;  %v2385_v46 = vmax.f32 %v2173_v36, 0.0 }
 0x2ce   : > { %v1924_v45 = vadd.f32 %v7354_v54, %v7349_v50 }
 0x2cf   : > { %v2386_v61 = vmax.f32 %v2176_v43, 0.0 }
 0x2d1   : > { %v2442_v15 = vpack.c.bf16 %v2386_v61, %v2385_v46  ;;  %v1927_v46 = vadd.f32 %v7354_v54, %v7356_v57 }
 0x2d2   : > { %v2180_v19 = vpop.f32.mrb[84].mxu1 }
 0x2d3   : > { %2475 = vst.msk [vmem:[#allocation2 + $0x38] sm:$0xff] %vm2467_vm1, %v2442_v15  ;;  %v2181_v58 = vadd.f32 %v2180_v19, %v1892_v52  ;;  %v2182_v60 = vpop.f32.mrb[85].mxu1  ;;  %5898 = vmatmul.mubr.msk.bf16.gmra.mrb[152].mxu0 %vm2467_vm1, %v2442_v15 }
 0x2d4   : > { %v2183_v1 = vpop.f32.mrb[86].mxu1 }
 0x2d5   : > { %v2184_v62 = vadd.f32 %v2183_v1, %v1895_v56  ;;  %v2185_v63 = vpop.f32.mrb[87].mxu1  ;;  %v2387_v49 = vmax.f32 %v2181_v58, 0.0  ;;  %v1932_v1 = vadd.f32 %v7354_v54, %v7362_v0 }
 0x2d7   : > { %v2388_v5 = vmax.f32 %v2184_v62, 0.0  ;;  %v1935_v62 = vadd.f32 %v7354_v54, %v7364_v11 }
 0x2d9   : > { %v2443_v21 = vpack.c.bf16 %v2388_v5, %v2387_v49 }
 0x2da   : > { %v2188_v25 = vpop.f32.mrb[88].mxu1 }
 0x2db   : > { %2476 = vst.msk [vmem:[#allocation2 + $0x40] sm:$0xff] %vm2467_vm1, %v2443_v21  ;;  %v2189_v8 = vadd.f32 %v2188_v25, %v1900_v6  ;;  %v2190_v12 = vpop.f32.mrb[89].mxu1  ;;  %5901 = vmatprep.mubr.msk.bf16.mxu0 %vm2467_vm1, %v2443_v21 }
 0x2dc   : > { %v2191_v14 = vpop.f32.mrb[90].mxu1  ;;  %v1943_v12 = vadd.f32 %v7354_v54, %v7374_v44 }
 0x2dd   : > { %v2192_v3 = vadd.f32 %v2191_v14, %v1903_v53  ;;  %v2193_v17 = vpop.f32.mrb[91].mxu1  ;;  %v2389_v38 = vmax.f32 %v2189_v8, 0.0  ;;  %v1940_v8 = vadd.f32 %v7354_v54, %v7370_v23 }
 0x2df   : > { %v2390_v7 = vmax.f32 %v2192_v3, 0.0 }
 0x2e1   : > { %v2444_v28 = vpack.c.bf16 %v2390_v7, %v2389_v38 }
 0x2e2   : > { %v2196_v32 = vpop.f32.mrb[92].mxu1 }
 0x2e3   : > { %2477 = vst.msk [vmem:[#allocation2 + $0x48] sm:$0xff] %vm2467_vm1, %v2444_v28  ;;  %v2197_v20 = vadd.f32 %v2196_v32, %v1908_v42  ;;  %v2198_v22 = vpop.f32.mrb[93].mxu1  ;;  %5902 = vmatmul.mubr.msk.bf16.gmra.mrb[156].mxu0 %vm2467_vm1, %v2444_v28  ;;  %v1951_v32 = vadd.f32 %v7354_v54, %v7384_v2 }
 0x2e4   : > { %v2199_v55 = vpop.f32.mrb[94].mxu1 }
 0x2e5   : > { %v2200_v26 = vadd.f32 %v2199_v55, %v1911_v18  ;;  %v2201_v29 = vpop.f32.mrb[95].mxu1  ;;  %v2391_v30 = vmax.f32 %v2197_v20, 0.0  ;;  %v1948_v18 = vadd.f32 %v7354_v54, %v7380_v51 }
 0x2e7   : > { %v2392_v59 = vmax.f32 %v2200_v26, 0.0 }
 0x2e9   : > { %v2445_v34 = vpack.c.bf16 %v2392_v59, %v2391_v30 }
 0x2ea   : > { %v2204_v39 = vpop.f32.mrb[96].mxu1 }
 0x2eb   : > { %2478 = vst.msk [vmem:[#allocation2 + $0x50] sm:$0xff] %vm2467_vm1, %v2445_v34  ;;  %v2205_v9 = vadd.f32 %v2204_v39, %v1916_v31  ;;  %v2206_v35 = vpop.f32.mrb[97].mxu1  ;;  %5905 = vmatprep.mubr.msk.bf16.mxu0 %vm2467_vm1, %v2445_v34  ;;  %v1956_v31 = vadd.f32 %v7354_v54, %v7390_v16  ;;  %v1959_v34 = vadd.f32 %v7354_v54, %v7394_v24 }
 0x2ec   : > { %v2207_v13 = vpop.f32.mrb[98].mxu1 }
 0x2ed   : > { %v2208_v36 = vadd.f32 %v2207_v13, %v1919_v33  ;;  %v2209_v40 = vpop.f32.mrb[99].mxu1  ;;  %v2393_v27 = vmax.f32 %v2205_v9, 0.0 }
 0x2ef   : > { %v2394_v43 = vmax.f32 %v2208_v36, 0.0 }
 0x2f1   : > { %v2446_v41 = vpack.c.bf16 %v2394_v43, %v2393_v27  ;;  %v1964_v27 = vadd.f32 %v7354_v54, %v7400_v37  ;;  %v1967_v43 = vadd.f32 %v7354_v54, %v7404_v48 }
 0x2f2   : > { %v2212_v47 = vpop.f32.mrb[100].mxu1 }
 0x2f3   : > { %2479 = vst.msk [vmem:[#allocation2 + $0x58] sm:$0xff] %vm2467_vm1, %v2446_v41  ;;  %v2213_v61 = vadd.f32 %v2212_v47, %v1924_v45  ;;  %v2214_v52 = vpop.f32.mrb[101].mxu1  ;;  %5906 = vmatmul.mubr.msk.bf16.gmra.mrb[160].mxu0 %vm2467_vm1, %v2446_v41 }
 0x2f4   : > { %v2215_v15 = vpop.f32.mrb[102].mxu1 }
 0x2f5   : > { %v2216_v56 = vadd.f32 %v2215_v15, %v1927_v46  ;;  %v2217_v19 = vpop.f32.mrb[103].mxu1  ;;  %v2395_v58 = vmax.f32 %v2213_v61, 0.0 }
 0x2f6   : > { %v1975_v19 = vadd.f32 %v7354_v54, %v7414_v10 }
 0x2f7   : > { %v2396_v60 = vmax.f32 %v2216_v56, 0.0  ;;  %v1972_v56 = vadd.f32 %v7354_v54, %v7410_v4 }
 0x2f9   : > { %v2447_v50 = vpack.c.bf16 %v2396_v60, %v2395_v58 }
 0x2fa   : > { %v2220_v57 = vpop.f32.mrb[104].mxu1 }
 0x2fb   : > { %2480 = vst.msk [vmem:[#allocation2 + $0x60] sm:$0xff] %vm2467_vm1, %v2447_v50  ;;  %v2221_v63 = vadd.f32 %v2220_v57, %v1932_v1  ;;  %v2222_v49 = vpop.f32.mrb[105].mxu1  ;;  %5909 = vmatprep.mubr.msk.bf16.mxu0 %vm2467_vm1, %v2447_v50 }
 0x2fc   : > { %v2223_v5 = vpop.f32.mrb[106].mxu1 }
 0x2fd   : > { %v2224_v6 = vadd.f32 %v2223_v5, %v1935_v62  ;;  %v2225_v21 = vpop.f32.mrb[107].mxu1  ;;  %v2397_v53 = vmax.f32 %v2221_v63, 0.0 }
 0x2ff   : > { %v2398_v25 = vmax.f32 %v2224_v6, 0.0 }
 0x301   : > { %v2448_v0 = vpack.c.bf16 %v2398_v25, %v2397_v53 }
 0x302   : > { %v2228_v11 = vpop.f32.mrb[108].mxu1 }
 0x303   : > { %2481 = vst.msk [vmem:[#allocation2 + $0x68] sm:$0xff] %vm2467_vm1, %v2448_v0  ;;  %v2229_v14 = vadd.f32 %v2228_v11, %v1940_v8  ;;  %v2230_v3 = vpop.f32.mrb[109].mxu1  ;;  %5910 = vmatmul.mubr.msk.bf16.gmra.mrb[164].mxu0 %vm2467_vm1, %v2448_v0 }
 0x304   : > { %v2231_v17 = vpop.f32.mrb[110].mxu1 }
 0x305   : > { %v2232_v38 = vadd.f32 %v2231_v17, %v1943_v12  ;;  %v2233_v7 = vpop.f32.mrb[111].mxu1  ;;  %v2399_v42 = vmax.f32 %v2229_v14, 0.0 }
 0x307   : > { %v2400_v28 = vmax.f32 %v2232_v38, 0.0 }
 0x309   : > { %v2449_v23 = vpack.c.bf16 %v2400_v28, %v2399_v42 }
 0x30a   : > { %v2236_v44 = vpop.f32.mrb[112].mxu1 }
 0x30b   : > { %2482 = vst.msk [vmem:[#allocation2 + $0x70] sm:$0xff] %vm2467_vm1, %v2449_v23  ;;  %v2237_v20 = vadd.f32 %v2236_v44, %v1948_v18  ;;  %v2238_v22 = vpop.f32.mrb[113].mxu1  ;;  %5913 = vmatprep.mubr.msk.bf16.mxu0 %vm2467_vm1, %v2449_v23 }
 0x30c   : > { %v2239_v55 = vpop.f32.mrb[114].mxu1 }
 0x30d   : > { %v2240_v26 = vadd.f32 %v2239_v55, %v1951_v32  ;;  %v2241_v29 = vpop.f32.mrb[115].mxu1  ;;  %v2401_v30 = vmax.f32 %v2237_v20, 0.0 }
 0x30f   : > { %v2402_v59 = vmax.f32 %v2240_v26, 0.0 }
 0x311   : > { %v2450_v51 = vpack.c.bf16 %v2402_v59, %v2401_v30 }
 0x312   : > { %v2244_v2 = vpop.f32.mrb[116].mxu1 }
 0x313   : > { %2483 = vst.msk [vmem:[#allocation2 + $0x78] sm:$0xff] %vm2467_vm1, %v2450_v51  ;;  %v2245_v33 = vadd.f32 %v2244_v2, %v1956_v31  ;;  %v2246_v39 = vpop.f32.mrb[117].mxu1  ;;  %5914 = vmatmul.mubr.msk.bf16.gmra.mrb[168].mxu0 %vm2467_vm1, %v2450_v51 }
 0x314   : > { %v2247_v9 = vpop.f32.mrb[118].mxu1 }
 0x315   : > { %v2248_v35 = vadd.f32 %v2247_v9, %v1959_v34  ;;  %v2249_v13 = vpop.f32.mrb[119].mxu1  ;;  %v2403_v36 = vmax.f32 %v2245_v33, 0.0 }
 0x317   : > { %v2404_v40 = vmax.f32 %v2248_v35, 0.0 }
 0x319   : > { %v2451_v16 = vpack.c.bf16 %v2404_v40, %v2403_v36 }
 0x31a   : > { %v2252_v24 = vpop.f32.mrb[120].mxu1 }
 0x31b   : > { %2484 = vst.msk [vmem:[#allocation2 + $0x80] sm:$0xff] %vm2467_vm1, %v2451_v16  ;;  %v2253_v45 = vadd.f32 %v2252_v24, %v1964_v27  ;;  %v2254_v41 = vpop.f32.mrb[121].mxu1  ;;  %5917 = vmatprep.mubr.msk.bf16.mxu0 %vm2467_vm1, %v2451_v16 }
 0x31c   : > { %v2255_v46 = vpop.f32.mrb[122].mxu1 }
 0x31d   : > { %v2256_v47 = vadd.f32 %v2255_v46, %v1967_v43  ;;  %v2257_v61 = vpop.f32.mrb[123].mxu1  ;;  %v2405_v52 = vmax.f32 %v2253_v45, 0.0 }
 0x31f   : > { %v2406_v15 = vmax.f32 %v2256_v47, 0.0 }
 0x321   : > { %v2452_v37 = vpack.c.bf16 %v2406_v15, %v2405_v52 }
 0x322   : > { %v2260_v48 = vpop.f32.mrb[124].mxu1 }
 0x323   : > { %2485 = vst.msk [vmem:[#allocation2 + $0x88] sm:$0xff] %vm2467_vm1, %v2452_v37  ;;  %v2261_v58 = vadd.f32 %v2260_v48, %v1972_v56  ;;  %v2262_v60 = vpop.f32.mrb[125].mxu1  ;;  %5918 = vmatmul.mubr.msk.bf16.gmra.mrb[172].mxu0 %vm2467_vm1, %v2452_v37 }
 0x324   : > { %v2263_v1 = vpop.f32.mrb[126].mxu1 }
 0x325   : > { %v2264_v50 = vadd.f32 %v2263_v1, %v1975_v19  ;;  %v2265_v62 = vpop.f32.mrb[127].mxu1  ;;  %v2407_v57 = vmax.f32 %v2261_v58, 0.0 }
 0x327   : > { %v2408_v63 = vmax.f32 %v2264_v50, 0.0 }
 0x329   : > { %v2453_v49 = vpack.c.bf16 %v2408_v63, %v2407_v57 }
 0x32a   : > { %v2268_v5 = vpop.f32.mrb[0].mxu1 }
 0x32b   : > { %2486 = vst.msk [vmem:[#allocation2 + $0x90] sm:$0xff] %vm2467_vm1, %v2453_v49  ;;  %v6167_v4 = vadd.f32 %v7354_v54, %v2268_v5  ;;  %v2270_v6 = vpop.f32.mrb[1].mxu1  ;;  %5921 = vmatprep.mubr.msk.bf16.mxu0 %vm2467_vm1, %v2453_v49 }
 0x32c   : > { %v2271_v10 = vpop.f32.mrb[2].mxu1 }
 0x32d   : > { %v6168_v21 = vadd.f32 %v7354_v54, %v2271_v10  ;;  %v2273_v53 = vpop.f32.mrb[3].mxu1  ;;  %v2409_v25 = vmax.f32 %v6167_v4, 0.0 }
 0x32f   : > { %v2410_v8 = vmax.f32 %v6168_v21, 0.0 }
 0x331   : > { %v2454_v0 = vpack.c.bf16 %v2410_v8, %v2409_v25 }
 0x332   : > { %v2276_v12 = vpop.f32.mrb[4].mxu1 }
 0x333   : > { %2487 = vst.msk [vmem:[#allocation2 + $0x98] sm:$0xff] %vm2467_vm1, %v2454_v0  ;;  %v6169_v11 = vadd.f32 %v7354_v54, %v2276_v12  ;;  %v2278_v14 = vpop.f32.mrb[5].mxu1  ;;  %5922 = vmatmul.mubr.msk.bf16.gmra.mrb[176].mxu0 %vm2467_vm1, %v2454_v0 }
 0x334   : > { %v2279_v3 = vpop.f32.mrb[6].mxu1 }
 0x335   : > { %v6170_v17 = vadd.f32 %v7354_v54, %v2279_v3  ;;  %v2281_v38 = vpop.f32.mrb[7].mxu1  ;;  %v2411_v7 = vmax.f32 %v6169_v11, 0.0 }
 0x337   : > { %v2412_v42 = vmax.f32 %v6170_v17, 0.0 }
 0x339   : > { %v2455_v28 = vpack.c.bf16 %v2412_v42, %v2411_v7 }
 0x33a   : > { %v2284_v18 = vpop.f32.mrb[8].mxu1 }
 0x33b   : > { %2488 = vst.msk [vmem:[#allocation2 + $0xa0] sm:$0xff] %vm2467_vm1, %v2455_v28  ;;  %v6171_v23 = vadd.f32 %v7354_v54, %v2284_v18  ;;  %v2286_v32 = vpop.f32.mrb[9].mxu1  ;;  %5925 = vmatprep.mubr.msk.bf16.mxu0 %vm2467_vm1, %v2455_v28 }
 0x33c   : > { %v2287_v44 = vpop.f32.mrb[10].mxu1 }
 0x33d   : > { %v6172_v20 = vadd.f32 %v7354_v54, %v2287_v44  ;;  %v2289_v22 = vpop.f32.mrb[11].mxu1  ;;  %v2413_v55 = vmax.f32 %v6171_v23, 0.0 }
 0x33f   : > { %v2414_v26 = vmax.f32 %v6172_v20, 0.0 }
 0x341   : > { %v2456_v29 = vpack.c.bf16 %v2414_v26, %v2413_v55 }
 0x342   : > { %v2292_v30 = vpop.f32.mrb[12].mxu1 }
 0x343   : > { %2489 = vst.msk [vmem:[#allocation2 + $0xa8] sm:$0xff] %vm2467_vm1, %v2456_v29  ;;  %v6173_v59 = vadd.f32 %v7354_v54, %v2292_v30  ;;  %v2294_v31 = vpop.f32.mrb[13].mxu1  ;;  %5926 = vmatmul.mubr.msk.bf16.gmra.mrb[180].mxu0 %vm2467_vm1, %v2456_v29 }
 0x344   : > { %v2295_v51 = vpop.f32.mrb[14].mxu1 }
 0x345   : > { %v6174_v34 = vadd.f32 %v7354_v54, %v2295_v51  ;;  %v2297_v2 = vpop.f32.mrb[15].mxu1  ;;  %v2415_v33 = vmax.f32 %v6173_v59, 0.0 }
 0x347   : > { %v2416_v39 = vmax.f32 %v6174_v34, 0.0 }
 0x349   : > { %v2457_v9 = vpack.c.bf16 %v2416_v39, %v2415_v33 }
 0x34a   : > { %v2300_v35 = vpop.f32.mrb[16].mxu1 }
 0x34b   : > { %2490 = vst.msk [vmem:[#allocation2 + $0xb0] sm:$0xff] %vm2467_vm1, %v2457_v9  ;;  %v6175_v13 = vadd.f32 %v7354_v54, %v2300_v35  ;;  %v2302_v36 = vpop.f32.mrb[17].mxu1  ;;  %5929 = vmatprep.mubr.msk.bf16.mxu0 %vm2467_vm1, %v2457_v9 }
 0x34c   : > { %v2303_v40 = vpop.f32.mrb[18].mxu1 }
 0x34d   : > { %v6176_v27 = vadd.f32 %v7354_v54, %v2303_v40  ;;  %v2305_v16 = vpop.f32.mrb[19].mxu1  ;;  %v2417_v43 = vmax.f32 %v6175_v13, 0.0 }
 0x34f   : > { %v2418_v24 = vmax.f32 %v6176_v27, 0.0 }
 0x351   : > { %v2458_v45 = vpack.c.bf16 %v2418_v24, %v2417_v43 }
 0x352   : > { %v2308_v41 = vpop.f32.mrb[20].mxu1 }
 0x353   : > { %2491 = vst.msk [vmem:[#allocation2 + $0xb8] sm:$0xff] %vm2467_vm1, %v2458_v45  ;;  %v6177_v46 = vadd.f32 %v7354_v54, %v2308_v41  ;;  %v2310_v47 = vpop.f32.mrb[21].mxu1  ;;  %5930 = vmatmul.mubr.msk.bf16.gmra.mrb[184].mxu0 %vm2467_vm1, %v2458_v45 }
 0x354   : > { %v2311_v61 = vpop.f32.mrb[22].mxu1 }
 0x355   : > { %v6178_v52 = vadd.f32 %v7354_v54, %v2311_v61  ;;  %v2313_v15 = vpop.f32.mrb[23].mxu1  ;;  %v2419_v56 = vmax.f32 %v6177_v46, 0.0 }
 0x357   : > { %v2420_v37 = vmax.f32 %v6178_v52, 0.0 }
 0x359   : > { %v2459_v19 = vpack.c.bf16 %v2420_v37, %v2419_v56 }
 0x35a   : > { %v2316_v48 = vpop.f32.mrb[24].mxu1 }
 0x35b   : > { %2492 = vst.msk [vmem:[#allocation2 + $0xc0] sm:$0xff] %vm2467_vm1, %v2459_v19  ;;  %v6179_v58 = vadd.f32 %v7354_v54, %v2316_v48  ;;  %v2318_v60 = vpop.f32.mrb[25].mxu1  ;;  %5933 = vmatprep.mubr.msk.bf16.mxu0 %vm2467_vm1, %v2459_v19 }
 0x35c   : > { %v2319_v1 = vpop.f32.mrb[26].mxu1 }
 0x35d   : > { %v6180_v50 = vadd.f32 %v7354_v54, %v2319_v1  ;;  %v2321_v62 = vpop.f32.mrb[27].mxu1  ;;  %v2421_v57 = vmax.f32 %v6179_v58, 0.0 }
 0x35f   : > { %v2422_v63 = vmax.f32 %v6180_v50, 0.0 }
 0x361   : > { %v2460_v49 = vpack.c.bf16 %v2422_v63, %v2421_v57 }
 0x362   : > { %v2324_v5 = vpop.f32.mrb[28].mxu1 }
 0x363   : > { %2493 = vst.msk [vmem:[#allocation2 + $0xc8] sm:$0xff] %vm2467_vm1, %v2460_v49  ;;  %v6181_v4 = vadd.f32 %v7354_v54, %v2324_v5  ;;  %v2326_v6 = vpop.f32.mrb[29].mxu1  ;;  %5934 = vmatmul.mubr.msk.bf16.gmra.mrb[188].mxu0 %vm2467_vm1, %v2460_v49 }
 0x364   : > { %v2327_v10 = vpop.f32.mrb[30].mxu1 }
 0x365   : > { %v6182_v21 = vadd.f32 %v7354_v54, %v2327_v10  ;;  %v2329_v53 = vpop.f32.mrb[31].mxu1  ;;  %v2423_v25 = vmax.f32 %v6181_v4, 0.0 }
 0x367   : > { %v2424_v8 = vmax.f32 %v6182_v21, 0.0 }
 0x369   : > { %v2461_v0 = vpack.c.bf16 %v2424_v8, %v2423_v25 }
 0x36a   : > { %v2332_v12 = vpop.f32.mrb[32].mxu1 }
 0x36b   : > { %2494 = vst.msk [vmem:[#allocation2 + $0xd0] sm:$0xff] %vm2467_vm1, %v2461_v0  ;;  %v6183_v11 = vadd.f32 %v7354_v54, %v2332_v12  ;;  %v2334_v14 = vpop.f32.mrb[33].mxu1  ;;  %5937 = vmatprep.mubr.msk.bf16.mxu0 %vm2467_vm1, %v2461_v0 }
 0x36c   : > { %v2335_v3 = vpop.f32.mrb[34].mxu1 }
 0x36d   : > { %v6184_v17 = vadd.f32 %v7354_v54, %v2335_v3  ;;  %v2337_v38 = vpop.f32.mrb[35].mxu1  ;;  %v2425_v7 = vmax.f32 %v6183_v11, 0.0 }
 0x36f   : > { %v2426_v42 = vmax.f32 %v6184_v17, 0.0 }
 0x371   : > { %v2462_v28 = vpack.c.bf16 %v2426_v42, %v2425_v7 }
 0x372   : > { %v2340_v18 = vpop.f32.mrb[36].mxu1 }
 0x373   : > { %2495 = vst.msk [vmem:[#allocation2 + $0xd8] sm:$0xff] %vm2467_vm1, %v2462_v28  ;;  %v6185_v23 = vadd.f32 %v7354_v54, %v2340_v18  ;;  %v2342_v32 = vpop.f32.mrb[37].mxu1  ;;  %5938 = vmatmul.mubr.msk.bf16.gmra.mrb[192].mxu0 %vm2467_vm1, %v2462_v28 }
 0x374   : > { %v2343_v44 = vpop.f32.mrb[38].mxu1 }
 0x375   : > { %v6186_v20 = vadd.f32 %v7354_v54, %v2343_v44  ;;  %v2345_v22 = vpop.f32.mrb[39].mxu1  ;;  %v2427_v26 = vmax.f32 %v6185_v23, 0.0 }
 0x376   : > { %v5887_v55 = vpop.f32.mrb[140].mxu0 }
 0x377   : > { %v2428_v29 = vmax.f32 %v6186_v20, 0.0  ;;  %v2662_v30 = vpop.f32.mrb[141].mxu0 }
 0x378   : > { %v5888_v59 = vpop.f32.mrb[142].mxu0 }
 0x379   : > { %v2463_v31 = vpack.c.bf16 %v2428_v29, %v2427_v26  ;;  %v2918_v51 = vpack.c.bf16 %v5888_v59, %v5887_v55  ;;  %v2665_v34 = vpop.f32.mrb[143].mxu0 }
 0x37a   : > { %v2917_v2 = vpack.c.bf16 %v2665_v34, %v2662_v30  ;;  %v2348_v33 = vpop.f32.mrb[40].mxu1 }
 0x37b   : > { %2496 = vst.msk [vmem:[#allocation2 + $0xe0] sm:$0xff] %vm2467_vm1, %v2463_v31  ;;  %v6187_v39 = vadd.f32 %v7354_v54, %v2348_v33  ;;  %v2350_v9 = vpop.f32.mrb[41].mxu1  ;;  %5941 = vmatprep.mubr.msk.bf16.mxu0 %vm2467_vm1, %v2463_v31 }
 0x37c   : > { %2951 = vst.msk [vmem:[#allocation3 + $0x8] sm:$0xff] %vm2949_vm2, %v2918_v51  ;;  %2950 = vst.msk [vmem:[#allocation3] sm:$0xff] %vm2949_vm2, %v2917_v2  ;;  %v2351_v35 = vpop.f32.mrb[42].mxu1 }
 0x37d   : > { %v6188_v13 = vadd.f32 %v7354_v54, %v2351_v35  ;;  %v2353_v36 = vpop.f32.mrb[43].mxu1  ;;  %v2429_v40 = vmax.f32 %v6187_v39, 0.0 }
 0x37f   : > { %v2430_v27 = vmax.f32 %v6188_v13, 0.0 }
 0x381   : > { %v2464_v16 = vpack.c.bf16 %v2430_v27, %v2429_v40 }
 0x382   : > { %v2356_v43 = vpop.f32.mrb[44].mxu1 }
 0x383   : > { %2497 = vst.msk [vmem:[#allocation2 + $0xe8] sm:$0xff] %vm2467_vm1, %v2464_v16  ;;  %v6189_v24 = vadd.f32 %v7354_v54, %v2356_v43  ;;  %v2358_v45 = vpop.f32.mrb[45].mxu1  ;;  %5942 = vmatmul.mubr.msk.bf16.gmra.mrb[196].mxu0 %vm2467_vm1, %v2464_v16 }
 0x384   : > { %v2359_v41 = vpop.f32.mrb[46].mxu1 }
 0x385   : > { %v6190_v46 = vadd.f32 %v7354_v54, %v2359_v41  ;;  %v2361_v47 = vpop.f32.mrb[47].mxu1  ;;  %v2431_v52 = vmax.f32 %v6189_v24, 0.0 }
 0x386   : > { %v5891_v61 = vpop.f32.mrb[144].mxu0 }
 0x387   : > { %v2432_v15 = vmax.f32 %v6190_v46, 0.0  ;;  %v2678_v56 = vpop.f32.mrb[145].mxu0 }
 0x388   : > { %v5892_v37 = vpop.f32.mrb[146].mxu0 }
 0x389   : > { %v2465_v19 = vpack.c.bf16 %v2432_v15, %v2431_v52  ;;  %v2920_v48 = vpack.c.bf16 %v5892_v37, %v5891_v61  ;;  %v2681_v58 = vpop.f32.mrb[147].mxu0 }
 0x38a   : > { %v2919_v60 = vpack.c.bf16 %v2681_v58, %v2678_v56  ;;  %v2364_v1 = vpop.f32.mrb[48].mxu1 }
 0x38b   : > { %2498 = vst.msk [vmem:[#allocation2 + $0xf0] sm:$0xff] %vm2467_vm1, %v2465_v19  ;;  %v6191_v50 = vadd.f32 %v7354_v54, %v2364_v1  ;;  %v2366_v62 = vpop.f32.mrb[49].mxu1  ;;  %5945 = vmatprep.mubr.msk.bf16.mxu0 %vm2467_vm1, %v2465_v19 }
 0x38c   : > { %2953 = vst.msk [vmem:[#allocation3 + $0x18] sm:$0xff] %vm2949_vm2, %v2920_v48  ;;  %2952 = vst.msk [vmem:[#allocation3 + $0x10] sm:$0xff] %vm2949_vm2, %v2919_v60  ;;  %v2367_v57 = vpop.f32.mrb[50].mxu1 }
 0x38d   : > { %v6192_v63 = vadd.f32 %v7354_v54, %v2367_v57  ;;  %v2369_v49 = vpop.f32.mrb[51].mxu1  ;;  %v2433_v5 = vmax.f32 %v6191_v50, 0.0 }
 0x38f   : > { %v2434_v4 = vmax.f32 %v6192_v63, 0.0 }
 0x391   : > { %v2466_v6 = vpack.c.bf16 %v2434_v4, %v2433_v5 }
 0x393   : > { %2499 = vst.msk [vmem:[#allocation2 + $0xf8] sm:$0xff] %vm2467_vm1, %v2466_v6  ;;  %5946 = vmatmul.mubr.msk.bf16.gmra.mrb[200].mxu0 %vm2467_vm1, %v2466_v6 }
 0x396   : > { %v5895_v10 = vpop.f32.mrb[148].mxu0 }
 0x397   : > { %v2694_v21 = vpop.f32.mrb[149].mxu0 }
 0x398   : > { %v5896_v53 = vpop.f32.mrb[150].mxu0 }
 0x399   : > { %v2922_v25 = vpack.c.bf16 %v5896_v53, %v5895_v10  ;;  %v2697_v8 = vpop.f32.mrb[151].mxu0 }
 0x39a   : > { %v2921_v0 = vpack.c.bf16 %v2697_v8, %v2694_v21 }
 0x39b   : > { %2955 = vst.msk [vmem:[#allocation3 + $0x28] sm:$0xff] %vm2949_vm2, %v2922_v25 }
 0x39c   : > { %2954 = vst.msk [vmem:[#allocation3 + $0x20] sm:$0xff] %vm2949_vm2, %v2921_v0 }
 0x3a6   : > { %v5899_v12 = vpop.f32.mrb[152].mxu0 }
 0x3a7   : > { %v2710_v54 = vpop.f32.mrb[153].mxu0 }
 0x3a8   : > { %v5900_v11 = vpop.f32.mrb[154].mxu0 }
 0x3a9   : > { %v2924_v14 = vpack.c.bf16 %v5900_v11, %v5899_v12  ;;  %v2713_v3 = vpop.f32.mrb[155].mxu0 }
 0x3aa   : > { %v2923_v17 = vpack.c.bf16 %v2713_v3, %v2710_v54 }
 0x3ab   : > { %2957 = vst.msk [vmem:[#allocation3 + $0x38] sm:$0xff] %vm2949_vm2, %v2924_v14 }
 0x3ac   : > { %2956 = vst.msk [vmem:[#allocation3 + $0x30] sm:$0xff] %vm2949_vm2, %v2923_v17 }
 0x3b6   : > { %v5903_v38 = vpop.f32.mrb[156].mxu0 }
 0x3b7   : > { %v2726_v7 = vpop.f32.mrb[157].mxu0 }
 0x3b8   : > { %v5904_v42 = vpop.f32.mrb[158].mxu0 }
 0x3b9   : > { %v2926_v28 = vpack.c.bf16 %v5904_v42, %v5903_v38  ;;  %v2729_v18 = vpop.f32.mrb[159].mxu0 }
 0x3ba   : > { %v2925_v23 = vpack.c.bf16 %v2729_v18, %v2726_v7 }
 0x3bb   : > { %2959 = vst.msk [vmem:[#allocation3 + $0x48] sm:$0xff] %vm2949_vm2, %v2926_v28 }
 0x3bc   : > { %2958 = vst.msk [vmem:[#allocation3 + $0x40] sm:$0xff] %vm2949_vm2, %v2925_v23 }
 0x3c6   : > { %v5907_v32 = vpop.f32.mrb[160].mxu0 }
 0x3c7   : > { %v2742_v44 = vpop.f32.mrb[161].mxu0 }
 0x3c8   : > { %v5908_v20 = vpop.f32.mrb[162].mxu0 }
 0x3c9   : > { %v2928_v22 = vpack.c.bf16 %v5908_v20, %v5907_v32  ;;  %v2745_v55 = vpop.f32.mrb[163].mxu0 }
 0x3ca   : > { %v2927_v26 = vpack.c.bf16 %v2745_v55, %v2742_v44 }
 0x3cb   : > { %2961 = vst.msk [vmem:[#allocation3 + $0x58] sm:$0xff] %vm2949_vm2, %v2928_v22 }
 0x3cc   : > { %2960 = vst.msk [vmem:[#allocation3 + $0x50] sm:$0xff] %vm2949_vm2, %v2927_v26 }
 0x3d6   : > { %v5911_v29 = vpop.f32.mrb[164].mxu0 }
 0x3d7   : > { %v2758_v30 = vpop.f32.mrb[165].mxu0 }
 0x3d8   : > { %v5912_v59 = vpop.f32.mrb[166].mxu0 }
 0x3d9   : > { %v2930_v31 = vpack.c.bf16 %v5912_v59, %v5911_v29  ;;  %v2761_v51 = vpop.f32.mrb[167].mxu0 }
 0x3da   : > { %v2929_v34 = vpack.c.bf16 %v2761_v51, %v2758_v30 }
 0x3db   : > { %2963 = vst.msk [vmem:[#allocation3 + $0x68] sm:$0xff] %vm2949_vm2, %v2930_v31 }
 0x3dc   : > { %2962 = vst.msk [vmem:[#allocation3 + $0x60] sm:$0xff] %vm2949_vm2, %v2929_v34 }
 0x3e6   : > { %v5915_v2 = vpop.f32.mrb[168].mxu0 }
 0x3e7   : > { %v2774_v33 = vpop.f32.mrb[169].mxu0 }
 0x3e8   : > { %v5916_v39 = vpop.f32.mrb[170].mxu0 }
 0x3e9   : > { %v2932_v9 = vpack.c.bf16 %v5916_v39, %v5915_v2  ;;  %v2777_v35 = vpop.f32.mrb[171].mxu0 }
 0x3ea   : > { %v2931_v13 = vpack.c.bf16 %v2777_v35, %v2774_v33 }
 0x3eb   : > { %2965 = vst.msk [vmem:[#allocation3 + $0x78] sm:$0xff] %vm2949_vm2, %v2932_v9 }
 0x3ec   : > { %2964 = vst.msk [vmem:[#allocation3 + $0x70] sm:$0xff] %vm2949_vm2, %v2931_v13 }
 0x3f6   : > { %v5919_v36 = vpop.f32.mrb[172].mxu0 }
 0x3f7   : > { %v2790_v40 = vpop.f32.mrb[173].mxu0 }
 0x3f8   : > { %v5920_v27 = vpop.f32.mrb[174].mxu0 }
 0x3f9   : > { %v2934_v16 = vpack.c.bf16 %v5920_v27, %v5919_v36  ;;  %v2793_v43 = vpop.f32.mrb[175].mxu0 }
 0x3fa   : > { %v2933_v24 = vpack.c.bf16 %v2793_v43, %v2790_v40 }
 0x3fb   : > { %2967 = vst.msk [vmem:[#allocation3 + $0x88] sm:$0xff] %vm2949_vm2, %v2934_v16 }
 0x3fc   : > { %2966 = vst.msk [vmem:[#allocation3 + $0x80] sm:$0xff] %vm2949_vm2, %v2933_v24 }
 0x406   : > { %v5923_v45 = vpop.f32.mrb[176].mxu0 }
 0x407   : > { %v2806_v41 = vpop.f32.mrb[177].mxu0 }
 0x408   : > { %v5924_v46 = vpop.f32.mrb[178].mxu0 }
 0x409   : > { %v2936_v47 = vpack.c.bf16 %v5924_v46, %v5923_v45  ;;  %v2809_v61 = vpop.f32.mrb[179].mxu0 }
 0x40a   : > { %v2935_v52 = vpack.c.bf16 %v2809_v61, %v2806_v41 }
 0x40b   : > { %2969 = vst.msk [vmem:[#allocation3 + $0x98] sm:$0xff] %vm2949_vm2, %v2936_v47 }
 0x40c   : > { %2968 = vst.msk [vmem:[#allocation3 + $0x90] sm:$0xff] %vm2949_vm2, %v2935_v52 }
 0x416   : > { %v5927_v15 = vpop.f32.mrb[180].mxu0 }
 0x417   : > { %v2822_v56 = vpop.f32.mrb[181].mxu0 }
 0x418   : > { %v5928_v37 = vpop.f32.mrb[182].mxu0 }
 0x419   : > { %v2938_v19 = vpack.c.bf16 %v5928_v37, %v5927_v15  ;;  %v2825_v48 = vpop.f32.mrb[183].mxu0 }
 0x41a   : > { %v2937_v58 = vpack.c.bf16 %v2825_v48, %v2822_v56 }
 0x41b   : > { %2971 = vst.msk [vmem:[#allocation3 + $0xa8] sm:$0xff] %vm2949_vm2, %v2938_v19 }
 0x41c   : > { %2970 = vst.msk [vmem:[#allocation3 + $0xa0] sm:$0xff] %vm2949_vm2, %v2937_v58 }
 0x426   : > { %v5931_v60 = vpop.f32.mrb[184].mxu0 }
 0x427   : > { %v2838_v1 = vpop.f32.mrb[185].mxu0 }
 0x428   : > { %v5932_v50 = vpop.f32.mrb[186].mxu0 }
 0x429   : > { %v2940_v62 = vpack.c.bf16 %v5932_v50, %v5931_v60  ;;  %v2841_v57 = vpop.f32.mrb[187].mxu0 }
 0x42a   : > { %v2939_v63 = vpack.c.bf16 %v2841_v57, %v2838_v1 }
 0x42b   : > { %2973 = vst.msk [vmem:[#allocation3 + $0xb8] sm:$0xff] %vm2949_vm2, %v2940_v62 }
 0x42c   : > { %2972 = vst.msk [vmem:[#allocation3 + $0xb0] sm:$0xff] %vm2949_vm2, %v2939_v63 }
 0x436   : > { %v5935_v49 = vpop.f32.mrb[188].mxu0 }
 0x437   : > { %v2854_v5 = vpop.f32.mrb[189].mxu0 }
 0x438   : > { %v5936_v4 = vpop.f32.mrb[190].mxu0 }
 0x439   : > { %v2942_v6 = vpack.c.bf16 %v5936_v4, %v5935_v49  ;;  %v2857_v10 = vpop.f32.mrb[191].mxu0 }
 0x43a   : > { %v2941_v21 = vpack.c.bf16 %v2857_v10, %v2854_v5 }
 0x43b   : > { %2975 = vst.msk [vmem:[#allocation3 + $0xc8] sm:$0xff] %vm2949_vm2, %v2942_v6 }
 0x43c   : > { %2974 = vst.msk [vmem:[#allocation3 + $0xc0] sm:$0xff] %vm2949_vm2, %v2941_v21 }
 0x446   : > { %v5939_v53 = vpop.f32.mrb[192].mxu0 }
 0x447   : > { %v2870_v25 = vpop.f32.mrb[193].mxu0 }
 0x448   : > { %v5940_v8 = vpop.f32.mrb[194].mxu0 }
 0x449   : > { %v2944_v0 = vpack.c.bf16 %v5940_v8, %v5939_v53  ;;  %v2873_v12 = vpop.f32.mrb[195].mxu0 }
 0x44a   : > { %v2943_v54 = vpack.c.bf16 %v2873_v12, %v2870_v25 }
 0x44b   : > { %2977 = vst.msk [vmem:[#allocation3 + $0xd8] sm:$0xff] %vm2949_vm2, %v2944_v0 }
 0x44c   : > { %2976 = vst.msk [vmem:[#allocation3 + $0xd0] sm:$0xff] %vm2949_vm2, %v2943_v54 }
 0x456   : > { %v5943_v11 = vpop.f32.mrb[196].mxu0 }
 0x457   : > { %v2886_v14 = vpop.f32.mrb[197].mxu0 }
 0x458   : > { %v5944_v3 = vpop.f32.mrb[198].mxu0 }
 0x459   : > { %v2946_v17 = vpack.c.bf16 %v5944_v3, %v5943_v11  ;;  %v2889_v38 = vpop.f32.mrb[199].mxu0 }
 0x45a   : > { %v2945_v7 = vpack.c.bf16 %v2889_v38, %v2886_v14 }
 0x45b   : > { %2979 = vst.msk [vmem:[#allocation3 + $0xe8] sm:$0xff] %vm2949_vm2, %v2946_v17 }
 0x45c   : > { %2978 = vst.msk [vmem:[#allocation3 + $0xe0] sm:$0xff] %vm2949_vm2, %v2945_v7 }
 0x466   : > { %v5947_v42 = vpop.f32.mrb[200].mxu0 }
 0x467   : > { %v2902_v28 = vpop.f32.mrb[201].mxu0 }
 0x468   : > { %v5948_v18 = vpop.f32.mrb[202].mxu0 }
 0x469   : > { %v2948_v23 = vpack.c.bf16 %v5948_v18, %v5947_v42  ;;  %v2905_v32 = vpop.f32.mrb[203].mxu0 }
 0x46a   : > { %v2947_v44 = vpack.c.bf16 %v2905_v32, %v2902_v28 }
 0x46b   : > { %2981 = vst.msk [vmem:[#allocation3 + $0xf8] sm:$0xff] %vm2949_vm2, %v2948_v23 }
 0x46c   : > { %2980 = vst.msk [vmem:[#allocation3 + $0xf0] sm:$0xff] %vm2949_vm2, %v2947_v44 }
 0x46d PF: > { %v3059_v20 = vld [vmem:[#allocation3 + $0x40] sm:$0xff]  ;;  %v3060_v55 = vld [vmem:[#allocation3 + $0x48] sm:$0xff]  ;;  %s7582_s18 = sshra.s32 %s5079_s20, 3  ;;  %v3061_v29 = vld [vmem:[#allocation3 + $0x50] sm:$0xff]  ;;  %s3766_s29 = sshra.s32 %s5079_s20, 4  ;;  %vm3822_vm3 = vcmask 523264  }
 0x46e   : > { %v3051_v22 = vld [vmem:[#allocation3] sm:$0xff]  ;;  %6245 = vmatprep.subr.bf16.mxu1 %v3059_v20  ;;  %s5458_s28 = sshll.u32 %s7582_s18, 4  ;;  %5530 = vmatprep.subr.bf16.mxu0 %v3059_v20  ;;  %v3052_v26 = vld [vmem:[#allocation3 + $0x8] sm:$0xff]  ;;  %v3053_v59 = vld [vmem:[#allocation3 + $0x10] sm:$0xff]  ;;  %s5380_s30 = sshll.u32 %s3766_s29, 3  ;;  %vm4124_vm4 = vcmask 261120  }
 0x46f   : > { %6253 = vmatpush3.bf16.msra.mxu1 %v3051_v22  ;;  %5531 = vmatpush3.bf16.msra.mxu0 %v3051_v22  ;;  %s7585_s25 = scalar_lea.vmem [#allocation4], %s5458_s28  ;;  %v3062_v31 = vld [vmem:[#allocation3 + $0x58] sm:$0xff]  ;;  %v3063_v34 = vld [vmem:[#allocation3 + $0x60] sm:$0xff]  ;;  %v3064_v33 = vld [vmem:[#allocation3 + $0x68] sm:$0xff]  ;;  %s7628_s12 = scalar_lea.vmem [#allocation2], %s5380_s30  ;;  %vm4358_vm5 = vcmask 130048  }
 0x470   : > { %6246 = vmatprep.subr.bf16.mxu1 %v3060_v55  ;;  %5532 = vmatprep.subr.bf16.mxu0 %v3060_v55  ;;  %v6612_v30 = vld [vmem:[%s7585_s25 + $0x84] ss:$16 sps:$4 sm:$0xff]   ;;  %v3054_v51 = vld [vmem:[#allocation3 + $0x18] sm:$0xff]  ;;  %v3056_v39 = vld [vmem:[#allocation3 + $0x28] sm:$0xff]  ;;  %s5379_s29 = sshll.u32 %s7582_s18, 2  ;;  %s5459_s30 = sshll.u32 %s7036_s17, 12 }
 0x471   : > { %3474 = vmatprep.mubr.bf16.mxu1 %v6612_v30  ;;  %v3055_v2 = vld [vmem:[#allocation3 + $0x20] sm:$0xff]  ;;  %v3065_v9 = vld [vmem:[#allocation3 + $0x70] sm:$0xff]  ;;  %v3066_v13 = vld [vmem:[#allocation3 + $0x78] sm:$0xff]  ;;  %s7688_s28 = scalar_lea.vmem %s8272_s0, %s5379_s29  ;;  %s5005_s20 = sshll.u32 %s7103_s21, 4  ;;  %s8224_s20 = int_to_ptr.vmem [resolvable:$true] %s5005_s20 }
 0x472   : > { %v3057_v35 = vld [vmem:[#allocation3 + $0x30] sm:$0xff]  ;;  %v3058_v36 = vld [vmem:[#allocation3 + $0x38] sm:$0xff]  ;;  %v3075_v16 = vld [vmem:[#allocation3 + $0xc0] sm:$0xff]  ;;  %s8231_s17 = scalar_lea.sflag [#allocation6], %s350_s11  ;;  %p8294_p9 = scmp.ne.s32.totalorder %s8286_s23, 0 }
 0x473   : > { %6254 = vmatpush3.bf16.msra.mxu1 %v3052_v26  ;;  %5533 = vmatpush3.bf16.msra.mxu0 %v3052_v26  ;;  %v6610_v40 = vld [vmem:[%s7585_s25 + $0x80] ss:$16 sps:$4 sm:$0xff]   ;;  %v6648_v27 = vld [vmem:[%s7585_s25 + $0x4] ss:$16 sps:$4 sm:$0xff]   ;;  %v3076_v46 = vld [vmem:[#allocation3 + $0xc8] sm:$0xff]  ;;  %s6957_s27 = smov [#allocation7]  }
 0x474   : > { %6247 = vmatprep.subr.bf16.mxu1 %v3061_v29  ;;  %5534 = vmatprep.subr.bf16.mxu0 %v3061_v29  ;;  %v6646_v43 = vld [vmem:[%s7585_s25] ss:$16 sps:$4 sm:$0xff]   ;;  %v6613_v24 = vld [vmem:[%s7585_s25 + $0xa4] ss:$16 sps:$4 sm:$0xff]   ;;  %v3068_v61 = vld [vmem:[#allocation3 + $0x88] sm:$0xff]  ;;  %s6889_s26 = sshll.u32 %s6957_s27, 4  ;;  %s6890_s26 = int_to_ptr.vmem [resolvable:$false] %s6889_s26 }
 0x475   : > { %3442 = vmatprep.mubr.bf16.mxu0 %v6648_v27  ;;  %v3067_v45 = vld [vmem:[#allocation3 + $0x80] sm:$0xff]  ;;  %v3077_v52 = vld [vmem:[#allocation3 + $0xd0] sm:$0xff]  ;;  %v3078_v19 = vld [vmem:[#allocation3 + $0xd8] sm:$0xff]  ;;  %s6891_s29 = scalar_lea.vmem %s6890_s26, 8192  ;;  %p6892_p13 = scmp.lt.s32.totalorder %s8224_s20, %s6890_s26 }
 0x476   : > { %v6652_v41 = vld [vmem:[%s7585_s25 + $0x24] ss:$16 sps:$4 sm:$0xff]   ;;  %v6615_v47 = vld [vmem:[%s7585_s25 + $0xa0] ss:$16 sps:$4 sm:$0xff]   ;;  %v3070_v58 = vld [vmem:[#allocation3 + $0x98] sm:$0xff] }
 0x477   : > { %6255 = vmatpush3.bf16.msra.mxu1 %v3053_v59  ;;  %5535 = vmatpush3.bf16.msra.mxu0 %v3053_v59  ;;  %v6654_v15 = vld [vmem:[%s7585_s25 + $0x20] ss:$16 sps:$4 sm:$0xff]   ;;  %v6616_v56 = vld [vmem:[%s7585_s25 + $0xc4] ss:$16 sps:$4 sm:$0xff]   ;;  %v3080_v49 = vld [vmem:[#allocation3 + $0xe8] sm:$0xff] }
 0x478   : > { %6248 = vmatprep.subr.bf16.mxu1 %v3062_v31  ;;  %5536 = vmatprep.subr.bf16.mxu0 %v3062_v31  ;;  %v3069_v37 = vld [vmem:[#allocation3 + $0x90] sm:$0xff]  ;;  %v3079_v60 = vld [vmem:[#allocation3 + $0xe0] sm:$0xff]  ;;  %v3072_v5 = vld [vmem:[#allocation3 + $0xa8] sm:$0xff] }
 0x479   : > { %v6658_v48 = vld [vmem:[%s7585_s25 + $0x44] ss:$16 sps:$4 sm:$0xff]   ;;  %v6618_v1 = vld [vmem:[%s7585_s25 + $0xc0] ss:$16 sps:$4 sm:$0xff]   ;;  %v3082_v25 = vld [vmem:[#allocation3 + $0xf8] sm:$0xff] }
 0x47a   : > { %v6660_v50 = vld [vmem:[%s7585_s25 + $0x40] ss:$16 sps:$4 sm:$0xff]   ;;  %v6619_v62 = vld [vmem:[%s7585_s25 + $0xe4] ss:$16 sps:$4 sm:$0xff]   ;;  %v3074_v8 = vld [vmem:[#allocation3 + $0xb8] sm:$0xff] }
 0x47b   : > { %6256 = vmatpush3.bf16.msra.mxu1 %v3054_v51  ;;  %5537 = vmatpush3.bf16.msra.mxu0 %v3054_v51  ;;  %v3071_v57 = vld [vmem:[#allocation3 + $0xa0] sm:$0xff]  ;;  %v3081_v4 = vld [vmem:[#allocation3 + $0xf0] sm:$0xff]  ;;  %v6695_v42 = vld [vmem:[%s8279_s7 + $0x8] sm:$0xff]  }
 0x47c   : > { %6249 = vmatprep.subr.bf16.mxu1 %v3063_v34  ;;  %5538 = vmatprep.subr.bf16.mxu0 %v3063_v34  ;;  %v6664_v63 = vld [vmem:[%s7585_s25 + $0x64] ss:$16 sps:$4 sm:$0xff]   ;;  %v6621_v6 = vld [vmem:[%s7585_s25 + $0xe0] ss:$16 sps:$4 sm:$0xff]   ;;  %v6700_v32 = vld [vmem:[%s8279_s7 + $0x18] sm:$0xff]  }
 0x47d   : > { %v6666_v10 = vld [vmem:[%s7585_s25 + $0x60] ss:$16 sps:$4 sm:$0xff]   ;;  %v6622_v21 = vld [vmem:[%s7585_s25 + $0x104] ss:$16 sps:$4 sm:$0xff]   ;;  %v3771_v20 = vld [vmem:[%s7628_s12 + $0x8] sm:$0xff] }
 0x47e   : > { %v3073_v53 = vld [vmem:[#allocation3 + $0xb0] sm:$0xff]  ;;  %v6691_v17 = vld [vmem:[%s8279_s7] sm:$0xff]   ;;  %v3773_v29 = vld [vmem:[%s7628_s12 + $0x18] sm:$0xff] }
 0x47f   : > { %6257 = vmatpush3.bf16.msra.mxu1 %v3055_v2  ;;  %5539 = vmatpush3.bf16.msra.mxu0 %v3055_v2  ;;  %v6624_v0 = vld [vmem:[%s7585_s25 + $0x100] ss:$16 sps:$4 sm:$0xff]   ;;  %v6625_v12 = vld [vmem:[%s7585_s25 + $0x124] ss:$16 sps:$4 sm:$0xff]   ;;  %v3775_v51 = vld [vmem:[%s7628_s12 + $0x28] sm:$0xff] }
 0x480   : > { %6250 = vmatprep.subr.bf16.mxu1 %v3064_v33  ;;  %5540 = vmatprep.subr.bf16.mxu0 %v3064_v33  ;;  %v6627_v54 = vld [vmem:[%s7585_s25 + $0x120] ss:$16 sps:$4 sm:$0xff]   ;;  %v6628_v11 = vld [vmem:[%s7585_s25 + $0x144] ss:$16 sps:$4 sm:$0xff]   ;;  %v6651_v2 = vld [vmem:[%s7585_s25 + $0xc] ss:$16 sps:$4 sm:$0xff]  }
 0x481   : > { %v6630_v14 = vld [vmem:[%s7585_s25 + $0x140] ss:$16 sps:$4 sm:$0xff]   ;;  %v6631_v3 = vld [vmem:[%s7585_s25 + $0x164] ss:$16 sps:$4 sm:$0xff]   ;;  %v6661_v27 = vld [vmem:[%s7585_s25 + $0x4c] ss:$16 sps:$4 sm:$0xff]  }
 0x482   : > { %v6633_v38 = vld [vmem:[%s7585_s25 + $0x160] ss:$16 sps:$4 sm:$0xff]   ;;  %v6634_v7 = vld [vmem:[%s7585_s25 + $0x184] ss:$16 sps:$4 sm:$0xff]  }
 0x483   : > { %6258 = vmatpush3.bf16.msra.mxu1 %v3056_v39  ;;  %5541 = vmatpush3.bf16.msra.mxu0 %v3056_v39  ;;  %v6696_v28 = vld [vmem:[%s8279_s7 + $0x10] sm:$0xff]   ;;  %v3770_v44 = vld [vmem:[%s7628_s12] sm:$0xff]  ;;  %v3777_v39 = vld [vmem:[%s7628_s12 + $0x38] sm:$0xff] }
 0x484   : > { %6251 = vmatprep.subr.bf16.mxu1 %v3065_v9  ;;  %5542 = vmatprep.subr.bf16.mxu0 %v3065_v9  ;;  %v6636_v18 = vld [vmem:[%s7585_s25 + $0x180] ss:$16 sps:$4 sm:$0xff]   ;;  %v6637_v23 = vld [vmem:[%s7585_s25 + $0x1a4] ss:$16 sps:$4 sm:$0xff]   ;;  %v6649_v9 = vld [vmem:[%s7585_s25 + $0x8] ss:$16 sps:$4 sm:$0xff]  }
 0x485   : > { %v6639_v22 = vld [vmem:[%s7585_s25 + $0x1a0] ss:$16 sps:$4 sm:$0xff]   ;;  %v6640_v55 = vld [vmem:[%s7585_s25 + $0x1c4] ss:$16 sps:$4 sm:$0xff]  }
 0x486   : > { %v3772_v26 = vld [vmem:[%s7628_s12 + $0x10] sm:$0xff]  ;;  %v3774_v31 = vld [vmem:[%s7628_s12 + $0x20] sm:$0xff] }
 0x487   : > { %6259 = vmatpush3.bf16.msra.mxu1 %v3057_v35  ;;  %5543 = vmatpush3.bf16.msra.mxu0 %v3057_v35  ;;  %v6642_v30 = vld [vmem:[%s7585_s25 + $0x1c0] ss:$16 sps:$4 sm:$0xff]   ;;  %v6643_v59 = vld [vmem:[%s7585_s25 + $0x1e4] ss:$16 sps:$4 sm:$0xff]   ;;  %v6655_v35 = vld [vmem:[%s7585_s25 + $0x2c] ss:$16 sps:$4 sm:$0xff]  }
 0x488   : > { %6252 = vmatprep.subr.bf16.mxu1 %v3066_v13  ;;  %5544 = vmatprep.subr.bf16.mxu0 %v3066_v13  ;;  %v6645_v34 = vld [vmem:[%s7585_s25 + $0x1e0] ss:$16 sps:$4 sm:$0xff]  }
 0x489   : > { %v3776_v33 = vld [vmem:[%s7628_s12 + $0x30] sm:$0xff]  ;;  %v3778_v13 = vld [vmem:[%s7628_s12 + $0x40] sm:$0xff] }
 0x48b   : > { %6260 = vmatpush3.bf16.msra.mxu1 %v3058_v36  ;;  %5545 = vmatpush3.bf16.msra.mxu0 %v3058_v36  ;;  %v3779_v36 = vld [vmem:[%s7628_s12 + $0x48] sm:$0xff] }
 0x48c   : > { %5642 = vmatprep.subr.bf16.mxu1 %v3075_v16  ;;  %5949 = vmatprep.subr.bf16.mxu0 %v6691_v17  ;;  %v3780_v16 = vld [vmem:[%s7628_s12 + $0x50] sm:$0xff] }
 0x48e   : > { %3475 = vmatmul.mubr.bf16.vlgmr.msra.gmra.mrb[0].mxu1 %v6610_v40  ;;  %3443 = vmatmul.mubr.bf16.vlgmr.msra.gmra.mrb[0].mxu0 %v6646_v43  ;;  %v6657_v40 = vld [vmem:[%s7585_s25 + $0x28] ss:$16 sps:$4 sm:$0xff]  }
 0x48f   : > { %5643 = vmatpush3.bf16.msra.mxu1 %v3067_v45  ;;  %3482 = vmatprep.mubr.bf16.mxu1 %v6613_v24  ;;  %v3781_v43 = vld [vmem:[%s7628_s12 + $0x58] sm:$0xff] }
 0x490   : > { %5644 = vmatprep.subr.bf16.mxu1 %v3076_v46  ;;  %3450 = vmatprep.mubr.bf16.mxu0 %v6652_v41  ;;  %v6663_v24 = vld [vmem:[%s7585_s25 + $0x48] ss:$16 sps:$4 sm:$0xff]   ;;  %v6667_v45 = vld [vmem:[%s7585_s25 + $0x6c] ss:$16 sps:$4 sm:$0xff]   ;;  %v3782_v41 = vld [vmem:[%s7628_s12 + $0x60] sm:$0xff] }
 0x491   : > { %5950 = vmatpush3.bf16.msra.mxu0 %v6691_v17  ;;  %v3783_v46 = vld [vmem:[%s7628_s12 + $0x68] sm:$0xff] }
 0x492   : > { %5951 = vmatprep.subr.bf16.mxu0 %v6695_v42  ;;  %v6690_v17 = vld [vmem:[%s7585_s25 + $0x148] ss:$16 sps:$4 sm:$0xff]  }
 0x493   : > { %5645 = vmatpush3.bf16.msra.mxu1 %v3068_v61  ;;  %v6670_v61 = vld [vmem:[%s7585_s25 + $0x8c] ss:$16 sps:$4 sm:$0xff]  }
 0x494   : > { %5646 = vmatprep.subr.bf16.mxu1 %v3077_v52  ;;  %v3784_v52 = vld [vmem:[%s7628_s12 + $0x70] sm:$0xff] }
 0x495   : > { %5952 = vmatpush3.bf16.msra.mxu0 %v6695_v42  ;;  %v6725_v42 = vld [vmem:[%s7688_s28 + $0x68] sm:$0xff]  }
 0x496   : > { %3483 = vmatmul.mubr.bf16.gmra.mrb[4].mxu1 %v6615_v47  ;;  %3451 = vmatmul.mubr.bf16.gmra.mrb[4].mxu0 %v6654_v15  ;;  %v6669_v47 = vld [vmem:[%s7585_s25 + $0x68] ss:$16 sps:$4 sm:$0xff]   ;;  %v6710_v15 = vld [vmem:[%s8278_s6] sm:$0xff]  }
 0x497   : > { %3490 = vmatprep.mubr.bf16.mxu1 %v6616_v56  ;;  %5647 = vmatpush3.bf16.msra.mxu1 %v3069_v37  ;;  %v3785_v56 = vld [vmem:[%s7628_s12 + $0x78] sm:$0xff]  ;;  %s8222_s12 = scalar_lea.hbm %s8282_s10, %s5459_s30 }
 0x498   : > { %5648 = vmatprep.subr.bf16.mxu1 %v3078_v19  ;;  %3458 = vmatprep.mubr.bf16.mxu0 %v6658_v48  ;;  %v6672_v37 = vld [vmem:[%s7585_s25 + $0x88] ss:$16 sps:$4 sm:$0xff]   ;;  %v6673_v19 = vld [vmem:[%s7585_s25 + $0xac] ss:$16 sps:$4 sm:$0xff]  }
 0x499   : > { %5953 = vmatprep.subr.bf16.mxu0 %v6696_v28  ;;  %v6711_v48 = vld [vmem:[%s8278_s6 + $0x8] sm:$0xff]  }
 0x49a   : > { %5954 = vmatpush3.bf16.msra.mxu0 %v6696_v28  ;;  %v6694_v28 = vld [vmem:[%s7585_s25 + $0x168] ss:$16 sps:$4 sm:$0xff]  }
 0x49b   : > { %5649 = vmatpush3.bf16.msra.mxu1 %v3070_v58  ;;  %5955 = vmatprep.subr.bf16.mxu0 %v6700_v32  ;;  %v6712_v58 = vld [vmem:[%s7688_s28] sm:$0xff]  }
 0x49c   : > { %5650 = vmatprep.subr.bf16.mxu1 %v3079_v60  ;;  %v6675_v60 = vld [vmem:[%s7585_s25 + $0xa8] ss:$16 sps:$4 sm:$0xff]  }
 0x49e   : > { %3491 = vmatmul.mubr.bf16.gmra.mrb[8].mxu1 %v6618_v1  ;;  %3459 = vmatmul.mubr.bf16.gmra.mrb[8].mxu0 %v6660_v50  ;;  %v6713_v1 = vld [vmem:[%s7688_s28 + $0x8] sm:$0xff]  }
 0x49f   : > { %3498 = vmatprep.mubr.bf16.mxu1 %v6619_v62  ;;  %5651 = vmatpush3.bf16.msra.mxu1 %v3071_v57  ;;  %v6676_v50 = vld [vmem:[%s7585_s25 + $0xcc] ss:$16 sps:$4 sm:$0xff]   ;;  %v6714_v62 = vld [vmem:[%s7688_s28 + $0x10] sm:$0xff]   ;;  %v6678_v57 = vld [vmem:[%s7585_s25 + $0xc8] ss:$16 sps:$4 sm:$0xff]  }
 0x4a0   : > { %5652 = vmatprep.subr.bf16.mxu1 %v3080_v49  ;;  %3466 = vmatprep.mubr.bf16.mxu0 %v6664_v63  ;;  %v6715_v63 = vld [vmem:[%s7688_s28 + $0x18] sm:$0xff]  }
 0x4a1   : > { %5956 = vmatpush3.bf16.msra.mxu0 %v6700_v32  ;;  %v6679_v49 = vld [vmem:[%s7585_s25 + $0xec] ss:$16 sps:$4 sm:$0xff]  }
 0x4a2   : > { %5989 = vmatprep.subr.bf16.mxu0 %v6710_v15  ;;  %v6727_v32 = vld [vmem:[%s7688_s28 + $0x78] sm:$0xff]  }
 0x4a3   : > { %5653 = vmatpush3.bf16.msra.mxu1 %v3072_v5  ;;  %v6716_v5 = vld [vmem:[%s7688_s28 + $0x20] sm:$0xff]  }
 0x4a4   : > { %5654 = vmatprep.subr.bf16.mxu1 %v3081_v4  ;;  %v6717_v4 = vld [vmem:[%s7688_s28 + $0x28] sm:$0xff]  }
 0x4a6   : > { %3499 = vmatmul.mubr.bf16.gmra.mrb[12].mxu1 %v6621_v6  ;;  %3467 = vmatmul.mubr.bf16.gmra.mrb[12].mxu0 %v6666_v10  ;;  %v6681_v6 = vld [vmem:[%s7585_s25 + $0xe8] ss:$16 sps:$4 sm:$0xff]   ;;  %v6682_v10 = vld [vmem:[%s7585_s25 + $0x10c] ss:$16 sps:$4 sm:$0xff]  }
 0x4a7   : > { %3506 = vmatprep.mubr.bf16.mxu1 %v6622_v21  ;;  %5655 = vmatpush3.bf16.msra.mxu1 %v3073_v53  ;;  %v6718_v21 = vld [vmem:[%s7688_s28 + $0x30] sm:$0xff]   ;;  %v6719_v53 = vld [vmem:[%s7688_s28 + $0x38] sm:$0xff]  }
 0x4a8   : > { %5656 = vmatprep.subr.bf16.mxu1 %v3082_v25  ;;  %5957 = vmatprep.mubr.msk.bf16.mxu0 %vm3822_vm3, %v3770_v44  ;;  %v6684_v25 = vld [vmem:[%s7585_s25 + $0x108] ss:$16 sps:$4 sm:$0xff]  }
 0x4a9   : > { %v6699_v44 = vld [vmem:[%s7585_s25 + $0x188] ss:$16 sps:$4 sm:$0xff]  }
 0x4ab   : > { %5657 = vmatpush3.bf16.msra.mxu1 %v3074_v8  ;;  %v6685_v8 = vld [vmem:[%s7585_s25 + $0x12c] ss:$16 sps:$4 sm:$0xff]  }
 0x4ae   : > { %3507 = vmatmul.mubr.bf16.gmra.mrb[16].mxu1 %v6624_v0  ;;  %5958 = vmatmul.mubr.msk.bf16.vlgmr.msra.gmra.mrb[16].mxu0 %vm3822_vm3, %v3771_v20  ;;  %v6720_v0 = vld [vmem:[%s7688_s28 + $0x40] sm:$0xff]   ;;  %v6701_v20 = vld [vmem:[%s7585_s25 + $0x1ac] ss:$16 sps:$4 sm:$0xff]  }
 0x4af   : > { %3514 = vmatprep.mubr.bf16.mxu1 %v6625_v12  ;;  %5961 = vmatprep.mubr.msk.bf16.mxu0 %vm3822_vm3, %v3772_v26  ;;  %v6721_v12 = vld [vmem:[%s7688_s28 + $0x48] sm:$0xff]  }
 0x4b0   : > { %5990 = vmatpush3.bf16.msra.mxu0 %v6710_v15  ;;  %v6704_v26 = vld [vmem:[%s7585_s25 + $0x1cc] ss:$16 sps:$4 sm:$0xff]  }
 0x4b1   : > { %5991 = vmatprep.subr.bf16.mxu0 %v6711_v48 }
 0x4b4   : > { %5992 = vmatpush3.bf16.msra.mxu0 %v6711_v48 }
 0x4b6   : > { %3515 = vmatmul.mubr.bf16.gmra.mrb[20].mxu1 %v6627_v54  ;;  %5962 = vmatmul.mubr.msk.bf16.gmra.mrb[20].mxu0 %vm3822_vm3, %v3773_v29  ;;  %v6687_v54 = vld [vmem:[%s7585_s25 + $0x128] ss:$16 sps:$4 sm:$0xff]  }
 0x4b7   : > { %3522 = vmatprep.mubr.bf16.mxu1 %v6628_v11  ;;  %5965 = vmatprep.mubr.msk.bf16.mxu0 %vm3822_vm3, %v3774_v31  ;;  %v6688_v11 = vld [vmem:[%s7585_s25 + $0x14c] ss:$16 sps:$4 sm:$0xff]   ;;  %v6706_v29 = vld [vmem:[%s7585_s25 + $0x1c8] ss:$16 sps:$4 sm:$0xff]  }
 0x4be   : > { %3523 = vmatmul.mubr.bf16.gmra.mrb[24].mxu1 %v6630_v14  ;;  %5966 = vmatmul.mubr.msk.bf16.gmra.mrb[24].mxu0 %vm3822_vm3, %v3775_v51  ;;  %v6722_v14 = vld [vmem:[%s7688_s28 + $0x50] sm:$0xff]  }
 0x4bf   : > { %3530 = vmatprep.mubr.bf16.mxu1 %v6631_v3  ;;  %5969 = vmatprep.mubr.msk.bf16.mxu0 %vm3822_vm3, %v3776_v33  ;;  %v6723_v3 = vld [vmem:[%s7688_s28 + $0x58] sm:$0xff]  }
 0x4c6   : > { %3531 = vmatmul.mubr.bf16.gmra.mrb[28].mxu1 %v6633_v38  ;;  %5970 = vmatmul.mubr.msk.bf16.gmra.mrb[28].mxu0 %vm3822_vm3, %v3777_v39  ;;  %v6692_v38 = vld [vmem:[%s7585_s25 + $0x16c] ss:$16 sps:$4 sm:$0xff]  }
 0x4c7   : > { %3538 = vmatprep.mubr.bf16.mxu1 %v6634_v7  ;;  %5973 = vmatprep.mubr.msk.bf16.mxu0 %vm3822_vm3, %v3778_v13  ;;  %v6724_v7 = vld [vmem:[%s7688_s28 + $0x60] sm:$0xff]  }
 0x4ce   : > { %3539 = vmatmul.mubr.bf16.gmra.mrb[32].mxu1 %v6636_v18  ;;  %5974 = vmatmul.mubr.msk.bf16.gmra.mrb[32].mxu0 %vm3822_vm3, %v3779_v36  ;;  %v6697_v18 = vld [vmem:[%s7585_s25 + $0x18c] ss:$16 sps:$4 sm:$0xff]  }
 0x4cf   : > { %3546 = vmatprep.mubr.bf16.mxu1 %v6637_v23  ;;  %5977 = vmatprep.mubr.msk.bf16.mxu0 %vm3822_vm3, %v3780_v16  ;;  %v6726_v23 = vld [vmem:[%s7688_s28 + $0x70] sm:$0xff]  }
 0x4d6   : > { %3547 = vmatmul.mubr.bf16.gmra.mrb[36].mxu1 %v6639_v22  ;;  %5978 = vmatmul.mubr.msk.bf16.gmra.mrb[36].mxu0 %vm3822_vm3, %v3781_v43  ;;  %v6728_v22 = vld [vmem:[%s8280_s8] sm:$0xff]  }
 0x4d7   : > { %3554 = vmatprep.mubr.bf16.mxu1 %v6640_v55  ;;  %5981 = vmatprep.mubr.msk.bf16.mxu0 %vm3822_vm3, %v3782_v41  ;;  %v6703_v55 = vld [vmem:[%s7585_s25 + $0x1a8] ss:$16 sps:$4 sm:$0xff]  }
 0x4d8   : > { %6025 = vmatprep.subr.bf16.mxu0 %v6728_v22 }
 0x4de   : > { %3555 = vmatmul.mubr.bf16.gmra.mrb[40].mxu1 %v6642_v30  ;;  %5982 = vmatmul.mubr.msk.bf16.gmra.mrb[40].mxu0 %vm3822_vm3, %v3783_v46  ;;  %v6707_v30 = vld [vmem:[%s7585_s25 + $0x1ec] ss:$16 sps:$4 sm:$0xff]  }
 0x4df   : > { %3562 = vmatprep.mubr.bf16.mxu1 %v6643_v59  ;;  %5985 = vmatprep.mubr.msk.bf16.mxu0 %vm3822_vm3, %v3784_v52 }
 0x4e6   : > { %3563 = vmatmul.mubr.bf16.gmra.mrb[44].mxu1 %v6645_v34  ;;  %5986 = vmatmul.mubr.msk.bf16.gmra.mrb[44].mxu0 %vm3822_vm3, %v3785_v56  ;;  %v6709_v34 = vld [vmem:[%s7585_s25 + $0x1e8] ss:$16 sps:$4 sm:$0xff]   ;;  %s6885_s25 = scalar_lea.vmem %s8224_s20, 4096 }
 0x4e7   : > { %3603 = vmatprep.mubr.bf16.mxu1 %v6651_v2  ;;  %5993 = vmatprep.mubr.msk.bf16.mxu0 %vm4124_vm4, %v6712_v58  ;;  %p6886_p6 = scmp.ne.s32.totalorder %s8224_s20, %s6885_s25  ;;  %p6893_p3 = scmp.lt.s32.totalorder %s6891_s29, %s6885_s25 }
 0x4e9   : > { %p6887_p10 = pnand %p6886_p6, %p8294_p9  ;;  %p6894_p4 = por %p6893_p3, %p6892_p13 }
 0x4eb   : > { %p6888_p11 = pneg %p6887_p10 }
 0x4ed   : > { %p6895_p7 = pnand %p6894_p4, %p6888_p11 }
 0x4ee   : > { %3604 = vmatmul.mubr.bf16.vlgmr.msra.gmra.mrb[48].mxu1 %v6649_v9  ;;  %5994 = vmatmul.mubr.msk.bf16.vlgmr.msra.gmra.mrb[16].mxu0 %vm4124_vm4, %v6713_v1 }
 0x4ef   : > { %3611 = vmatprep.mubr.bf16.mxu1 %v6655_v35  ;;  %5997 = vmatprep.mubr.msk.bf16.mxu0 %vm4124_vm4, %v6714_v62 }
 0x4f0   : > { %6026 = vmatpush3.bf16.msra.mxu0 %v6728_v22 }
 0x4f6   : > { %3612 = vmatmul.mubr.bf16.gmra.mrb[52].mxu1 %v6657_v40  ;;  %5998 = vmatmul.mubr.msk.bf16.gmra.mrb[20].mxu0 %vm4124_vm4, %v6715_v63 }
 0x4f7   : > { %3619 = vmatprep.mubr.bf16.mxu1 %v6661_v27  ;;  %6001 = vmatprep.mubr.msk.bf16.mxu0 %vm4124_vm4, %v6716_v5 }
 0x4fe   : > { %3620 = vmatmul.mubr.bf16.gmra.mrb[56].mxu1 %v6663_v24  ;;  %6002 = vmatmul.mubr.msk.bf16.gmra.mrb[24].mxu0 %vm4124_vm4, %v6717_v4 }
 0x4ff   : > { %3627 = vmatprep.mubr.bf16.mxu1 %v6667_v45  ;;  %6005 = vmatprep.mubr.msk.bf16.mxu0 %vm4124_vm4, %v6718_v21 }
 0x506   : > { %3628 = vmatmul.mubr.bf16.gmra.mrb[60].mxu1 %v6669_v47  ;;  %6006 = vmatmul.mubr.msk.bf16.gmra.mrb[28].mxu0 %vm4124_vm4, %v6719_v53 }
 0x507   : > { %3635 = vmatprep.mubr.bf16.mxu1 %v6670_v61  ;;  %6009 = vmatprep.mubr.msk.bf16.mxu0 %vm4124_vm4, %v6720_v0 }
 0x50e   : > { %3636 = vmatmul.mubr.bf16.gmra.mrb[64].mxu1 %v6672_v37  ;;  %6010 = vmatmul.mubr.msk.bf16.gmra.mrb[32].mxu0 %vm4124_vm4, %v6721_v12 }
 0x50f   : > { %3643 = vmatprep.mubr.bf16.mxu1 %v6673_v19  ;;  %6013 = vmatprep.mubr.msk.bf16.mxu0 %vm4124_vm4, %v6722_v14 }
 0x516   : > { %3644 = vmatmul.mubr.bf16.gmra.mrb[68].mxu1 %v6675_v60  ;;  %6014 = vmatmul.mubr.msk.bf16.gmra.mrb[36].mxu0 %vm4124_vm4, %v6723_v3 }
 0x517   : > { %3651 = vmatprep.mubr.bf16.mxu1 %v6676_v50  ;;  %6017 = vmatprep.mubr.msk.bf16.mxu0 %vm4124_vm4, %v6724_v7 }
 0x51e   : > { %3652 = vmatmul.mubr.bf16.gmra.mrb[72].mxu1 %v6678_v57  ;;  %6018 = vmatmul.mubr.msk.bf16.gmra.mrb[40].mxu0 %vm4124_vm4, %v6725_v42 }
 0x51f   : > { %3659 = vmatprep.mubr.bf16.mxu1 %v6679_v49  ;;  %6021 = vmatprep.mubr.msk.bf16.mxu0 %vm4124_vm4, %v6726_v23 }
 0x526   : > { %3660 = vmatmul.mubr.bf16.gmra.mrb[76].mxu1 %v6681_v6  ;;  %6022 = vmatmul.mubr.msk.bf16.gmra.mrb[44].mxu0 %vm4124_vm4, %v6727_v32 }
 0x527   : > { %3667 = vmatprep.mubr.bf16.mxu1 %v6682_v10 }
 0x52e   : > { %3668 = vmatmul.mubr.bf16.gmra.mrb[80].mxu1 %v6684_v25 }
 0x52f   : > { %3675 = vmatprep.mubr.bf16.mxu1 %v6685_v8 }
 0x536   : > { %3676 = vmatmul.mubr.bf16.gmra.mrb[84].mxu1 %v6687_v54 }
 0x537   : > { %3683 = vmatprep.mubr.bf16.mxu1 %v6688_v11 }
 0x53e   : > { %3684 = vmatmul.mubr.bf16.gmra.mrb[88].mxu1 %v6690_v17 }
 0x53f   : > { %3691 = vmatprep.mubr.bf16.mxu1 %v6692_v38 }
 0x546   : > { %3692 = vmatmul.mubr.bf16.gmra.mrb[92].mxu1 %v6694_v28 }
 0x547   : > { %3699 = vmatprep.mubr.bf16.mxu1 %v6697_v18 }
 0x54e   : > { %3700 = vmatmul.mubr.bf16.gmra.mrb[96].mxu1 %v6699_v44 }
 0x54f   : > { %3707 = vmatprep.mubr.bf16.mxu1 %v6701_v20 }
 0x556   : > { %3708 = vmatmul.mubr.bf16.gmra.mrb[100].mxu1 %v6703_v55 }
 0x557   : > { %3715 = vmatprep.mubr.bf16.mxu1 %v6704_v26 }
 0x55e   : > { %3716 = vmatmul.mubr.bf16.gmra.mrb[104].mxu1 %v6706_v29 }
 0x55f   : > { %3723 = vmatprep.mubr.bf16.mxu1 %v6707_v30 }
 0x561   : > { %v5570_v59 = vpop.f32.mrb[0].mxu1  ;;  %v5546_v31 = vpop.f32.mrb[0].mxu0 }
 0x562   : > { %v5571_v51 = vpop.f32.mrb[1].mxu1  ;;  %v5547_v2 = vpop.f32.mrb[1].mxu0 }
 0x563   : > { %v7746_v33 = vadd.f32 %v5571_v51, %v5570_v59  ;;  %v5573_v39 = vpop.f32.mrb[2].mxu1  ;;  %v7748_v9 = vadd.f32 %v5547_v2, %v5546_v31  ;;  %v5549_v35 = vpop.f32.mrb[2].mxu0 }
 0x564   : > { %v5574_v13 = vpop.f32.mrb[3].mxu1  ;;  %v5550_v36 = vpop.f32.mrb[3].mxu0 }
 0x565   : > { %v7750_v40 = vadd.f32 %v5574_v13, %v5573_v39  ;;  %v7752_v27 = vadd.f32 %v5550_v36, %v5549_v35 }
 0x566   : > { %3724 = vmatmul.mubr.bf16.gmra.mrb[108].mxu1 %v6709_v34 }
 0x569   : > { %v5576_v16 = vpop.f32.mrb[4].mxu1  ;;  %v5552_v43 = vpop.f32.mrb[4].mxu0 }
 0x56a   : > { %v5577_v24 = vpop.f32.mrb[5].mxu1  ;;  %v5553_v45 = vpop.f32.mrb[5].mxu0 }
 0x56b   : > { %v7754_v41 = vadd.f32 %v5577_v24, %v5576_v16  ;;  %v5579_v46 = vpop.f32.mrb[6].mxu1  ;;  %v7756_v47 = vadd.f32 %v5553_v45, %v5552_v43  ;;  %v5555_v61 = vpop.f32.mrb[6].mxu0 }
 0x56c   : > { %v5580_v52 = vpop.f32.mrb[7].mxu1  ;;  %v5556_v15 = vpop.f32.mrb[7].mxu0 }
 0x56d   : > { %v7758_v56 = vadd.f32 %v5580_v52, %v5579_v46  ;;  %v7760_v37 = vadd.f32 %v5556_v15, %v5555_v61 }
 0x571   : > { %v5582_v19 = vpop.f32.mrb[8].mxu1  ;;  %v5558_v48 = vpop.f32.mrb[8].mxu0 }
 0x572   : > { %v5583_v58 = vpop.f32.mrb[9].mxu1  ;;  %v5559_v60 = vpop.f32.mrb[9].mxu0 }
 0x573   : > { %v7762_v1 = vadd.f32 %v5583_v58, %v5582_v19  ;;  %v5585_v50 = vpop.f32.mrb[10].mxu1  ;;  %v7764_v62 = vadd.f32 %v5559_v60, %v5558_v48  ;;  %v5561_v57 = vpop.f32.mrb[10].mxu0 }
 0x574   : > { %v5586_v63 = vpop.f32.mrb[11].mxu1  ;;  %v5562_v49 = vpop.f32.mrb[11].mxu0 }
 0x575   : > { %v7766_v5 = vadd.f32 %v5586_v63, %v5585_v50  ;;  %v7768_v4 = vadd.f32 %v5562_v49, %v5561_v57 }
 0x579   : > { %v5588_v6 = vpop.f32.mrb[12].mxu1  ;;  %v5564_v10 = vpop.f32.mrb[12].mxu0 }
 0x57a   : > { %v5589_v21 = vpop.f32.mrb[13].mxu1  ;;  %v5565_v53 = vpop.f32.mrb[13].mxu0 }
 0x57b   : > { %v7770_v25 = vadd.f32 %v5589_v21, %v5588_v6  ;;  %v5591_v8 = vpop.f32.mrb[14].mxu1  ;;  %v7772_v0 = vadd.f32 %v5565_v53, %v5564_v10  ;;  %v5567_v12 = vpop.f32.mrb[14].mxu0 }
 0x57c   : > { %v5592_v54 = vpop.f32.mrb[15].mxu1  ;;  %v5568_v11 = vpop.f32.mrb[15].mxu0 }
 0x57d   : > { %v7774_v14 = vadd.f32 %v5592_v54, %v5591_v8  ;;  %v7776_v3 = vadd.f32 %v5568_v11, %v5567_v12 }
 0x581   : > { %v5594_v17 = vpop.f32.mrb[16].mxu1 }
 0x582   : > { %v5595_v38 = vpop.f32.mrb[17].mxu1 }
 0x583   : > { %v7778_v7 = vadd.f32 %v5595_v38, %v5594_v17  ;;  %v5597_v42 = vpop.f32.mrb[18].mxu1  ;;  %v7813_v17 = vld [vmem:[%s8277_s5] ss:$0 sm:$0xff] }
 0x584   : > { %v5598_v28 = vpop.f32.mrb[19].mxu1  ;;  %v3445_v38 = vadd.f32 %v7748_v9, %v7813_v17  ;;  %v3456_v9 = vadd.f32 %v7760_v37, %v7813_v17 }
 0x585   : > { %v7780_v18 = vadd.f32 %v5598_v28, %v5597_v42 }
 0x589   : > { %v5600_v23 = vpop.f32.mrb[20].mxu1 }
 0x58a   : > { %v5601_v32 = vpop.f32.mrb[21].mxu1 }
 0x58b   : > { %v7782_v44 = vadd.f32 %v5601_v32, %v5600_v23  ;;  %v5603_v20 = vpop.f32.mrb[22].mxu1  ;;  %v3448_v23 = vadd.f32 %v7752_v27, %v7813_v17 }
 0x58c   : > { %v5604_v22 = vpop.f32.mrb[23].mxu1 }
 0x58d   : > { %v7784_v55 = vadd.f32 %v5604_v22, %v5603_v20 }
 0x591   : > { %v5606_v26 = vpop.f32.mrb[24].mxu1 }
 0x592   : > { %v5607_v29 = vpop.f32.mrb[25].mxu1 }
 0x593   : > { %v7786_v30 = vadd.f32 %v5607_v29, %v5606_v26  ;;  %v5609_v59 = vpop.f32.mrb[26].mxu1 }
 0x594   : > { %v5610_v31 = vpop.f32.mrb[27].mxu1 }
 0x595   : > { %v7788_v51 = vadd.f32 %v5610_v31, %v5609_v59 }
 0x599   : > { %v5612_v34 = vpop.f32.mrb[28].mxu1 }
 0x59a   : > { %v5613_v2 = vpop.f32.mrb[29].mxu1 }
 0x59b   : > { %v7790_v39 = vadd.f32 %v5613_v2, %v5612_v34  ;;  %v5615_v35 = vpop.f32.mrb[30].mxu1  ;;  %v3453_v34 = vadd.f32 %v7756_v47, %v7813_v17  ;;  %v3464_v47 = vadd.f32 %v7768_v4, %v7813_v17 }
 0x59c   : > { %v5616_v13 = vpop.f32.mrb[31].mxu1 }
 0x59d   : > { %v7792_v36 = vadd.f32 %v5616_v13, %v5615_v35 }
 0x5a1   : > { %v5618_v16 = vpop.f32.mrb[32].mxu1 }
 0x5a2   : > { %v5619_v43 = vpop.f32.mrb[33].mxu1 }
 0x5a3   : > { %v7794_v24 = vadd.f32 %v5619_v43, %v5618_v16  ;;  %v5621_v45 = vpop.f32.mrb[34].mxu1 }
 0x5a4   : > { %v5622_v46 = vpop.f32.mrb[35].mxu1 }
 0x5a5   : > { %v7796_v61 = vadd.f32 %v5622_v46, %v5621_v45 }
 0x5a9   : > { %v5624_v52 = vpop.f32.mrb[36].mxu1 }
 0x5aa   : > { %v5625_v15 = vpop.f32.mrb[37].mxu1 }
 0x5ab   : > { %v7798_v19 = vadd.f32 %v5625_v15, %v5624_v52  ;;  %v5627_v48 = vpop.f32.mrb[38].mxu1  ;;  %v3461_v15 = vadd.f32 %v7764_v62, %v7813_v17  ;;  %v3472_v62 = vadd.f32 %v7776_v3, %v7813_v17  ;;  %v3480_v3 = vadd.f32 %v7750_v40, %v7813_v17 }
 0x5ac   : > { %v5628_v58 = vpop.f32.mrb[39].mxu1 }
 0x5ad   : > { %v7800_v60 = vadd.f32 %v5628_v58, %v5627_v48 }
 0x5b1   : > { %v5630_v50 = vpop.f32.mrb[40].mxu1 }
 0x5b2   : > { %v5631_v57 = vpop.f32.mrb[41].mxu1 }
 0x5b3   : > { %v7802_v63 = vadd.f32 %v5631_v57, %v5630_v50  ;;  %v5633_v49 = vpop.f32.mrb[42].mxu1 }
 0x5b4   : > { %v5634_v6 = vpop.f32.mrb[43].mxu1 }
 0x5b5   : > { %v7804_v10 = vadd.f32 %v5634_v6, %v5633_v49 }
 0x5b9   : > { %v5636_v21 = vpop.f32.mrb[44].mxu1 }
 0x5ba   : > { %v5637_v53 = vpop.f32.mrb[45].mxu1 }
 0x5bb   : > { %v7806_v8 = vadd.f32 %v5637_v53, %v5636_v21  ;;  %v5639_v12 = vpop.f32.mrb[46].mxu1 }
 0x5bc   : > { %v5640_v54 = vpop.f32.mrb[47].mxu1 }
 0x5bd   : > { %v7808_v11 = vadd.f32 %v5640_v54, %v5639_v12  ;;  %v3469_v12 = vadd.f32 %v7772_v0, %v7813_v17 }
 0x5c1   : > { %v5658_v42 = vpop.f32.mrb[48].mxu1 }
 0x5c2   : > { %v5659_v28 = vpop.f32.mrb[49].mxu1 }
 0x5c3   : > { %v5660_v32 = vadd.f32 %v5659_v28, %v5658_v42  ;;  %v5661_v20 = vpop.f32.mrb[50].mxu1 }
 0x5c4   : > { %v5662_v22 = vpop.f32.mrb[51].mxu1 }
 0x5c5   : > { %v3606_v26 = vadd.f32 %v5660_v32, %v3445_v38  ;;  %v5663_v29 = vadd.f32 %v5662_v22, %v5661_v20 }
 0x5c7   : > { %v3609_v59 = vadd.f32 %v5663_v29, %v3448_v23 }
 0x5c9   : > { %v4334_v31 = vpack.c.bf16 %v3609_v59, %v3606_v26  ;;  %v5664_v2 = vpop.f32.mrb[52].mxu1  ;;  %v3477_v59 = vadd.f32 %v7746_v33, %v7813_v17 }
 0x5ca   : > { %v5665_v35 = vpop.f32.mrb[53].mxu1 }
 0x5cb   : > { %v5666_v13 = vadd.f32 %v5665_v35, %v5664_v2  ;;  %v5667_v16 = vpop.f32.mrb[54].mxu1  ;;  %6027 = vmatprep.mubr.msk.bf16.mxu0 %vm4358_vm5, %v4334_v31 }
 0x5cc   : > { %v5668_v27 = vpop.f32.mrb[55].mxu1 }
 0x5cd   : > { %v3614_v43 = vadd.f32 %v5666_v13, %v3453_v34  ;;  %v5669_v45 = vadd.f32 %v5668_v27, %v5667_v16 }
 0x5cf   : > { %v3617_v46 = vadd.f32 %v5669_v45, %v3456_v9 }
 0x5d1   : > { %v4335_v52 = vpack.c.bf16 %v3617_v46, %v3614_v43  ;;  %v5670_v48 = vpop.f32.mrb[56].mxu1  ;;  %v3485_v43 = vadd.f32 %v7754_v41, %v7813_v17 }
 0x5d2   : > { %v5671_v58 = vpop.f32.mrb[57].mxu1 }
 0x5d3   : > { %v5672_v50 = vadd.f32 %v5671_v58, %v5670_v48  ;;  %v5673_v57 = vpop.f32.mrb[58].mxu1  ;;  %6028 = vmatmul.mubr.msk.bf16.vlgmr.msra.gmra.mrb[16].mxu0 %vm4358_vm5, %v4335_v52  ;;  %v3488_v52 = vadd.f32 %v7758_v56, %v7813_v17 }
 0x5d4   : > { %v5674_v37 = vpop.f32.mrb[59].mxu1 }
 0x5d5   : > { %v3622_v49 = vadd.f32 %v5672_v50, %v3461_v15  ;;  %v5675_v6 = vadd.f32 %v5674_v37, %v5673_v57  ;;  %v3493_v57 = vadd.f32 %v7762_v1, %v7813_v17 }
 0x5d7   : > { %v3625_v21 = vadd.f32 %v5675_v6, %v3464_v47  ;;  %v3496_v6 = vadd.f32 %v7766_v5, %v7813_v17 }
 0x5d9   : > { %v4336_v53 = vpack.c.bf16 %v3625_v21, %v3622_v49  ;;  %v5676_v54 = vpop.f32.mrb[60].mxu1 }
 0x5da   : > { %v5677_v38 = vpop.f32.mrb[61].mxu1 }
 0x5db   : > { %v5678_v42 = vadd.f32 %v5677_v38, %v5676_v54  ;;  %v5679_v28 = vpop.f32.mrb[62].mxu1  ;;  %6031 = vmatprep.mubr.msk.bf16.mxu0 %vm4358_vm5, %v4336_v53 }
 0x5dc   : > { %v5680_v4 = vpop.f32.mrb[63].mxu1 }
 0x5dd   : > { %v3630_v23 = vadd.f32 %v5678_v42, %v3469_v12  ;;  %v5681_v32 = vadd.f32 %v5680_v4, %v5679_v28  ;;  %v3504_v4 = vadd.f32 %v7774_v14, %v7813_v17 }
 0x5df   : > { %v3633_v20 = vadd.f32 %v5681_v32, %v3472_v62  ;;  %v3501_v62 = vadd.f32 %v7770_v25, %v7813_v17 }
 0x5e1   : > { %v4337_v22 = vpack.c.bf16 %v3633_v20, %v3630_v23  ;;  %v5682_v26 = vpop.f32.mrb[64].mxu1 }
 0x5e2   : > { %v5683_v29 = vpop.f32.mrb[65].mxu1 }
 0x5e3   : > { %v5684_v0 = vadd.f32 %v5683_v29, %v5682_v26  ;;  %v5685_v31 = vpop.f32.mrb[66].mxu1  ;;  %6032 = vmatmul.mubr.msk.bf16.gmra.mrb[20].mxu0 %vm4358_vm5, %v4337_v22  ;;  %v3509_v29 = vadd.f32 %v7778_v7, %v7813_v17 }
 0x5e4   : > { %v5686_v34 = vpop.f32.mrb[67].mxu1 }
 0x5e5   : > { %v3638_v2 = vadd.f32 %v5684_v0, %v3477_v59  ;;  %v5687_v35 = vadd.f32 %v5686_v34, %v5685_v31  ;;  %v3512_v31 = vadd.f32 %v7780_v18, %v7813_v17 }
 0x5e7   : > { %v3641_v9 = vadd.f32 %v5687_v35, %v3480_v3 }
 0x5e9   : > { %v4338_v13 = vpack.c.bf16 %v3641_v9, %v3638_v2  ;;  %v5688_v16 = vpop.f32.mrb[68].mxu1 }
 0x5ea   : > { %v5689_v27 = vpop.f32.mrb[69].mxu1 }
 0x5eb   : > { %v5690_v45 = vadd.f32 %v5689_v27, %v5688_v16  ;;  %v5691_v46 = vpop.f32.mrb[70].mxu1  ;;  %6035 = vmatprep.mubr.msk.bf16.mxu0 %vm4358_vm5, %v4338_v13  ;;  %v3517_v13 = vadd.f32 %v7782_v44, %v7813_v17 }
 0x5ec   : > { %v5692_v33 = vpop.f32.mrb[71].mxu1 }
 0x5ed   : > { %v3646_v15 = vadd.f32 %v5690_v45, %v3485_v43  ;;  %v5693_v48 = vadd.f32 %v5692_v33, %v5691_v46  ;;  %v3520_v43 = vadd.f32 %v7784_v55, %v7813_v17 }
 0x5ef   : > { %v3649_v40 = vadd.f32 %v5693_v48, %v3488_v52  ;;  %v3525_v48 = vadd.f32 %v7786_v30, %v7813_v17 }
 0x5f1   : > { %v4339_v58 = vpack.c.bf16 %v3649_v40, %v3646_v15  ;;  %v5694_v47 = vpop.f32.mrb[72].mxu1 }
 0x5f2   : > { %v5695_v50 = vpop.f32.mrb[73].mxu1 }
 0x5f3   : > { %v5696_v37 = vadd.f32 %v5695_v50, %v5694_v47  ;;  %v5697_v49 = vpop.f32.mrb[74].mxu1  ;;  %6036 = vmatmul.mubr.msk.bf16.gmra.mrb[24].mxu0 %vm4358_vm5, %v4339_v58  ;;  %v3528_v47 = vadd.f32 %v7788_v51, %v7813_v17 }
 0x5f4   : > { %v5698_v41 = vpop.f32.mrb[75].mxu1 }
 0x5f5   : > { %v3654_v21 = vadd.f32 %v5696_v37, %v3493_v57  ;;  %v5699_v53 = vadd.f32 %v5698_v41, %v5697_v49 }
 0x5f7   : > { %v3657_v56 = vadd.f32 %v5699_v53, %v3496_v6  ;;  %v3533_v6 = vadd.f32 %v7790_v39, %v7813_v17 }
 0x5f9   : > { %v4340_v12 = vpack.c.bf16 %v3657_v56, %v3654_v21  ;;  %v5700_v54 = vpop.f32.mrb[76].mxu1  ;;  %v3536_v56 = vadd.f32 %v7792_v36, %v7813_v17 }
 0x5fa   : > { %v5701_v38 = vpop.f32.mrb[77].mxu1 }
 0x5fb   : > { %v5702_v42 = vadd.f32 %v5701_v38, %v5700_v54  ;;  %v5703_v28 = vpop.f32.mrb[78].mxu1  ;;  %6039 = vmatprep.mubr.msk.bf16.mxu0 %vm4358_vm5, %v4340_v12 }
 0x5fc   : > { %v5704_v1 = vpop.f32.mrb[79].mxu1 }
 0x5fd   : > { %v3662_v23 = vadd.f32 %v5702_v42, %v3501_v62  ;;  %v5705_v32 = vadd.f32 %v5704_v1, %v5703_v28  ;;  %v3541_v28 = vadd.f32 %v7794_v24, %v7813_v17 }
 0x5ff   : > { %v3665_v5 = vadd.f32 %v5705_v32, %v3504_v4 }
 0x601   : > { %v4341_v20 = vpack.c.bf16 %v3665_v5, %v3662_v23  ;;  %v5706_v22 = vpop.f32.mrb[80].mxu1  ;;  %v3544_v23 = vadd.f32 %v7796_v61, %v7813_v17 }
 0x602   : > { %v5707_v26 = vpop.f32.mrb[81].mxu1 }
 0x603   : > { %v5708_v59 = vadd.f32 %v5707_v26, %v5706_v22  ;;  %v5709_v0 = vpop.f32.mrb[82].mxu1  ;;  %6040 = vmatmul.mubr.msk.bf16.gmra.mrb[28].mxu0 %vm4358_vm5, %v4341_v20 }
 0x604   : > { %v5710_v25 = vpop.f32.mrb[83].mxu1 }
 0x605   : > { %v3670_v34 = vadd.f32 %v5708_v59, %v3509_v29  ;;  %v5711_v3 = vadd.f32 %v5710_v25, %v5709_v0  ;;  %v3549_v29 = vadd.f32 %v7798_v19, %v7813_v17  ;;  %v3552_v25 = vadd.f32 %v7800_v60, %v7813_v17 }
 0x607   : > { %v3673_v14 = vadd.f32 %v5711_v3, %v3512_v31 }
 0x609   : > { %v4342_v2 = vpack.c.bf16 %v3673_v14, %v3670_v34  ;;  %v5712_v35 = vpop.f32.mrb[84].mxu1 }
 0x60a   : > { %v5713_v9 = vpop.f32.mrb[85].mxu1 }
 0x60b   : > { %v5714_v16 = vadd.f32 %v5713_v9, %v5712_v35  ;;  %v5715_v27 = vpop.f32.mrb[86].mxu1  ;;  %6043 = vmatprep.mubr.msk.bf16.mxu0 %vm4358_vm5, %v4342_v2  ;;  %v3557_v35 = vadd.f32 %v7802_v63, %v7813_v17 }
 0x60c   : > { %v5716_v7 = vpop.f32.mrb[87].mxu1 }
 0x60d   : > { %v3678_v45 = vadd.f32 %v5714_v16, %v3517_v13  ;;  %v5717_v46 = vadd.f32 %v5716_v7, %v5715_v27  ;;  %v3560_v16 = vadd.f32 %v7804_v10, %v7813_v17 }
 0x60f   : > { %v3681_v18 = vadd.f32 %v5717_v46, %v3520_v43 }
 0x611   : > { %v4343_v33 = vpack.c.bf16 %v3681_v18, %v3678_v45  ;;  %v5718_v52 = vpop.f32.mrb[88].mxu1  ;;  %v3565_v18 = vadd.f32 %v7806_v8, %v7813_v17 }
 0x612   : > { %v5719_v15 = vpop.f32.mrb[89].mxu1 }
 0x613   : > { %v5720_v40 = vadd.f32 %v5719_v15, %v5718_v52  ;;  %v5721_v58 = vpop.f32.mrb[90].mxu1  ;;  %6044 = vmatmul.mubr.msk.bf16.gmra.mrb[32].mxu0 %vm4358_vm5, %v4343_v33  ;;  %v3568_v15 = vadd.f32 %v7808_v11, %v7813_v17 }
 0x614   : > { %v5722_v44 = vpop.f32.mrb[91].mxu1 }
 0x615   : > { %v3686_v50 = vadd.f32 %v5720_v40, %v3525_v48  ;;  %v5723_v57 = vadd.f32 %v5722_v44, %v5721_v58  ;;  %v7898_v44 = vld [vmem:[%s8281_s9] ss:$0 sm:$0xff] }
 0x617   : > { %v3689_v55 = vadd.f32 %v5723_v57, %v3528_v47 }
 0x619   : > { %v4344_v37 = vpack.c.bf16 %v3689_v55, %v3686_v50  ;;  %v5724_v49 = vpop.f32.mrb[92].mxu1 }
 0x61a   : > { %v5725_v41 = vpop.f32.mrb[93].mxu1 }
 0x61b   : > { %v5726_v21 = vadd.f32 %v5725_v41, %v5724_v49  ;;  %v5727_v53 = vpop.f32.mrb[94].mxu1  ;;  %6047 = vmatprep.mubr.msk.bf16.mxu0 %vm4358_vm5, %v4344_v37 }
 0x61c   : > { %v5728_v30 = vpop.f32.mrb[95].mxu1 }
 0x61d   : > { %v3694_v12 = vadd.f32 %v5726_v21, %v3533_v6  ;;  %v5729_v54 = vadd.f32 %v5728_v30, %v5727_v53 }
 0x61f   : > { %v3697_v51 = vadd.f32 %v5729_v54, %v3536_v56 }
 0x621   : > { %v4345_v38 = vpack.c.bf16 %v3697_v51, %v3694_v12  ;;  %v5730_v62 = vpop.f32.mrb[96].mxu1 }
 0x622   : > { %v5731_v42 = vpop.f32.mrb[97].mxu1 }
 0x623   : > { %v5732_v1 = vadd.f32 %v5731_v42, %v5730_v62  ;;  %v5733_v4 = vpop.f32.mrb[98].mxu1  ;;  %6048 = vmatmul.mubr.msk.bf16.gmra.mrb[36].mxu0 %vm4358_vm5, %v4345_v38 }
 0x624   : > { %v5734_v39 = vpop.f32.mrb[99].mxu1 }
 0x625   : > { %v3702_v32 = vadd.f32 %v5732_v1, %v3541_v28  ;;  %v5735_v5 = vadd.f32 %v5734_v39, %v5733_v4 }
 0x627   : > { %v3705_v36 = vadd.f32 %v5735_v5, %v3544_v23 }
 0x629   : > { %v4346_v20 = vpack.c.bf16 %v3705_v36, %v3702_v32  ;;  %v5736_v22 = vpop.f32.mrb[100].mxu1 }
 0x62a   : > { %v5737_v26 = vpop.f32.mrb[101].mxu1 }
 0x62b   : > { %v5738_v59 = vadd.f32 %v5737_v26, %v5736_v22  ;;  %v5739_v0 = vpop.f32.mrb[102].mxu1  ;;  %6051 = vmatprep.mubr.msk.bf16.mxu0 %vm4358_vm5, %v4346_v20 }
 0x62c   : > { %v5740_v24 = vpop.f32.mrb[103].mxu1 }
 0x62d   : > { %v3710_v31 = vadd.f32 %v5738_v59, %v3549_v29  ;;  %v5741_v34 = vadd.f32 %v5740_v24, %v5739_v0 }
 0x62f   : > { %v3713_v61 = vadd.f32 %v5741_v34, %v3552_v25 }
 0x631   : > { %v4347_v3 = vpack.c.bf16 %v3713_v61, %v3710_v31  ;;  %v5742_v14 = vpop.f32.mrb[104].mxu1 }
 0x632   : > { %v5743_v2 = vpop.f32.mrb[105].mxu1 }
 0x633   : > { %v5744_v9 = vadd.f32 %v5743_v2, %v5742_v14  ;;  %v5745_v13 = vpop.f32.mrb[106].mxu1  ;;  %6052 = vmatmul.mubr.msk.bf16.gmra.mrb[40].mxu0 %vm4358_vm5, %v4347_v3 }
 0x634   : > { %v5746_v19 = vpop.f32.mrb[107].mxu1 }
 0x635   : > { %v3718_v27 = vadd.f32 %v5744_v9, %v3557_v35  ;;  %v5747_v7 = vadd.f32 %v5746_v19, %v5745_v13 }
 0x637   : > { %v3721_v60 = vadd.f32 %v5747_v7, %v3560_v16 }
 0x639   : > { %v4348_v43 = vpack.c.bf16 %v3721_v60, %v3718_v27  ;;  %v5748_v45 = vpop.f32.mrb[108].mxu1 }
 0x63a   : > { %v5749_v46 = vpop.f32.mrb[109].mxu1 }
 0x63b   : > { %v5750_v33 = vadd.f32 %v5749_v46, %v5748_v45  ;;  %v5751_v52 = vpop.f32.mrb[110].mxu1  ;;  %6055 = vmatprep.mubr.msk.bf16.mxu0 %vm4358_vm5, %v4348_v43 }
 0x63c   : > { %v5752_v63 = vpop.f32.mrb[111].mxu1 }
 0x63d   : > { %v3726_v48 = vadd.f32 %v5750_v33, %v3565_v18  ;;  %v5753_v40 = vadd.f32 %v5752_v63, %v5751_v52 }
 0x63f   : > { %v3729_v10 = vadd.f32 %v5753_v40, %v3568_v15 }
 0x641   : > { %v4349_v58 = vpack.c.bf16 %v3729_v10, %v3726_v48 }
 0x643   : > { %6056 = vmatmul.mubr.msk.bf16.gmra.mrb[44].mxu0 %vm4358_vm5, %v4349_v58 }
 0x6a6   : > { %v6029_v8 = vpop.f32.mrb[16].mxu0 }
 0x6a7   : > { %v7901_v47 = vadd.f32 %v6029_v8, %v7898_v44  ;;  %v4441_v50 = vpop.f32.mrb[17].mxu0 }
 0x6a8   : > { %v7904_v57 = vadd.f32 %v7898_v44, %v4441_v50  ;;  %v6030_v11 = vpop.f32.mrb[18].mxu0 }
 0x6a9   : > { %4643 = vmax.xlane.f32.xlu1 %v7901_v47  ;;  %v4444_v17 = vpop.f32.mrb[19].mxu0  ;;  %v7909_v55 = vadd.f32 %v6030_v11, %v7898_v44 }
 0x6aa   : > { %4639 = vmax.xlane.f32.xlu0 %v7904_v57  ;;  %v7912_v37 = vadd.f32 %v7898_v44, %v4444_v17 }
 0x6ad   : > { %4645 = vmax.xlane.f32.xlu1 %v7909_v55 }
 0x6ae   : > { %4641 = vmax.xlane.f32.xlu0 %v7912_v37 }
 0x6b6   : > { %v6033_v49 = vpop.f32.mrb[20].mxu0 }
 0x6b7   : > { %v7917_v41 = vadd.f32 %v6033_v49, %v7898_v44  ;;  %v4457_v6 = vpop.f32.mrb[21].mxu0 }
 0x6b8   : > { %v6034_v21 = vpop.f32.mrb[22].mxu0  ;;  %v7924_v56 = vadd.f32 %v7898_v44, %v4457_v6 }
 0x6b9   : > { %v7920_v53 = vadd.f32 %v6034_v21, %v7898_v44  ;;  %4651 = vmax.xlane.f32.xlu0 %v7917_v41  ;;  %v4460_v30 = vpop.f32.mrb[23].mxu0 }
 0x6ba   : > { %v7928_v12 = vadd.f32 %v7898_v44, %v4460_v30 }
 0x6bb   : > { %4653 = vmax.xlane.f32.xlu1 %v7920_v53 }
 0x6bd   : > { %4647 = vmax.xlane.f32.xlu0 %v7924_v56 }
 0x6bf   : > { %4649 = vmax.xlane.f32.xlu1 %v7928_v12 }
 0x6c6   : > { %v6037_v54 = vpop.f32.mrb[24].mxu0 }
 0x6c7   : > { %v7933_v51 = vadd.f32 %v6037_v54, %v7898_v44  ;;  %v4473_v38 = vpop.f32.mrb[25].mxu0 }
 0x6c8   : > { %v6038_v62 = vpop.f32.mrb[26].mxu0  ;;  %v7940_v1 = vadd.f32 %v7898_v44, %v4473_v38 }
 0x6c9   : > { %v7936_v42 = vadd.f32 %v6038_v62, %v7898_v44  ;;  %4659 = vmax.xlane.f32.xlu0 %v7933_v51  ;;  %v4476_v28 = vpop.f32.mrb[27].mxu0 }
 0x6ca   : > { %v7944_v4 = vadd.f32 %v7898_v44, %v4476_v28 }
 0x6cb   : > { %4661 = vmax.xlane.f32.xlu1 %v7936_v42 }
 0x6cd   : > { %4655 = vmax.xlane.f32.xlu0 %v7940_v1 }
 0x6cf   : > { %4657 = vmax.xlane.f32.xlu1 %v7944_v4 }
 0x6d6   : > { %v6041_v39 = vpop.f32.mrb[28].mxu0 }
 0x6d7   : > { %v7949_v23 = vadd.f32 %v6041_v39, %v7898_v44  ;;  %v4489_v32 = vpop.f32.mrb[29].mxu0 }
 0x6d8   : > { %v6042_v5 = vpop.f32.mrb[30].mxu0  ;;  %v7956_v22 = vadd.f32 %v7898_v44, %v4489_v32 }
 0x6d9   : > { %v7952_v36 = vadd.f32 %v6042_v5, %v7898_v44  ;;  %4667 = vmax.xlane.f32.xlu0 %v7949_v23  ;;  %v4492_v20 = vpop.f32.mrb[31].mxu0 }
 0x6da   : > { %v7960_v26 = vadd.f32 %v7898_v44, %v4492_v20 }
 0x6db   : > { %4669 = vmax.xlane.f32.xlu1 %v7952_v36 }
 0x6dd   : > { %4663 = vmax.xlane.f32.xlu0 %v7956_v22 }
 0x6df   : > { %4665 = vmax.xlane.f32.xlu1 %v7960_v26 }
 0x6e6   : > { %v6045_v29 = vpop.f32.mrb[32].mxu0 }
 0x6e7   : > { %v7965_v59 = vadd.f32 %v6045_v29, %v7898_v44  ;;  %v4505_v0 = vpop.f32.mrb[33].mxu0 }
 0x6e8   : > { %v6046_v24 = vpop.f32.mrb[34].mxu0  ;;  %v7972_v34 = vadd.f32 %v7898_v44, %v4505_v0 }
 0x6e9   : > { %v7968_v25 = vadd.f32 %v6046_v24, %v7898_v44  ;;  %4675 = vmax.xlane.f32.xlu0 %v7965_v59  ;;  %v4508_v31 = vpop.f32.mrb[35].mxu0 }
 0x6ea   : > { %v7976_v61 = vadd.f32 %v7898_v44, %v4508_v31 }
 0x6eb   : > { %4677 = vmax.xlane.f32.xlu1 %v7968_v25 }
 0x6ed   : > { %4671 = vmax.xlane.f32.xlu0 %v7972_v34 }
 0x6ef   : > { %4673 = vmax.xlane.f32.xlu1 %v7976_v61 }
 0x6f6   : > { %v6049_v3 = vpop.f32.mrb[36].mxu0 }
 0x6f7   : > { %v7981_v14 = vadd.f32 %v6049_v3, %v7898_v44  ;;  %v4521_v2 = vpop.f32.mrb[37].mxu0 }
 0x6f8   : > { %v6050_v35 = vpop.f32.mrb[38].mxu0  ;;  %v7988_v19 = vadd.f32 %v7898_v44, %v4521_v2 }
 0x6f9   : > { %v7984_v9 = vadd.f32 %v6050_v35, %v7898_v44  ;;  %4683 = vmax.xlane.f32.xlu0 %v7981_v14  ;;  %v4524_v13 = vpop.f32.mrb[39].mxu0 }
 0x6fa   : > { %v7992_v16 = vadd.f32 %v7898_v44, %v4524_v13 }
 0x6fb   : > { %4685 = vmax.xlane.f32.xlu1 %v7984_v9 }
 0x6fd   : > { %4679 = vmax.xlane.f32.xlu0 %v7988_v19 }
 0x6ff   : > { %4681 = vmax.xlane.f32.xlu1 %v7992_v16 }
 0x706   : > { %v6053_v27 = vpop.f32.mrb[40].mxu0 }
 0x707   : > { %v7997_v7 = vadd.f32 %v6053_v27, %v7898_v44  ;;  %v4537_v60 = vpop.f32.mrb[41].mxu0 }
 0x708   : > { %v6054_v43 = vpop.f32.mrb[42].mxu0  ;;  %v8004_v18 = vadd.f32 %v7898_v44, %v4537_v60 }
 0x709   : > { %v8000_v45 = vadd.f32 %v6054_v43, %v7898_v44  ;;  %4691 = vmax.xlane.f32.xlu0 %v7997_v7  ;;  %v4540_v46 = vpop.f32.mrb[43].mxu0 }
 0x70a   : > { %v8008_v33 = vadd.f32 %v7898_v44, %v4540_v46 }
 0x70b   : > { %4693 = vmax.xlane.f32.xlu1 %v8000_v45 }
 0x70d   : > { %4687 = vmax.xlane.f32.xlu0 %v8004_v18 }
 0x70f   : > { %4689 = vmax.xlane.f32.xlu1 %v8008_v33 }
 0x716   : > { %v6057_v52 = vpop.f32.mrb[44].mxu0 }
 0x717   : > { %v4553_v63 = vpop.f32.mrb[45].mxu0  ;;  %v8020_v58 = vadd.f32 %v6057_v52, %v7898_v44 }
 0x718   : > { %v8013_v15 = vadd.f32 %v7898_v44, %v4553_v63  ;;  %v6058_v48 = vpop.f32.mrb[46].mxu0 }
 0x719   : > { %v4556_v40 = vpop.f32.mrb[47].mxu0  ;;  %v8024_v8 = vadd.f32 %v6058_v48, %v7898_v44 }
 0x71a   : > { %v8016_v10 = vadd.f32 %v7898_v44, %v4556_v40  ;;  %4695 = vmax.xlane.f32.xlu0 %v8013_v15 }
 0x71c   : > { %4697 = vmax.xlane.f32.xlu1 %v8016_v10 }
 0x71e   : > { %4699 = vmax.xlane.f32.xlu0 %v8020_v58 }
 0x720   : > { %4701 = vmax.xlane.f32.xlu1 %v8024_v8 }
 0x736   : > { %v4644_v50 = vpop.xlane.xlu1 %4643 }
 0x737   : > { %v8029_v11 = vsub.f32 %v7901_v47, %v4644_v50  ;;  %v4640_v17 = vpop.xlane.xlu0 %4639 }
 0x738   : > { %v8032_v49 = vsub.f32 %v7904_v57, %v4640_v17 }
 0x739   : > { %v4739_v6 = vmul.f32 1.442695, %v8029_v11 }
 0x73a   : > { %v4735_v21 = vmul.f32 1.442695, %v8032_v49  ;;  %v4646_v30 = vpop.xlane.xlu1 %4645 }
 0x73b   : > { %6729 = vpow2.f32 %v4739_v6  ;;  %v8037_v44 = vsub.f32 %v7909_v55, %v4646_v30  ;;  %v4642_v54 = vpop.xlane.xlu0 %4641 }
 0x73c   : > { %v8040_v38 = vsub.f32 %v7912_v37, %v4642_v54  ;;  %6731 = vpow2.f32 %v4735_v21 }
 0x73d   : > { %v4741_v47 = vmul.f32 1.442695, %v8037_v44 }
 0x73e   : > { %v4737_v57 = vmul.f32 1.442695, %v8040_v38 }
 0x73f   : > { %6733 = vpow2.f32 %v4741_v47 }
 0x740   : > { %6735 = vpow2.f32 %v4737_v57 }
 0x745   : > { %v6730_v62 = vpop.eup %6729 }
 0x746   : > { %v4652_v28 = vpop.xlane.xlu0 %4651  ;;  %4803 = vadd.xlane.f32.xlu0 %v6730_v62  ;;  %v6732_v32 = vpop.eup %6731 }
 0x747   : > { %v8045_v39 = vsub.f32 %v7917_v41, %v4652_v28 }
 0x748   : > { %v4654_v55 = vpop.xlane.xlu1 %4653 }
 0x749   : > { %v6734_v5 = vpop.eup %6733  ;;  %v4747_v20 = vmul.f32 1.442695, %v8045_v39  ;;  %v8049_v37 = vsub.f32 %v7920_v53, %v4654_v55 }
 0x74a   : > { %v4648_v29 = vpop.xlane.xlu0 %4647  ;;  %4799 = vadd.xlane.f32.xlu0 %v6732_v32  ;;  %4805 = vadd.xlane.f32.xlu1 %v6734_v5  ;;  %v6736_v41 = vpop.eup %6735 }
 0x74b   : > { %6737 = vpow2.f32 %v4747_v20  ;;  %v4749_v0 = vmul.f32 1.442695, %v8049_v37  ;;  %v8053_v24 = vsub.f32 %v7924_v56, %v4648_v29 }
 0x74c   : > { %v4650_v31 = vpop.xlane.xlu1 %4649 }
 0x74d   : > { %6739 = vpow2.f32 %v4749_v0  ;;  %v4743_v3 = vmul.f32 1.442695, %v8053_v24  ;;  %v8057_v2 = vsub.f32 %v7928_v12, %v4650_v31 }
 0x74e   : > { %4801 = vadd.xlane.f32.xlu1 %v6736_v41 }
 0x74f   : > { %6741 = vpow2.f32 %v4743_v3  ;;  %v4745_v53 = vmul.f32 1.442695, %v8057_v2 }
 0x751   : > { %6743 = vpow2.f32 %v4745_v53 }
 0x755   : > { %v6738_v35 = vpop.eup %6737 }
 0x756   : > { %v4660_v13 = vpop.xlane.xlu0 %4659  ;;  %4811 = vadd.xlane.f32.xlu0 %v6738_v35 }
 0x757   : > { %v6740_v27 = vpop.eup %6739  ;;  %v8061_v56 = vsub.f32 %v7933_v51, %v4660_v13 }
 0x758   : > { %v4662_v60 = vpop.xlane.xlu1 %4661  ;;  %4813 = vadd.xlane.f32.xlu1 %v6740_v27 }
 0x759   : > { %v6742_v43 = vpop.eup %6741  ;;  %v4755_v46 = vmul.f32 1.442695, %v8061_v56  ;;  %v8065_v12 = vsub.f32 %v7936_v42, %v4662_v60 }
 0x75a   : > { %v4656_v52 = vpop.xlane.xlu0 %4655  ;;  %4807 = vadd.xlane.f32.xlu0 %v6742_v43 }
 0x75b   : > { %v6744_v63 = vpop.eup %6743  ;;  %6745 = vpow2.f32 %v4755_v46  ;;  %v4757_v48 = vmul.f32 1.442695, %v8065_v12  ;;  %v8069_v40 = vsub.f32 %v7940_v1, %v4656_v52 }
 0x75c   : > { %v4658_v50 = vpop.xlane.xlu1 %4657  ;;  %4809 = vadd.xlane.f32.xlu1 %v6744_v63 }
 0x75d   : > { %6747 = vpow2.f32 %v4757_v48  ;;  %v4751_v51 = vmul.f32 1.442695, %v8069_v40  ;;  %v8073_v17 = vsub.f32 %v7944_v4, %v4658_v50 }
 0x75f   : > { %6749 = vpow2.f32 %v4751_v51  ;;  %v4753_v42 = vmul.f32 1.442695, %v8073_v17 }
 0x761   : > { %6751 = vpow2.f32 %v4753_v42 }
 0x765   : > { %v6746_v6 = vpop.eup %6745 }
 0x766   : > { %v4668_v21 = vpop.xlane.xlu0 %4667  ;;  %4819 = vadd.xlane.f32.xlu0 %v6746_v6 }
 0x767   : > { %v6748_v30 = vpop.eup %6747  ;;  %v8077_v54 = vsub.f32 %v7949_v23, %v4668_v21 }
 0x768   : > { %v4670_v1 = vpop.xlane.xlu1 %4669  ;;  %4821 = vadd.xlane.f32.xlu1 %v6748_v30 }
 0x769   : > { %v6750_v47 = vpop.eup %6749  ;;  %v4763_v57 = vmul.f32 1.442695, %v8077_v54  ;;  %v8081_v62 = vsub.f32 %v7952_v36, %v4670_v1 }
 0x76a   : > { %v4664_v4 = vpop.xlane.xlu0 %4663  ;;  %4815 = vadd.xlane.f32.xlu0 %v6750_v47 }
 0x76b   : > { %v6752_v28 = vpop.eup %6751  ;;  %6753 = vpow2.f32 %v4763_v57  ;;  %v4765_v32 = vmul.f32 1.442695, %v8081_v62  ;;  %v8085_v55 = vsub.f32 %v7956_v22, %v4664_v4 }
 0x76c   : > { %v4666_v5 = vpop.xlane.xlu1 %4665  ;;  %4817 = vadd.xlane.f32.xlu1 %v6752_v28 }
 0x76d   : > { %6755 = vpow2.f32 %v4765_v32  ;;  %v4759_v23 = vmul.f32 1.442695, %v8085_v55  ;;  %v8089_v20 = vsub.f32 %v7960_v26, %v4666_v5 }
 0x76f   : > { %6757 = vpow2.f32 %v4759_v23  ;;  %v4761_v36 = vmul.f32 1.442695, %v8089_v20 }
 0x771   : > { %6759 = vpow2.f32 %v4761_v36 }
 0x775   : > { %v6754_v29 = vpop.eup %6753 }
 0x776   : > { %v4676_v0 = vpop.xlane.xlu0 %4675  ;;  %4827 = vadd.xlane.f32.xlu0 %v6754_v29 }
 0x777   : > { %v6756_v31 = vpop.eup %6755  ;;  %v8093_v41 = vsub.f32 %v7965_v59, %v4676_v0 }
 0x778   : > { %v4678_v22 = vpop.xlane.xlu1 %4677  ;;  %4829 = vadd.xlane.f32.xlu1 %v6756_v31 }
 0x779   : > { %v6758_v3 = vpop.eup %6757  ;;  %v4771_v53 = vmul.f32 1.442695, %v8093_v41  ;;  %v8097_v35 = vsub.f32 %v7968_v25, %v4678_v22 }
 0x77a   : > { %v4672_v26 = vpop.xlane.xlu0 %4671  ;;  %4823 = vadd.xlane.f32.xlu0 %v6758_v3 }
 0x77b   : > { %v6760_v13 = vpop.eup %6759  ;;  %6761 = vpow2.f32 %v4771_v53  ;;  %v4773_v27 = vmul.f32 1.442695, %v8097_v35  ;;  %v8101_v60 = vsub.f32 %v7972_v34, %v4672_v26 }
 0x77c   : > { %v4674_v43 = vpop.xlane.xlu1 %4673  ;;  %4825 = vadd.xlane.f32.xlu1 %v6760_v13 }
 0x77d   : > { %6763 = vpow2.f32 %v4773_v27  ;;  %v4767_v59 = vmul.f32 1.442695, %v8101_v60  ;;  %v8105_v46 = vsub.f32 %v7976_v61, %v4674_v43 }
 0x77f   : > { %6765 = vpow2.f32 %v4767_v59  ;;  %v4769_v25 = vmul.f32 1.442695, %v8105_v46 }
 0x781   : > { %6767 = vpow2.f32 %v4769_v25 }
 0x785   : > { %v6762_v52 = vpop.eup %6761 }
 0x786   : > { %v4684_v63 = vpop.xlane.xlu0 %4683  ;;  %4835 = vadd.xlane.f32.xlu0 %v6762_v52 }
 0x787   : > { %v6764_v48 = vpop.eup %6763  ;;  %v8109_v50 = vsub.f32 %v7981_v14, %v4684_v63 }
 0x788   : > { %v4686_v34 = vpop.xlane.xlu1 %4685  ;;  %4837 = vadd.xlane.f32.xlu1 %v6764_v48 }
 0x789   : > { %v6766_v51 = vpop.eup %6765  ;;  %v4779_v42 = vmul.f32 1.442695, %v8109_v50  ;;  %v8113_v6 = vsub.f32 %v7984_v9, %v4686_v34 }
 0x78a   : > { %v4680_v61 = vpop.xlane.xlu0 %4679  ;;  %4831 = vadd.xlane.f32.xlu0 %v6766_v51 }
 0x78b   : > { %v6768_v21 = vpop.eup %6767  ;;  %6769 = vpow2.f32 %v4779_v42  ;;  %v4781_v30 = vmul.f32 1.442695, %v8113_v6  ;;  %v8117_v1 = vsub.f32 %v7988_v19, %v4680_v61 }
 0x78c   : > { %v4682_v47 = vpop.xlane.xlu1 %4681  ;;  %4833 = vadd.xlane.f32.xlu1 %v6768_v21 }
 0x78d   : > { %6771 = vpow2.f32 %v4781_v30  ;;  %v4775_v14 = vmul.f32 1.442695, %v8117_v1  ;;  %v8121_v57 = vsub.f32 %v7992_v16, %v4682_v47 }
 0x78f   : > { %6773 = vpow2.f32 %v4775_v14  ;;  %v4777_v9 = vmul.f32 1.442695, %v8121_v57 }
 0x791   : > { %6775 = vpow2.f32 %v4777_v9 }
 0x795   : > { %v6770_v4 = vpop.eup %6769 }
 0x796   : > { %v4692_v28 = vpop.xlane.xlu0 %4691  ;;  %4843 = vadd.xlane.f32.xlu0 %v6770_v4 }
 0x797   : > { %v6772_v32 = vpop.eup %6771  ;;  %v8125_v5 = vsub.f32 %v7997_v7, %v4692_v28 }
 0x798   : > { %v4694_v19 = vpop.xlane.xlu1 %4693  ;;  %4845 = vadd.xlane.f32.xlu1 %v6772_v32 }
 0x799   : > { %v6774_v23 = vpop.eup %6773  ;;  %v4787_v36 = vmul.f32 1.442695, %v8125_v5  ;;  %v8129_v29 = vsub.f32 %v8000_v45, %v4694_v19 }
 0x79a   : > { %v4688_v16 = vpop.xlane.xlu0 %4687  ;;  %4839 = vadd.xlane.f32.xlu0 %v6774_v23 }
 0x79b   : > { %v6776_v0 = vpop.eup %6775  ;;  %6777 = vpow2.f32 %v4787_v36  ;;  %v4789_v31 = vmul.f32 1.442695, %v8129_v29  ;;  %v8133_v22 = vsub.f32 %v8004_v18, %v4688_v16 }
 0x79c   : > { %v4690_v3 = vpop.xlane.xlu1 %4689  ;;  %4841 = vadd.xlane.f32.xlu1 %v6776_v0 }
 0x79d   : > { %6779 = vpow2.f32 %v4789_v31  ;;  %v4783_v7 = vmul.f32 1.442695, %v8133_v22  ;;  %v8137_v53 = vsub.f32 %v8008_v33, %v4690_v3 }
 0x79f   : > { %6781 = vpow2.f32 %v4783_v7  ;;  %v4785_v45 = vmul.f32 1.442695, %v8137_v53 }
 0x7a1   : > { %6783 = vpow2.f32 %v4785_v45 }
 0x7a5   : > { %v6778_v26 = vpop.eup %6777 }
 0x7a6   : > { %4851 = vadd.xlane.f32.xlu0 %v6778_v26 }
 0x7a7   : > { %v6780_v13 = vpop.eup %6779  ;;  %v4696_v27 = vpop.xlane.xlu0 %4695 }
 0x7a8   : > { %v8141_v43 = vsub.f32 %v8013_v15, %v4696_v27  ;;  %4853 = vadd.xlane.f32.xlu1 %v6780_v13 }
 0x7a9   : > { %v6782_v18 = vpop.eup %6781  ;;  %v4698_v59 = vpop.xlane.xlu1 %4697 }
 0x7aa   : > { %v4791_v25 = vmul.f32 1.442695, %v8141_v43  ;;  %v8145_v52 = vsub.f32 %v8016_v10, %v4698_v59  ;;  %4847 = vadd.xlane.f32.xlu0 %v6782_v18 }
 0x7ab   : > { %v6784_v33 = vpop.eup %6783  ;;  %v4700_v63 = vpop.xlane.xlu0 %4699 }
 0x7ac   : > { %6785 = vpow2.f32 %v4791_v25  ;;  %v4793_v48 = vmul.f32 1.442695, %v8145_v52  ;;  %v8149_v34 = vsub.f32 %v8020_v58, %v4700_v63  ;;  %4849 = vadd.xlane.f32.xlu1 %v6784_v33 }
 0x7ad   : > { %v4702_v15 = vpop.xlane.xlu1 %4701 }
 0x7ae   : > { %6787 = vpow2.f32 %v4793_v48  ;;  %v4795_v51 = vmul.f32 1.442695, %v8149_v34  ;;  %v8153_v42 = vsub.f32 %v8024_v8, %v4702_v15 }
 0x7b0   : > { %6789 = vpow2.f32 %v4795_v51  ;;  %v4797_v10 = vmul.f32 1.442695, %v8153_v42 }
 0x7b2   : > { %6791 = vpow2.f32 %v4797_v10 }
 0x7b6   : > { %v6786_v61 = vpop.eup %6785 }
 0x7b7   : > { %4855 = vadd.xlane.f32.xlu0 %v6786_v61 }
 0x7b8   : > { %v6788_v21 = vpop.eup %6787 }
 0x7b9   : > { %4857 = vadd.xlane.f32.xlu1 %v6788_v21 }
 0x7ba   : > { %v6790_v30 = vpop.eup %6789 }
 0x7bb   : > { %4859 = vadd.xlane.f32.xlu0 %v6790_v30 }
 0x7bc   : > { %v6792_v58 = vpop.eup %6791 }
 0x7bd   : > { %4861 = vadd.xlane.f32.xlu1 %v6792_v58 }
 0x7d3   : > { %v4804_v47 = vpop.xlane.xlu0 %4803 }
 0x7d4   : > { %6793 = vlog2.f32 %v4804_v47 }
 0x7d7   : > { %v4800_v14 = vpop.xlane.xlu0 %4799  ;;  %v4806_v9 = vpop.xlane.xlu1 %4805 }
 0x7d8   : > { %6795 = vlog2.f32 %v4800_v14 }
 0x7d9   : > { %6797 = vlog2.f32 %v4806_v9 }
 0x7db   : > { %v4802_v8 = vpop.xlane.xlu1 %4801 }
 0x7dc   : > { %6799 = vlog2.f32 %v4802_v8 }
 0x7de   : > { %v6794_v4 = vpop.eup %6793 }
 0x7df   : > { %v4868_v28 = vmul.f32 0.6931472, %v6794_v4 }
 0x7e1   : > { %v4929_v32 = vsub.f32 %v8029_v11, %v4868_v28 }
 0x7e2   : > { %v6796_v19 = vpop.eup %6795 }
 0x7e3   : > { %v6798_v23 = vpop.eup %6797  ;;  %4961 = vst [vmem:[%s7103_s21 + $0x10] sm:$0xff] %v4929_v32  ;;  %v4864_v36 = vmul.f32 0.6931472, %v6796_v19  ;;  %v4812_v16 = vpop.xlane.xlu0 %4811 }
 0x7e4   : > { %v4870_v0 = vmul.f32 0.6931472, %v6798_v23  ;;  %6801 = vlog2.f32 %v4812_v16 }
 0x7e5   : > { %v4927_v31 = vsub.f32 %v8032_v49, %v4864_v36  ;;  %v4814_v3 = vpop.xlane.xlu1 %4813 }
 0x7e6   : > { %v6800_v7 = vpop.eup %6799  ;;  %v4930_v45 = vsub.f32 %v8037_v44, %v4870_v0  ;;  %6803 = vlog2.f32 %v4814_v3 }
 0x7e7   : > { %4959 = vst [vmem:[%s7103_s21] sm:$0xff] %v4927_v31  ;;  %v4866_v26 = vmul.f32 0.6931472, %v6800_v7  ;;  %v4808_v11 = vpop.xlane.xlu0 %4807 }
 0x7e8   : > { %4962 = vst [vmem:[%s7103_s21 + $0x18] sm:$0xff] %v4930_v45  ;;  %6805 = vlog2.f32 %v4808_v11 }
 0x7e9   : > { %v4928_v13 = vsub.f32 %v8040_v38, %v4866_v26  ;;  %v4810_v27 = vpop.xlane.xlu1 %4809 }
 0x7ea   : > { %6807 = vlog2.f32 %v4810_v27 }
 0x7eb   : > { %4960 = vst [vmem:[%s7103_s21 + $0x8] sm:$0xff] %v4928_v13 }
 0x7ee   : > { %v6802_v18 = vpop.eup %6801 }
 0x7ef   : > { %v4876_v59 = vmul.f32 0.6931472, %v6802_v18 }
 0x7f0   : > { %v6804_v49 = vpop.eup %6803 }
 0x7f1   : > { %v4933_v25 = vsub.f32 %v8045_v39, %v4876_v59  ;;  %v4878_v44 = vmul.f32 0.6931472, %v6804_v49 }
 0x7f2   : > { %v6806_v33 = vpop.eup %6805 }
 0x7f3   : > { %4965 = vst [vmem:[%s7103_s21 + $0x30] sm:$0xff] %v4933_v25  ;;  %v4934_v63 = vsub.f32 %v8049_v37, %v4878_v44  ;;  %v4872_v48 = vmul.f32 0.6931472, %v6806_v33  ;;  %v4820_v15 = vpop.xlane.xlu0 %4819 }
 0x7f4   : > { %v6808_v51 = vpop.eup %6807  ;;  %6809 = vlog2.f32 %v4820_v15 }
 0x7f5   : > { %4966 = vst [vmem:[%s7103_s21 + $0x38] sm:$0xff] %v4934_v63  ;;  %v4931_v38 = vsub.f32 %v8053_v24, %v4872_v48  ;;  %v4874_v10 = vmul.f32 0.6931472, %v6808_v51  ;;  %v4822_v61 = vpop.xlane.xlu1 %4821 }
 0x7f6   : > { %6811 = vlog2.f32 %v4822_v61 }
 0x7f7   : > { %4963 = vst [vmem:[%s7103_s21 + $0x20] sm:$0xff] %v4931_v38  ;;  %v4932_v39 = vsub.f32 %v8057_v2, %v4874_v10  ;;  %v4816_v21 = vpop.xlane.xlu0 %4815 }
 0x7f8   : > { %6813 = vlog2.f32 %v4816_v21 }
 0x7f9   : > { %4964 = vst [vmem:[%s7103_s21 + $0x28] sm:$0xff] %v4932_v39  ;;  %v4818_v30 = vpop.xlane.xlu1 %4817 }
 0x7fa   : > { %6815 = vlog2.f32 %v4818_v30 }
 0x7fe   : > { %v6810_v37 = vpop.eup %6809 }
 0x7ff   : > { %v4884_v58 = vmul.f32 0.6931472, %v6810_v37 }
 0x800   : > { %v6812_v47 = vpop.eup %6811 }
 0x801   : > { %v4937_v14 = vsub.f32 %v8061_v56, %v4884_v58  ;;  %v4886_v24 = vmul.f32 0.6931472, %v6812_v47 }
 0x802   : > { %v6814_v9 = vpop.eup %6813 }
 0x803   : > { %4969 = vst [vmem:[%s7103_s21 + $0x50] sm:$0xff] %v4937_v14  ;;  %v4938_v8 = vsub.f32 %v8065_v12, %v4886_v24  ;;  %v4880_v4 = vmul.f32 0.6931472, %v6814_v9  ;;  %v4828_v2 = vpop.xlane.xlu0 %4827 }
 0x804   : > { %v6816_v28 = vpop.eup %6815  ;;  %6817 = vlog2.f32 %v4828_v2 }
 0x805   : > { %4970 = vst [vmem:[%s7103_s21 + $0x58] sm:$0xff] %v4938_v8  ;;  %v4935_v32 = vsub.f32 %v8069_v40, %v4880_v4  ;;  %v4882_v19 = vmul.f32 0.6931472, %v6816_v28  ;;  %v4830_v23 = vpop.xlane.xlu1 %4829 }
 0x806   : > { %6819 = vlog2.f32 %v4830_v23 }
 0x807   : > { %4967 = vst [vmem:[%s7103_s21 + $0x40] sm:$0xff] %v4935_v32  ;;  %v4936_v56 = vsub.f32 %v8073_v17, %v4882_v19  ;;  %v4824_v36 = vpop.xlane.xlu0 %4823 }
 0x808   : > { %6821 = vlog2.f32 %v4824_v36 }
 0x809   : > { %4968 = vst [vmem:[%s7103_s21 + $0x48] sm:$0xff] %v4936_v56  ;;  %v4826_v16 = vpop.xlane.xlu1 %4825 }
 0x80a   : > { %6823 = vlog2.f32 %v4826_v16 }
 0x80e   : > { %v6818_v12 = vpop.eup %6817 }
 0x80f   : > { %v4892_v0 = vmul.f32 0.6931472, %v6818_v12 }
 0x810   : > { %v6820_v31 = vpop.eup %6819 }
 0x811   : > { %v4941_v3 = vsub.f32 %v8077_v54, %v4892_v0  ;;  %v4894_v40 = vmul.f32 0.6931472, %v6820_v31 }
 0x812   : > { %v6822_v7 = vpop.eup %6821 }
 0x813   : > { %4973 = vst [vmem:[%s7103_s21 + $0x70] sm:$0xff] %v4941_v3  ;;  %v4942_v45 = vsub.f32 %v8081_v62, %v4894_v40  ;;  %v4888_v26 = vmul.f32 0.6931472, %v6822_v7  ;;  %v4836_v17 = vpop.xlane.xlu0 %4835 }
 0x814   : > { %v6824_v11 = vpop.eup %6823  ;;  %6825 = vlog2.f32 %v4836_v17 }
 0x815   : > { %4974 = vst [vmem:[%s7103_s21 + $0x78] sm:$0xff] %v4942_v45  ;;  %v4939_v13 = vsub.f32 %v8085_v55, %v4888_v26  ;;  %v4890_v27 = vmul.f32 0.6931472, %v6824_v11  ;;  %v4838_v18 = vpop.xlane.xlu1 %4837 }
 0x816   : > { %6827 = vlog2.f32 %v4838_v18 }
 0x817   : > { %4971 = vst [vmem:[%s7103_s21 + $0x60] sm:$0xff] %v4939_v13  ;;  %v4940_v54 = vsub.f32 %v8089_v20, %v4890_v27  ;;  %v4832_v59 = vpop.xlane.xlu0 %4831 }
 0x818   : > { %6829 = vlog2.f32 %v4832_v59 }
 0x819   : > { %4972 = vst [vmem:[%s7103_s21 + $0x68] sm:$0xff] %v4940_v54  ;;  %v4834_v49 = vpop.xlane.xlu1 %4833 }
 0x81a   : > { %6831 = vlog2.f32 %v4834_v49 }
 0x81e   : > { %v6826_v62 = vpop.eup %6825 }
 0x81f   : > { %v4900_v25 = vmul.f32 0.6931472, %v6826_v62 }
 0x820   : > { %v6828_v44 = vpop.eup %6827 }
 0x821   : > { %v4945_v33 = vsub.f32 %v8093_v41, %v4900_v25  ;;  %v4902_v55 = vmul.f32 0.6931472, %v6828_v44 }
 0x822   : > { %v6830_v63 = vpop.eup %6829 }
 0x823   : > { %4977 = vst [vmem:[%s7103_s21 + $0x90] sm:$0xff] %v4945_v33  ;;  %v4946_v48 = vsub.f32 %v8097_v35, %v4902_v55  ;;  %v4896_v15 = vmul.f32 0.6931472, %v6830_v63  ;;  %v4844_v20 = vpop.xlane.xlu0 %4843 }
 0x824   : > { %v6832_v51 = vpop.eup %6831  ;;  %6833 = vlog2.f32 %v4844_v20 }
 0x825   : > { %4978 = vst [vmem:[%s7103_s21 + $0x98] sm:$0xff] %v4946_v48  ;;  %v4943_v38 = vsub.f32 %v8101_v60, %v4896_v15  ;;  %v4898_v10 = vmul.f32 0.6931472, %v6832_v51  ;;  %v4846_v61 = vpop.xlane.xlu1 %4845 }
 0x826   : > { %6835 = vlog2.f32 %v4846_v61 }
 0x827   : > { %4975 = vst [vmem:[%s7103_s21 + $0x80] sm:$0xff] %v4943_v38  ;;  %v4944_v41 = vsub.f32 %v8105_v46, %v4898_v10  ;;  %v4840_v39 = vpop.xlane.xlu0 %4839 }
 0x828   : > { %6837 = vlog2.f32 %v4840_v39 }
 0x829   : > { %4976 = vst [vmem:[%s7103_s21 + $0x88] sm:$0xff] %v4944_v41  ;;  %v4842_v21 = vpop.xlane.xlu1 %4841 }
 0x82a   : > { %6839 = vlog2.f32 %v4842_v21 }
 0x82e   : > { %v6834_v35 = vpop.eup %6833 }
 0x82f   : > { %v4908_v30 = vmul.f32 0.6931472, %v6834_v35 }
 0x830   : > { %v6836_v37 = vpop.eup %6835 }
 0x831   : > { %v4949_v58 = vsub.f32 %v8109_v50, %v4908_v30  ;;  %v4910_v60 = vmul.f32 0.6931472, %v6836_v37 }
 0x832   : > { %v6838_v47 = vpop.eup %6837 }
 0x833   : > { %4981 = vst [vmem:[%s7103_s21 + $0xb0] sm:$0xff] %v4949_v58  ;;  %v4950_v14 = vsub.f32 %v8113_v6, %v4910_v60  ;;  %v4904_v24 = vmul.f32 0.6931472, %v6838_v47  ;;  %v4852_v46 = vpop.xlane.xlu0 %4851 }
 0x834   : > { %v6840_v9 = vpop.eup %6839  ;;  %6841 = vlog2.f32 %v4852_v46 }
 0x835   : > { %4982 = vst [vmem:[%s7103_s21 + $0xb8] sm:$0xff] %v4950_v14  ;;  %v4947_v8 = vsub.f32 %v8117_v1, %v4904_v24  ;;  %v4906_v4 = vmul.f32 0.6931472, %v6840_v9  ;;  %v4854_v2 = vpop.xlane.xlu1 %4853 }
 0x836   : > { %6843 = vlog2.f32 %v4854_v2 }
 0x837   : > { %4979 = vst [vmem:[%s7103_s21 + $0xa0] sm:$0xff] %v4947_v8  ;;  %v4948_v50 = vsub.f32 %v8121_v57, %v4906_v4  ;;  %v4848_v28 = vpop.xlane.xlu0 %4847 }
 0x838   : > { %6845 = vlog2.f32 %v4848_v28 }
 0x839   : > { %4980 = vst [vmem:[%s7103_s21 + $0xa8] sm:$0xff] %v4948_v50  ;;  %v4850_v32 = vpop.xlane.xlu1 %4849 }
 0x83a   : > { %6847 = vlog2.f32 %v4850_v32 }
 0x83e   : > { %v6842_v6 = vpop.eup %6841 }
 0x83f   : > { %v4916_v19 = vmul.f32 0.6931472, %v6842_v6 }
 0x840   : > { %v6844_v23 = vpop.eup %6843 }
 0x841   : > { %v4953_v56 = vsub.f32 %v8125_v5, %v4916_v19  ;;  %v4918_v1 = vmul.f32 0.6931472, %v6844_v23 }
 0x842   : > { %v6846_v36 = vpop.eup %6845 }
 0x843   : > { %4985 = vst [vmem:[%s7103_s21 + $0xd0] sm:$0xff] %v4953_v56  ;;  %v4954_v16 = vsub.f32 %v8129_v29, %v4918_v1  ;;  %v4912_v12 = vmul.f32 0.6931472, %v6846_v36 }
 0x844   : > { %v6848_v57 = vpop.eup %6847  ;;  %v4856_v0 = vpop.xlane.xlu0 %4855 }
 0x845   : > { %4986 = vst [vmem:[%s7103_s21 + $0xd8] sm:$0xff] %v4954_v16  ;;  %v4951_v31 = vsub.f32 %v8133_v22, %v4912_v12  ;;  %v4914_v3 = vmul.f32 0.6931472, %v6848_v57  ;;  %6849 = vlog2.f32 %v4856_v0 }
 0x846   : > { %v4858_v40 = vpop.xlane.xlu1 %4857 }
 0x847   : > { %4983 = vst [vmem:[%s7103_s21 + $0xc0] sm:$0xff] %v4951_v31  ;;  %v4952_v7 = vsub.f32 %v8137_v53, %v4914_v3  ;;  %6851 = vlog2.f32 %v4858_v40 }
 0x848   : > { %v4860_v5 = vpop.xlane.xlu0 %4859 }
 0x849   : > { %4984 = vst [vmem:[%s7103_s21 + $0xc8] sm:$0xff] %v4952_v7  ;;  %6853 = vlog2.f32 %v4860_v5 }
 0x84a   : > { %v4862_v29 = vpop.xlane.xlu1 %4861 }
 0x84b   : > { %6855 = vlog2.f32 %v4862_v29 }
 0x84f   : > { %v6850_v45 = vpop.eup %6849 }
 0x850   : > { %v4920_v26 = vmul.f32 0.6931472, %v6850_v45 }
 0x851   : > { %v6852_v22 = vpop.eup %6851 }
 0x852   : > { %v4955_v17 = vsub.f32 %v8141_v43, %v4920_v26  ;;  %v4922_v11 = vmul.f32 0.6931472, %v6852_v22 }
 0x853   : > { %v6854_v13 = vpop.eup %6853 }
 0x854   : > { %4987 = vst [vmem:[%s7103_s21 + $0xe0] sm:$0xff] %v4955_v17  ;;  %v4956_v53 = vsub.f32 %v8145_v52, %v4922_v11  ;;  %v4924_v27 = vmul.f32 0.6931472, %v6854_v13 }
 0x855   : > { %v6856_v18 = vpop.eup %6855 }
 0x856   : > { %4988 = vst [vmem:[%s7103_s21 + $0xe8] sm:$0xff] %v4956_v53  ;;  %v4957_v54 = vsub.f32 %v8149_v34, %v4924_v27  ;;  %v4926_v59 = vmul.f32 0.6931472, %v6856_v18 }
 0x858   : > { %4989 = vst [vmem:[%s7103_s21 + $0xf0] sm:$0xff] %v4957_v54  ;;  %v4958_v43 = vsub.f32 %v8153_v42, %v4926_v59 }
 0x85a   : > { %4990 = vst [vmem:[%s7103_s21 + $0xf8] sm:$0xff] %v4958_v43 }
 0x85b   : > { %6898 = shalt.err (!%p6895_p7)
}
 0x85c   : > { %s6899_s11 = scalar_lea.hbm %s8222_s12, 4096  ;;  %s6903_s28 = scalar_lea.hbm %s8282_s10, 8192 }
 0x85d   : > { %p6900_p8 = scmp.ne.s32.totalorder %s8222_s12, %s6899_s11  ;;  %p6904_p2 = scmp.lt.u32.totalorder %s8222_s12, %s8282_s10 }
 0x85e   : > { %p6905_p1 = scmp.lt.u32.totalorder %s6903_s28, %s6899_s11  ;;  %p6907_p6 = scmp.lt.u32.totalorder %s6899_s11, %s8222_s12 }
 0x85f   : > { %p6901_p12 = pnand %p6900_p8, %p8294_p9 }
 0x860   : > { %p6906_p5 = por %p6905_p1, %p6904_p2 }
 0x861   : > { %p6902_p0 = pneg %p6901_p12 }
 0x862   : > { %p6908_p10 = por %p6907_p6, %p6906_p5 }
 0x864   : > { %p6909_p11 = pnand %p6908_p10, %p6902_p0 }
 0x866   : > { %6912 = shalt.err (!%p6909_p11)
}
 0x867   : > { %s6958_s25 = smov 128   ;;  %s6959_s26 = smov 8  }
 0x868   : > { %6329 = dma.vmem_to_hbm [thread:$0]  (%p8294_p9), %s8224_s20, 4096, %s8222_s12, %s8231_s17, %s6958_s25, %s6958_s25, %s6959_s26  }
 0x869 PF: > { %p6341_p13 = scmp.ge.s32.totalorder %s6951_s16, 2  ;;  %s5020_s29 = sand.u32 1, %s6939_s13  }
 0x86a   : > { %p8295_p3 = scmp.ne.s32.totalorder %s8287_s24, 0  ;;  %s5021_s11 = scalar_lea.sflag [#allocation6], %s5020_s29 }
 0x86c   : > { %p6336_p4 = pnand %p6341_p13, %p8295_p3 }
 0x86e   : > { %6934 = dma.done.wait (!%p6336_p4), %s5021_s11, 4096  }
 0x86f   : > { %6936 = vsyncadd (!%p6336_p4), %s5021_s11, 4294963200  ;;  %p21_p7 = scmp.ge.s32.totalorder %s7040_s19, 4   ;;  %s8296_s13 = smov %s6943_s14 }
 0x870   : > { %s8297_s14 = smov %s6947_s15  ;;  %s8298_s15 = smov %s7051_s22 }
 0x871   : > { %s8299_s16 = smov %s7040_s19  ;;  %23 = sbr.rel (!%p21_p7) target bundleno = 4 (0x4), region = 104 }
 0x878   :  { %5026 = vsyncpa [#allocation5], 1 }
 0x879   :  { %5028 = vsyncpa [#allocation5 + $0x1], 1 }
 0x87a   :  { %5029 = vsyncpa [#allocation6], 1 }
 0x87b   :  { %5031 = vsyncpa [#allocation6 + $0x1], 1 }

// kernel: tpu_custom_call.1
= control target key start
LH: loop header
LB: loop body
LE: loop exit
PB: predicated region body
PF: predicated region fallthrough
CT: control target
= control target key end

     0   :  { %15 = vsyncpa [#allocation5], 0  ;;  %s8272_s0 = inlined_call_operand.vmem [shape: bf16[512,32], index: 0, kind: input, shape index: {}]   ;;  %s8273_s1 = inlined_call_operand.hbm [shape: bf16[512,512], index: 1, kind: input, shape index: {}]   ;;  %s8274_s2 = inlined_call_operand.vmem [shape: bf16[32,64], index: 2, kind: input, shape index: {}]   ;;  %s8275_s3 = inlined_call_operand.vmem [shape: f32[1,64], index: 3, kind: input, shape index: {}]   ;;  %s8276_s4 = inlined_call_operand.vmem [shape: bf16[64,16], index: 4, kind: input, shape index: {}]   ;;  %s8277_s5 = inlined_call_operand.vmem [shape: f32[1,16], index: 5, kind: input, shape index: {}]   ;;  %s8278_s6 = inlined_call_operand.vmem [shape: bf16[32,128], index: 6, kind: input, shape index: {}]   ;;  %s8279_s7 = inlined_call_operand.vmem [shape: bf16[64,128], index: 7, kind: input, shape index: {}]   ;;  %s8280_s8 = inlined_call_operand.vmem [shape: bf16[16,128], index: 8, kind: input, shape index: {}]   ;;  %s8281_s9 = inlined_call_operand.vmem [shape: f32[1,128], index: 9, kind: input, shape index: {}]   ;;  %s8282_s10 = inlined_call_operand.hbm [shape: f32[512,128], index: 10, kind: output, shape index: {}]  }
   0x1   :  { %16 = vsyncpa [#allocation6], 0 }
   0x2   :  { %18 = vsyncpa [#allocation6 + $0x1], 0  ;;  %s7015_s13 = smov 0   ;;  %s7017_s14 = smov 0  }
   0x3   :  { %s7019_s15 = smov 0   ;;  %s7021_s16 = smov 0  }
   0x4 LB: > { %s7036_s17 = sadd.s32 4294967295, %s6951_s16   ;;  %s5073_s18 = sadd.s32 4294967294, %s6951_s16   ;;  %s6951_s16 = sphi %s7021_s16, %s8299_s16   ;;  %s6947_s15 = sphi %s7019_s15, %s8298_s15   ;;  %s6943_s14 = sphi %s7017_s14, %s8297_s14   ;;  %s6939_s13 = sphi %s7015_s13, %s8296_s13  }
   0x5   : > { %s7040_s19 = sadd.s32 1, %s6951_s16   ;;  %s241_s20 = sadd.s32 1, %s6947_s15 }
   0x6   : > { %s238_s21 = ssub.s32 %s6951_s16, %s7040_s19  ;;  %p251_p0 = scmp.ne.s32.totalorder %s6947_s15, %s6943_s14 }
   0x7   : > { %p239_p1 = scmp.eq.s32.totalorder %s238_s21, 0  ;;  %p252_p2 = scmp.eq.s32.totalorder %s7036_s17, 1 }
   0x8   : > { %p257_p3 = scmp.ne.s32.totalorder %s6943_s14, %s6939_s13  ;;  %p258_p4 = scmp.eq.s32.totalorder %s5073_s18, 1 }
   0x9   : > { %s7051_s22 = scalar_select %p239_p1, %s6947_s15, %s241_s20  }
   0xa   : > { %p7053_p5 = por %p252_p2, %p251_p0  ;;  %p7057_p6 = por %p258_p4, %p257_p3 }
   0xb   : > { %p5074_p7 = scmp.ge.s32.totalorder %s6951_s16, 1  ;;  %p265_p8 = scmp.lt.s32.totalorder %s6951_s16, 3 }
   0xc   : > { %s8286_s23 = scalar_select %p7053_p5, 1, 0 }
   0xd   : > { %s8287_s24 = scalar_select %p7057_p6, 1, 0 }
   0xe   : > { %p8283_p10 = scmp.eq.s32.totalorder %s7036_s17, 0  ;;  %p7065_p11 = pnand %p5074_p7, %p265_p8 }
   0xf   : > { %s6953_s26 = smov [#allocation4]   ;;  %s6857_s11 = scalar_lea.hbm %s8273_s1, 16384 }
  0x10   : > { %s8288_s25 = scalar_select %p7065_p11, 1, 0 }
  0x11   : > { %s280_s27 = sshll.u32 %s6953_s26, 4  ;;  %p6331_p12 = pneg %p7065_p11  ;;  %s281_s27 = int_to_ptr.vmem [resolvable:$true] %s280_s27 }
  0x12   : > { %p6858_p0 = scmp.ne.s32.totalorder %s8273_s1, %s6857_s11  ;;  %p6864_p4 = scmp.lt.u32.totalorder %s6857_s11, %s8273_s1 }
  0x13   : > { %p7073_p13 = pnand %p8283_p10, %p6331_p12 }
  0x15   : > { %p6859_p1 = pneg %p7073_p13 }
  0x17   : > { %p6860_p2 = pnand %p6859_p1, %p6858_p0 }
  0x19   : > { %p6861_p3 = pneg %p6860_p2 }
  0x1b   : > { %p6866_p7 = pnand %p6864_p4, %p6861_p3 }
  0x1d   : > { %6869 = shalt.err (!%p6866_p7)
}
  0x1e   : > { %s6870_s26 = scalar_lea.vmem %s281_s27, 16384  ;;  %p6878_p10 = scmp.lt.s32.totalorder %s281_s27, %s281_s27 }
  0x1f   : > { %p6871_p8 = scmp.ne.s32.totalorder %s281_s27, %s6870_s26  ;;  %p6879_p6 = scmp.lt.s32.totalorder %s6870_s26, %s6870_s26 }
  0x21   : > { %p6873_p12 = pnand %p6871_p8, %p6859_p1  ;;  %p6880_p5 = por %p6879_p6, %p6878_p10 }
  0x23   : > { %p6874_p9 = pneg %p6873_p12 }
  0x25   : > { %p6881_p11 = pnand %p6880_p5, %p6874_p9 }
  0x27   : > { %6884 = shalt.err (!%p6881_p11)
}
  0x28   : > { %s6954_s29 = smov 256   ;;  %s6955_s30 = smov 16  }
  0x29   : > { %6334 = dma.hbm_to_vmem [thread:$0]  (!%p7073_p13), %s8273_s1, 16384, %s281_s27, [#allocation5], %s6954_s29, %s6954_s29, %s6955_s30  }
  0x2a   : > { %p8290_p0 = scmp.ne.s32.totalorder %s8288_s25, 0 }
  0x2b   : > { %p8291_p2 = scmp.eq.s32.totalorder (!%p8290_p0), %s7036_s17, 0 }
  0x2c   : > { %320 = sbr.rel (%p8290_p0) target bundleno = 2153 (0x869), region = 60 }
  0x33   : > { %6930 = dma.done.wait (%p8291_p2), [#allocation5], 16384   ;;  %p8292_p1 = pmov %p8291_p2 }
  0x34   : > { %s350_s11 = sand.u32 1, %s6943_s14   ;;  %s5079_s20 = sshll.u32 %s7036_s17, 8 }
  0x35   : > { %6932 = vsyncadd (%p8292_p1), [#allocation5], 4294950912  ;;  %s5078_s28 = sshll.u32 %s350_s11, 8  ;;  %p8293_p5 = scmp.ne.s32.totalorder %s7036_s17, 0 }
  0x36   : > { %s7103_s21 = scalar_lea.vmem [#allocation7], %s5078_s28  ;;  %v6380_v0 = vld [vmem:[%s8274_s2] sm:$0xff] (!%p8293_p5)   ;;  %v6381_v1 = vld [vmem:[%s8274_s2 + $0x8] sm:$0xff] (!%p8293_p5)   ;;  %vm600_vm0 = vcmask (!%p8293_p5), 261120   ;;  %v6384_v4 = vld [vmem:[%s8272_s0 + $0x10] sm:$0xff] (!%p8293_p5)   ;;  %v6956_v27 = vmov (!%p8293_p5), 0  }
  0x37   : > { %359 = sbr.rel (%p8293_p5) target bundleno = 1133 (0x46d), region = 68  ;;  %5809 = vmatprep.subr.bf16.mxu0 (!%p8293_p5), %v6380_v0  ;;  %v6382_v2 = vld [vmem:[%s8272_s0] sm:$0xff] (!%p8293_p5)   ;;  %v6383_v3 = vld [vmem:[%s8272_s0 + $0x8] sm:$0xff] (!%p8293_p5)   ;;  %v6385_v5 = vld [vmem:[%s8272_s0 + $0x18] sm:$0xff] (!%p8293_p5)   ;;  %6059 = vmatprep.subr.bf16.mxu1 (!%p8293_p5), %v6956_v27  ;;  %vm2467_vm1 = vcmask (!%p8293_p5), 523264   ;;  %vm2949_vm2 = vcmask (!%p8293_p5), 130048  }
  0x38   : > { %5810 = vmatpush3.bf16.msra.mxu0 (!%p8293_p5), %v6380_v0  ;;  %5813 = vmatprep.mubr.msk.bf16.mxu0 (!%p8293_p5), %vm600_vm0, %v6382_v2  ;;  %v6386_v6 = vld [vmem:[%s8272_s0 + $0x20] sm:$0xff] (!%p8293_p5)   ;;  %v6387_v7 = vld [vmem:[%s8272_s0 + $0x28] sm:$0xff] (!%p8293_p5)   ;;  %v6388_v8 = vld [vmem:[%s8272_s0 + $0x30] sm:$0xff] (!%p8293_p5)  }
  0x39   : > { %5811 = vmatprep.subr.bf16.mxu0 (!%p8293_p5), %v6381_v1  ;;  %v6389_v9 = vld [vmem:[%s8272_s0 + $0x38] sm:$0xff] (!%p8293_p5)   ;;  %v6390_v10 = vld [vmem:[%s8272_s0 + $0x40] sm:$0xff] (!%p8293_p5)   ;;  %v6391_v11 = vld [vmem:[%s8272_s0 + $0x48] sm:$0xff] (!%p8293_p5)  }
  0x3a   : > { %v6392_v12 = vld [vmem:[%s8272_s0 + $0x50] sm:$0xff] (!%p8293_p5)   ;;  %v6393_v13 = vld [vmem:[%s8272_s0 + $0x58] sm:$0xff] (!%p8293_p5)   ;;  %v6394_v14 = vld [vmem:[%s8272_s0 + $0x60] sm:$0xff] (!%p8293_p5)  }
  0x3b   : > { %v6395_v15 = vld [vmem:[%s8272_s0 + $0x68] sm:$0xff] (!%p8293_p5)   ;;  %v6396_v16 = vld [vmem:[%s8272_s0 + $0x70] sm:$0xff] (!%p8293_p5)   ;;  %v6397_v17 = vld [vmem:[%s8272_s0 + $0x78] sm:$0xff] (!%p8293_p5)  }
  0x3c   : > { %5812 = vmatpush3.bf16.msra.mxu0 (!%p8293_p5), %v6381_v1  ;;  %v6398_v18 = vld [vmem:[%s8272_s0 + $0x80] sm:$0xff] (!%p8293_p5)   ;;  %v6399_v19 = vld [vmem:[%s8272_s0 + $0x88] sm:$0xff] (!%p8293_p5)   ;;  %v6400_v20 = vld [vmem:[%s8272_s0 + $0x90] sm:$0xff] (!%p8293_p5)  }
  0x3d   : > { %v6401_v21 = vld [vmem:[%s8272_s0 + $0x98] sm:$0xff] (!%p8293_p5)   ;;  %v6402_v22 = vld [vmem:[%s8272_s0 + $0xa0] sm:$0xff] (!%p8293_p5)   ;;  %v6403_v23 = vld [vmem:[%s8272_s0 + $0xa8] sm:$0xff] (!%p8293_p5)   ;;  %1793 = vmatprep.subr.bf16.mxu0 (!%p8293_p5), %v6956_v27 }
  0x3e   : > { %v6404_v24 = vld [vmem:[%s8272_s0 + $0xb0] sm:$0xff]   ;;  %v6405_v25 = vld [vmem:[%s8272_s0 + $0xb8] sm:$0xff]   ;;  %v6406_v26 = vld [vmem:[%s8272_s0 + $0xc0] sm:$0xff]  }
  0x3f   : > { %5814 = vmatmul.mubr.msk.bf16.vlgmr.msra.gmra.mrb[0].mxu0 %vm600_vm0, %v6383_v3  ;;  %v6407_v28 = vld [vmem:[%s8272_s0 + $0xc8] sm:$0xff]   ;;  %v6408_v29 = vld [vmem:[%s8272_s0 + $0xd0] sm:$0xff]   ;;  %v6409_v30 = vld [vmem:[%s8272_s0 + $0xd8] sm:$0xff]  }
  0x40   : > { %5817 = vmatprep.mubr.msk.bf16.mxu0 %vm600_vm0, %v6384_v4  ;;  %v6410_v31 = vld [vmem:[%s8272_s0 + $0xe0] sm:$0xff]   ;;  %v6411_v32 = vld [vmem:[%s8272_s0 + $0xe8] sm:$0xff]   ;;  %v6412_v33 = vld [vmem:[%s8272_s0 + $0xf0] sm:$0xff]  }
  0x41   : > { %v6413_v34 = vld [vmem:[%s8272_s0 + $0xf8] sm:$0xff]   ;;  %v6416_v35 = vld [vmem:[#allocation4 + $0x264] ss:$16 sps:$4 sm:$0xff]  }
  0x42   : > { %1977 = vmatprep.mubr.bf16.mxu1 %v6416_v35  ;;  %v6455_v2 = vld [vmem:[#allocation4 + $0x4] ss:$16 sps:$4 sm:$0xff]   ;;  %v6461_v35 = vld [vmem:[#allocation4 + $0x20] ss:$16 sps:$4 sm:$0xff]  }
  0x47   : > { %5818 = vmatmul.mubr.msk.bf16.gmra.mrb[4].mxu0 %vm600_vm0, %v6385_v5 }
  0x48   : > { %5821 = vmatprep.mubr.msk.bf16.mxu0 %vm600_vm0, %v6386_v6 }
  0x4f   : > { %5822 = vmatmul.mubr.msk.bf16.gmra.mrb[8].mxu0 %vm600_vm0, %v6387_v7 }
  0x50   : > { %5825 = vmatprep.mubr.msk.bf16.mxu0 %vm600_vm0, %v6388_v8 }
  0x57   : > { %5826 = vmatmul.mubr.msk.bf16.gmra.mrb[12].mxu0 %vm600_vm0, %v6389_v9 }
  0x58   : > { %5829 = vmatprep.mubr.msk.bf16.mxu0 %vm600_vm0, %v6390_v10 }
  0x5f   : > { %5830 = vmatmul.mubr.msk.bf16.gmra.mrb[16].mxu0 %vm600_vm0, %v6391_v11 }
  0x60   : > { %5833 = vmatprep.mubr.msk.bf16.mxu0 %vm600_vm0, %v6392_v12 }
  0x67   : > { %5834 = vmatmul.mubr.msk.bf16.gmra.mrb[20].mxu0 %vm600_vm0, %v6393_v13 }
  0x68   : > { %5837 = vmatprep.mubr.msk.bf16.mxu0 %vm600_vm0, %v6394_v14 }
  0x6f   : > { %5838 = vmatmul.mubr.msk.bf16.gmra.mrb[24].mxu0 %vm600_vm0, %v6395_v15 }
  0x70   : > { %5841 = vmatprep.mubr.msk.bf16.mxu0 %vm600_vm0, %v6396_v16 }
  0x77   : > { %5842 = vmatmul.mubr.msk.bf16.gmra.mrb[28].mxu0 %vm600_vm0, %v6397_v17 }
  0x78   : > { %5845 = vmatprep.mubr.msk.bf16.mxu0 %vm600_vm0, %v6398_v18 }
  0x7f   : > { %5846 = vmatmul.mubr.msk.bf16.gmra.mrb[32].mxu0 %vm600_vm0, %v6399_v19 }
  0x80   : > { %5849 = vmatprep.mubr.msk.bf16.mxu0 %vm600_vm0, %v6400_v20 }
  0x87   : > { %5850 = vmatmul.mubr.msk.bf16.gmra.mrb[36].mxu0 %vm600_vm0, %v6401_v21 }
  0x88   : > { %5853 = vmatprep.mubr.msk.bf16.mxu0 %vm600_vm0, %v6402_v22 }
  0x8f   : > { %5854 = vmatmul.mubr.msk.bf16.gmra.mrb[40].mxu0 %vm600_vm0, %v6403_v23  ;;  %v6414_v23 = vld [vmem:[#allocation4 + $0x260] ss:$16 sps:$4 sm:$0xff]  }
  0x90   : > { %5857 = vmatprep.mubr.msk.bf16.mxu0 %vm600_vm0, %v6404_v24  ;;  %v6453_v24 = vld [vmem:[#allocation4] ss:$16 sps:$4 sm:$0xff]  }
  0x97   : > { %5858 = vmatmul.mubr.msk.bf16.gmra.mrb[44].mxu0 %vm600_vm0, %v6405_v25 }
  0x98   : > { %5861 = vmatprep.mubr.msk.bf16.mxu0 %vm600_vm0, %v6406_v26  ;;  %v6417_v26 = vld [vmem:[#allocation4 + $0x284] ss:$16 sps:$4 sm:$0xff]  }
  0x9f   : > { %5862 = vmatmul.mubr.msk.bf16.gmra.mrb[48].mxu0 %vm600_vm0, %v6407_v28 }
  0xa0   : > { %5865 = vmatprep.mubr.msk.bf16.mxu0 %vm600_vm0, %v6408_v29 }
  0xa7   : > { %5866 = vmatmul.mubr.msk.bf16.gmra.mrb[52].mxu0 %vm600_vm0, %v6409_v30  ;;  %v6459_v30 = vld [vmem:[#allocation4 + $0x24] ss:$16 sps:$4 sm:$0xff]  }
  0xa8   : > { %5869 = vmatprep.mubr.msk.bf16.mxu0 %vm600_vm0, %v6410_v31 }
  0xaf   : > { %5870 = vmatmul.mubr.msk.bf16.gmra.mrb[56].mxu0 %vm600_vm0, %v6411_v32 }
  0xb0   : > { %5873 = vmatprep.mubr.msk.bf16.mxu0 %vm600_vm0, %v6412_v33 }
  0xb7   : > { %5874 = vmatmul.mubr.msk.bf16.gmra.mrb[60].mxu0 %vm600_vm0, %v6413_v34  ;;  %v6419_v34 = vld [vmem:[#allocation4 + $0x280] ss:$16 sps:$4 sm:$0xff]  }
  0xb8   : > { %1825 = vmatprep.mubr.bf16.mxu0 %v6455_v2  ;;  %v6429_v2 = vld [vmem:[#allocation4 + $0x304] ss:$16 sps:$4 sm:$0xff]  }
 0x112   : > { %v5815_v36 = vpop.f32.mrb[0].mxu0 }
 0x113   : > { %v731_v37 = vpop.f32.mrb[1].mxu0 }
 0x114   : > { %v5816_v38 = vpop.f32.mrb[2].mxu0 }
 0x115   : > { %v1115_v39 = vpack.c.bf16 %v5816_v38, %v5815_v36  ;;  %v734_v40 = vpop.f32.mrb[3].mxu0 }
 0x116   : > { %v1114_v41 = vpack.c.bf16 %v734_v40, %v731_v37  ;;  %v6420_v37 = vld [vmem:[#allocation4 + $0x2a4] ss:$16 sps:$4 sm:$0xff]  }
 0x117   : > { %v6465_v40 = vld [vmem:[#allocation4 + $0x44] ss:$16 sps:$4 sm:$0xff]  }
 0x118   : > { %1794 = vmatpush1.bf16.msra.mxu0 %v1114_v41  ;;  %6075 = vmatpush1.bf16.msra.mxu1 %v1114_v41 }
 0x119   : > { %1795 = vmatprep.subr.bf16.mxu0 %v6956_v27  ;;  %6060 = vmatprep.subr.bf16.mxu1 %v6956_v27 }
 0x11a   : > { %v5819_v42 = vpop.f32.mrb[4].mxu0 }
 0x11b   : > { %v747_v43 = vpop.f32.mrb[5].mxu0 }
 0x11c   : > { %v5820_v44 = vpop.f32.mrb[6].mxu0  ;;  %1796 = vmatpush1.bf16.msra.mxu0 %v1115_v39  ;;  %6076 = vmatpush1.bf16.msra.mxu1 %v1115_v39 }
 0x11d   : > { %v1117_v45 = vpack.c.bf16 %v5820_v44, %v5819_v42  ;;  %v750_v46 = vpop.f32.mrb[7].mxu0  ;;  %1797 = vmatprep.subr.bf16.mxu0 %v6956_v27  ;;  %6061 = vmatprep.subr.bf16.mxu1 %v6956_v27  ;;  %v6422_v44 = vld [vmem:[#allocation4 + $0x2a0] ss:$16 sps:$4 sm:$0xff]  }
 0x11e   : > { %v1116_v47 = vpack.c.bf16 %v750_v46, %v747_v43 }
 0x120   : > { %1798 = vmatpush1.bf16.msra.mxu0 %v1116_v47  ;;  %6077 = vmatpush1.bf16.msra.mxu1 %v1116_v47  ;;  %v6423_v47 = vld [vmem:[#allocation4 + $0x2c4] ss:$16 sps:$4 sm:$0xff]  }
 0x121   : > { %1799 = vmatprep.subr.bf16.mxu0 %v6956_v27  ;;  %6062 = vmatprep.subr.bf16.mxu1 %v6956_v27 }
 0x122   : > { %v5823_v48 = vpop.f32.mrb[8].mxu0 }
 0x123   : > { %v763_v49 = vpop.f32.mrb[9].mxu0 }
 0x124   : > { %v5824_v50 = vpop.f32.mrb[10].mxu0  ;;  %1800 = vmatpush1.bf16.msra.mxu0 %v1117_v45  ;;  %6078 = vmatpush1.bf16.msra.mxu1 %v1117_v45  ;;  %v6467_v45 = vld [vmem:[#allocation4 + $0x40] ss:$16 sps:$4 sm:$0xff]  }
 0x125   : > { %v1119_v51 = vpack.c.bf16 %v5824_v50, %v5823_v48  ;;  %v766_v52 = vpop.f32.mrb[11].mxu0  ;;  %1801 = vmatprep.subr.bf16.mxu0 %v6956_v27  ;;  %6063 = vmatprep.subr.bf16.mxu1 %v6956_v27  ;;  %v6471_v50 = vld [vmem:[#allocation4 + $0x64] ss:$16 sps:$4 sm:$0xff]  }
 0x126   : > { %v1118_v53 = vpack.c.bf16 %v766_v52, %v763_v49 }
 0x128   : > { %1802 = vmatpush1.bf16.msra.mxu0 %v1118_v53  ;;  %6079 = vmatpush1.bf16.msra.mxu1 %v1118_v53  ;;  %v6425_v53 = vld [vmem:[#allocation4 + $0x2c0] ss:$16 sps:$4 sm:$0xff]  }
 0x129   : > { %1803 = vmatprep.subr.bf16.mxu0 %v6956_v27  ;;  %6064 = vmatprep.subr.bf16.mxu1 %v6956_v27 }
 0x12a   : > { %v5827_v54 = vpop.f32.mrb[12].mxu0 }
 0x12b   : > { %v779_v55 = vpop.f32.mrb[13].mxu0 }
 0x12c   : > { %v5828_v56 = vpop.f32.mrb[14].mxu0  ;;  %1804 = vmatpush1.bf16.msra.mxu0 %v1119_v51  ;;  %6080 = vmatpush1.bf16.msra.mxu1 %v1119_v51 }
 0x12d   : > { %v1121_v57 = vpack.c.bf16 %v5828_v56, %v5827_v54  ;;  %v782_v58 = vpop.f32.mrb[15].mxu0  ;;  %1805 = vmatprep.subr.bf16.mxu0 %v6956_v27  ;;  %6065 = vmatprep.subr.bf16.mxu1 %v6956_v27 }
 0x12e   : > { %v1120_v59 = vpack.c.bf16 %v782_v58, %v779_v55  ;;  %v6473_v55 = vld [vmem:[#allocation4 + $0x60] ss:$16 sps:$4 sm:$0xff]  }
 0x130   : > { %1806 = vmatpush1.bf16.msra.mxu0 %v1120_v59  ;;  %6081 = vmatpush1.bf16.msra.mxu1 %v1120_v59 }
 0x131   : > { %1807 = vmatprep.subr.bf16.mxu0 %v6956_v27  ;;  %6066 = vmatprep.subr.bf16.mxu1 %v6956_v27 }
 0x132   : > { %v5831_v60 = vpop.f32.mrb[16].mxu0 }
 0x133   : > { %v795_v61 = vpop.f32.mrb[17].mxu0 }
 0x134   : > { %v5832_v62 = vpop.f32.mrb[18].mxu0  ;;  %1808 = vmatpush1.bf16.msra.mxu0 %v1121_v57  ;;  %6082 = vmatpush1.bf16.msra.mxu1 %v1121_v57  ;;  %v6426_v57 = vld [vmem:[#allocation4 + $0x2e4] ss:$16 sps:$4 sm:$0xff]  }
 0x135   : > { %v1123_v63 = vpack.c.bf16 %v5832_v62, %v5831_v60  ;;  %v798_v0 = vpop.f32.mrb[19].mxu0  ;;  %1809 = vmatprep.subr.bf16.mxu0 %v6956_v27  ;;  %6067 = vmatprep.subr.bf16.mxu1 %v6956_v27  ;;  %v6477_v60 = vld [vmem:[#allocation4 + $0x84] ss:$16 sps:$4 sm:$0xff]  }
 0x136   : > { %v1122_v1 = vpack.c.bf16 %v798_v0, %v795_v61 }
 0x138   : > { %1810 = vmatpush1.bf16.msra.mxu0 %v1122_v1  ;;  %6083 = vmatpush1.bf16.msra.mxu1 %v1122_v1  ;;  %v6479_v1 = vld [vmem:[#allocation4 + $0x80] ss:$16 sps:$4 sm:$0xff]  }
 0x139   : > { %1811 = vmatprep.subr.bf16.mxu0 %v6956_v27  ;;  %6068 = vmatprep.subr.bf16.mxu1 %v6956_v27 }
 0x13a   : > { %v5835_v3 = vpop.f32.mrb[20].mxu0 }
 0x13b   : > { %v811_v4 = vpop.f32.mrb[21].mxu0 }
 0x13c   : > { %v5836_v5 = vpop.f32.mrb[22].mxu0  ;;  %1812 = vmatpush1.bf16.msra.mxu0 %v1123_v63  ;;  %6084 = vmatpush1.bf16.msra.mxu1 %v1123_v63  ;;  %v6428_v63 = vld [vmem:[#allocation4 + $0x2e0] ss:$16 sps:$4 sm:$0xff]  }
 0x13d   : > { %v1125_v6 = vpack.c.bf16 %v5836_v5, %v5835_v3  ;;  %v814_v7 = vpop.f32.mrb[23].mxu0  ;;  %1813 = vmatprep.subr.bf16.mxu0 %v6956_v27  ;;  %6069 = vmatprep.subr.bf16.mxu1 %v6956_v27 }
 0x13e   : > { %v1124_v8 = vpack.c.bf16 %v814_v7, %v811_v4 }
 0x140   : > { %1814 = vmatpush1.bf16.msra.mxu0 %v1124_v8  ;;  %6085 = vmatpush1.bf16.msra.mxu1 %v1124_v8 }
 0x141   : > { %1815 = vmatprep.subr.bf16.mxu0 %v6956_v27  ;;  %6070 = vmatprep.subr.bf16.mxu1 %v6956_v27 }
 0x142   : > { %v5839_v9 = vpop.f32.mrb[24].mxu0 }
 0x143   : > { %v827_v10 = vpop.f32.mrb[25].mxu0 }
 0x144   : > { %v5840_v11 = vpop.f32.mrb[26].mxu0  ;;  %1816 = vmatpush1.bf16.msra.mxu0 %v1125_v6  ;;  %6086 = vmatpush1.bf16.msra.mxu1 %v1125_v6  ;;  %v6483_v6 = vld [vmem:[#allocation4 + $0xa4] ss:$16 sps:$4 sm:$0xff]  }
 0x145   : > { %v1127_v12 = vpack.c.bf16 %v5840_v11, %v5839_v9  ;;  %v830_v13 = vpop.f32.mrb[27].mxu0  ;;  %1817 = vmatprep.subr.bf16.mxu0 %v6956_v27  ;;  %6071 = vmatprep.subr.bf16.mxu1 %v6956_v27  ;;  %v6431_v9 = vld [vmem:[#allocation4 + $0x300] ss:$16 sps:$4 sm:$0xff]  }
 0x146   : > { %v1126_v14 = vpack.c.bf16 %v830_v13, %v827_v10  ;;  %v6485_v11 = vld [vmem:[#allocation4 + $0xa0] ss:$16 sps:$4 sm:$0xff]  }
 0x148   : > { %1818 = vmatpush1.bf16.msra.mxu0 %v1126_v14  ;;  %6087 = vmatpush1.bf16.msra.mxu1 %v1126_v14 }
 0x149   : > { %1819 = vmatprep.subr.bf16.mxu0 %v6956_v27  ;;  %6072 = vmatprep.subr.bf16.mxu1 %v6956_v27 }
 0x14a   : > { %v5843_v15 = vpop.f32.mrb[28].mxu0 }
 0x14b   : > { %v843_v16 = vpop.f32.mrb[29].mxu0 }
 0x14c   : > { %v5844_v17 = vpop.f32.mrb[30].mxu0  ;;  %1820 = vmatpush1.bf16.msra.mxu0 %v1127_v12  ;;  %6088 = vmatpush1.bf16.msra.mxu1 %v1127_v12  ;;  %v6432_v12 = vld [vmem:[#allocation4 + $0x324] ss:$16 sps:$4 sm:$0xff]  }
 0x14d   : > { %v1129_v18 = vpack.c.bf16 %v5844_v17, %v5843_v15  ;;  %v846_v19 = vpop.f32.mrb[31].mxu0  ;;  %1821 = vmatprep.subr.bf16.mxu0 %v6956_v27  ;;  %6073 = vmatprep.subr.bf16.mxu1 %v6956_v27 }
 0x14e   : > { %v1128_v20 = vpack.c.bf16 %v846_v19, %v843_v16  ;;  %v6489_v16 = vld [vmem:[#allocation4 + $0xc4] ss:$16 sps:$4 sm:$0xff]   ;;  %v6434_v19 = vld [vmem:[#allocation4 + $0x320] ss:$16 sps:$4 sm:$0xff]  }
 0x150   : > { %1822 = vmatpush1.bf16.msra.mxu0 %v1128_v20  ;;  %6089 = vmatpush1.bf16.msra.mxu1 %v1128_v20 }
 0x151   : > { %1823 = vmatprep.subr.bf16.mxu0 %v6956_v27  ;;  %6074 = vmatprep.subr.bf16.mxu1 %v6956_v27 }
 0x152   : > { %v5847_v21 = vpop.f32.mrb[32].mxu0 }
 0x153   : > { %v859_v22 = vpop.f32.mrb[33].mxu0 }
 0x154   : > { %v5848_v25 = vpop.f32.mrb[34].mxu0  ;;  %1824 = vmatpush1.bf16.msra.mxu0 %v1129_v18  ;;  %6090 = vmatpush1.bf16.msra.mxu1 %v1129_v18 }
 0x155   : > { %v1131_v28 = vpack.c.bf16 %v5848_v25, %v5847_v21  ;;  %v862_v29 = vpop.f32.mrb[35].mxu0  ;;  %2082 = vmatprep.subr.bf16.mxu1 %v6956_v27  ;;  %v6491_v21 = vld [vmem:[#allocation4 + $0xc0] ss:$16 sps:$4 sm:$0xff]  }
 0x156   : > { %v1130_v31 = vpack.c.bf16 %v862_v29, %v859_v22  ;;  %v6435_v22 = vld [vmem:[#allocation4 + $0x344] ss:$16 sps:$4 sm:$0xff]  }
 0x157   : > { %1978 = vmatmul.mubr.bf16.vlgmr.msra.gmra.mrb[0].mxu1 %v6414_v23  ;;  %1826 = vmatmul.mubr.bf16.vlgmr.msra.gmra.mrb[64].mxu0 %v6453_v24 }
 0x158   : > { %2083 = vmatpush1.bf16.msra.mxu1 %v1130_v31  ;;  %1985 = vmatprep.mubr.bf16.mxu1 %v6417_v26  ;;  %v6495_v26 = vld [vmem:[#allocation4 + $0xe4] ss:$16 sps:$4 sm:$0xff]  }
 0x159   : > { %2084 = vmatprep.subr.bf16.mxu1 %v6956_v27  ;;  %1833 = vmatprep.mubr.bf16.mxu0 %v6459_v30  ;;  %v6437_v30 = vld [vmem:[#allocation4 + $0x340] ss:$16 sps:$4 sm:$0xff]  }
 0x15a   : > { %v5851_v32 = vpop.f32.mrb[36].mxu0 }
 0x15b   : > { %v875_v33 = vpop.f32.mrb[37].mxu0 }
 0x15c   : > { %v5852_v36 = vpop.f32.mrb[38].mxu0  ;;  %2085 = vmatpush1.bf16.msra.mxu1 %v1131_v28 }
 0x15d   : > { %v1133_v38 = vpack.c.bf16 %v5852_v36, %v5851_v32  ;;  %v878_v39 = vpop.f32.mrb[39].mxu0  ;;  %2086 = vmatprep.subr.bf16.mxu1 %v6956_v27  ;;  %v6497_v32 = vld [vmem:[#allocation4 + $0xe0] ss:$16 sps:$4 sm:$0xff]  }
 0x15e   : > { %v1132_v41 = vpack.c.bf16 %v878_v39, %v875_v33  ;;  %v6438_v33 = vld [vmem:[#allocation4 + $0x364] ss:$16 sps:$4 sm:$0xff]   ;;  %v6440_v39 = vld [vmem:[#allocation4 + $0x360] ss:$16 sps:$4 sm:$0xff]  }
 0x15f   : > { %1986 = vmatmul.mubr.bf16.gmra.mrb[4].mxu1 %v6419_v34  ;;  %1834 = vmatmul.mubr.bf16.gmra.mrb[68].mxu0 %v6461_v35 }
 0x160   : > { %2087 = vmatpush1.bf16.msra.mxu1 %v1132_v41  ;;  %1993 = vmatprep.mubr.bf16.mxu1 %v6420_v37  ;;  %v6501_v37 = vld [vmem:[#allocation4 + $0x104] ss:$16 sps:$4 sm:$0xff]  }
 0x161   : > { %2088 = vmatprep.subr.bf16.mxu1 %v6956_v27  ;;  %1841 = vmatprep.mubr.bf16.mxu0 %v6465_v40  ;;  %v6503_v40 = vld [vmem:[#allocation4 + $0x100] ss:$16 sps:$4 sm:$0xff]   ;;  %v6441_v41 = vld [vmem:[#allocation4 + $0x384] ss:$16 sps:$4 sm:$0xff]  }
 0x162   : > { %v5855_v42 = vpop.f32.mrb[40].mxu0 }
 0x163   : > { %v891_v43 = vpop.f32.mrb[41].mxu0 }
 0x164   : > { %2089 = vmatpush1.bf16.msra.mxu1 %v1133_v38  ;;  %v5856_v46 = vpop.f32.mrb[42].mxu0 }
 0x165   : > { %v1135_v48 = vpack.c.bf16 %v5856_v46, %v5855_v42  ;;  %v894_v49 = vpop.f32.mrb[43].mxu0  ;;  %2090 = vmatprep.subr.bf16.mxu1 %v6956_v27  ;;  %v6507_v42 = vld [vmem:[#allocation4 + $0x124] ss:$16 sps:$4 sm:$0xff]  }
 0x166   : > { %v1134_v51 = vpack.c.bf16 %v894_v49, %v891_v43  ;;  %v6443_v43 = vld [vmem:[#allocation4 + $0x380] ss:$16 sps:$4 sm:$0xff]   ;;  %v6513_v46 = vld [vmem:[#allocation4 + $0x144] ss:$16 sps:$4 sm:$0xff]  }
 0x167   : > { %1994 = vmatmul.mubr.bf16.gmra.mrb[8].mxu1 %v6422_v44  ;;  %1842 = vmatmul.mubr.bf16.gmra.mrb[72].mxu0 %v6467_v45  ;;  %v6509_v44 = vld [vmem:[#allocation4 + $0x120] ss:$16 sps:$4 sm:$0xff]   ;;  %v6444_v45 = vld [vmem:[#allocation4 + $0x3a4] ss:$16 sps:$4 sm:$0xff]  }
 0x168   : > { %2091 = vmatpush1.bf16.msra.mxu1 %v1134_v51  ;;  %2001 = vmatprep.mubr.bf16.mxu1 %v6423_v47  ;;  %v6446_v47 = vld [vmem:[#allocation4 + $0x3a0] ss:$16 sps:$4 sm:$0xff]   ;;  %v6519_v49 = vld [vmem:[#allocation4 + $0x164] ss:$16 sps:$4 sm:$0xff]  }
 0x169   : > { %2092 = vmatprep.subr.bf16.mxu1 %v6956_v27  ;;  %1849 = vmatprep.mubr.bf16.mxu0 %v6471_v50  ;;  %v6449_v50 = vld [vmem:[#allocation4 + $0x3c0] ss:$16 sps:$4 sm:$0xff]  }
 0x16a   : > { %v5859_v52 = vpop.f32.mrb[44].mxu0  ;;  %v6521_v51 = vld [vmem:[#allocation4 + $0x160] ss:$16 sps:$4 sm:$0xff]  }
 0x16b   : > { %v907_v54 = vpop.f32.mrb[45].mxu0 }
 0x16c   : > { %2093 = vmatpush1.bf16.msra.mxu1 %v1135_v48  ;;  %v5860_v56 = vpop.f32.mrb[46].mxu0  ;;  %v6447_v48 = vld [vmem:[#allocation4 + $0x3c4] ss:$16 sps:$4 sm:$0xff]  }
 0x16d   : > { %v1137_v58 = vpack.c.bf16 %v5860_v56, %v5859_v52  ;;  %v910_v59 = vpop.f32.mrb[47].mxu0  ;;  %2094 = vmatprep.subr.bf16.mxu1 %v6956_v27  ;;  %v6450_v52 = vld [vmem:[#allocation4 + $0x3e4] ss:$16 sps:$4 sm:$0xff]   ;;  %v6458_v56 = vld [vmem:[#allocation4 + $0xc] ss:$16 sps:$4 sm:$0xff]  }
 0x16e   : > { %v1136_v61 = vpack.c.bf16 %v910_v59, %v907_v54  ;;  %v6452_v54 = vld [vmem:[#allocation4 + $0x3e0] ss:$16 sps:$4 sm:$0xff]  }
 0x16f   : > { %2002 = vmatmul.mubr.bf16.gmra.mrb[12].mxu1 %v6425_v53  ;;  %1850 = vmatmul.mubr.bf16.gmra.mrb[76].mxu0 %v6473_v55  ;;  %v6525_v53 = vld [vmem:[#allocation4 + $0x184] ss:$16 sps:$4 sm:$0xff]   ;;  %v6527_v55 = vld [vmem:[#allocation4 + $0x180] ss:$16 sps:$4 sm:$0xff]  }
 0x170   : > { %2009 = vmatprep.mubr.bf16.mxu1 %v6426_v57  ;;  %2095 = vmatpush1.bf16.msra.mxu1 %v1136_v61  ;;  %v6531_v57 = vld [vmem:[#allocation4 + $0x1a4] ss:$16 sps:$4 sm:$0xff]   ;;  %v6533_v59 = vld [vmem:[#allocation4 + $0x1a0] ss:$16 sps:$4 sm:$0xff]  }
 0x171   : > { %2096 = vmatprep.subr.bf16.mxu1 %v6956_v27  ;;  %1857 = vmatprep.mubr.bf16.mxu0 %v6477_v60  ;;  %v6462_v60 = vld [vmem:[#allocation4 + $0x2c] ss:$16 sps:$4 sm:$0xff]   ;;  %v6537_v61 = vld [vmem:[#allocation4 + $0x1c4] ss:$16 sps:$4 sm:$0xff]  }
 0x172   : > { %v5863_v62 = vpop.f32.mrb[48].mxu0 }
 0x173   : > { %v923_v0 = vpop.f32.mrb[49].mxu0 }
 0x174   : > { %2097 = vmatpush1.bf16.msra.mxu1 %v1137_v58  ;;  %v5864_v3 = vpop.f32.mrb[50].mxu0  ;;  %v6456_v58 = vld [vmem:[#allocation4 + $0x8] ss:$16 sps:$4 sm:$0xff]  }
 0x175   : > { %v1139_v4 = vpack.c.bf16 %v5864_v3, %v5863_v62  ;;  %v926_v5 = vpop.f32.mrb[51].mxu0  ;;  %2098 = vmatprep.subr.bf16.mxu1 %v6956_v27  ;;  %v6464_v62 = vld [vmem:[#allocation4 + $0x28] ss:$16 sps:$4 sm:$0xff]   ;;  %v6545_v3 = vld [vmem:[#allocation4 + $0x1e0] ss:$16 sps:$4 sm:$0xff]  }
 0x176   : > { %v1138_v7 = vpack.c.bf16 %v926_v5, %v923_v0  ;;  %v6468_v0 = vld [vmem:[#allocation4 + $0x4c] ss:$16 sps:$4 sm:$0xff]   ;;  %v6549_v5 = vld [vmem:[#allocation4 + $0x204] ss:$16 sps:$4 sm:$0xff]  }
 0x177   : > { %2010 = vmatmul.mubr.bf16.gmra.mrb[16].mxu1 %v6428_v63  ;;  %1858 = vmatmul.mubr.bf16.gmra.mrb[80].mxu0 %v6479_v1  ;;  %v6539_v63 = vld [vmem:[#allocation4 + $0x1c0] ss:$16 sps:$4 sm:$0xff]   ;;  %v6543_v1 = vld [vmem:[#allocation4 + $0x1e4] ss:$16 sps:$4 sm:$0xff]  }
 0x178   : > { %2017 = vmatprep.mubr.bf16.mxu1 %v6429_v2  ;;  %2099 = vmatpush1.bf16.msra.mxu1 %v1138_v7  ;;  %v6470_v2 = vld [vmem:[#allocation4 + $0x48] ss:$16 sps:$4 sm:$0xff]   ;;  %v6551_v7 = vld [vmem:[#allocation4 + $0x200] ss:$16 sps:$4 sm:$0xff]  }
 0x179   : > { %2100 = vmatprep.subr.bf16.mxu1 %v6956_v27  ;;  %1865 = vmatprep.mubr.bf16.mxu0 %v6483_v6  ;;  %v6476_v6 = vld [vmem:[#allocation4 + $0x68] ss:$16 sps:$4 sm:$0xff]  }
 0x17a   : > { %v5867_v8 = vpop.f32.mrb[52].mxu0 }
 0x17b   : > { %v939_v10 = vpop.f32.mrb[53].mxu0 }
 0x17c   : > { %2101 = vmatpush1.bf16.msra.mxu1 %v1139_v4  ;;  %v5868_v13 = vpop.f32.mrb[54].mxu0  ;;  %v6474_v4 = vld [vmem:[#allocation4 + $0x6c] ss:$16 sps:$4 sm:$0xff]  }
 0x17d   : > { %v1141_v14 = vpack.c.bf16 %v5868_v13, %v5867_v8  ;;  %v942_v15 = vpop.f32.mrb[55].mxu0  ;;  %2102 = vmatprep.subr.bf16.mxu1 %v6956_v27  ;;  %v6480_v8 = vld [vmem:[#allocation4 + $0x8c] ss:$16 sps:$4 sm:$0xff]   ;;  %v6561_v13 = vld [vmem:[#allocation4 + $0x244] ss:$16 sps:$4 sm:$0xff]  }
 0x17e   : > { %v1140_v17 = vpack.c.bf16 %v942_v15, %v939_v10  ;;  %v6482_v10 = vld [vmem:[#allocation4 + $0x88] ss:$16 sps:$4 sm:$0xff]   ;;  %v6563_v15 = vld [vmem:[#allocation4 + $0x240] ss:$16 sps:$4 sm:$0xff]  }
 0x17f   : > { %2018 = vmatmul.mubr.bf16.gmra.mrb[20].mxu1 %v6431_v9  ;;  %1866 = vmatmul.mubr.bf16.gmra.mrb[84].mxu0 %v6485_v11  ;;  %v6555_v9 = vld [vmem:[#allocation4 + $0x224] ss:$16 sps:$4 sm:$0xff]   ;;  %v6557_v11 = vld [vmem:[#allocation4 + $0x220] ss:$16 sps:$4 sm:$0xff]  }
 0x180   : > { %2025 = vmatprep.mubr.bf16.mxu1 %v6432_v12  ;;  %2103 = vmatpush1.bf16.msra.mxu1 %v1140_v17  ;;  %v6486_v12 = vld [vmem:[#allocation4 + $0xac] ss:$16 sps:$4 sm:$0xff]   ;;  %v6494_v17 = vld [vmem:[#allocation4 + $0xc8] ss:$16 sps:$4 sm:$0xff]  }
 0x181   : > { %2104 = vmatprep.subr.bf16.mxu1 %v6956_v27  ;;  %1873 = vmatprep.mubr.bf16.mxu0 %v6489_v16  ;;  %v6492_v16 = vld [vmem:[#allocation4 + $0xcc] ss:$16 sps:$4 sm:$0xff]  }
 0x182   : > { %v5871_v18 = vpop.f32.mrb[56].mxu0 }
 0x183   : > { %v955_v20 = vpop.f32.mrb[57].mxu0 }
 0x184   : > { %2105 = vmatpush1.bf16.msra.mxu1 %v1141_v14  ;;  %v5872_v23 = vpop.f32.mrb[58].mxu0  ;;  %v6488_v14 = vld [vmem:[#allocation4 + $0xa8] ss:$16 sps:$4 sm:$0xff]  }
 0x185   : > { %v1143_v24 = vpack.c.bf16 %v5872_v23, %v5871_v18  ;;  %v958_v25 = vpop.f32.mrb[59].mxu0  ;;  %2106 = vmatprep.subr.bf16.mxu1 %v6956_v27  ;;  %v6498_v18 = vld [vmem:[#allocation4 + $0xec] ss:$16 sps:$4 sm:$0xff]   ;;  %v6585_v23 = vld [vmem:[%s8276_s4] sm:$0xff]  }
 0x186   : > { %v1142_v28 = vpack.c.bf16 %v958_v25, %v955_v20  ;;  %v6504_v20 = vld [vmem:[#allocation4 + $0x10c] ss:$16 sps:$4 sm:$0xff]   ;;  %5877 = vmatprep.subr.bf16.mxu0 %v6585_v23 }
 0x187   : > { %2026 = vmatmul.mubr.bf16.gmra.mrb[24].mxu1 %v6434_v19  ;;  %1874 = vmatmul.mubr.bf16.gmra.mrb[88].mxu0 %v6491_v21  ;;  %v6500_v19 = vld [vmem:[#allocation4 + $0xe8] ss:$16 sps:$4 sm:$0xff]   ;;  %v6516_v25 = vld [vmem:[#allocation4 + $0x14c] ss:$16 sps:$4 sm:$0xff]  }
 0x188   : > { %2033 = vmatprep.mubr.bf16.mxu1 %v6435_v22  ;;  %2107 = vmatpush1.bf16.msra.mxu1 %v1142_v28  ;;  %v6506_v21 = vld [vmem:[#allocation4 + $0x108] ss:$16 sps:$4 sm:$0xff]   ;;  %v6510_v22 = vld [vmem:[#allocation4 + $0x12c] ss:$16 sps:$4 sm:$0xff]  }
 0x189   : > { %2108 = vmatprep.subr.bf16.mxu1 %v6956_v27  ;;  %1881 = vmatprep.mubr.bf16.mxu0 %v6495_v26  ;;  %v6518_v26 = vld [vmem:[#allocation4 + $0x148] ss:$16 sps:$4 sm:$0xff]   ;;  %v6522_v28 = vld [vmem:[#allocation4 + $0x16c] ss:$16 sps:$4 sm:$0xff]  }
 0x18a   : > { %v5875_v29 = vpop.f32.mrb[60].mxu0  ;;  %5878 = vmatpush3.bf16.msra.mxu0 %v6585_v23 }
 0x18b   : > { %v971_v31 = vpop.f32.mrb[61].mxu0 }
 0x18c   : > { %2109 = vmatpush1.bf16.msra.mxu1 %v1143_v24  ;;  %v5876_v34 = vpop.f32.mrb[62].mxu0  ;;  %v6512_v24 = vld [vmem:[#allocation4 + $0x128] ss:$16 sps:$4 sm:$0xff]  }
 0x18d   : > { %v1145_v35 = vpack.c.bf16 %v5876_v34, %v5875_v29  ;;  %v974_v36 = vpop.f32.mrb[63].mxu0  ;;  %2110 = vmatprep.subr.bf16.mxu1 %v6956_v27  ;;  %v6524_v29 = vld [vmem:[#allocation4 + $0x168] ss:$16 sps:$4 sm:$0xff]   ;;  %v6534_v34 = vld [vmem:[#allocation4 + $0x1ac] ss:$16 sps:$4 sm:$0xff]  }
 0x18e   : > { %v1144_v38 = vpack.c.bf16 %v974_v36, %v971_v31  ;;  %v6595_v31 = vld [vmem:[%s8276_s4 + $0x8] sm:$0xff]  }
 0x18f   : > { %2034 = vmatmul.mubr.bf16.gmra.mrb[28].mxu1 %v6437_v30  ;;  %1882 = vmatmul.mubr.bf16.gmra.mrb[92].mxu0 %v6497_v32  ;;  %v6528_v30 = vld [vmem:[#allocation4 + $0x18c] ss:$16 sps:$4 sm:$0xff]   ;;  %v6596_v32 = vld [vmem:[%s8276_s4 + $0x10] sm:$0xff]   ;;  %v6536_v36 = vld [vmem:[#allocation4 + $0x1a8] ss:$16 sps:$4 sm:$0xff]  }
 0x190   : > { %2041 = vmatprep.mubr.bf16.mxu1 %v6438_v33  ;;  %2111 = vmatpush1.bf16.msra.mxu1 %v1144_v38  ;;  %v6530_v33 = vld [vmem:[#allocation4 + $0x188] ss:$16 sps:$4 sm:$0xff]  }
 0x191   : > { %2112 = vmatprep.subr.bf16.mxu1 %v6956_v27  ;;  %1889 = vmatprep.mubr.bf16.mxu0 %v6501_v37  ;;  %v6515_v27 = vld [vmem:[#allocation4 + $0x140] ss:$16 sps:$4 sm:$0xff]   ;;  %v6540_v37 = vld [vmem:[#allocation4 + $0x1cc] ss:$16 sps:$4 sm:$0xff]  }
 0x192   : > { %5879 = vmatprep.subr.bf16.mxu0 %v6595_v31 }
 0x193   : > { %5880 = vmatpush3.bf16.msra.mxu0 %v6595_v31  ;;  %v6582_v31 = vld [vmem:[#allocation4 + $0x30c] ss:$16 sps:$4 sm:$0xff]  }
 0x194   : > { %2113 = vmatpush1.bf16.msra.mxu1 %v1145_v35  ;;  %5881 = vmatprep.subr.bf16.mxu0 %v6596_v32  ;;  %v6600_v35 = vld [vmem:[%s8276_s4 + $0x18] sm:$0xff]  }
 0x197   : > { %2042 = vmatmul.mubr.bf16.gmra.mrb[32].mxu1 %v6440_v39  ;;  %1890 = vmatmul.mubr.bf16.gmra.mrb[96].mxu0 %v6503_v40  ;;  %v6542_v39 = vld [vmem:[#allocation4 + $0x1c8] ss:$16 sps:$4 sm:$0xff]  }
 0x198   : > { %2049 = vmatprep.mubr.bf16.mxu1 %v6441_v41  ;;  %1897 = vmatprep.mubr.bf16.mxu0 %v6507_v42  ;;  %v6546_v41 = vld [vmem:[#allocation4 + $0x1ec] ss:$16 sps:$4 sm:$0xff]  }
 0x199   : > { %5882 = vmatpush3.bf16.msra.mxu0 %v6596_v32 }
 0x19a   : > { %5883 = vmatprep.subr.bf16.mxu0 %v6600_v35 }
 0x19d   : > { %5884 = vmatpush3.bf16.msra.mxu0 %v6600_v35  ;;  %v6584_v35 = vld [vmem:[#allocation4 + $0x308] ss:$16 sps:$4 sm:$0xff]  }
 0x19f   : > { %2050 = vmatmul.mubr.bf16.gmra.mrb[36].mxu1 %v6443_v43  ;;  %1898 = vmatmul.mubr.bf16.gmra.mrb[100].mxu0 %v6509_v44 }
 0x1a0   : > { %2057 = vmatprep.mubr.bf16.mxu1 %v6444_v45  ;;  %1905 = vmatprep.mubr.bf16.mxu0 %v6513_v46  ;;  %v6548_v45 = vld [vmem:[#allocation4 + $0x1e8] ss:$16 sps:$4 sm:$0xff]  }
 0x1a7   : > { %2058 = vmatmul.mubr.bf16.gmra.mrb[40].mxu1 %v6446_v47  ;;  %1906 = vmatmul.mubr.bf16.gmra.mrb[104].mxu0 %v6515_v27  ;;  %v6552_v47 = vld [vmem:[#allocation4 + $0x20c] ss:$16 sps:$4 sm:$0xff]  }
 0x1a8   : > { %2065 = vmatprep.mubr.bf16.mxu1 %v6447_v48  ;;  %1913 = vmatprep.mubr.bf16.mxu0 %v6519_v49 }
 0x1af   : > { %2066 = vmatmul.mubr.bf16.gmra.mrb[44].mxu1 %v6449_v50  ;;  %1914 = vmatmul.mubr.bf16.gmra.mrb[108].mxu0 %v6521_v51  ;;  %v6554_v50 = vld [vmem:[#allocation4 + $0x208] ss:$16 sps:$4 sm:$0xff]  }
 0x1b0   : > { %2073 = vmatprep.mubr.bf16.mxu1 %v6450_v52  ;;  %1921 = vmatprep.mubr.bf16.mxu0 %v6525_v53  ;;  %v6558_v52 = vld [vmem:[#allocation4 + $0x22c] ss:$16 sps:$4 sm:$0xff]  }
 0x1b7   : > { %2074 = vmatmul.mubr.bf16.gmra.mrb[48].mxu1 %v6452_v54  ;;  %1922 = vmatmul.mubr.bf16.gmra.mrb[112].mxu0 %v6527_v55 }
 0x1b8   : > { %2114 = vmatprep.mubr.bf16.mxu1 %v6458_v56  ;;  %1929 = vmatprep.mubr.bf16.mxu0 %v6531_v57  ;;  %v6560_v56 = vld [vmem:[#allocation4 + $0x228] ss:$16 sps:$4 sm:$0xff]  }
 0x1bf   : > { %2115 = vmatmul.mubr.bf16.vlgmr.msra.gmra.mrb[52].mxu1 %v6456_v58  ;;  %1930 = vmatmul.mubr.bf16.gmra.mrb[116].mxu0 %v6533_v59  ;;  %v6564_v58 = vld [vmem:[#allocation4 + $0x24c] ss:$16 sps:$4 sm:$0xff]  }
 0x1c0   : > { %2122 = vmatprep.mubr.bf16.mxu1 %v6462_v60  ;;  %1937 = vmatprep.mubr.bf16.mxu0 %v6537_v61 }
 0x1c7   : > { %2123 = vmatmul.mubr.bf16.gmra.mrb[56].mxu1 %v6464_v62  ;;  %1938 = vmatmul.mubr.bf16.gmra.mrb[120].mxu0 %v6539_v63  ;;  %v6566_v62 = vld [vmem:[#allocation4 + $0x248] ss:$16 sps:$4 sm:$0xff]  }
 0x1c8   : > { %2130 = vmatprep.mubr.bf16.mxu1 %v6468_v0  ;;  %1945 = vmatprep.mubr.bf16.mxu0 %v6543_v1  ;;  %v6567_v0 = vld [vmem:[#allocation4 + $0x26c] ss:$16 sps:$4 sm:$0xff]  }
 0x1cf   : > { %2131 = vmatmul.mubr.bf16.gmra.mrb[60].mxu1 %v6470_v2  ;;  %1946 = vmatmul.mubr.bf16.gmra.mrb[124].mxu0 %v6545_v3 }
 0x1d0   : > { %2138 = vmatprep.mubr.bf16.mxu1 %v6474_v4  ;;  %1953 = vmatprep.mubr.bf16.mxu0 %v6549_v5  ;;  %v6569_v4 = vld [vmem:[#allocation4 + $0x268] ss:$16 sps:$4 sm:$0xff]  }
 0x1d7   : > { %2139 = vmatmul.mubr.bf16.gmra.mrb[64].mxu1 %v6476_v6  ;;  %1954 = vmatmul.mubr.bf16.gmra.mrb[128].mxu0 %v6551_v7  ;;  %v6570_v6 = vld [vmem:[#allocation4 + $0x28c] ss:$16 sps:$4 sm:$0xff]  }
 0x1d8   : > { %2146 = vmatprep.mubr.bf16.mxu1 %v6480_v8  ;;  %1961 = vmatprep.mubr.bf16.mxu0 %v6555_v9 }
 0x1df   : > { %2147 = vmatmul.mubr.bf16.gmra.mrb[68].mxu1 %v6482_v10  ;;  %1962 = vmatmul.mubr.bf16.gmra.mrb[132].mxu0 %v6557_v11  ;;  %v6572_v10 = vld [vmem:[#allocation4 + $0x288] ss:$16 sps:$4 sm:$0xff]  }
 0x1e0   : > { %2154 = vmatprep.mubr.bf16.mxu1 %v6486_v12  ;;  %1969 = vmatprep.mubr.bf16.mxu0 %v6561_v13  ;;  %v6573_v12 = vld [vmem:[#allocation4 + $0x2ac] ss:$16 sps:$4 sm:$0xff]  }
 0x1e7   : > { %2155 = vmatmul.mubr.bf16.gmra.mrb[72].mxu1 %v6488_v14  ;;  %1970 = vmatmul.mubr.bf16.gmra.mrb[136].mxu0 %v6563_v15 }
 0x1e8   : > { %2162 = vmatprep.mubr.bf16.mxu1 %v6492_v16  ;;  %v6575_v16 = vld [vmem:[#allocation4 + $0x2a8] ss:$16 sps:$4 sm:$0xff]  }
 0x1ef   : > { %2163 = vmatmul.mubr.bf16.gmra.mrb[76].mxu1 %v6494_v17 }
 0x1f0   : > { %2170 = vmatprep.mubr.bf16.mxu1 %v6498_v18  ;;  %v6576_v18 = vld [vmem:[#allocation4 + $0x2cc] ss:$16 sps:$4 sm:$0xff]  }
 0x1f7   : > { %2171 = vmatmul.mubr.bf16.gmra.mrb[80].mxu1 %v6500_v19 }
 0x1f8   : > { %2178 = vmatprep.mubr.bf16.mxu1 %v6504_v20 }
 0x1ff   : > { %2179 = vmatmul.mubr.bf16.gmra.mrb[84].mxu1 %v6506_v21 }
 0x200   : > { %2186 = vmatprep.mubr.bf16.mxu1 %v6510_v22  ;;  %v6578_v22 = vld [vmem:[#allocation4 + $0x2c8] ss:$16 sps:$4 sm:$0xff]  }
 0x207   : > { %2187 = vmatmul.mubr.bf16.gmra.mrb[88].mxu1 %v6512_v24  ;;  %v6579_v24 = vld [vmem:[#allocation4 + $0x2ec] ss:$16 sps:$4 sm:$0xff]  }
 0x208   : > { %2194 = vmatprep.mubr.bf16.mxu1 %v6516_v25 }
 0x20f   : > { %2195 = vmatmul.mubr.bf16.gmra.mrb[92].mxu1 %v6518_v26 }
 0x210   : > { %2202 = vmatprep.mubr.bf16.mxu1 %v6522_v28 }
 0x217   : > { %2203 = vmatmul.mubr.bf16.gmra.mrb[96].mxu1 %v6524_v29  ;;  %v6581_v29 = vld [vmem:[#allocation4 + $0x2e8] ss:$16 sps:$4 sm:$0xff]  }
 0x218   : > { %2210 = vmatprep.mubr.bf16.mxu1 %v6528_v30 }
 0x21f   : > { %2211 = vmatmul.mubr.bf16.gmra.mrb[100].mxu1 %v6530_v33 }
 0x220   : > { %2218 = vmatprep.mubr.bf16.mxu1 %v6534_v34 }
 0x227   : > { %2219 = vmatmul.mubr.bf16.gmra.mrb[104].mxu1 %v6536_v36 }
 0x228   : > { %2226 = vmatprep.mubr.bf16.mxu1 %v6540_v37  ;;  %v6586_v37 = vld [vmem:[#allocation4 + $0x32c] ss:$16 sps:$4 sm:$0xff]  }
 0x22a   : > { %v7301_v38 = vpop.f32.mrb[64].mxu0 }
 0x22b   : > { %v1829_v40 = vpop.f32.mrb[65].mxu0 }
 0x22c   : > { %v7303_v42 = vpop.f32.mrb[66].mxu0 }
 0x22d   : > { %v1832_v43 = vpop.f32.mrb[67].mxu0 }
 0x22e   : > { %v6588_v43 = vld [vmem:[#allocation4 + $0x328] ss:$16 sps:$4 sm:$0xff]  }
 0x22f   : > { %2227 = vmatmul.mubr.bf16.gmra.mrb[108].mxu1 %v6542_v39 }
 0x230   : > { %2234 = vmatprep.mubr.bf16.mxu1 %v6546_v41 }
 0x232   : > { %v7305_v44 = vpop.f32.mrb[68].mxu0 }
 0x233   : > { %v1837_v46 = vpop.f32.mrb[69].mxu0 }
 0x234   : > { %v7307_v27 = vpop.f32.mrb[70].mxu0  ;;  %v6589_v46 = vld [vmem:[#allocation4 + $0x34c] ss:$16 sps:$4 sm:$0xff]  }
 0x235   : > { %v1840_v48 = vpop.f32.mrb[71].mxu0 }
 0x237   : > { %2235 = vmatmul.mubr.bf16.gmra.mrb[112].mxu1 %v6548_v45 }
 0x238   : > { %2242 = vmatprep.mubr.bf16.mxu1 %v6552_v47 }
 0x23a   : > { %v7309_v49 = vpop.f32.mrb[72].mxu0 }
 0x23b   : > { %v1845_v51 = vpop.f32.mrb[73].mxu0 }
 0x23c   : > { %v7311_v53 = vpop.f32.mrb[74].mxu0  ;;  %v6591_v51 = vld [vmem:[#allocation4 + $0x348] ss:$16 sps:$4 sm:$0xff]  }
 0x23d   : > { %v1848_v54 = vpop.f32.mrb[75].mxu0 }
 0x23e   : > { %v7354_v54 = vld [vmem:[%s8275_s3] ss:$0 sm:$0xff] }
 0x23f   : > { %2243 = vmatmul.mubr.bf16.gmra.mrb[116].mxu1 %v6554_v50 }
 0x240   : > { %2250 = vmatprep.mubr.bf16.mxu1 %v6558_v52 }
 0x242   : > { %v7313_v55 = vpop.f32.mrb[76].mxu0 }
 0x243   : > { %v1853_v57 = vpop.f32.mrb[77].mxu0 }
 0x244   : > { %v7315_v59 = vpop.f32.mrb[78].mxu0 }
 0x245   : > { %v1856_v60 = vpop.f32.mrb[79].mxu0 }
 0x246   : > { %v1828_v60 = vadd.f32 %v7354_v54, %v7301_v38 }
 0x247   : > { %2251 = vmatmul.mubr.bf16.gmra.mrb[120].mxu1 %v6560_v56  ;;  %v6592_v56 = vld [vmem:[#allocation4 + $0x36c] ss:$16 sps:$4 sm:$0xff]  }
 0x248   : > { %2258 = vmatprep.mubr.bf16.mxu1 %v6564_v58 }
 0x24a   : > { %v7317_v61 = vpop.f32.mrb[80].mxu0 }
 0x24b   : > { %v1861_v63 = vpop.f32.mrb[81].mxu0 }
 0x24c   : > { %v7319_v1 = vpop.f32.mrb[82].mxu0 }
 0x24d   : > { %v1864_v2 = vpop.f32.mrb[83].mxu0 }
 0x24f   : > { %2259 = vmatmul.mubr.bf16.gmra.mrb[124].mxu1 %v6566_v62  ;;  %v1831_v62 = vadd.f32 %v7354_v54, %v7303_v42  ;;  %v1836_v42 = vadd.f32 %v7354_v54, %v7305_v44 }
 0x250   : > { %2266 = vmatprep.mubr.bf16.mxu1 %v6567_v0 }
 0x252   : > { %v7321_v3 = vpop.f32.mrb[84].mxu0 }
 0x253   : > { %v1869_v5 = vpop.f32.mrb[85].mxu0 }
 0x254   : > { %v7323_v7 = vpop.f32.mrb[86].mxu0  ;;  %v6594_v5 = vld [vmem:[#allocation4 + $0x368] ss:$16 sps:$4 sm:$0xff]  }
 0x255   : > { %v1872_v8 = vpop.f32.mrb[87].mxu0 }
 0x257   : > { %2267 = vmatmul.mubr.bf16.gmra.mrb[0].mxu1 %v6569_v4 }
 0x258   : > { %2274 = vmatprep.mubr.bf16.mxu1 %v6570_v6 }
 0x25a   : > { %v7325_v9 = vpop.f32.mrb[88].mxu0 }
 0x25b   : > { %v1877_v11 = vpop.f32.mrb[89].mxu0 }
 0x25c   : > { %v7327_v13 = vpop.f32.mrb[90].mxu0 }
 0x25d   : > { %v1880_v14 = vpop.f32.mrb[91].mxu0 }
 0x25f   : > { %2275 = vmatmul.mubr.bf16.gmra.mrb[4].mxu1 %v6572_v10  ;;  %v6597_v10 = vld [vmem:[#allocation4 + $0x38c] ss:$16 sps:$4 sm:$0xff]  }
 0x260   : > { %2282 = vmatprep.mubr.bf16.mxu1 %v6573_v12 }
 0x262   : > { %v7329_v15 = vpop.f32.mrb[92].mxu0 }
 0x263   : > { %v1885_v17 = vpop.f32.mrb[93].mxu0 }
 0x264   : > { %v7331_v19 = vpop.f32.mrb[94].mxu0 }
 0x265   : > { %v1888_v20 = vpop.f32.mrb[95].mxu0 }
 0x266   : > { %v1839_v20 = vadd.f32 %v7354_v54, %v7307_v27 }
 0x267   : > { %2283 = vmatmul.mubr.bf16.gmra.mrb[8].mxu1 %v6575_v16 }
 0x268   : > { %2290 = vmatprep.mubr.bf16.mxu1 %v6576_v18 }
 0x26a   : > { %v7333_v21 = vpop.f32.mrb[96].mxu0 }
 0x26b   : > { %v1893_v23 = vpop.f32.mrb[97].mxu0 }
 0x26c   : > { %v7335_v25 = vpop.f32.mrb[98].mxu0 }
 0x26d   : > { %v1896_v26 = vpop.f32.mrb[99].mxu0 }
 0x26f   : > { %2291 = vmatmul.mubr.bf16.gmra.mrb[12].mxu1 %v6578_v22 }
 0x270   : > { %2298 = vmatprep.mubr.bf16.mxu1 %v6579_v24 }
 0x272   : > { %v7337_v28 = vpop.f32.mrb[100].mxu0 }
 0x273   : > { %v1901_v30 = vpop.f32.mrb[101].mxu0 }
 0x274   : > { %v7339_v32 = vpop.f32.mrb[102].mxu0 }
 0x275   : > { %v1904_v33 = vpop.f32.mrb[103].mxu0 }
 0x276   : > { %v6601_v33 = vld [vmem:[#allocation4 + $0x3ac] ss:$16 sps:$4 sm:$0xff]  }
 0x277   : > { %2299 = vmatmul.mubr.bf16.gmra.mrb[16].mxu1 %v6581_v29  ;;  %v6599_v29 = vld [vmem:[#allocation4 + $0x388] ss:$16 sps:$4 sm:$0xff]  }
 0x278   : > { %2306 = vmatprep.mubr.bf16.mxu1 %v6582_v31 }
 0x27a   : > { %v7341_v34 = vpop.f32.mrb[104].mxu0 }
 0x27b   : > { %v1909_v36 = vpop.f32.mrb[105].mxu0 }
 0x27c   : > { %v7343_v39 = vpop.f32.mrb[106].mxu0 }
 0x27d   : > { %v1912_v40 = vpop.f32.mrb[107].mxu0 }
 0x27f   : > { %2307 = vmatmul.mubr.bf16.gmra.mrb[20].mxu1 %v6584_v35 }
 0x280   : > { %2314 = vmatprep.mubr.bf16.mxu1 %v6586_v37 }
 0x282   : > { %v7345_v41 = vpop.f32.mrb[108].mxu0 }
 0x283   : > { %v1917_v45 = vpop.f32.mrb[109].mxu0 }
 0x284   : > { %v7347_v47 = vpop.f32.mrb[110].mxu0 }
 0x285   : > { %v1920_v48 = vpop.f32.mrb[111].mxu0 }
 0x287   : > { %2315 = vmatmul.mubr.bf16.gmra.mrb[24].mxu1 %v6588_v43  ;;  %v1844_v43 = vadd.f32 %v7354_v54, %v7309_v49 }
 0x288   : > { %2322 = vmatprep.mubr.bf16.mxu1 %v6589_v46  ;;  %v1847_v46 = vadd.f32 %v7354_v54, %v7311_v53 }
 0x28a   : > { %v7349_v50 = vpop.f32.mrb[112].mxu0 }
 0x28b   : > { %v1925_v52 = vpop.f32.mrb[113].mxu0 }
 0x28c   : > { %v7356_v57 = vpop.f32.mrb[114].mxu0 }
 0x28d   : > { %v1928_v58 = vpop.f32.mrb[115].mxu0 }
 0x28e   : > { %v6603_v58 = vld [vmem:[#allocation4 + $0x3a8] ss:$16 sps:$4 sm:$0xff]  }
 0x28f   : > { %2323 = vmatmul.mubr.bf16.gmra.mrb[28].mxu1 %v6591_v51 }
 0x290   : > { %2330 = vmatprep.mubr.bf16.mxu1 %v6592_v56 }
 0x292   : > { %v2116_v63 = vpop.f32.mrb[52].mxu1  ;;  %v7362_v0 = vpop.f32.mrb[116].mxu0 }
 0x293   : > { %v2117_v2 = vadd.f32 %v2116_v63, %v1828_v60  ;;  %v2118_v4 = vpop.f32.mrb[53].mxu1  ;;  %v1933_v6 = vpop.f32.mrb[117].mxu0  ;;  %v6604_v63 = vld [vmem:[#allocation4 + $0x3cc] ss:$16 sps:$4 sm:$0xff]  }
 0x294   : > { %v2119_v8 = vpop.f32.mrb[54].mxu1  ;;  %v7364_v11 = vpop.f32.mrb[118].mxu0 }
 0x295   : > { %v2120_v12 = vadd.f32 %v2119_v8, %v1831_v62  ;;  %v2121_v14 = vpop.f32.mrb[55].mxu1  ;;  %v1936_v16 = vpop.f32.mrb[119].mxu0  ;;  %v2371_v17 = vmax.f32 %v2117_v2, 0.0  ;;  %v1852_v8 = vadd.f32 %v7354_v54, %v7313_v55 }
 0x297   : > { %v2372_v38 = vmax.f32 %v2120_v12, 0.0  ;;  %2331 = vmatmul.mubr.bf16.gmra.mrb[32].mxu1 %v6594_v5  ;;  %v1855_v12 = vadd.f32 %v7354_v54, %v7315_v59 }
 0x298   : > { %2338 = vmatprep.mubr.bf16.mxu1 %v6597_v10 }
 0x299   : > { %v2435_v18 = vpack.c.bf16 %v2372_v38, %v2371_v17 }
 0x29a   : > { %v2124_v22 = vpop.f32.mrb[56].mxu1  ;;  %v7370_v23 = vpop.f32.mrb[120].mxu0 }
 0x29b   : > { %2468 = vst.msk [vmem:[#allocation2] sm:$0xff] %vm2467_vm1, %v2435_v18  ;;  %v2125_v24 = vadd.f32 %v2124_v22, %v1836_v42  ;;  %v2126_v26 = vpop.f32.mrb[57].mxu1  ;;  %5885 = vmatprep.mubr.msk.bf16.mxu0 %vm2467_vm1, %v2435_v18  ;;  %v1941_v30 = vpop.f32.mrb[121].mxu0  ;;  %v6606_v42 = vld [vmem:[#allocation4 + $0x3c8] ss:$16 sps:$4 sm:$0xff]  }
 0x29c   : > { %v2127_v31 = vpop.f32.mrb[58].mxu1  ;;  %v7374_v44 = vpop.f32.mrb[122].mxu0  ;;  %v6607_v22 = vld [vmem:[#allocation4 + $0x3ec] ss:$16 sps:$4 sm:$0xff]  }
 0x29d   : > { %v2128_v35 = vadd.f32 %v2127_v31, %v1839_v20  ;;  %v2129_v36 = vpop.f32.mrb[59].mxu1  ;;  %v1944_v37 = vpop.f32.mrb[123].mxu0  ;;  %v2373_v40 = vmax.f32 %v2125_v24, 0.0  ;;  %v1860_v31 = vadd.f32 %v7354_v54, %v7317_v61 }
 0x29f   : > { %v2374_v27 = vmax.f32 %v2128_v35, 0.0  ;;  %2339 = vmatmul.mubr.bf16.gmra.mrb[36].mxu1 %v6599_v29  ;;  %v1863_v35 = vadd.f32 %v7354_v54, %v7319_v1  ;;  %v1868_v1 = vadd.f32 %v7354_v54, %v7321_v3 }
 0x2a0   : > { %2346 = vmatprep.mubr.bf16.mxu1 %v6601_v33 }
 0x2a1   : > { %v2436_v45 = vpack.c.bf16 %v2374_v27, %v2373_v40 }
 0x2a2   : > { %v2132_v48 = vpop.f32.mrb[60].mxu1  ;;  %v7380_v51 = vpop.f32.mrb[124].mxu0 }
 0x2a3   : > { %2469 = vst.msk [vmem:[#allocation2 + $0x8] sm:$0xff] %vm2467_vm1, %v2436_v45  ;;  %v2133_v52 = vadd.f32 %v2132_v48, %v1844_v43  ;;  %v2134_v56 = vpop.f32.mrb[61].mxu1  ;;  %5886 = vmatmul.mubr.msk.bf16.vlgmr.msra.gmra.mrb[140].mxu0 %vm2467_vm1, %v2436_v45  ;;  %v1949_v60 = vpop.f32.mrb[125].mxu0  ;;  %v6609_v43 = vld [vmem:[#allocation4 + $0x3e8] ss:$16 sps:$4 sm:$0xff]  }
 0x2a4   : > { %v2135_v62 = vpop.f32.mrb[62].mxu1  ;;  %v7384_v2 = vpop.f32.mrb[126].mxu0 }
 0x2a5   : > { %v2136_v49 = vadd.f32 %v2135_v62, %v1847_v46  ;;  %v2137_v4 = vpop.f32.mrb[63].mxu1  ;;  %v1952_v5 = vpop.f32.mrb[127].mxu0  ;;  %v2375_v6 = vmax.f32 %v2133_v52, 0.0 }
 0x2a7   : > { %v2376_v53 = vmax.f32 %v2136_v49, 0.0  ;;  %2347 = vmatmul.mubr.bf16.gmra.mrb[40].mxu1 %v6603_v58 }
 0x2a8   : > { %2354 = vmatprep.mubr.bf16.mxu1 %v6604_v63  ;;  %v1871_v63 = vadd.f32 %v7354_v54, %v7323_v7  ;;  %v1876_v7 = vadd.f32 %v7354_v54, %v7325_v9 }
 0x2a9   : > { %v2437_v10 = vpack.c.bf16 %v2376_v53, %v2375_v6 }
 0x2aa   : > { %v2140_v14 = vpop.f32.mrb[64].mxu1  ;;  %v7390_v16 = vpop.f32.mrb[128].mxu0 }
 0x2ab   : > { %2470 = vst.msk [vmem:[#allocation2 + $0x10] sm:$0xff] %vm2467_vm1, %v2437_v10  ;;  %v2141_v17 = vadd.f32 %v2140_v14, %v1852_v8  ;;  %v2142_v38 = vpop.f32.mrb[65].mxu1  ;;  %5889 = vmatprep.mubr.msk.bf16.mxu0 %vm2467_vm1, %v2437_v10  ;;  %v1957_v18 = vpop.f32.mrb[129].mxu0 }
 0x2ac   : > { %v2143_v20 = vpop.f32.mrb[66].mxu1  ;;  %v7394_v24 = vpop.f32.mrb[130].mxu0  ;;  %v1879_v18 = vadd.f32 %v7354_v54, %v7327_v13 }
 0x2ad   : > { %v2144_v55 = vadd.f32 %v2143_v20, %v1855_v12  ;;  %v2145_v26 = vpop.f32.mrb[67].mxu1  ;;  %v1960_v29 = vpop.f32.mrb[131].mxu0  ;;  %v2377_v30 = vmax.f32 %v2141_v17, 0.0 }
 0x2af   : > { %v2378_v59 = vmax.f32 %v2144_v55, 0.0  ;;  %2355 = vmatmul.mubr.bf16.gmra.mrb[44].mxu1 %v6606_v42 }
 0x2b0   : > { %2362 = vmatprep.mubr.bf16.mxu1 %v6607_v22 }
 0x2b1   : > { %v2438_v33 = vpack.c.bf16 %v2378_v59, %v2377_v30 }
 0x2b2   : > { %v2148_v36 = vpop.f32.mrb[68].mxu1  ;;  %v7400_v37 = vpop.f32.mrb[132].mxu0 }
 0x2b3   : > { %2471 = vst.msk [vmem:[#allocation2 + $0x18] sm:$0xff] %vm2467_vm1, %v2438_v33  ;;  %v2149_v40 = vadd.f32 %v2148_v36, %v1860_v31  ;;  %v2150_v27 = vpop.f32.mrb[69].mxu1  ;;  %5890 = vmatmul.mubr.msk.bf16.gmra.mrb[144].mxu0 %vm2467_vm1, %v2438_v33  ;;  %v1965_v45 = vpop.f32.mrb[133].mxu0  ;;  %v1884_v33 = vadd.f32 %v7354_v54, %v7329_v15 }
 0x2b4   : > { %v2151_v46 = vpop.f32.mrb[70].mxu1  ;;  %v7404_v48 = vpop.f32.mrb[134].mxu0 }
 0x2b5   : > { %v2152_v61 = vadd.f32 %v2151_v46, %v1863_v35  ;;  %v2153_v52 = vpop.f32.mrb[71].mxu1  ;;  %v1968_v56 = vpop.f32.mrb[135].mxu0  ;;  %v2379_v58 = vmax.f32 %v2149_v40, 0.0  ;;  %v1887_v35 = vadd.f32 %v7354_v54, %v7331_v19 }
 0x2b6   : > { %v1892_v52 = vadd.f32 %v7354_v54, %v7333_v21  ;;  %v1895_v56 = vadd.f32 %v7354_v54, %v7335_v25 }
 0x2b7   : > { %v2380_v60 = vmax.f32 %v2152_v61, 0.0  ;;  %2363 = vmatmul.mubr.bf16.gmra.mrb[48].mxu1 %v6609_v43 }
 0x2b9   : > { %v2439_v62 = vpack.c.bf16 %v2380_v60, %v2379_v58 }
 0x2ba   : > { %v2156_v49 = vpop.f32.mrb[72].mxu1  ;;  %v7410_v4 = vpop.f32.mrb[136].mxu0 }
 0x2bb   : > { %2472 = vst.msk [vmem:[#allocation2 + $0x20] sm:$0xff] %vm2467_vm1, %v2439_v62  ;;  %v2157_v5 = vadd.f32 %v2156_v49, %v1868_v1  ;;  %v2158_v6 = vpop.f32.mrb[73].mxu1  ;;  %5893 = vmatprep.mubr.msk.bf16.mxu0 %vm2467_vm1, %v2439_v62  ;;  %v1973_v53 = vpop.f32.mrb[137].mxu0 }
 0x2bc   : > { %v2159_v8 = vpop.f32.mrb[74].mxu1  ;;  %v7414_v10 = vpop.f32.mrb[138].mxu0  ;;  %v1900_v6 = vadd.f32 %v7354_v54, %v7337_v28  ;;  %v1903_v53 = vadd.f32 %v7354_v54, %v7339_v32 }
 0x2bd   : > { %v2160_v12 = vadd.f32 %v2159_v8, %v1871_v63  ;;  %v2161_v14 = vpop.f32.mrb[75].mxu1  ;;  %v1976_v3 = vpop.f32.mrb[139].mxu0  ;;  %v2381_v17 = vmax.f32 %v2157_v5, 0.0 }
 0x2bf   : > { %v2382_v38 = vmax.f32 %v2160_v12, 0.0 }
 0x2c1   : > { %v2440_v42 = vpack.c.bf16 %v2382_v38, %v2381_v17 }
 0x2c2   : > { %v2164_v20 = vpop.f32.mrb[76].mxu1 }
 0x2c3   : > { %2473 = vst.msk [vmem:[#allocation2 + $0x28] sm:$0xff] %vm2467_vm1, %v2440_v42  ;;  %v2165_v22 = vadd.f32 %v2164_v20, %v1876_v7  ;;  %v2166_v55 = vpop.f32.mrb[77].mxu1  ;;  %5894 = vmatmul.mubr.msk.bf16.gmra.mrb[148].mxu0 %vm2467_vm1, %v2440_v42  ;;  %v1908_v42 = vadd.f32 %v7354_v54, %v7341_v34 }
 0x2c4   : > { %v2167_v26 = vpop.f32.mrb[78].mxu1 }
 0x2c5   : > { %v2168_v29 = vadd.f32 %v2167_v26, %v1879_v18  ;;  %v2169_v30 = vpop.f32.mrb[79].mxu1  ;;  %v2383_v59 = vmax.f32 %v2165_v22, 0.0  ;;  %v1911_v18 = vadd.f32 %v7354_v54, %v7343_v39 }
 0x2c7   : > { %v2384_v31 = vmax.f32 %v2168_v29, 0.0 }
 0x2c9   : > { %v2441_v9 = vpack.c.bf16 %v2384_v31, %v2383_v59  ;;  %v1916_v31 = vadd.f32 %v7354_v54, %v7345_v41 }
 0x2ca   : > { %v2172_v13 = vpop.f32.mrb[80].mxu1 }
 0x2cb   : > { %2474 = vst.msk [vmem:[#allocation2 + $0x30] sm:$0xff] %vm2467_vm1, %v2441_v9  ;;  %v2173_v36 = vadd.f32 %v2172_v13, %v1884_v33  ;;  %v2174_v40 = vpop.f32.mrb[81].mxu1  ;;  %5897 = vmatprep.mubr.msk.bf16.mxu0 %vm2467_vm1, %v2441_v9  ;;  %v1919_v33 = vadd.f32 %v7354_v54, %v7347_v47 }
 0x2cc   : > { %v2175_v27 = vpop.f32.mrb[82].mxu1 }
 0x2cd   : > { %v2176_v43 = vadd.f32 %v2175_v27, %v1887_v35  ;;  %v2177_v45 = vpop.f32.mrb[83].mxu1  ;;  %v2385_v46 = vmax.f32 %v2173_v36, 0.0 }
 0x2ce   : > { %v1924_v45 = vadd.f32 %v7354_v54, %v7349_v50 }
 0x2cf   : > { %v2386_v61 = vmax.f32 %v2176_v43, 0.0 }
 0x2d1   : > { %v2442_v15 = vpack.c.bf16 %v2386_v61, %v2385_v46  ;;  %v1927_v46 = vadd.f32 %v7354_v54, %v7356_v57 }
 0x2d2   : > { %v2180_v19 = vpop.f32.mrb[84].mxu1 }
 0x2d3   : > { %2475 = vst.msk [vmem:[#allocation2 + $0x38] sm:$0xff] %vm2467_vm1, %v2442_v15  ;;  %v2181_v58 = vadd.f32 %v2180_v19, %v1892_v52  ;;  %v2182_v60 = vpop.f32.mrb[85].mxu1  ;;  %5898 = vmatmul.mubr.msk.bf16.gmra.mrb[152].mxu0 %vm2467_vm1, %v2442_v15 }
 0x2d4   : > { %v2183_v1 = vpop.f32.mrb[86].mxu1 }
 0x2d5   : > { %v2184_v62 = vadd.f32 %v2183_v1, %v1895_v56  ;;  %v2185_v63 = vpop.f32.mrb[87].mxu1  ;;  %v2387_v49 = vmax.f32 %v2181_v58, 0.0  ;;  %v1932_v1 = vadd.f32 %v7354_v54, %v7362_v0 }
 0x2d7   : > { %v2388_v5 = vmax.f32 %v2184_v62, 0.0  ;;  %v1935_v62 = vadd.f32 %v7354_v54, %v7364_v11 }
 0x2d9   : > { %v2443_v21 = vpack.c.bf16 %v2388_v5, %v2387_v49 }
 0x2da   : > { %v2188_v25 = vpop.f32.mrb[88].mxu1 }
 0x2db   : > { %2476 = vst.msk [vmem:[#allocation2 + $0x40] sm:$0xff] %vm2467_vm1, %v2443_v21  ;;  %v2189_v8 = vadd.f32 %v2188_v25, %v1900_v6  ;;  %v2190_v12 = vpop.f32.mrb[89].mxu1  ;;  %5901 = vmatprep.mubr.msk.bf16.mxu0 %vm2467_vm1, %v2443_v21 }
 0x2dc   : > { %v2191_v14 = vpop.f32.mrb[90].mxu1  ;;  %v1943_v12 = vadd.f32 %v7354_v54, %v7374_v44 }
 0x2dd   : > { %v2192_v3 = vadd.f32 %v2191_v14, %v1903_v53  ;;  %v2193_v17 = vpop.f32.mrb[91].mxu1  ;;  %v2389_v38 = vmax.f32 %v2189_v8, 0.0  ;;  %v1940_v8 = vadd.f32 %v7354_v54, %v7370_v23 }
 0x2df   : > { %v2390_v7 = vmax.f32 %v2192_v3, 0.0 }
 0x2e1   : > { %v2444_v28 = vpack.c.bf16 %v2390_v7, %v2389_v38 }
 0x2e2   : > { %v2196_v32 = vpop.f32.mrb[92].mxu1 }
 0x2e3   : > { %2477 = vst.msk [vmem:[#allocation2 + $0x48] sm:$0xff] %vm2467_vm1, %v2444_v28  ;;  %v2197_v20 = vadd.f32 %v2196_v32, %v1908_v42  ;;  %v2198_v22 = vpop.f32.mrb[93].mxu1  ;;  %5902 = vmatmul.mubr.msk.bf16.gmra.mrb[156].mxu0 %vm2467_vm1, %v2444_v28  ;;  %v1951_v32 = vadd.f32 %v7354_v54, %v7384_v2 }
 0x2e4   : > { %v2199_v55 = vpop.f32.mrb[94].mxu1 }
 0x2e5   : > { %v2200_v26 = vadd.f32 %v2199_v55, %v1911_v18  ;;  %v2201_v29 = vpop.f32.mrb[95].mxu1  ;;  %v2391_v30 = vmax.f32 %v2197_v20, 0.0  ;;  %v1948_v18 = vadd.f32 %v7354_v54, %v7380_v51 }
 0x2e7   : > { %v2392_v59 = vmax.f32 %v2200_v26, 0.0 }
 0x2e9   : > { %v2445_v34 = vpack.c.bf16 %v2392_v59, %v2391_v30 }
 0x2ea   : > { %v2204_v39 = vpop.f32.mrb[96].mxu1 }
 0x2eb   : > { %2478 = vst.msk [vmem:[#allocation2 + $0x50] sm:$0xff] %vm2467_vm1, %v2445_v34  ;;  %v2205_v9 = vadd.f32 %v2204_v39, %v1916_v31  ;;  %v2206_v35 = vpop.f32.mrb[97].mxu1  ;;  %5905 = vmatprep.mubr.msk.bf16.mxu0 %vm2467_vm1, %v2445_v34  ;;  %v1956_v31 = vadd.f32 %v7354_v54, %v7390_v16  ;;  %v1959_v34 = vadd.f32 %v7354_v54, %v7394_v24 }
 0x2ec   : > { %v2207_v13 = vpop.f32.mrb[98].mxu1 }
 0x2ed   : > { %v2208_v36 = vadd.f32 %v2207_v13, %v1919_v33  ;;  %v2209_v40 = vpop.f32.mrb[99].mxu1  ;;  %v2393_v27 = vmax.f32 %v2205_v9, 0.0 }
 0x2ef   : > { %v2394_v43 = vmax.f32 %v2208_v36, 0.0 }
 0x2f1   : > { %v2446_v41 = vpack.c.bf16 %v2394_v43, %v2393_v27  ;;  %v1964_v27 = vadd.f32 %v7354_v54, %v7400_v37  ;;  %v1967_v43 = vadd.f32 %v7354_v54, %v7404_v48 }
 0x2f2   : > { %v2212_v47 = vpop.f32.mrb[100].mxu1 }
 0x2f3   : > { %2479 = vst.msk [vmem:[#allocation2 + $0x58] sm:$0xff] %vm2467_vm1, %v2446_v41  ;;  %v2213_v61 = vadd.f32 %v2212_v47, %v1924_v45  ;;  %v2214_v52 = vpop.f32.mrb[101].mxu1  ;;  %5906 = vmatmul.mubr.msk.bf16.gmra.mrb[160].mxu0 %vm2467_vm1, %v2446_v41 }
 0x2f4   : > { %v2215_v15 = vpop.f32.mrb[102].mxu1 }
 0x2f5   : > { %v2216_v56 = vadd.f32 %v2215_v15, %v1927_v46  ;;  %v2217_v19 = vpop.f32.mrb[103].mxu1  ;;  %v2395_v58 = vmax.f32 %v2213_v61, 0.0 }
 0x2f6   : > { %v1975_v19 = vadd.f32 %v7354_v54, %v7414_v10 }
 0x2f7   : > { %v2396_v60 = vmax.f32 %v2216_v56, 0.0  ;;  %v1972_v56 = vadd.f32 %v7354_v54, %v7410_v4 }
 0x2f9   : > { %v2447_v50 = vpack.c.bf16 %v2396_v60, %v2395_v58 }
 0x2fa   : > { %v2220_v57 = vpop.f32.mrb[104].mxu1 }
 0x2fb   : > { %2480 = vst.msk [vmem:[#allocation2 + $0x60] sm:$0xff] %vm2467_vm1, %v2447_v50  ;;  %v2221_v63 = vadd.f32 %v2220_v57, %v1932_v1  ;;  %v2222_v49 = vpop.f32.mrb[105].mxu1  ;;  %5909 = vmatprep.mubr.msk.bf16.mxu0 %vm2467_vm1, %v2447_v50 }
 0x2fc   : > { %v2223_v5 = vpop.f32.mrb[106].mxu1 }
 0x2fd   : > { %v2224_v6 = vadd.f32 %v2223_v5, %v1935_v62  ;;  %v2225_v21 = vpop.f32.mrb[107].mxu1  ;;  %v2397_v53 = vmax.f32 %v2221_v63, 0.0 }
 0x2ff   : > { %v2398_v25 = vmax.f32 %v2224_v6, 0.0 }
 0x301   : > { %v2448_v0 = vpack.c.bf16 %v2398_v25, %v2397_v53 }
 0x302   : > { %v2228_v11 = vpop.f32.mrb[108].mxu1 }
 0x303   : > { %2481 = vst.msk [vmem:[#allocation2 + $0x68] sm:$0xff] %vm2467_vm1, %v2448_v0  ;;  %v2229_v14 = vadd.f32 %v2228_v11, %v1940_v8  ;;  %v2230_v3 = vpop.f32.mrb[109].mxu1  ;;  %5910 = vmatmul.mubr.msk.bf16.gmra.mrb[164].mxu0 %vm2467_vm1, %v2448_v0 }
 0x304   : > { %v2231_v17 = vpop.f32.mrb[110].mxu1 }
 0x305   : > { %v2232_v38 = vadd.f32 %v2231_v17, %v1943_v12  ;;  %v2233_v7 = vpop.f32.mrb[111].mxu1  ;;  %v2399_v42 = vmax.f32 %v2229_v14, 0.0 }
 0x307   : > { %v2400_v28 = vmax.f32 %v2232_v38, 0.0 }
 0x309   : > { %v2449_v23 = vpack.c.bf16 %v2400_v28, %v2399_v42 }
 0x30a   : > { %v2236_v44 = vpop.f32.mrb[112].mxu1 }
 0x30b   : > { %2482 = vst.msk [vmem:[#allocation2 + $0x70] sm:$0xff] %vm2467_vm1, %v2449_v23  ;;  %v2237_v20 = vadd.f32 %v2236_v44, %v1948_v18  ;;  %v2238_v22 = vpop.f32.mrb[113].mxu1  ;;  %5913 = vmatprep.mubr.msk.bf16.mxu0 %vm2467_vm1, %v2449_v23 }
 0x30c   : > { %v2239_v55 = vpop.f32.mrb[114].mxu1 }
 0x30d   : > { %v2240_v26 = vadd.f32 %v2239_v55, %v1951_v32  ;;  %v2241_v29 = vpop.f32.mrb[115].mxu1  ;;  %v2401_v30 = vmax.f32 %v2237_v20, 0.0 }
 0x30f   : > { %v2402_v59 = vmax.f32 %v2240_v26, 0.0 }
 0x311   : > { %v2450_v51 = vpack.c.bf16 %v2402_v59, %v2401_v30 }
 0x312   : > { %v2244_v2 = vpop.f32.mrb[116].mxu1 }
 0x313   : > { %2483 = vst.msk [vmem:[#allocation2 + $0x78] sm:$0xff] %vm2467_vm1, %v2450_v51  ;;  %v2245_v33 = vadd.f32 %v2244_v2, %v1956_v31  ;;  %v2246_v39 = vpop.f32.mrb[117].mxu1  ;;  %5914 = vmatmul.mubr.msk.bf16.gmra.mrb[168].mxu0 %vm2467_vm1, %v2450_v51 }
 0x314   : > { %v2247_v9 = vpop.f32.mrb[118].mxu1 }
 0x315   : > { %v2248_v35 = vadd.f32 %v2247_v9, %v1959_v34  ;;  %v2249_v13 = vpop.f32.mrb[119].mxu1  ;;  %v2403_v36 = vmax.f32 %v2245_v33, 0.0 }
 0x317   : > { %v2404_v40 = vmax.f32 %v2248_v35, 0.0 }
 0x319   : > { %v2451_v16 = vpack.c.bf16 %v2404_v40, %v2403_v36 }
 0x31a   : > { %v2252_v24 = vpop.f32.mrb[120].mxu1 }
 0x31b   : > { %2484 = vst.msk [vmem:[#allocation2 + $0x80] sm:$0xff] %vm2467_vm1, %v2451_v16  ;;  %v2253_v45 = vadd.f32 %v2252_v24, %v1964_v27  ;;  %v2254_v41 = vpop.f32.mrb[121].mxu1  ;;  %5917 = vmatprep.mubr.msk.bf16.mxu0 %vm2467_vm1, %v2451_v16 }
 0x31c   : > { %v2255_v46 = vpop.f32.mrb[122].mxu1 }
 0x31d   : > { %v2256_v47 = vadd.f32 %v2255_v46, %v1967_v43  ;;  %v2257_v61 = vpop.f32.mrb[123].mxu1  ;;  %v2405_v52 = vmax.f32 %v2253_v45, 0.0 }
 0x31f   : > { %v2406_v15 = vmax.f32 %v2256_v47, 0.0 }
 0x321   : > { %v2452_v37 = vpack.c.bf16 %v2406_v15, %v2405_v52 }
 0x322   : > { %v2260_v48 = vpop.f32.mrb[124].mxu1 }
 0x323   : > { %2485 = vst.msk [vmem:[#allocation2 + $0x88] sm:$0xff] %vm2467_vm1, %v2452_v37  ;;  %v2261_v58 = vadd.f32 %v2260_v48, %v1972_v56  ;;  %v2262_v60 = vpop.f32.mrb[125].mxu1  ;;  %5918 = vmatmul.mubr.msk.bf16.gmra.mrb[172].mxu0 %vm2467_vm1, %v2452_v37 }
 0x324   : > { %v2263_v1 = vpop.f32.mrb[126].mxu1 }
 0x325   : > { %v2264_v50 = vadd.f32 %v2263_v1, %v1975_v19  ;;  %v2265_v62 = vpop.f32.mrb[127].mxu1  ;;  %v2407_v57 = vmax.f32 %v2261_v58, 0.0 }
 0x327   : > { %v2408_v63 = vmax.f32 %v2264_v50, 0.0 }
 0x329   : > { %v2453_v49 = vpack.c.bf16 %v2408_v63, %v2407_v57 }
 0x32a   : > { %v2268_v5 = vpop.f32.mrb[0].mxu1 }
 0x32b   : > { %2486 = vst.msk [vmem:[#allocation2 + $0x90] sm:$0xff] %vm2467_vm1, %v2453_v49  ;;  %v6167_v4 = vadd.f32 %v7354_v54, %v2268_v5  ;;  %v2270_v6 = vpop.f32.mrb[1].mxu1  ;;  %5921 = vmatprep.mubr.msk.bf16.mxu0 %vm2467_vm1, %v2453_v49 }
 0x32c   : > { %v2271_v10 = vpop.f32.mrb[2].mxu1 }
 0x32d   : > { %v6168_v21 = vadd.f32 %v7354_v54, %v2271_v10  ;;  %v2273_v53 = vpop.f32.mrb[3].mxu1  ;;  %v2409_v25 = vmax.f32 %v6167_v4, 0.0 }
 0x32f   : > { %v2410_v8 = vmax.f32 %v6168_v21, 0.0 }
 0x331   : > { %v2454_v0 = vpack.c.bf16 %v2410_v8, %v2409_v25 }
 0x332   : > { %v2276_v12 = vpop.f32.mrb[4].mxu1 }
 0x333   : > { %2487 = vst.msk [vmem:[#allocation2 + $0x98] sm:$0xff] %vm2467_vm1, %v2454_v0  ;;  %v6169_v11 = vadd.f32 %v7354_v54, %v2276_v12  ;;  %v2278_v14 = vpop.f32.mrb[5].mxu1  ;;  %5922 = vmatmul.mubr.msk.bf16.gmra.mrb[176].mxu0 %vm2467_vm1, %v2454_v0 }
 0x334   : > { %v2279_v3 = vpop.f32.mrb[6].mxu1 }
 0x335   : > { %v6170_v17 = vadd.f32 %v7354_v54, %v2279_v3  ;;  %v2281_v38 = vpop.f32.mrb[7].mxu1  ;;  %v2411_v7 = vmax.f32 %v6169_v11, 0.0 }
 0x337   : > { %v2412_v42 = vmax.f32 %v6170_v17, 0.0 }
 0x339   : > { %v2455_v28 = vpack.c.bf16 %v2412_v42, %v2411_v7 }
 0x33a   : > { %v2284_v18 = vpop.f32.mrb[8].mxu1 }
 0x33b   : > { %2488 = vst.msk [vmem:[#allocation2 + $0xa0] sm:$0xff] %vm2467_vm1, %v2455_v28  ;;  %v6171_v23 = vadd.f32 %v7354_v54, %v2284_v18  ;;  %v2286_v32 = vpop.f32.mrb[9].mxu1  ;;  %5925 = vmatprep.mubr.msk.bf16.mxu0 %vm2467_vm1, %v2455_v28 }
 0x33c   : > { %v2287_v44 = vpop.f32.mrb[10].mxu1 }
 0x33d   : > { %v6172_v20 = vadd.f32 %v7354_v54, %v2287_v44  ;;  %v2289_v22 = vpop.f32.mrb[11].mxu1  ;;  %v2413_v55 = vmax.f32 %v6171_v23, 0.0 }
 0x33f   : > { %v2414_v26 = vmax.f32 %v6172_v20, 0.0 }
 0x341   : > { %v2456_v29 = vpack.c.bf16 %v2414_v26, %v2413_v55 }
 0x342   : > { %v2292_v30 = vpop.f32.mrb[12].mxu1 }
 0x343   : > { %2489 = vst.msk [vmem:[#allocation2 + $0xa8] sm:$0xff] %vm2467_vm1, %v2456_v29  ;;  %v6173_v59 = vadd.f32 %v7354_v54, %v2292_v30  ;;  %v2294_v31 = vpop.f32.mrb[13].mxu1  ;;  %5926 = vmatmul.mubr.msk.bf16.gmra.mrb[180].mxu0 %vm2467_vm1, %v2456_v29 }
 0x344   : > { %v2295_v51 = vpop.f32.mrb[14].mxu1 }
 0x345   : > { %v6174_v34 = vadd.f32 %v7354_v54, %v2295_v51  ;;  %v2297_v2 = vpop.f32.mrb[15].mxu1  ;;  %v2415_v33 = vmax.f32 %v6173_v59, 0.0 }
 0x347   : > { %v2416_v39 = vmax.f32 %v6174_v34, 0.0 }
 0x349   : > { %v2457_v9 = vpack.c.bf16 %v2416_v39, %v2415_v33 }
 0x34a   : > { %v2300_v35 = vpop.f32.mrb[16].mxu1 }
 0x34b   : > { %2490 = vst.msk [vmem:[#allocation2 + $0xb0] sm:$0xff] %vm2467_vm1, %v2457_v9  ;;  %v6175_v13 = vadd.f32 %v7354_v54, %v2300_v35  ;;  %v2302_v36 = vpop.f32.mrb[17].mxu1  ;;  %5929 = vmatprep.mubr.msk.bf16.mxu0 %vm2467_vm1, %v2457_v9 }
 0x34c   : > { %v2303_v40 = vpop.f32.mrb[18].mxu1 }
 0x34d   : > { %v6176_v27 = vadd.f32 %v7354_v54, %v2303_v40  ;;  %v2305_v16 = vpop.f32.mrb[19].mxu1  ;;  %v2417_v43 = vmax.f32 %v6175_v13, 0.0 }
 0x34f   : > { %v2418_v24 = vmax.f32 %v6176_v27, 0.0 }
 0x351   : > { %v2458_v45 = vpack.c.bf16 %v2418_v24, %v2417_v43 }
 0x352   : > { %v2308_v41 = vpop.f32.mrb[20].mxu1 }
 0x353   : > { %2491 = vst.msk [vmem:[#allocation2 + $0xb8] sm:$0xff] %vm2467_vm1, %v2458_v45  ;;  %v6177_v46 = vadd.f32 %v7354_v54, %v2308_v41  ;;  %v2310_v47 = vpop.f32.mrb[21].mxu1  ;;  %5930 = vmatmul.mubr.msk.bf16.gmra.mrb[184].mxu0 %vm2467_vm1, %v2458_v45 }
 0x354   : > { %v2311_v61 = vpop.f32.mrb[22].mxu1 }
 0x355   : > { %v6178_v52 = vadd.f32 %v7354_v54, %v2311_v61  ;;  %v2313_v15 = vpop.f32.mrb[23].mxu1  ;;  %v2419_v56 = vmax.f32 %v6177_v46, 0.0 }
 0x357   : > { %v2420_v37 = vmax.f32 %v6178_v52, 0.0 }
 0x359   : > { %v2459_v19 = vpack.c.bf16 %v2420_v37, %v2419_v56 }
 0x35a   : > { %v2316_v48 = vpop.f32.mrb[24].mxu1 }
 0x35b   : > { %2492 = vst.msk [vmem:[#allocation2 + $0xc0] sm:$0xff] %vm2467_vm1, %v2459_v19  ;;  %v6179_v58 = vadd.f32 %v7354_v54, %v2316_v48  ;;  %v2318_v60 = vpop.f32.mrb[25].mxu1  ;;  %5933 = vmatprep.mubr.msk.bf16.mxu0 %vm2467_vm1, %v2459_v19 }
 0x35c   : > { %v2319_v1 = vpop.f32.mrb[26].mxu1 }
 0x35d   : > { %v6180_v50 = vadd.f32 %v7354_v54, %v2319_v1  ;;  %v2321_v62 = vpop.f32.mrb[27].mxu1  ;;  %v2421_v57 = vmax.f32 %v6179_v58, 0.0 }
 0x35f   : > { %v2422_v63 = vmax.f32 %v6180_v50, 0.0 }
 0x361   : > { %v2460_v49 = vpack.c.bf16 %v2422_v63, %v2421_v57 }
 0x362   : > { %v2324_v5 = vpop.f32.mrb[28].mxu1 }
 0x363   : > { %2493 = vst.msk [vmem:[#allocation2 + $0xc8] sm:$0xff] %vm2467_vm1, %v2460_v49  ;;  %v6181_v4 = vadd.f32 %v7354_v54, %v2324_v5  ;;  %v2326_v6 = vpop.f32.mrb[29].mxu1  ;;  %5934 = vmatmul.mubr.msk.bf16.gmra.mrb[188].mxu0 %vm2467_vm1, %v2460_v49 }
 0x364   : > { %v2327_v10 = vpop.f32.mrb[30].mxu1 }
 0x365   : > { %v6182_v21 = vadd.f32 %v7354_v54, %v2327_v10  ;;  %v2329_v53 = vpop.f32.mrb[31].mxu1  ;;  %v2423_v25 = vmax.f32 %v6181_v4, 0.0 }
 0x367   : > { %v2424_v8 = vmax.f32 %v6182_v21, 0.0 }
 0x369   : > { %v2461_v0 = vpack.c.bf16 %v2424_v8, %v2423_v25 }
 0x36a   : > { %v2332_v12 = vpop.f32.mrb[32].mxu1 }
 0x36b   : > { %2494 = vst.msk [vmem:[#allocation2 + $0xd0] sm:$0xff] %vm2467_vm1, %v2461_v0  ;;  %v6183_v11 = vadd.f32 %v7354_v54, %v2332_v12  ;;  %v2334_v14 = vpop.f32.mrb[33].mxu1  ;;  %5937 = vmatprep.mubr.msk.bf16.mxu0 %vm2467_vm1, %v2461_v0 }
 0x36c   : > { %v2335_v3 = vpop.f32.mrb[34].mxu1 }
 0x36d   : > { %v6184_v17 = vadd.f32 %v7354_v54, %v2335_v3  ;;  %v2337_v38 = vpop.f32.mrb[35].mxu1  ;;  %v2425_v7 = vmax.f32 %v6183_v11, 0.0 }
 0x36f   : > { %v2426_v42 = vmax.f32 %v6184_v17, 0.0 }
 0x371   : > { %v2462_v28 = vpack.c.bf16 %v2426_v42, %v2425_v7 }
 0x372   : > { %v2340_v18 = vpop.f32.mrb[36].mxu1 }
 0x373   : > { %2495 = vst.msk [vmem:[#allocation2 + $0xd8] sm:$0xff] %vm2467_vm1, %v2462_v28  ;;  %v6185_v23 = vadd.f32 %v7354_v54, %v2340_v18  ;;  %v2342_v32 = vpop.f32.mrb[37].mxu1  ;;  %5938 = vmatmul.mubr.msk.bf16.gmra.mrb[192].mxu0 %vm2467_vm1, %v2462_v28 }
 0x374   : > { %v2343_v44 = vpop.f32.mrb[38].mxu1 }
 0x375   : > { %v6186_v20 = vadd.f32 %v7354_v54, %v2343_v44  ;;  %v2345_v22 = vpop.f32.mrb[39].mxu1  ;;  %v2427_v26 = vmax.f32 %v6185_v23, 0.0 }
 0x376   : > { %v5887_v55 = vpop.f32.mrb[140].mxu0 }
 0x377   : > { %v2428_v29 = vmax.f32 %v6186_v20, 0.0  ;;  %v2662_v30 = vpop.f32.mrb[141].mxu0 }
 0x378   : > { %v5888_v59 = vpop.f32.mrb[142].mxu0 }
 0x379   : > { %v2463_v31 = vpack.c.bf16 %v2428_v29, %v2427_v26  ;;  %v2918_v51 = vpack.c.bf16 %v5888_v59, %v5887_v55  ;;  %v2665_v34 = vpop.f32.mrb[143].mxu0 }
 0x37a   : > { %v2917_v2 = vpack.c.bf16 %v2665_v34, %v2662_v30  ;;  %v2348_v33 = vpop.f32.mrb[40].mxu1 }
 0x37b   : > { %2496 = vst.msk [vmem:[#allocation2 + $0xe0] sm:$0xff] %vm2467_vm1, %v2463_v31  ;;  %v6187_v39 = vadd.f32 %v7354_v54, %v2348_v33  ;;  %v2350_v9 = vpop.f32.mrb[41].mxu1  ;;  %5941 = vmatprep.mubr.msk.bf16.mxu0 %vm2467_vm1, %v2463_v31 }
 0x37c   : > { %2951 = vst.msk [vmem:[#allocation3 + $0x8] sm:$0xff] %vm2949_vm2, %v2918_v51  ;;  %2950 = vst.msk [vmem:[#allocation3] sm:$0xff] %vm2949_vm2, %v2917_v2  ;;  %v2351_v35 = vpop.f32.mrb[42].mxu1 }
 0x37d   : > { %v6188_v13 = vadd.f32 %v7354_v54, %v2351_v35  ;;  %v2353_v36 = vpop.f32.mrb[43].mxu1  ;;  %v2429_v40 = vmax.f32 %v6187_v39, 0.0 }
 0x37f   : > { %v2430_v27 = vmax.f32 %v6188_v13, 0.0 }
 0x381   : > { %v2464_v16 = vpack.c.bf16 %v2430_v27, %v2429_v40 }
 0x382   : > { %v2356_v43 = vpop.f32.mrb[44].mxu1 }
 0x383   : > { %2497 = vst.msk [vmem:[#allocation2 + $0xe8] sm:$0xff] %vm2467_vm1, %v2464_v16  ;;  %v6189_v24 = vadd.f32 %v7354_v54, %v2356_v43  ;;  %v2358_v45 = vpop.f32.mrb[45].mxu1  ;;  %5942 = vmatmul.mubr.msk.bf16.gmra.mrb[196].mxu0 %vm2467_vm1, %v2464_v16 }
 0x384   : > { %v2359_v41 = vpop.f32.mrb[46].mxu1 }
 0x385   : > { %v6190_v46 = vadd.f32 %v7354_v54, %v2359_v41  ;;  %v2361_v47 = vpop.f32.mrb[47].mxu1  ;;  %v2431_v52 = vmax.f32 %v6189_v24, 0.0 }
 0x386   : > { %v5891_v61 = vpop.f32.mrb[144].mxu0 }
 0x387   : > { %v2432_v15 = vmax.f32 %v6190_v46, 0.0  ;;  %v2678_v56 = vpop.f32.mrb[145].mxu0 }
 0x388   : > { %v5892_v37 = vpop.f32.mrb[146].mxu0 }
 0x389   : > { %v2465_v19 = vpack.c.bf16 %v2432_v15, %v2431_v52  ;;  %v2920_v48 = vpack.c.bf16 %v5892_v37, %v5891_v61  ;;  %v2681_v58 = vpop.f32.mrb[147].mxu0 }
 0x38a   : > { %v2919_v60 = vpack.c.bf16 %v2681_v58, %v2678_v56  ;;  %v2364_v1 = vpop.f32.mrb[48].mxu1 }
 0x38b   : > { %2498 = vst.msk [vmem:[#allocation2 + $0xf0] sm:$0xff] %vm2467_vm1, %v2465_v19  ;;  %v6191_v50 = vadd.f32 %v7354_v54, %v2364_v1  ;;  %v2366_v62 = vpop.f32.mrb[49].mxu1  ;;  %5945 = vmatprep.mubr.msk.bf16.mxu0 %vm2467_vm1, %v2465_v19 }
 0x38c   : > { %2953 = vst.msk [vmem:[#allocation3 + $0x18] sm:$0xff] %vm2949_vm2, %v2920_v48  ;;  %2952 = vst.msk [vmem:[#allocation3 + $0x10] sm:$0xff] %vm2949_vm2, %v2919_v60  ;;  %v2367_v57 = vpop.f32.mrb[50].mxu1 }
 0x38d   : > { %v6192_v63 = vadd.f32 %v7354_v54, %v2367_v57  ;;  %v2369_v49 = vpop.f32.mrb[51].mxu1  ;;  %v2433_v5 = vmax.f32 %v6191_v50, 0.0 }
 0x38f   : > { %v2434_v4 = vmax.f32 %v6192_v63, 0.0 }
 0x391   : > { %v2466_v6 = vpack.c.bf16 %v2434_v4, %v2433_v5 }
 0x393   : > { %2499 = vst.msk [vmem:[#allocation2 + $0xf8] sm:$0xff] %vm2467_vm1, %v2466_v6  ;;  %5946 = vmatmul.mubr.msk.bf16.gmra.mrb[200].mxu0 %vm2467_vm1, %v2466_v6 }
 0x396   : > { %v5895_v10 = vpop.f32.mrb[148].mxu0 }
 0x397   : > { %v2694_v21 = vpop.f32.mrb[149].mxu0 }
 0x398   : > { %v5896_v53 = vpop.f32.mrb[150].mxu0 }
 0x399   : > { %v2922_v25 = vpack.c.bf16 %v5896_v53, %v5895_v10  ;;  %v2697_v8 = vpop.f32.mrb[151].mxu0 }
 0x39a   : > { %v2921_v0 = vpack.c.bf16 %v2697_v8, %v2694_v21 }
 0x39b   : > { %2955 = vst.msk [vmem:[#allocation3 + $0x28] sm:$0xff] %vm2949_vm2, %v2922_v25 }
 0x39c   : > { %2954 = vst.msk [vmem:[#allocation3 + $0x20] sm:$0xff] %vm2949_vm2, %v2921_v0 }
 0x3a6   : > { %v5899_v12 = vpop.f32.mrb[152].mxu0 }
 0x3a7   : > { %v2710_v54 = vpop.f32.mrb[153].mxu0 }
 0x3a8   : > { %v5900_v11 = vpop.f32.mrb[154].mxu0 }
 0x3a9   : > { %v2924_v14 = vpack.c.bf16 %v5900_v11, %v5899_v12  ;;  %v2713_v3 = vpop.f32.mrb[155].mxu0 }
 0x3aa   : > { %v2923_v17 = vpack.c.bf16 %v2713_v3, %v2710_v54 }
 0x3ab   : > { %2957 = vst.msk [vmem:[#allocation3 + $0x38] sm:$0xff] %vm2949_vm2, %v2924_v14 }
 0x3ac   : > { %2956 = vst.msk [vmem:[#allocation3 + $0x30] sm:$0xff] %vm2949_vm2, %v2923_v17 }
 0x3b6   : > { %v5903_v38 = vpop.f32.mrb[156].mxu0 }
 0x3b7   : > { %v2726_v7 = vpop.f32.mrb[157].mxu0 }
 0x3b8   : > { %v5904_v42 = vpop.f32.mrb[158].mxu0 }
 0x3b9   : > { %v2926_v28 = vpack.c.bf16 %v5904_v42, %v5903_v38  ;;  %v2729_v18 = vpop.f32.mrb[159].mxu0 }
 0x3ba   : > { %v2925_v23 = vpack.c.bf16 %v2729_v18, %v2726_v7 }
 0x3bb   : > { %2959 = vst.msk [vmem:[#allocation3 + $0x48] sm:$0xff] %vm2949_vm2, %v2926_v28 }
 0x3bc   : > { %2958 = vst.msk [vmem:[#allocation3 + $0x40] sm:$0xff] %vm2949_vm2, %v2925_v23 }
 0x3c6   : > { %v5907_v32 = vpop.f32.mrb[160].mxu0 }
 0x3c7   : > { %v2742_v44 = vpop.f32.mrb[161].mxu0 }
 0x3c8   : > { %v5908_v20 = vpop.f32.mrb[162].mxu0 }
 0x3c9   : > { %v2928_v22 = vpack.c.bf16 %v5908_v20, %v5907_v32  ;;  %v2745_v55 = vpop.f32.mrb[163].mxu0 }
 0x3ca   : > { %v2927_v26 = vpack.c.bf16 %v2745_v55, %v2742_v44 }
 0x3cb   : > { %2961 = vst.msk [vmem:[#allocation3 + $0x58] sm:$0xff] %vm2949_vm2, %v2928_v22 }
 0x3cc   : > { %2960 = vst.msk [vmem:[#allocation3 + $0x50] sm:$0xff] %vm2949_vm2, %v2927_v26 }
 0x3d6   : > { %v5911_v29 = vpop.f32.mrb[164].mxu0 }
 0x3d7   : > { %v2758_v30 = vpop.f32.mrb[165].mxu0 }
 0x3d8   : > { %v5912_v59 = vpop.f32.mrb[166].mxu0 }
 0x3d9   : > { %v2930_v31 = vpack.c.bf16 %v5912_v59, %v5911_v29  ;;  %v2761_v51 = vpop.f32.mrb[167].mxu0 }
 0x3da   : > { %v2929_v34 = vpack.c.bf16 %v2761_v51, %v2758_v30 }
 0x3db   : > { %2963 = vst.msk [vmem:[#allocation3 + $0x68] sm:$0xff] %vm2949_vm2, %v2930_v31 }
 0x3dc   : > { %2962 = vst.msk [vmem:[#allocation3 + $0x60] sm:$0xff] %vm2949_vm2, %v2929_v34 }
 0x3e6   : > { %v5915_v2 = vpop.f32.mrb[168].mxu0 }
 0x3e7   : > { %v2774_v33 = vpop.f32.mrb[169].mxu0 }
 0x3e8   : > { %v5916_v39 = vpop.f32.mrb[170].mxu0 }
 0x3e9   : > { %v2932_v9 = vpack.c.bf16 %v5916_v39, %v5915_v2  ;;  %v2777_v35 = vpop.f32.mrb[171].mxu0 }
 0x3ea   : > { %v2931_v13 = vpack.c.bf16 %v2777_v35, %v2774_v33 }
 0x3eb   : > { %2965 = vst.msk [vmem:[#allocation3 + $0x78] sm:$0xff] %vm2949_vm2, %v2932_v9 }
 0x3ec   : > { %2964 = vst.msk [vmem:[#allocation3 + $0x70] sm:$0xff] %vm2949_vm2, %v2931_v13 }
 0x3f6   : > { %v5919_v36 = vpop.f32.mrb[172].mxu0 }
 0x3f7   : > { %v2790_v40 = vpop.f32.mrb[173].mxu0 }
 0x3f8   : > { %v5920_v27 = vpop.f32.mrb[174].mxu0 }
 0x3f9   : > { %v2934_v16 = vpack.c.bf16 %v5920_v27, %v5919_v36  ;;  %v2793_v43 = vpop.f32.mrb[175].mxu0 }
 0x3fa   : > { %v2933_v24 = vpack.c.bf16 %v2793_v43, %v2790_v40 }
 0x3fb   : > { %2967 = vst.msk [vmem:[#allocation3 + $0x88] sm:$0xff] %vm2949_vm2, %v2934_v16 }
 0x3fc   : > { %2966 = vst.msk [vmem:[#allocation3 + $0x80] sm:$0xff] %vm2949_vm2, %v2933_v24 }
 0x406   : > { %v5923_v45 = vpop.f32.mrb[176].mxu0 }
 0x407   : > { %v2806_v41 = vpop.f32.mrb[177].mxu0 }
 0x408   : > { %v5924_v46 = vpop.f32.mrb[178].mxu0 }
 0x409   : > { %v2936_v47 = vpack.c.bf16 %v5924_v46, %v5923_v45  ;;  %v2809_v61 = vpop.f32.mrb[179].mxu0 }
 0x40a   : > { %v2935_v52 = vpack.c.bf16 %v2809_v61, %v2806_v41 }
 0x40b   : > { %2969 = vst.msk [vmem:[#allocation3 + $0x98] sm:$0xff] %vm2949_vm2, %v2936_v47 }
 0x40c   : > { %2968 = vst.msk [vmem:[#allocation3 + $0x90] sm:$0xff] %vm2949_vm2, %v2935_v52 }
 0x416   : > { %v5927_v15 = vpop.f32.mrb[180].mxu0 }
 0x417   : > { %v2822_v56 = vpop.f32.mrb[181].mxu0 }
 0x418   : > { %v5928_v37 = vpop.f32.mrb[182].mxu0 }
 0x419   : > { %v2938_v19 = vpack.c.bf16 %v5928_v37, %v5927_v15  ;;  %v2825_v48 = vpop.f32.mrb[183].mxu0 }
 0x41a   : > { %v2937_v58 = vpack.c.bf16 %v2825_v48, %v2822_v56 }
 0x41b   : > { %2971 = vst.msk [vmem:[#allocation3 + $0xa8] sm:$0xff] %vm2949_vm2, %v2938_v19 }
 0x41c   : > { %2970 = vst.msk [vmem:[#allocation3 + $0xa0] sm:$0xff] %vm2949_vm2, %v2937_v58 }
 0x426   : > { %v5931_v60 = vpop.f32.mrb[184].mxu0 }
 0x427   : > { %v2838_v1 = vpop.f32.mrb[185].mxu0 }
 0x428   : > { %v5932_v50 = vpop.f32.mrb[186].mxu0 }
 0x429   : > { %v2940_v62 = vpack.c.bf16 %v5932_v50, %v5931_v60  ;;  %v2841_v57 = vpop.f32.mrb[187].mxu0 }
 0x42a   : > { %v2939_v63 = vpack.c.bf16 %v2841_v57, %v2838_v1 }
 0x42b   : > { %2973 = vst.msk [vmem:[#allocation3 + $0xb8] sm:$0xff] %vm2949_vm2, %v2940_v62 }
 0x42c   : > { %2972 = vst.msk [vmem:[#allocation3 + $0xb0] sm:$0xff] %vm2949_vm2, %v2939_v63 }
 0x436   : > { %v5935_v49 = vpop.f32.mrb[188].mxu0 }
 0x437   : > { %v2854_v5 = vpop.f32.mrb[189].mxu0 }
 0x438   : > { %v5936_v4 = vpop.f32.mrb[190].mxu0 }
 0x439   : > { %v2942_v6 = vpack.c.bf16 %v5936_v4, %v5935_v49  ;;  %v2857_v10 = vpop.f32.mrb[191].mxu0 }
 0x43a   : > { %v2941_v21 = vpack.c.bf16 %v2857_v10, %v2854_v5 }
 0x43b   : > { %2975 = vst.msk [vmem:[#allocation3 + $0xc8] sm:$0xff] %vm2949_vm2, %v2942_v6 }
 0x43c   : > { %2974 = vst.msk [vmem:[#allocation3 + $0xc0] sm:$0xff] %vm2949_vm2, %v2941_v21 }
 0x446   : > { %v5939_v53 = vpop.f32.mrb[192].mxu0 }
 0x447   : > { %v2870_v25 = vpop.f32.mrb[193].mxu0 }
 0x448   : > { %v5940_v8 = vpop.f32.mrb[194].mxu0 }
 0x449   : > { %v2944_v0 = vpack.c.bf16 %v5940_v8, %v5939_v53  ;;  %v2873_v12 = vpop.f32.mrb[195].mxu0 }
 0x44a   : > { %v2943_v54 = vpack.c.bf16 %v2873_v12, %v2870_v25 }
 0x44b   : > { %2977 = vst.msk [vmem:[#allocation3 + $0xd8] sm:$0xff] %vm2949_vm2, %v2944_v0 }
 0x44c   : > { %2976 = vst.msk [vmem:[#allocation3 + $0xd0] sm:$0xff] %vm2949_vm2, %v2943_v54 }
 0x456   : > { %v5943_v11 = vpop.f32.mrb[196].mxu0 }
 0x457   : > { %v2886_v14 = vpop.f32.mrb[197].mxu0 }
 0x458   : > { %v5944_v3 = vpop.f32.mrb[198].mxu0 }
 0x459   : > { %v2946_v17 = vpack.c.bf16 %v5944_v3, %v5943_v11  ;;  %v2889_v38 = vpop.f32.mrb[199].mxu0 }
 0x45a   : > { %v2945_v7 = vpack.c.bf16 %v2889_v38, %v2886_v14 }
 0x45b   : > { %2979 = vst.msk [vmem:[#allocation3 + $0xe8] sm:$0xff] %vm2949_vm2, %v2946_v17 }
 0x45c   : > { %2978 = vst.msk [vmem:[#allocation3 + $0xe0] sm:$0xff] %vm2949_vm2, %v2945_v7 }
 0x466   : > { %v5947_v42 = vpop.f32.mrb[200].mxu0 }
 0x467   : > { %v2902_v28 = vpop.f32.mrb[201].mxu0 }
 0x468   : > { %v5948_v18 = vpop.f32.mrb[202].mxu0 }
 0x469   : > { %v2948_v23 = vpack.c.bf16 %v5948_v18, %v5947_v42  ;;  %v2905_v32 = vpop.f32.mrb[203].mxu0 }
 0x46a   : > { %v2947_v44 = vpack.c.bf16 %v2905_v32, %v2902_v28 }
 0x46b   : > { %2981 = vst.msk [vmem:[#allocation3 + $0xf8] sm:$0xff] %vm2949_vm2, %v2948_v23 }
 0x46c   : > { %2980 = vst.msk [vmem:[#allocation3 + $0xf0] sm:$0xff] %vm2949_vm2, %v2947_v44 }
 0x46d PF: > { %v3059_v20 = vld [vmem:[#allocation3 + $0x40] sm:$0xff]  ;;  %v3060_v55 = vld [vmem:[#allocation3 + $0x48] sm:$0xff]  ;;  %s7582_s18 = sshra.s32 %s5079_s20, 3  ;;  %v3061_v29 = vld [vmem:[#allocation3 + $0x50] sm:$0xff]  ;;  %s3766_s29 = sshra.s32 %s5079_s20, 4  ;;  %vm3822_vm3 = vcmask 523264  }
 0x46e   : > { %v3051_v22 = vld [vmem:[#allocation3] sm:$0xff]  ;;  %6245 = vmatprep.subr.bf16.mxu1 %v3059_v20  ;;  %s5458_s28 = sshll.u32 %s7582_s18, 4  ;;  %5530 = vmatprep.subr.bf16.mxu0 %v3059_v20  ;;  %v3052_v26 = vld [vmem:[#allocation3 + $0x8] sm:$0xff]  ;;  %v3053_v59 = vld [vmem:[#allocation3 + $0x10] sm:$0xff]  ;;  %s5380_s30 = sshll.u32 %s3766_s29, 3  ;;  %vm4124_vm4 = vcmask 261120  }
 0x46f   : > { %6253 = vmatpush3.bf16.msra.mxu1 %v3051_v22  ;;  %5531 = vmatpush3.bf16.msra.mxu0 %v3051_v22  ;;  %s7585_s25 = scalar_lea.vmem [#allocation4], %s5458_s28  ;;  %v3062_v31 = vld [vmem:[#allocation3 + $0x58] sm:$0xff]  ;;  %v3063_v34 = vld [vmem:[#allocation3 + $0x60] sm:$0xff]  ;;  %v3064_v33 = vld [vmem:[#allocation3 + $0x68] sm:$0xff]  ;;  %s7628_s12 = scalar_lea.vmem [#allocation2], %s5380_s30  ;;  %vm4358_vm5 = vcmask 130048  }
 0x470   : > { %6246 = vmatprep.subr.bf16.mxu1 %v3060_v55  ;;  %5532 = vmatprep.subr.bf16.mxu0 %v3060_v55  ;;  %v6612_v30 = vld [vmem:[%s7585_s25 + $0x84] ss:$16 sps:$4 sm:$0xff]   ;;  %v3054_v51 = vld [vmem:[#allocation3 + $0x18] sm:$0xff]  ;;  %v3056_v39 = vld [vmem:[#allocation3 + $0x28] sm:$0xff]  ;;  %s5379_s29 = sshll.u32 %s7582_s18, 2  ;;  %s5459_s30 = sshll.u32 %s7036_s17, 12 }
 0x471   : > { %3474 = vmatprep.mubr.bf16.mxu1 %v6612_v30  ;;  %v3055_v2 = vld [vmem:[#allocation3 + $0x20] sm:$0xff]  ;;  %v3065_v9 = vld [vmem:[#allocation3 + $0x70] sm:$0xff]  ;;  %v3066_v13 = vld [vmem:[#allocation3 + $0x78] sm:$0xff]  ;;  %s7688_s28 = scalar_lea.vmem %s8272_s0, %s5379_s29  ;;  %s5005_s20 = sshll.u32 %s7103_s21, 4  ;;  %s8224_s20 = int_to_ptr.vmem [resolvable:$true] %s5005_s20 }
 0x472   : > { %v3057_v35 = vld [vmem:[#allocation3 + $0x30] sm:$0xff]  ;;  %v3058_v36 = vld [vmem:[#allocation3 + $0x38] sm:$0xff]  ;;  %v3075_v16 = vld [vmem:[#allocation3 + $0xc0] sm:$0xff]  ;;  %s8231_s17 = scalar_lea.sflag [#allocation6], %s350_s11  ;;  %p8294_p9 = scmp.ne.s32.totalorder %s8286_s23, 0 }
 0x473   : > { %6254 = vmatpush3.bf16.msra.mxu1 %v3052_v26  ;;  %5533 = vmatpush3.bf16.msra.mxu0 %v3052_v26  ;;  %v6610_v40 = vld [vmem:[%s7585_s25 + $0x80] ss:$16 sps:$4 sm:$0xff]   ;;  %v6648_v27 = vld [vmem:[%s7585_s25 + $0x4] ss:$16 sps:$4 sm:$0xff]   ;;  %v3076_v46 = vld [vmem:[#allocation3 + $0xc8] sm:$0xff]  ;;  %s6957_s27 = smov [#allocation7]  }
 0x474   : > { %6247 = vmatprep.subr.bf16.mxu1 %v3061_v29  ;;  %5534 = vmatprep.subr.bf16.mxu0 %v3061_v29  ;;  %v6646_v43 = vld [vmem:[%s7585_s25] ss:$16 sps:$4 sm:$0xff]   ;;  %v6613_v24 = vld [vmem:[%s7585_s25 + $0xa4] ss:$16 sps:$4 sm:$0xff]   ;;  %v3068_v61 = vld [vmem:[#allocation3 + $0x88] sm:$0xff]  ;;  %s6889_s26 = sshll.u32 %s6957_s27, 4  ;;  %s6890_s26 = int_to_ptr.vmem [resolvable:$false] %s6889_s26 }
 0x475   : > { %3442 = vmatprep.mubr.bf16.mxu0 %v6648_v27  ;;  %v3067_v45 = vld [vmem:[#allocation3 + $0x80] sm:$0xff]  ;;  %v3077_v52 = vld [vmem:[#allocation3 + $0xd0] sm:$0xff]  ;;  %v3078_v19 = vld [vmem:[#allocation3 + $0xd8] sm:$0xff]  ;;  %s6891_s29 = scalar_lea.vmem %s6890_s26, 8192  ;;  %p6892_p13 = scmp.lt.s32.totalorder %s8224_s20, %s6890_s26 }
 0x476   : > { %v6652_v41 = vld [vmem:[%s7585_s25 + $0x24] ss:$16 sps:$4 sm:$0xff]   ;;  %v6615_v47 = vld [vmem:[%s7585_s25 + $0xa0] ss:$16 sps:$4 sm:$0xff]   ;;  %v3070_v58 = vld [vmem:[#allocation3 + $0x98] sm:$0xff] }
 0x477   : > { %6255 = vmatpush3.bf16.msra.mxu1 %v3053_v59  ;;  %5535 = vmatpush3.bf16.msra.mxu0 %v3053_v59  ;;  %v6654_v15 = vld [vmem:[%s7585_s25 + $0x20] ss:$16 sps:$4 sm:$0xff]   ;;  %v6616_v56 = vld [vmem:[%s7585_s25 + $0xc4] ss:$16 sps:$4 sm:$0xff]   ;;  %v3080_v49 = vld [vmem:[#allocation3 + $0xe8] sm:$0xff] }
 0x478   : > { %6248 = vmatprep.subr.bf16.mxu1 %v3062_v31  ;;  %5536 = vmatprep.subr.bf16.mxu0 %v3062_v31  ;;  %v3069_v37 = vld [vmem:[#allocation3 + $0x90] sm:$0xff]  ;;  %v3079_v60 = vld [vmem:[#allocation3 + $0xe0] sm:$0xff]  ;;  %v3072_v5 = vld [vmem:[#allocation3 + $0xa8] sm:$0xff] }
 0x479   : > { %v6658_v48 = vld [vmem:[%s7585_s25 + $0x44] ss:$16 sps:$4 sm:$0xff]   ;;  %v6618_v1 = vld [vmem:[%s7585_s25 + $0xc0] ss:$16 sps:$4 sm:$0xff]   ;;  %v3082_v25 = vld [vmem:[#allocation3 + $0xf8] sm:$0xff] }
 0x47a   : > { %v6660_v50 = vld [vmem:[%s7585_s25 + $0x40] ss:$16 sps:$4 sm:$0xff]   ;;  %v6619_v62 = vld [vmem:[%s7585_s25 + $0xe4] ss:$16 sps:$4 sm:$0xff]   ;;  %v3074_v8 = vld [vmem:[#allocation3 + $0xb8] sm:$0xff] }
 0x47b   : > { %6256 = vmatpush3.bf16.msra.mxu1 %v3054_v51  ;;  %5537 = vmatpush3.bf16.msra.mxu0 %v3054_v51  ;;  %v3071_v57 = vld [vmem:[#allocation3 + $0xa0] sm:$0xff]  ;;  %v3081_v4 = vld [vmem:[#allocation3 + $0xf0] sm:$0xff]  ;;  %v6695_v42 = vld [vmem:[%s8279_s7 + $0x8] sm:$0xff]  }
 0x47c   : > { %6249 = vmatprep.subr.bf16.mxu1 %v3063_v34  ;;  %5538 = vmatprep.subr.bf16.mxu0 %v3063_v34  ;;  %v6664_v63 = vld [vmem:[%s7585_s25 + $0x64] ss:$16 sps:$4 sm:$0xff]   ;;  %v6621_v6 = vld [vmem:[%s7585_s25 + $0xe0] ss:$16 sps:$4 sm:$0xff]   ;;  %v6700_v32 = vld [vmem:[%s8279_s7 + $0x18] sm:$0xff]  }
 0x47d   : > { %v6666_v10 = vld [vmem:[%s7585_s25 + $0x60] ss:$16 sps:$4 sm:$0xff]   ;;  %v6622_v21 = vld [vmem:[%s7585_s25 + $0x104] ss:$16 sps:$4 sm:$0xff]   ;;  %v3771_v20 = vld [vmem:[%s7628_s12 + $0x8] sm:$0xff] }
 0x47e   : > { %v3073_v53 = vld [vmem:[#allocation3 + $0xb0] sm:$0xff]  ;;  %v6691_v17 = vld [vmem:[%s8279_s7] sm:$0xff]   ;;  %v3773_v29 = vld [vmem:[%s7628_s12 + $0x18] sm:$0xff] }
 0x47f   : > { %6257 = vmatpush3.bf16.msra.mxu1 %v3055_v2  ;;  %5539 = vmatpush3.bf16.msra.mxu0 %v3055_v2  ;;  %v6624_v0 = vld [vmem:[%s7585_s25 + $0x100] ss:$16 sps:$4 sm:$0xff]   ;;  %v6625_v12 = vld [vmem:[%s7585_s25 + $0x124] ss:$16 sps:$4 sm:$0xff]   ;;  %v3775_v51 = vld [vmem:[%s7628_s12 + $0x28] sm:$0xff] }
 0x480   : > { %6250 = vmatprep.subr.bf16.mxu1 %v3064_v33  ;;  %5540 = vmatprep.subr.bf16.mxu0 %v3064_v33  ;;  %v6627_v54 = vld [vmem:[%s7585_s25 + $0x120] ss:$16 sps:$4 sm:$0xff]   ;;  %v6628_v11 = vld [vmem:[%s7585_s25 + $0x144] ss:$16 sps:$4 sm:$0xff]   ;;  %v6651_v2 = vld [vmem:[%s7585_s25 + $0xc] ss:$16 sps:$4 sm:$0xff]  }
 0x481   : > { %v6630_v14 = vld [vmem:[%s7585_s25 + $0x140] ss:$16 sps:$4 sm:$0xff]   ;;  %v6631_v3 = vld [vmem:[%s7585_s25 + $0x164] ss:$16 sps:$4 sm:$0xff]   ;;  %v6661_v27 = vld [vmem:[%s7585_s25 + $0x4c] ss:$16 sps:$4 sm:$0xff]  }
 0x482   : > { %v6633_v38 = vld [vmem:[%s7585_s25 + $0x160] ss:$16 sps:$4 sm:$0xff]   ;;  %v6634_v7 = vld [vmem:[%s7585_s25 + $0x184] ss:$16 sps:$4 sm:$0xff]  }
 0x483   : > { %6258 = vmatpush3.bf16.msra.mxu1 %v3056_v39  ;;  %5541 = vmatpush3.bf16.msra.mxu0 %v3056_v39  ;;  %v6696_v28 = vld [vmem:[%s8279_s7 + $0x10] sm:$0xff]   ;;  %v3770_v44 = vld [vmem:[%s7628_s12] sm:$0xff]  ;;  %v3777_v39 = vld [vmem:[%s7628_s12 + $0x38] sm:$0xff] }
 0x484   : > { %6251 = vmatprep.subr.bf16.mxu1 %v3065_v9  ;;  %5542 = vmatprep.subr.bf16.mxu0 %v3065_v9  ;;  %v6636_v18 = vld [vmem:[%s7585_s25 + $0x180] ss:$16 sps:$4 sm:$0xff]   ;;  %v6637_v23 = vld [vmem:[%s7585_s25 + $0x1a4] ss:$16 sps:$4 sm:$0xff]   ;;  %v6649_v9 = vld [vmem:[%s7585_s25 + $0x8] ss:$16 sps:$4 sm:$0xff]  }
 0x485   : > { %v6639_v22 = vld [vmem:[%s7585_s25 + $0x1a0] ss:$16 sps:$4 sm:$0xff]   ;;  %v6640_v55 = vld [vmem:[%s7585_s25 + $0x1c4] ss:$16 sps:$4 sm:$0xff]  }
 0x486   : > { %v3772_v26 = vld [vmem:[%s7628_s12 + $0x10] sm:$0xff]  ;;  %v3774_v31 = vld [vmem:[%s7628_s12 + $0x20] sm:$0xff] }
 0x487   : > { %6259 = vmatpush3.bf16.msra.mxu1 %v3057_v35  ;;  %5543 = vmatpush3.bf16.msra.mxu0 %v3057_v35  ;;  %v6642_v30 = vld [vmem:[%s7585_s25 + $0x1c0] ss:$16 sps:$4 sm:$0xff]   ;;  %v6643_v59 = vld [vmem:[%s7585_s25 + $0x1e4] ss:$16 sps:$4 sm:$0xff]   ;;  %v6655_v35 = vld [vmem:[%s7585_s25 + $0x2c] ss:$16 sps:$4 sm:$0xff]  }
 0x488   : > { %6252 = vmatprep.subr.bf16.mxu1 %v3066_v13  ;;  %5544 = vmatprep.subr.bf16.mxu0 %v3066_v13  ;;  %v6645_v34 = vld [vmem:[%s7585_s25 + $0x1e0] ss:$16 sps:$4 sm:$0xff]  }
 0x489   : > { %v3776_v33 = vld [vmem:[%s7628_s12 + $0x30] sm:$0xff]  ;;  %v3778_v13 = vld [vmem:[%s7628_s12 + $0x40] sm:$0xff] }
 0x48b   : > { %6260 = vmatpush3.bf16.msra.mxu1 %v3058_v36  ;;  %5545 = vmatpush3.bf16.msra.mxu0 %v3058_v36  ;;  %v3779_v36 = vld [vmem:[%s7628_s12 + $0x48] sm:$0xff] }
 0x48c   : > { %5642 = vmatprep.subr.bf16.mxu1 %v3075_v16  ;;  %5949 = vmatprep.subr.bf16.mxu0 %v6691_v17  ;;  %v3780_v16 = vld [vmem:[%s7628_s12 + $0x50] sm:$0xff] }
 0x48e   : > { %3475 = vmatmul.mubr.bf16.vlgmr.msra.gmra.mrb[0].mxu1 %v6610_v40  ;;  %3443 = vmatmul.mubr.bf16.vlgmr.msra.gmra.mrb[0].mxu0 %v6646_v43  ;;  %v6657_v40 = vld [vmem:[%s7585_s25 + $0x28] ss:$16 sps:$4 sm:$0xff]  }
 0x48f   : > { %5643 = vmatpush3.bf16.msra.mxu1 %v3067_v45  ;;  %3482 = vmatprep.mubr.bf16.mxu1 %v6613_v24  ;;  %v3781_v43 = vld [vmem:[%s7628_s12 + $0x58] sm:$0xff] }
 0x490   : > { %5644 = vmatprep.subr.bf16.mxu1 %v3076_v46  ;;  %3450 = vmatprep.mubr.bf16.mxu0 %v6652_v41  ;;  %v6663_v24 = vld [vmem:[%s7585_s25 + $0x48] ss:$16 sps:$4 sm:$0xff]   ;;  %v6667_v45 = vld [vmem:[%s7585_s25 + $0x6c] ss:$16 sps:$4 sm:$0xff]   ;;  %v3782_v41 = vld [vmem:[%s7628_s12 + $0x60] sm:$0xff] }
 0x491   : > { %5950 = vmatpush3.bf16.msra.mxu0 %v6691_v17  ;;  %v3783_v46 = vld [vmem:[%s7628_s12 + $0x68] sm:$0xff] }
 0x492   : > { %5951 = vmatprep.subr.bf16.mxu0 %v6695_v42  ;;  %v6690_v17 = vld [vmem:[%s7585_s25 + $0x148] ss:$16 sps:$4 sm:$0xff]  }
 0x493   : > { %5645 = vmatpush3.bf16.msra.mxu1 %v3068_v61  ;;  %v6670_v61 = vld [vmem:[%s7585_s25 + $0x8c] ss:$16 sps:$4 sm:$0xff]  }
 0x494   : > { %5646 = vmatprep.subr.bf16.mxu1 %v3077_v52  ;;  %v3784_v52 = vld [vmem:[%s7628_s12 + $0x70] sm:$0xff] }
 0x495   : > { %5952 = vmatpush3.bf16.msra.mxu0 %v6695_v42  ;;  %v6725_v42 = vld [vmem:[%s7688_s28 + $0x68] sm:$0xff]  }
 0x496   : > { %3483 = vmatmul.mubr.bf16.gmra.mrb[4].mxu1 %v6615_v47  ;;  %3451 = vmatmul.mubr.bf16.gmra.mrb[4].mxu0 %v6654_v15  ;;  %v6669_v47 = vld [vmem:[%s7585_s25 + $0x68] ss:$16 sps:$4 sm:$0xff]   ;;  %v6710_v15 = vld [vmem:[%s8278_s6] sm:$0xff]  }
 0x497   : > { %3490 = vmatprep.mubr.bf16.mxu1 %v6616_v56  ;;  %5647 = vmatpush3.bf16.msra.mxu1 %v3069_v37  ;;  %v3785_v56 = vld [vmem:[%s7628_s12 + $0x78] sm:$0xff]  ;;  %s8222_s12 = scalar_lea.hbm %s8282_s10, %s5459_s30 }
 0x498   : > { %5648 = vmatprep.subr.bf16.mxu1 %v3078_v19  ;;  %3458 = vmatprep.mubr.bf16.mxu0 %v6658_v48  ;;  %v6672_v37 = vld [vmem:[%s7585_s25 + $0x88] ss:$16 sps:$4 sm:$0xff]   ;;  %v6673_v19 = vld [vmem:[%s7585_s25 + $0xac] ss:$16 sps:$4 sm:$0xff]  }
 0x499   : > { %5953 = vmatprep.subr.bf16.mxu0 %v6696_v28  ;;  %v6711_v48 = vld [vmem:[%s8278_s6 + $0x8] sm:$0xff]  }
 0x49a   : > { %5954 = vmatpush3.bf16.msra.mxu0 %v6696_v28  ;;  %v6694_v28 = vld [vmem:[%s7585_s25 + $0x168] ss:$16 sps:$4 sm:$0xff]  }
 0x49b   : > { %5649 = vmatpush3.bf16.msra.mxu1 %v3070_v58  ;;  %5955 = vmatprep.subr.bf16.mxu0 %v6700_v32  ;;  %v6712_v58 = vld [vmem:[%s7688_s28] sm:$0xff]  }
 0x49c   : > { %5650 = vmatprep.subr.bf16.mxu1 %v3079_v60  ;;  %v6675_v60 = vld [vmem:[%s7585_s25 + $0xa8] ss:$16 sps:$4 sm:$0xff]  }
 0x49e   : > { %3491 = vmatmul.mubr.bf16.gmra.mrb[8].mxu1 %v6618_v1  ;;  %3459 = vmatmul.mubr.bf16.gmra.mrb[8].mxu0 %v6660_v50  ;;  %v6713_v1 = vld [vmem:[%s7688_s28 + $0x8] sm:$0xff]  }
 0x49f   : > { %3498 = vmatprep.mubr.bf16.mxu1 %v6619_v62  ;;  %5651 = vmatpush3.bf16.msra.mxu1 %v3071_v57  ;;  %v6676_v50 = vld [vmem:[%s7585_s25 + $0xcc] ss:$16 sps:$4 sm:$0xff]   ;;  %v6714_v62 = vld [vmem:[%s7688_s28 + $0x10] sm:$0xff]   ;;  %v6678_v57 = vld [vmem:[%s7585_s25 + $0xc8] ss:$16 sps:$4 sm:$0xff]  }
 0x4a0   : > { %5652 = vmatprep.subr.bf16.mxu1 %v3080_v49  ;;  %3466 = vmatprep.mubr.bf16.mxu0 %v6664_v63  ;;  %v6715_v63 = vld [vmem:[%s7688_s28 + $0x18] sm:$0xff]  }
 0x4a1   : > { %5956 = vmatpush3.bf16.msra.mxu0 %v6700_v32  ;;  %v6679_v49 = vld [vmem:[%s7585_s25 + $0xec] ss:$16 sps:$4 sm:$0xff]  }
 0x4a2   : > { %5989 = vmatprep.subr.bf16.mxu0 %v6710_v15  ;;  %v6727_v32 = vld [vmem:[%s7688_s28 + $0x78] sm:$0xff]  }
 0x4a3   : > { %5653 = vmatpush3.bf16.msra.mxu1 %v3072_v5  ;;  %v6716_v5 = vld [vmem:[%s7688_s28 + $0x20] sm:$0xff]  }
 0x4a4   : > { %5654 = vmatprep.subr.bf16.mxu1 %v3081_v4  ;;  %v6717_v4 = vld [vmem:[%s7688_s28 + $0x28] sm:$0xff]  }
 0x4a6   : > { %3499 = vmatmul.mubr.bf16.gmra.mrb[12].mxu1 %v6621_v6  ;;  %3467 = vmatmul.mubr.bf16.gmra.mrb[12].mxu0 %v6666_v10  ;;  %v6681_v6 = vld [vmem:[%s7585_s25 + $0xe8] ss:$16 sps:$4 sm:$0xff]   ;;  %v6682_v10 = vld [vmem:[%s7585_s25 + $0x10c] ss:$16 sps:$4 sm:$0xff]  }
 0x4a7   : > { %3506 = vmatprep.mubr.bf16.mxu1 %v6622_v21  ;;  %5655 = vmatpush3.bf16.msra.mxu1 %v3073_v53  ;;  %v6718_v21 = vld [vmem:[%s7688_s28 + $0x30] sm:$0xff]   ;;  %v6719_v53 = vld [vmem:[%s7688_s28 + $0x38] sm:$0xff]  }
 0x4a8   : > { %5656 = vmatprep.subr.bf16.mxu1 %v3082_v25  ;;  %5957 = vmatprep.mubr.msk.bf16.mxu0 %vm3822_vm3, %v3770_v44  ;;  %v6684_v25 = vld [vmem:[%s7585_s25 + $0x108] ss:$16 sps:$4 sm:$0xff]  }
 0x4a9   : > { %v6699_v44 = vld [vmem:[%s7585_s25 + $0x188] ss:$16 sps:$4 sm:$0xff]  }
 0x4ab   : > { %5657 = vmatpush3.bf16.msra.mxu1 %v3074_v8  ;;  %v6685_v8 = vld [vmem:[%s7585_s25 + $0x12c] ss:$16 sps:$4 sm:$0xff]  }
 0x4ae   : > { %3507 = vmatmul.mubr.bf16.gmra.mrb[16].mxu1 %v6624_v0  ;;  %5958 = vmatmul.mubr.msk.bf16.vlgmr.msra.gmra.mrb[16].mxu0 %vm3822_vm3, %v3771_v20  ;;  %v6720_v0 = vld [vmem:[%s7688_s28 + $0x40] sm:$0xff]   ;;  %v6701_v20 = vld [vmem:[%s7585_s25 + $0x1ac] ss:$16 sps:$4 sm:$0xff]  }
 0x4af   : > { %3514 = vmatprep.mubr.bf16.mxu1 %v6625_v12  ;;  %5961 = vmatprep.mubr.msk.bf16.mxu0 %vm3822_vm3, %v3772_v26  ;;  %v6721_v12 = vld [vmem:[%s7688_s28 + $0x48] sm:$0xff]  }
 0x4b0   : > { %5990 = vmatpush3.bf16.msra.mxu0 %v6710_v15  ;;  %v6704_v26 = vld [vmem:[%s7585_s25 + $0x1cc] ss:$16 sps:$4 sm:$0xff]  }
 0x4b1   : > { %5991 = vmatprep.subr.bf16.mxu0 %v6711_v48 }
 0x4b4   : > { %5992 = vmatpush3.bf16.msra.mxu0 %v6711_v48 }
 0x4b6   : > { %3515 = vmatmul.mubr.bf16.gmra.mrb[20].mxu1 %v6627_v54  ;;  %5962 = vmatmul.mubr.msk.bf16.gmra.mrb[20].mxu0 %vm3822_vm3, %v3773_v29  ;;  %v6687_v54 = vld [vmem:[%s7585_s25 + $0x128] ss:$16 sps:$4 sm:$0xff]  }
 0x4b7   : > { %3522 = vmatprep.mubr.bf16.mxu1 %v6628_v11  ;;  %5965 = vmatprep.mubr.msk.bf16.mxu0 %vm3822_vm3, %v3774_v31  ;;  %v6688_v11 = vld [vmem:[%s7585_s25 + $0x14c] ss:$16 sps:$4 sm:$0xff]   ;;  %v6706_v29 = vld [vmem:[%s7585_s25 + $0x1c8] ss:$16 sps:$4 sm:$0xff]  }
 0x4be   : > { %3523 = vmatmul.mubr.bf16.gmra.mrb[24].mxu1 %v6630_v14  ;;  %5966 = vmatmul.mubr.msk.bf16.gmra.mrb[24].mxu0 %vm3822_vm3, %v3775_v51  ;;  %v6722_v14 = vld [vmem:[%s7688_s28 + $0x50] sm:$0xff]  }
 0x4bf   : > { %3530 = vmatprep.mubr.bf16.mxu1 %v6631_v3  ;;  %5969 = vmatprep.mubr.msk.bf16.mxu0 %vm3822_vm3, %v3776_v33  ;;  %v6723_v3 = vld [vmem:[%s7688_s28 + $0x58] sm:$0xff]  }
 0x4c6   : > { %3531 = vmatmul.mubr.bf16.gmra.mrb[28].mxu1 %v6633_v38  ;;  %5970 = vmatmul.mubr.msk.bf16.gmra.mrb[28].mxu0 %vm3822_vm3, %v3777_v39  ;;  %v6692_v38 = vld [vmem:[%s7585_s25 + $0x16c] ss:$16 sps:$4 sm:$0xff]  }
 0x4c7   : > { %3538 = vmatprep.mubr.bf16.mxu1 %v6634_v7  ;;  %5973 = vmatprep.mubr.msk.bf16.mxu0 %vm3822_vm3, %v3778_v13  ;;  %v6724_v7 = vld [vmem:[%s7688_s28 + $0x60] sm:$0xff]  }
 0x4ce   : > { %3539 = vmatmul.mubr.bf16.gmra.mrb[32].mxu1 %v6636_v18  ;;  %5974 = vmatmul.mubr.msk.bf16.gmra.mrb[32].mxu0 %vm3822_vm3, %v3779_v36  ;;  %v6697_v18 = vld [vmem:[%s7585_s25 + $0x18c] ss:$16 sps:$4 sm:$0xff]  }
 0x4cf   : > { %3546 = vmatprep.mubr.bf16.mxu1 %v6637_v23  ;;  %5977 = vmatprep.mubr.msk.bf16.mxu0 %vm3822_vm3, %v3780_v16  ;;  %v6726_v23 = vld [vmem:[%s7688_s28 + $0x70] sm:$0xff]  }
 0x4d6   : > { %3547 = vmatmul.mubr.bf16.gmra.mrb[36].mxu1 %v6639_v22  ;;  %5978 = vmatmul.mubr.msk.bf16.gmra.mrb[36].mxu0 %vm3822_vm3, %v3781_v43  ;;  %v6728_v22 = vld [vmem:[%s8280_s8] sm:$0xff]  }
 0x4d7   : > { %3554 = vmatprep.mubr.bf16.mxu1 %v6640_v55  ;;  %5981 = vmatprep.mubr.msk.bf16.mxu0 %vm3822_vm3, %v3782_v41  ;;  %v6703_v55 = vld [vmem:[%s7585_s25 + $0x1a8] ss:$16 sps:$4 sm:$0xff]  }
 0x4d8   : > { %6025 = vmatprep.subr.bf16.mxu0 %v6728_v22 }
 0x4de   : > { %3555 = vmatmul.mubr.bf16.gmra.mrb[40].mxu1 %v6642_v30  ;;  %5982 = vmatmul.mubr.msk.bf16.gmra.mrb[40].mxu0 %vm3822_vm3, %v3783_v46  ;;  %v6707_v30 = vld [vmem:[%s7585_s25 + $0x1ec] ss:$16 sps:$4 sm:$0xff]  }
 0x4df   : > { %3562 = vmatprep.mubr.bf16.mxu1 %v6643_v59  ;;  %5985 = vmatprep.mubr.msk.bf16.mxu0 %vm3822_vm3, %v3784_v52 }
 0x4e6   : > { %3563 = vmatmul.mubr.bf16.gmra.mrb[44].mxu1 %v6645_v34  ;;  %5986 = vmatmul.mubr.msk.bf16.gmra.mrb[44].mxu0 %vm3822_vm3, %v3785_v56  ;;  %v6709_v34 = vld [vmem:[%s7585_s25 + $0x1e8] ss:$16 sps:$4 sm:$0xff]   ;;  %s6885_s25 = scalar_lea.vmem %s8224_s20, 4096 }
 0x4e7   : > { %3603 = vmatprep.mubr.bf16.mxu1 %v6651_v2  ;;  %5993 = vmatprep.mubr.msk.bf16.mxu0 %vm4124_vm4, %v6712_v58  ;;  %p6886_p6 = scmp.ne.s32.totalorder %s8224_s20, %s6885_s25  ;;  %p6893_p3 = scmp.lt.s32.totalorder %s6891_s29, %s6885_s25 }
 0x4e9   : > { %p6887_p10 = pnand %p6886_p6, %p8294_p9  ;;  %p6894_p4 = por %p6893_p3, %p6892_p13 }
 0x4eb   : > { %p6888_p11 = pneg %p6887_p10 }
 0x4ed   : > { %p6895_p7 = pnand %p6894_p4, %p6888_p11 }
 0x4ee   : > { %3604 = vmatmul.mubr.bf16.vlgmr.msra.gmra.mrb[48].mxu1 %v6649_v9  ;;  %5994 = vmatmul.mubr.msk.bf16.vlgmr.msra.gmra.mrb[16].mxu0 %vm4124_vm4, %v6713_v1 }
 0x4ef   : > { %3611 = vmatprep.mubr.bf16.mxu1 %v6655_v35  ;;  %5997 = vmatprep.mubr.msk.bf16.mxu0 %vm4124_vm4, %v6714_v62 }
 0x4f0   : > { %6026 = vmatpush3.bf16.msra.mxu0 %v6728_v22 }
 0x4f6   : > { %3612 = vmatmul.mubr.bf16.gmra.mrb[52].mxu1 %v6657_v40  ;;  %5998 = vmatmul.mubr.msk.bf16.gmra.mrb[20].mxu0 %vm4124_vm4, %v6715_v63 }
 0x4f7   : > { %3619 = vmatprep.mubr.bf16.mxu1 %v6661_v27  ;;  %6001 = vmatprep.mubr.msk.bf16.mxu0 %vm4124_vm4, %v6716_v5 }
 0x4fe   : > { %3620 = vmatmul.mubr.bf16.gmra.mrb[56].mxu1 %v6663_v24  ;;  %6002 = vmatmul.mubr.msk.bf16.gmra.mrb[24].mxu0 %vm4124_vm4, %v6717_v4 }
 0x4ff   : > { %3627 = vmatprep.mubr.bf16.mxu1 %v6667_v45  ;;  %6005 = vmatprep.mubr.msk.bf16.mxu0 %vm4124_vm4, %v6718_v21 }
 0x506   : > { %3628 = vmatmul.mubr.bf16.gmra.mrb[60].mxu1 %v6669_v47  ;;  %6006 = vmatmul.mubr.msk.bf16.gmra.mrb[28].mxu0 %vm4124_vm4, %v6719_v53 }
 0x507   : > { %3635 = vmatprep.mubr.bf16.mxu1 %v6670_v61  ;;  %6009 = vmatprep.mubr.msk.bf16.mxu0 %vm4124_vm4, %v6720_v0 }
 0x50e   : > { %3636 = vmatmul.mubr.bf16.gmra.mrb[64].mxu1 %v6672_v37  ;;  %6010 = vmatmul.mubr.msk.bf16.gmra.mrb[32].mxu0 %vm4124_vm4, %v6721_v12 }
 0x50f   : > { %3643 = vmatprep.mubr.bf16.mxu1 %v6673_v19  ;;  %6013 = vmatprep.mubr.msk.bf16.mxu0 %vm4124_vm4, %v6722_v14 }
 0x516   : > { %3644 = vmatmul.mubr.bf16.gmra.mrb[68].mxu1 %v6675_v60  ;;  %6014 = vmatmul.mubr.msk.bf16.gmra.mrb[36].mxu0 %vm4124_vm4, %v6723_v3 }
 0x517   : > { %3651 = vmatprep.mubr.bf16.mxu1 %v6676_v50  ;;  %6017 = vmatprep.mubr.msk.bf16.mxu0 %vm4124_vm4, %v6724_v7 }
 0x51e   : > { %3652 = vmatmul.mubr.bf16.gmra.mrb[72].mxu1 %v6678_v57  ;;  %6018 = vmatmul.mubr.msk.bf16.gmra.mrb[40].mxu0 %vm4124_vm4, %v6725_v42 }
 0x51f   : > { %3659 = vmatprep.mubr.bf16.mxu1 %v6679_v49  ;;  %6021 = vmatprep.mubr.msk.bf16.mxu0 %vm4124_vm4, %v6726_v23 }
 0x526   : > { %3660 = vmatmul.mubr.bf16.gmra.mrb[76].mxu1 %v6681_v6  ;;  %6022 = vmatmul.mubr.msk.bf16.gmra.mrb[44].mxu0 %vm4124_vm4, %v6727_v32 }
 0x527   : > { %3667 = vmatprep.mubr.bf16.mxu1 %v6682_v10 }
 0x52e   : > { %3668 = vmatmul.mubr.bf16.gmra.mrb[80].mxu1 %v6684_v25 }
 0x52f   : > { %3675 = vmatprep.mubr.bf16.mxu1 %v6685_v8 }
 0x536   : > { %3676 = vmatmul.mubr.bf16.gmra.mrb[84].mxu1 %v6687_v54 }
 0x537   : > { %3683 = vmatprep.mubr.bf16.mxu1 %v6688_v11 }
 0x53e   : > { %3684 = vmatmul.mubr.bf16.gmra.mrb[88].mxu1 %v6690_v17 }
 0x53f   : > { %3691 = vmatprep.mubr.bf16.mxu1 %v6692_v38 }
 0x546   : > { %3692 = vmatmul.mubr.bf16.gmra.mrb[92].mxu1 %v6694_v28 }
 0x547   : > { %3699 = vmatprep.mubr.bf16.mxu1 %v6697_v18 }
 0x54e   : > { %3700 = vmatmul.mubr.bf16.gmra.mrb[96].mxu1 %v6699_v44 }
 0x54f   : > { %3707 = vmatprep.mubr.bf16.mxu1 %v6701_v20 }
 0x556   : > { %3708 = vmatmul.mubr.bf16.gmra.mrb[100].mxu1 %v6703_v55 }
 0x557   : > { %3715 = vmatprep.mubr.bf16.mxu1 %v6704_v26 }
 0x55e   : > { %3716 = vmatmul.mubr.bf16.gmra.mrb[104].mxu1 %v6706_v29 }
 0x55f   : > { %3723 = vmatprep.mubr.bf16.mxu1 %v6707_v30 }
 0x561   : > { %v5570_v59 = vpop.f32.mrb[0].mxu1  ;;  %v5546_v31 = vpop.f32.mrb[0].mxu0 }
 0x562   : > { %v5571_v51 = vpop.f32.mrb[1].mxu1  ;;  %v5547_v2 = vpop.f32.mrb[1].mxu0 }
 0x563   : > { %v7746_v33 = vadd.f32 %v5571_v51, %v5570_v59  ;;  %v5573_v39 = vpop.f32.mrb[2].mxu1  ;;  %v7748_v9 = vadd.f32 %v5547_v2, %v5546_v31  ;;  %v5549_v35 = vpop.f32.mrb[2].mxu0 }
 0x564   : > { %v5574_v13 = vpop.f32.mrb[3].mxu1  ;;  %v5550_v36 = vpop.f32.mrb[3].mxu0 }
 0x565   : > { %v7750_v40 = vadd.f32 %v5574_v13, %v5573_v39  ;;  %v7752_v27 = vadd.f32 %v5550_v36, %v5549_v35 }
 0x566   : > { %3724 = vmatmul.mubr.bf16.gmra.mrb[108].mxu1 %v6709_v34 }
 0x569   : > { %v5576_v16 = vpop.f32.mrb[4].mxu1  ;;  %v5552_v43 = vpop.f32.mrb[4].mxu0 }
 0x56a   : > { %v5577_v24 = vpop.f32.mrb[5].mxu1  ;;  %v5553_v45 = vpop.f32.mrb[5].mxu0 }
 0x56b   : > { %v7754_v41 = vadd.f32 %v5577_v24, %v5576_v16  ;;  %v5579_v46 = vpop.f32.mrb[6].mxu1  ;;  %v7756_v47 = vadd.f32 %v5553_v45, %v5552_v43  ;;  %v5555_v61 = vpop.f32.mrb[6].mxu0 }
 0x56c   : > { %v5580_v52 = vpop.f32.mrb[7].mxu1  ;;  %v5556_v15 = vpop.f32.mrb[7].mxu0 }
 0x56d   : > { %v7758_v56 = vadd.f32 %v5580_v52, %v5579_v46  ;;  %v7760_v37 = vadd.f32 %v5556_v15, %v5555_v61 }
 0x571   : > { %v5582_v19 = vpop.f32.mrb[8].mxu1  ;;  %v5558_v48 = vpop.f32.mrb[8].mxu0 }
 0x572   : > { %v5583_v58 = vpop.f32.mrb[9].mxu1  ;;  %v5559_v60 = vpop.f32.mrb[9].mxu0 }
 0x573   : > { %v7762_v1 = vadd.f32 %v5583_v58, %v5582_v19  ;;  %v5585_v50 = vpop.f32.mrb[10].mxu1  ;;  %v7764_v62 = vadd.f32 %v5559_v60, %v5558_v48  ;;  %v5561_v57 = vpop.f32.mrb[10].mxu0 }
 0x574   : > { %v5586_v63 = vpop.f32.mrb[11].mxu1  ;;  %v5562_v49 = vpop.f32.mrb[11].mxu0 }
 0x575   : > { %v7766_v5 = vadd.f32 %v5586_v63, %v5585_v50  ;;  %v7768_v4 = vadd.f32 %v5562_v49, %v5561_v57 }
 0x579   : > { %v5588_v6 = vpop.f32.mrb[12].mxu1  ;;  %v5564_v10 = vpop.f32.mrb[12].mxu0 }
 0x57a   : > { %v5589_v21 = vpop.f32.mrb[13].mxu1  ;;  %v5565_v53 = vpop.f32.mrb[13].mxu0 }
 0x57b   : > { %v7770_v25 = vadd.f32 %v5589_v21, %v5588_v6  ;;  %v5591_v8 = vpop.f32.mrb[14].mxu1  ;;  %v7772_v0 = vadd.f32 %v5565_v53, %v5564_v10  ;;  %v5567_v12 = vpop.f32.mrb[14].mxu0 }
 0x57c   : > { %v5592_v54 = vpop.f32.mrb[15].mxu1  ;;  %v5568_v11 = vpop.f32.mrb[15].mxu0 }
 0x57d   : > { %v7774_v14 = vadd.f32 %v5592_v54, %v5591_v8  ;;  %v7776_v3 = vadd.f32 %v5568_v11, %v5567_v12 }
 0x581   : > { %v5594_v17 = vpop.f32.mrb[16].mxu1 }
 0x582   : > { %v5595_v38 = vpop.f32.mrb[17].mxu1 }
 0x583   : > { %v7778_v7 = vadd.f32 %v5595_v38, %v5594_v17  ;;  %v5597_v42 = vpop.f32.mrb[18].mxu1  ;;  %v7813_v17 = vld [vmem:[%s8277_s5] ss:$0 sm:$0xff] }
 0x584   : > { %v5598_v28 = vpop.f32.mrb[19].mxu1  ;;  %v3445_v38 = vadd.f32 %v7748_v9, %v7813_v17  ;;  %v3456_v9 = vadd.f32 %v7760_v37, %v7813_v17 }
 0x585   : > { %v7780_v18 = vadd.f32 %v5598_v28, %v5597_v42 }
 0x589   : > { %v5600_v23 = vpop.f32.mrb[20].mxu1 }
 0x58a   : > { %v5601_v32 = vpop.f32.mrb[21].mxu1 }
 0x58b   : > { %v7782_v44 = vadd.f32 %v5601_v32, %v5600_v23  ;;  %v5603_v20 = vpop.f32.mrb[22].mxu1  ;;  %v3448_v23 = vadd.f32 %v7752_v27, %v7813_v17 }
 0x58c   : > { %v5604_v22 = vpop.f32.mrb[23].mxu1 }
 0x58d   : > { %v7784_v55 = vadd.f32 %v5604_v22, %v5603_v20 }
 0x591   : > { %v5606_v26 = vpop.f32.mrb[24].mxu1 }
 0x592   : > { %v5607_v29 = vpop.f32.mrb[25].mxu1 }
 0x593   : > { %v7786_v30 = vadd.f32 %v5607_v29, %v5606_v26  ;;  %v5609_v59 = vpop.f32.mrb[26].mxu1 }
 0x594   : > { %v5610_v31 = vpop.f32.mrb[27].mxu1 }
 0x595   : > { %v7788_v51 = vadd.f32 %v5610_v31, %v5609_v59 }
 0x599   : > { %v5612_v34 = vpop.f32.mrb[28].mxu1 }
 0x59a   : > { %v5613_v2 = vpop.f32.mrb[29].mxu1 }
 0x59b   : > { %v7790_v39 = vadd.f32 %v5613_v2, %v5612_v34  ;;  %v5615_v35 = vpop.f32.mrb[30].mxu1  ;;  %v3453_v34 = vadd.f32 %v7756_v47, %v7813_v17  ;;  %v3464_v47 = vadd.f32 %v7768_v4, %v7813_v17 }
 0x59c   : > { %v5616_v13 = vpop.f32.mrb[31].mxu1 }
 0x59d   : > { %v7792_v36 = vadd.f32 %v5616_v13, %v5615_v35 }
 0x5a1   : > { %v5618_v16 = vpop.f32.mrb[32].mxu1 }
 0x5a2   : > { %v5619_v43 = vpop.f32.mrb[33].mxu1 }
 0x5a3   : > { %v7794_v24 = vadd.f32 %v5619_v43, %v5618_v16  ;;  %v5621_v45 = vpop.f32.mrb[34].mxu1 }
 0x5a4   : > { %v5622_v46 = vpop.f32.mrb[35].mxu1 }
 0x5a5   : > { %v7796_v61 = vadd.f32 %v5622_v46, %v5621_v45 }
 0x5a9   : > { %v5624_v52 = vpop.f32.mrb[36].mxu1 }
 0x5aa   : > { %v5625_v15 = vpop.f32.mrb[37].mxu1 }
 0x5ab   : > { %v7798_v19 = vadd.f32 %v5625_v15, %v5624_v52  ;;  %v5627_v48 = vpop.f32.mrb[38].mxu1  ;;  %v3461_v15 = vadd.f32 %v7764_v62, %v7813_v17  ;;  %v3472_v62 = vadd.f32 %v7776_v3, %v7813_v17  ;;  %v3480_v3 = vadd.f32 %v7750_v40, %v7813_v17 }
 0x5ac   : > { %v5628_v58 = vpop.f32.mrb[39].mxu1 }
 0x5ad   : > { %v7800_v60 = vadd.f32 %v5628_v58, %v5627_v48 }
 0x5b1   : > { %v5630_v50 = vpop.f32.mrb[40].mxu1 }
 0x5b2   : > { %v5631_v57 = vpop.f32.mrb[41].mxu1 }
 0x5b3   : > { %v7802_v63 = vadd.f32 %v5631_v57, %v5630_v50  ;;  %v5633_v49 = vpop.f32.mrb[42].mxu1 }
 0x5b4   : > { %v5634_v6 = vpop.f32.mrb[43].mxu1 }
 0x5b5   : > { %v7804_v10 = vadd.f32 %v5634_v6, %v5633_v49 }
 0x5b9   : > { %v5636_v21 = vpop.f32.mrb[44].mxu1 }
 0x5ba   : > { %v5637_v53 = vpop.f32.mrb[45].mxu1 }
 0x5bb   : > { %v7806_v8 = vadd.f32 %v5637_v53, %v5636_v21  ;;  %v5639_v12 = vpop.f32.mrb[46].mxu1 }
 0x5bc   : > { %v5640_v54 = vpop.f32.mrb[47].mxu1 }
 0x5bd   : > { %v7808_v11 = vadd.f32 %v5640_v54, %v5639_v12  ;;  %v3469_v12 = vadd.f32 %v7772_v0, %v7813_v17 }
 0x5c1   : > { %v5658_v42 = vpop.f32.mrb[48].mxu1 }
 0x5c2   : > { %v5659_v28 = vpop.f32.mrb[49].mxu1 }
 0x5c3   : > { %v5660_v32 = vadd.f32 %v5659_v28, %v5658_v42  ;;  %v5661_v20 = vpop.f32.mrb[50].mxu1 }
 0x5c4   : > { %v5662_v22 = vpop.f32.mrb[51].mxu1 }
 0x5c5   : > { %v3606_v26 = vadd.f32 %v5660_v32, %v3445_v38  ;;  %v5663_v29 = vadd.f32 %v5662_v22, %v5661_v20 }
 0x5c7   : > { %v3609_v59 = vadd.f32 %v5663_v29, %v3448_v23 }
 0x5c9   : > { %v4334_v31 = vpack.c.bf16 %v3609_v59, %v3606_v26  ;;  %v5664_v2 = vpop.f32.mrb[52].mxu1  ;;  %v3477_v59 = vadd.f32 %v7746_v33, %v7813_v17 }
 0x5ca   : > { %v5665_v35 = vpop.f32.mrb[53].mxu1 }
 0x5cb   : > { %v5666_v13 = vadd.f32 %v5665_v35, %v5664_v2  ;;  %v5667_v16 = vpop.f32.mrb[54].mxu1  ;;  %6027 = vmatprep.mubr.msk.bf16.mxu0 %vm4358_vm5, %v4334_v31 }
 0x5cc   : > { %v5668_v27 = vpop.f32.mrb[55].mxu1 }
 0x5cd   : > { %v3614_v43 = vadd.f32 %v5666_v13, %v3453_v34  ;;  %v5669_v45 = vadd.f32 %v5668_v27, %v5667_v16 }
 0x5cf   : > { %v3617_v46 = vadd.f32 %v5669_v45, %v3456_v9 }
 0x5d1   : > { %v4335_v52 = vpack.c.bf16 %v3617_v46, %v3614_v43  ;;  %v5670_v48 = vpop.f32.mrb[56].mxu1  ;;  %v3485_v43 = vadd.f32 %v7754_v41, %v7813_v17 }
 0x5d2   : > { %v5671_v58 = vpop.f32.mrb[57].mxu1 }
 0x5d3   : > { %v5672_v50 = vadd.f32 %v5671_v58, %v5670_v48  ;;  %v5673_v57 = vpop.f32.mrb[58].mxu1  ;;  %6028 = vmatmul.mubr.msk.bf16.vlgmr.msra.gmra.mrb[16].mxu0 %vm4358_vm5, %v4335_v52  ;;  %v3488_v52 = vadd.f32 %v7758_v56, %v7813_v17 }
 0x5d4   : > { %v5674_v37 = vpop.f32.mrb[59].mxu1 }
 0x5d5   : > { %v3622_v49 = vadd.f32 %v5672_v50, %v3461_v15  ;;  %v5675_v6 = vadd.f32 %v5674_v37, %v5673_v57  ;;  %v3493_v57 = vadd.f32 %v7762_v1, %v7813_v17 }
 0x5d7   : > { %v3625_v21 = vadd.f32 %v5675_v6, %v3464_v47  ;;  %v3496_v6 = vadd.f32 %v7766_v5, %v7813_v17 }
 0x5d9   : > { %v4336_v53 = vpack.c.bf16 %v3625_v21, %v3622_v49  ;;  %v5676_v54 = vpop.f32.mrb[60].mxu1 }
 0x5da   : > { %v5677_v38 = vpop.f32.mrb[61].mxu1 }
 0x5db   : > { %v5678_v42 = vadd.f32 %v5677_v38, %v5676_v54  ;;  %v5679_v28 = vpop.f32.mrb[62].mxu1  ;;  %6031 = vmatprep.mubr.msk.bf16.mxu0 %vm4358_vm5, %v4336_v53 }
 0x5dc   : > { %v5680_v4 = vpop.f32.mrb[63].mxu1 }
 0x5dd   : > { %v3630_v23 = vadd.f32 %v5678_v42, %v3469_v12  ;;  %v5681_v32 = vadd.f32 %v5680_v4, %v5679_v28  ;;  %v3504_v4 = vadd.f32 %v7774_v14, %v7813_v17 }
 0x5df   : > { %v3633_v20 = vadd.f32 %v5681_v32, %v3472_v62  ;;  %v3501_v62 = vadd.f32 %v7770_v25, %v7813_v17 }
 0x5e1   : > { %v4337_v22 = vpack.c.bf16 %v3633_v20, %v3630_v23  ;;  %v5682_v26 = vpop.f32.mrb[64].mxu1 }
 0x5e2   : > { %v5683_v29 = vpop.f32.mrb[65].mxu1 }
 0x5e3   : > { %v5684_v0 = vadd.f32 %v5683_v29, %v5682_v26  ;;  %v5685_v31 = vpop.f32.mrb[66].mxu1  ;;  %6032 = vmatmul.mubr.msk.bf16.gmra.mrb[20].mxu0 %vm4358_vm5, %v4337_v22  ;;  %v3509_v29 = vadd.f32 %v7778_v7, %v7813_v17 }
 0x5e4   : > { %v5686_v34 = vpop.f32.mrb[67].mxu1 }
 0x5e5   : > { %v3638_v2 = vadd.f32 %v5684_v0, %v3477_v59  ;;  %v5687_v35 = vadd.f32 %v5686_v34, %v5685_v31  ;;  %v3512_v31 = vadd.f32 %v7780_v18, %v7813_v17 }
 0x5e7   : > { %v3641_v9 = vadd.f32 %v5687_v35, %v3480_v3 }
 0x5e9   : > { %v4338_v13 = vpack.c.bf16 %v3641_v9, %v3638_v2  ;;  %v5688_v16 = vpop.f32.mrb[68].mxu1 }
 0x5ea   : > { %v5689_v27 = vpop.f32.mrb[69].mxu1 }
 0x5eb   : > { %v5690_v45 = vadd.f32 %v5689_v27, %v5688_v16  ;;  %v5691_v46 = vpop.f32.mrb[70].mxu1  ;;  %6035 = vmatprep.mubr.msk.bf16.mxu0 %vm4358_vm5, %v4338_v13  ;;  %v3517_v13 = vadd.f32 %v7782_v44, %v7813_v17 }
 0x5ec   : > { %v5692_v33 = vpop.f32.mrb[71].mxu1 }
 0x5ed   : > { %v3646_v15 = vadd.f32 %v5690_v45, %v3485_v43  ;;  %v5693_v48 = vadd.f32 %v5692_v33, %v5691_v46  ;;  %v3520_v43 = vadd.f32 %v7784_v55, %v7813_v17 }
 0x5ef   : > { %v3649_v40 = vadd.f32 %v5693_v48, %v3488_v52  ;;  %v3525_v48 = vadd.f32 %v7786_v30, %v7813_v17 }
 0x5f1   : > { %v4339_v58 = vpack.c.bf16 %v3649_v40, %v3646_v15  ;;  %v5694_v47 = vpop.f32.mrb[72].mxu1 }
 0x5f2   : > { %v5695_v50 = vpop.f32.mrb[73].mxu1 }
 0x5f3   : > { %v5696_v37 = vadd.f32 %v5695_v50, %v5694_v47  ;;  %v5697_v49 = vpop.f32.mrb[74].mxu1  ;;  %6036 = vmatmul.mubr.msk.bf16.gmra.mrb[24].mxu0 %vm4358_vm5, %v4339_v58  ;;  %v3528_v47 = vadd.f32 %v7788_v51, %v7813_v17 }
 0x5f4   : > { %v5698_v41 = vpop.f32.mrb[75].mxu1 }
 0x5f5   : > { %v3654_v21 = vadd.f32 %v5696_v37, %v3493_v57  ;;  %v5699_v53 = vadd.f32 %v5698_v41, %v5697_v49 }
 0x5f7   : > { %v3657_v56 = vadd.f32 %v5699_v53, %v3496_v6  ;;  %v3533_v6 = vadd.f32 %v7790_v39, %v7813_v17 }
 0x5f9   : > { %v4340_v12 = vpack.c.bf16 %v3657_v56, %v3654_v21  ;;  %v5700_v54 = vpop.f32.mrb[76].mxu1  ;;  %v3536_v56 = vadd.f32 %v7792_v36, %v7813_v17 }
 0x5fa   : > { %v5701_v38 = vpop.f32.mrb[77].mxu1 }
 0x5fb   : > { %v5702_v42 = vadd.f32 %v5701_v38, %v5700_v54  ;;  %v5703_v28 = vpop.f32.mrb[78].mxu1  ;;  %6039 = vmatprep.mubr.msk.bf16.mxu0 %vm4358_vm5, %v4340_v12 }
 0x5fc   : > { %v5704_v1 = vpop.f32.mrb[79].mxu1 }
 0x5fd   : > { %v3662_v23 = vadd.f32 %v5702_v42, %v3501_v62  ;;  %v5705_v32 = vadd.f32 %v5704_v1, %v5703_v28  ;;  %v3541_v28 = vadd.f32 %v7794_v24, %v7813_v17 }
 0x5ff   : > { %v3665_v5 = vadd.f32 %v5705_v32, %v3504_v4 }
 0x601   : > { %v4341_v20 = vpack.c.bf16 %v3665_v5, %v3662_v23  ;;  %v5706_v22 = vpop.f32.mrb[80].mxu1  ;;  %v3544_v23 = vadd.f32 %v7796_v61, %v7813_v17 }
 0x602   : > { %v5707_v26 = vpop.f32.mrb[81].mxu1 }
 0x603   : > { %v5708_v59 = vadd.f32 %v5707_v26, %v5706_v22  ;;  %v5709_v0 = vpop.f32.mrb[82].mxu1  ;;  %6040 = vmatmul.mubr.msk.bf16.gmra.mrb[28].mxu0 %vm4358_vm5, %v4341_v20 }
 0x604   : > { %v5710_v25 = vpop.f32.mrb[83].mxu1 }
 0x605   : > { %v3670_v34 = vadd.f32 %v5708_v59, %v3509_v29  ;;  %v5711_v3 = vadd.f32 %v5710_v25, %v5709_v0  ;;  %v3549_v29 = vadd.f32 %v7798_v19, %v7813_v17  ;;  %v3552_v25 = vadd.f32 %v7800_v60, %v7813_v17 }
 0x607   : > { %v3673_v14 = vadd.f32 %v5711_v3, %v3512_v31 }
 0x609   : > { %v4342_v2 = vpack.c.bf16 %v3673_v14, %v3670_v34  ;;  %v5712_v35 = vpop.f32.mrb[84].mxu1 }
 0x60a   : > { %v5713_v9 = vpop.f32.mrb[85].mxu1 }
 0x60b   : > { %v5714_v16 = vadd.f32 %v5713_v9, %v5712_v35  ;;  %v5715_v27 = vpop.f32.mrb[86].mxu1  ;;  %6043 = vmatprep.mubr.msk.bf16.mxu0 %vm4358_vm5, %v4342_v2  ;;  %v3557_v35 = vadd.f32 %v7802_v63, %v7813_v17 }
 0x60c   : > { %v5716_v7 = vpop.f32.mrb[87].mxu1 }
 0x60d   : > { %v3678_v45 = vadd.f32 %v5714_v16, %v3517_v13  ;;  %v5717_v46 = vadd.f32 %v5716_v7, %v5715_v27  ;;  %v3560_v16 = vadd.f32 %v7804_v10, %v7813_v17 }
 0x60f   : > { %v3681_v18 = vadd.f32 %v5717_v46, %v3520_v43 }
 0x611   : > { %v4343_v33 = vpack.c.bf16 %v3681_v18, %v3678_v45  ;;  %v5718_v52 = vpop.f32.mrb[88].mxu1  ;;  %v3565_v18 = vadd.f32 %v7806_v8, %v7813_v17 }
 0x612   : > { %v5719_v15 = vpop.f32.mrb[89].mxu1 }
 0x613   : > { %v5720_v40 = vadd.f32 %v5719_v15, %v5718_v52  ;;  %v5721_v58 = vpop.f32.mrb[90].mxu1  ;;  %6044 = vmatmul.mubr.msk.bf16.gmra.mrb[32].mxu0 %vm4358_vm5, %v4343_v33  ;;  %v3568_v15 = vadd.f32 %v7808_v11, %v7813_v17 }
 0x614   : > { %v5722_v44 = vpop.f32.mrb[91].mxu1 }
 0x615   : > { %v3686_v50 = vadd.f32 %v5720_v40, %v3525_v48  ;;  %v5723_v57 = vadd.f32 %v5722_v44, %v5721_v58  ;;  %v7898_v44 = vld [vmem:[%s8281_s9] ss:$0 sm:$0xff] }
 0x617   : > { %v3689_v55 = vadd.f32 %v5723_v57, %v3528_v47 }
 0x619   : > { %v4344_v37 = vpack.c.bf16 %v3689_v55, %v3686_v50  ;;  %v5724_v49 = vpop.f32.mrb[92].mxu1 }
 0x61a   : > { %v5725_v41 = vpop.f32.mrb[93].mxu1 }
 0x61b   : > { %v5726_v21 = vadd.f32 %v5725_v41, %v5724_v49  ;;  %v5727_v53 = vpop.f32.mrb[94].mxu1  ;;  %6047 = vmatprep.mubr.msk.bf16.mxu0 %vm4358_vm5, %v4344_v37 }
 0x61c   : > { %v5728_v30 = vpop.f32.mrb[95].mxu1 }
 0x61d   : > { %v3694_v12 = vadd.f32 %v5726_v21, %v3533_v6  ;;  %v5729_v54 = vadd.f32 %v5728_v30, %v5727_v53 }
 0x61f   : > { %v3697_v51 = vadd.f32 %v5729_v54, %v3536_v56 }
 0x621   : > { %v4345_v38 = vpack.c.bf16 %v3697_v51, %v3694_v12  ;;  %v5730_v62 = vpop.f32.mrb[96].mxu1 }
 0x622   : > { %v5731_v42 = vpop.f32.mrb[97].mxu1 }
 0x623   : > { %v5732_v1 = vadd.f32 %v5731_v42, %v5730_v62  ;;  %v5733_v4 = vpop.f32.mrb[98].mxu1  ;;  %6048 = vmatmul.mubr.msk.bf16.gmra.mrb[36].mxu0 %vm4358_vm5, %v4345_v38 }
 0x624   : > { %v5734_v39 = vpop.f32.mrb[99].mxu1 }
 0x625   : > { %v3702_v32 = vadd.f32 %v5732_v1, %v3541_v28  ;;  %v5735_v5 = vadd.f32 %v5734_v39, %v5733_v4 }
 0x627   : > { %v3705_v36 = vadd.f32 %v5735_v5, %v3544_v23 }
 0x629   : > { %v4346_v20 = vpack.c.bf16 %v3705_v36, %v3702_v32  ;;  %v5736_v22 = vpop.f32.mrb[100].mxu1 }
 0x62a   : > { %v5737_v26 = vpop.f32.mrb[101].mxu1 }
 0x62b   : > { %v5738_v59 = vadd.f32 %v5737_v26, %v5736_v22  ;;  %v5739_v0 = vpop.f32.mrb[102].mxu1  ;;  %6051 = vmatprep.mubr.msk.bf16.mxu0 %vm4358_vm5, %v4346_v20 }
 0x62c   : > { %v5740_v24 = vpop.f32.mrb[103].mxu1 }
 0x62d   : > { %v3710_v31 = vadd.f32 %v5738_v59, %v3549_v29  ;;  %v5741_v34 = vadd.f32 %v5740_v24, %v5739_v0 }
 0x62f   : > { %v3713_v61 = vadd.f32 %v5741_v34, %v3552_v25 }
 0x631   : > { %v4347_v3 = vpack.c.bf16 %v3713_v61, %v3710_v31  ;;  %v5742_v14 = vpop.f32.mrb[104].mxu1 }
 0x632   : > { %v5743_v2 = vpop.f32.mrb[105].mxu1 }
 0x633   : > { %v5744_v9 = vadd.f32 %v5743_v2, %v5742_v14  ;;  %v5745_v13 = vpop.f32.mrb[106].mxu1  ;;  %6052 = vmatmul.mubr.msk.bf16.gmra.mrb[40].mxu0 %vm4358_vm5, %v4347_v3 }
 0x634   : > { %v5746_v19 = vpop.f32.mrb[107].mxu1 }
 0x635   : > { %v3718_v27 = vadd.f32 %v5744_v9, %v3557_v35  ;;  %v5747_v7 = vadd.f32 %v5746_v19, %v5745_v13 }
 0x637   : > { %v3721_v60 = vadd.f32 %v5747_v7, %v3560_v16 }
 0x639   : > { %v4348_v43 = vpack.c.bf16 %v3721_v60, %v3718_v27  ;;  %v5748_v45 = vpop.f32.mrb[108].mxu1 }
 0x63a   : > { %v5749_v46 = vpop.f32.mrb[109].mxu1 }
 0x63b   : > { %v5750_v33 = vadd.f32 %v5749_v46, %v5748_v45  ;;  %v5751_v52 = vpop.f32.mrb[110].mxu1  ;;  %6055 = vmatprep.mubr.msk.bf16.mxu0 %vm4358_vm5, %v4348_v43 }
 0x63c   : > { %v5752_v63 = vpop.f32.mrb[111].mxu1 }
 0x63d   : > { %v3726_v48 = vadd.f32 %v5750_v33, %v3565_v18  ;;  %v5753_v40 = vadd.f32 %v5752_v63, %v5751_v52 }
 0x63f   : > { %v3729_v10 = vadd.f32 %v5753_v40, %v3568_v15 }
 0x641   : > { %v4349_v58 = vpack.c.bf16 %v3729_v10, %v3726_v48 }
 0x643   : > { %6056 = vmatmul.mubr.msk.bf16.gmra.mrb[44].mxu0 %vm4358_vm5, %v4349_v58 }
 0x6a6   : > { %v6029_v8 = vpop.f32.mrb[16].mxu0 }
 0x6a7   : > { %v7901_v47 = vadd.f32 %v6029_v8, %v7898_v44  ;;  %v4441_v50 = vpop.f32.mrb[17].mxu0 }
 0x6a8   : > { %v7904_v57 = vadd.f32 %v7898_v44, %v4441_v50  ;;  %v6030_v11 = vpop.f32.mrb[18].mxu0 }
 0x6a9   : > { %4643 = vmax.xlane.f32.xlu1 %v7901_v47  ;;  %v4444_v17 = vpop.f32.mrb[19].mxu0  ;;  %v7909_v55 = vadd.f32 %v6030_v11, %v7898_v44 }
 0x6aa   : > { %4639 = vmax.xlane.f32.xlu0 %v7904_v57  ;;  %v7912_v37 = vadd.f32 %v7898_v44, %v4444_v17 }
 0x6ad   : > { %4645 = vmax.xlane.f32.xlu1 %v7909_v55 }
 0x6ae   : > { %4641 = vmax.xlane.f32.xlu0 %v7912_v37 }
 0x6b6   : > { %v6033_v49 = vpop.f32.mrb[20].mxu0 }
 0x6b7   : > { %v7917_v41 = vadd.f32 %v6033_v49, %v7898_v44  ;;  %v4457_v6 = vpop.f32.mrb[21].mxu0 }
 0x6b8   : > { %v6034_v21 = vpop.f32.mrb[22].mxu0  ;;  %v7924_v56 = vadd.f32 %v7898_v44, %v4457_v6 }
 0x6b9   : > { %v7920_v53 = vadd.f32 %v6034_v21, %v7898_v44  ;;  %4651 = vmax.xlane.f32.xlu0 %v7917_v41  ;;  %v4460_v30 = vpop.f32.mrb[23].mxu0 }
 0x6ba   : > { %v7928_v12 = vadd.f32 %v7898_v44, %v4460_v30 }
 0x6bb   : > { %4653 = vmax.xlane.f32.xlu1 %v7920_v53 }
 0x6bd   : > { %4647 = vmax.xlane.f32.xlu0 %v7924_v56 }
 0x6bf   : > { %4649 = vmax.xlane.f32.xlu1 %v7928_v12 }
 0x6c6   : > { %v6037_v54 = vpop.f32.mrb[24].mxu0 }
 0x6c7   : > { %v7933_v51 = vadd.f32 %v6037_v54, %v7898_v44  ;;  %v4473_v38 = vpop.f32.mrb[25].mxu0 }
 0x6c8   : > { %v6038_v62 = vpop.f32.mrb[26].mxu0  ;;  %v7940_v1 = vadd.f32 %v7898_v44, %v4473_v38 }
 0x6c9   : > { %v7936_v42 = vadd.f32 %v6038_v62, %v7898_v44  ;;  %4659 = vmax.xlane.f32.xlu0 %v7933_v51  ;;  %v4476_v28 = vpop.f32.mrb[27].mxu0 }
 0x6ca   : > { %v7944_v4 = vadd.f32 %v7898_v44, %v4476_v28 }
 0x6cb   : > { %4661 = vmax.xlane.f32.xlu1 %v7936_v42 }
 0x6cd   : > { %4655 = vmax.xlane.f32.xlu0 %v7940_v1 }
 0x6cf   : > { %4657 = vmax.xlane.f32.xlu1 %v7944_v4 }
 0x6d6   : > { %v6041_v39 = vpop.f32.mrb[28].mxu0 }
 0x6d7   : > { %v7949_v23 = vadd.f32 %v6041_v39, %v7898_v44  ;;  %v4489_v32 = vpop.f32.mrb[29].mxu0 }
 0x6d8   : > { %v6042_v5 = vpop.f32.mrb[30].mxu0  ;;  %v7956_v22 = vadd.f32 %v7898_v44, %v4489_v32 }
 0x6d9   : > { %v7952_v36 = vadd.f32 %v6042_v5, %v7898_v44  ;;  %4667 = vmax.xlane.f32.xlu0 %v7949_v23  ;;  %v4492_v20 = vpop.f32.mrb[31].mxu0 }
 0x6da   : > { %v7960_v26 = vadd.f32 %v7898_v44, %v4492_v20 }
 0x6db   : > { %4669 = vmax.xlane.f32.xlu1 %v7952_v36 }
 0x6dd   : > { %4663 = vmax.xlane.f32.xlu0 %v7956_v22 }
 0x6df   : > { %4665 = vmax.xlane.f32.xlu1 %v7960_v26 }
 0x6e6   : > { %v6045_v29 = vpop.f32.mrb[32].mxu0 }
 0x6e7   : > { %v7965_v59 = vadd.f32 %v6045_v29, %v7898_v44  ;;  %v4505_v0 = vpop.f32.mrb[33].mxu0 }
 0x6e8   : > { %v6046_v24 = vpop.f32.mrb[34].mxu0  ;;  %v7972_v34 = vadd.f32 %v7898_v44, %v4505_v0 }
 0x6e9   : > { %v7968_v25 = vadd.f32 %v6046_v24, %v7898_v44  ;;  %4675 = vmax.xlane.f32.xlu0 %v7965_v59  ;;  %v4508_v31 = vpop.f32.mrb[35].mxu0 }
 0x6ea   : > { %v7976_v61 = vadd.f32 %v7898_v44, %v4508_v31 }
 0x6eb   : > { %4677 = vmax.xlane.f32.xlu1 %v7968_v25 }
 0x6ed   : > { %4671 = vmax.xlane.f32.xlu0 %v7972_v34 }
 0x6ef   : > { %4673 = vmax.xlane.f32.xlu1 %v7976_v61 }
 0x6f6   : > { %v6049_v3 = vpop.f32.mrb[36].mxu0 }
 0x6f7   : > { %v7981_v14 = vadd.f32 %v6049_v3, %v7898_v44  ;;  %v4521_v2 = vpop.f32.mrb[37].mxu0 }
 0x6f8   : > { %v6050_v35 = vpop.f32.mrb[38].mxu0  ;;  %v7988_v19 = vadd.f32 %v7898_v44, %v4521_v2 }
 0x6f9   : > { %v7984_v9 = vadd.f32 %v6050_v35, %v7898_v44  ;;  %4683 = vmax.xlane.f32.xlu0 %v7981_v14  ;;  %v4524_v13 = vpop.f32.mrb[39].mxu0 }
 0x6fa   : > { %v7992_v16 = vadd.f32 %v7898_v44, %v4524_v13 }
 0x6fb   : > { %4685 = vmax.xlane.f32.xlu1 %v7984_v9 }
 0x6fd   : > { %4679 = vmax.xlane.f32.xlu0 %v7988_v19 }
 0x6ff   : > { %4681 = vmax.xlane.f32.xlu1 %v7992_v16 }
 0x706   : > { %v6053_v27 = vpop.f32.mrb[40].mxu0 }
 0x707   : > { %v7997_v7 = vadd.f32 %v6053_v27, %v7898_v44  ;;  %v4537_v60 = vpop.f32.mrb[41].mxu0 }
 0x708   : > { %v6054_v43 = vpop.f32.mrb[42].mxu0  ;;  %v8004_v18 = vadd.f32 %v7898_v44, %v4537_v60 }
 0x709   : > { %v8000_v45 = vadd.f32 %v6054_v43, %v7898_v44  ;;  %4691 = vmax.xlane.f32.xlu0 %v7997_v7  ;;  %v4540_v46 = vpop.f32.mrb[43].mxu0 }
 0x70a   : > { %v8008_v33 = vadd.f32 %v7898_v44, %v4540_v46 }
 0x70b   : > { %4693 = vmax.xlane.f32.xlu1 %v8000_v45 }
 0x70d   : > { %4687 = vmax.xlane.f32.xlu0 %v8004_v18 }
 0x70f   : > { %4689 = vmax.xlane.f32.xlu1 %v8008_v33 }
 0x716   : > { %v6057_v52 = vpop.f32.mrb[44].mxu0 }
 0x717   : > { %v4553_v63 = vpop.f32.mrb[45].mxu0  ;;  %v8020_v58 = vadd.f32 %v6057_v52, %v7898_v44 }
 0x718   : > { %v8013_v15 = vadd.f32 %v7898_v44, %v4553_v63  ;;  %v6058_v48 = vpop.f32.mrb[46].mxu0 }
 0x719   : > { %v4556_v40 = vpop.f32.mrb[47].mxu0  ;;  %v8024_v8 = vadd.f32 %v6058_v48, %v7898_v44 }
 0x71a   : > { %v8016_v10 = vadd.f32 %v7898_v44, %v4556_v40  ;;  %4695 = vmax.xlane.f32.xlu0 %v8013_v15 }
 0x71c   : > { %4697 = vmax.xlane.f32.xlu1 %v8016_v10 }
 0x71e   : > { %4699 = vmax.xlane.f32.xlu0 %v8020_v58 }
 0x720   : > { %4701 = vmax.xlane.f32.xlu1 %v8024_v8 }
 0x736   : > { %v4644_v50 = vpop.xlane.xlu1 %4643 }
 0x737   : > { %v8029_v11 = vsub.f32 %v7901_v47, %v4644_v50  ;;  %v4640_v17 = vpop.xlane.xlu0 %4639 }
 0x738   : > { %v8032_v49 = vsub.f32 %v7904_v57, %v4640_v17 }
 0x739   : > { %v4739_v6 = vmul.f32 1.442695, %v8029_v11 }
 0x73a   : > { %v4735_v21 = vmul.f32 1.442695, %v8032_v49  ;;  %v4646_v30 = vpop.xlane.xlu1 %4645 }
 0x73b   : > { %6729 = vpow2.f32 %v4739_v6  ;;  %v8037_v44 = vsub.f32 %v7909_v55, %v4646_v30  ;;  %v4642_v54 = vpop.xlane.xlu0 %4641 }
 0x73c   : > { %v8040_v38 = vsub.f32 %v7912_v37, %v4642_v54  ;;  %6731 = vpow2.f32 %v4735_v21 }
 0x73d   : > { %v4741_v47 = vmul.f32 1.442695, %v8037_v44 }
 0x73e   : > { %v4737_v57 = vmul.f32 1.442695, %v8040_v38 }
 0x73f   : > { %6733 = vpow2.f32 %v4741_v47 }
 0x740   : > { %6735 = vpow2.f32 %v4737_v57 }
 0x745   : > { %v6730_v62 = vpop.eup %6729 }
 0x746   : > { %v4652_v28 = vpop.xlane.xlu0 %4651  ;;  %4803 = vadd.xlane.f32.xlu0 %v6730_v62  ;;  %v6732_v32 = vpop.eup %6731 }
 0x747   : > { %v8045_v39 = vsub.f32 %v7917_v41, %v4652_v28 }
 0x748   : > { %v4654_v55 = vpop.xlane.xlu1 %4653 }
 0x749   : > { %v6734_v5 = vpop.eup %6733  ;;  %v4747_v20 = vmul.f32 1.442695, %v8045_v39  ;;  %v8049_v37 = vsub.f32 %v7920_v53, %v4654_v55 }
 0x74a   : > { %v4648_v29 = vpop.xlane.xlu0 %4647  ;;  %4799 = vadd.xlane.f32.xlu0 %v6732_v32  ;;  %4805 = vadd.xlane.f32.xlu1 %v6734_v5  ;;  %v6736_v41 = vpop.eup %6735 }
 0x74b   : > { %6737 = vpow2.f32 %v4747_v20  ;;  %v4749_v0 = vmul.f32 1.442695, %v8049_v37  ;;  %v8053_v24 = vsub.f32 %v7924_v56, %v4648_v29 }
 0x74c   : > { %v4650_v31 = vpop.xlane.xlu1 %4649 }
 0x74d   : > { %6739 = vpow2.f32 %v4749_v0  ;;  %v4743_v3 = vmul.f32 1.442695, %v8053_v24  ;;  %v8057_v2 = vsub.f32 %v7928_v12, %v4650_v31 }
 0x74e   : > { %4801 = vadd.xlane.f32.xlu1 %v6736_v41 }
 0x74f   : > { %6741 = vpow2.f32 %v4743_v3  ;;  %v4745_v53 = vmul.f32 1.442695, %v8057_v2 }
 0x751   : > { %6743 = vpow2.f32 %v4745_v53 }
 0x755   : > { %v6738_v35 = vpop.eup %6737 }
 0x756   : > { %v4660_v13 = vpop.xlane.xlu0 %4659  ;;  %4811 = vadd.xlane.f32.xlu0 %v6738_v35 }
 0x757   : > { %v6740_v27 = vpop.eup %6739  ;;  %v8061_v56 = vsub.f32 %v7933_v51, %v4660_v13 }
 0x758   : > { %v4662_v60 = vpop.xlane.xlu1 %4661  ;;  %4813 = vadd.xlane.f32.xlu1 %v6740_v27 }
 0x759   : > { %v6742_v43 = vpop.eup %6741  ;;  %v4755_v46 = vmul.f32 1.442695, %v8061_v56  ;;  %v8065_v12 = vsub.f32 %v7936_v42, %v4662_v60 }
 0x75a   : > { %v4656_v52 = vpop.xlane.xlu0 %4655  ;;  %4807 = vadd.xlane.f32.xlu0 %v6742_v43 }
 0x75b   : > { %v6744_v63 = vpop.eup %6743  ;;  %6745 = vpow2.f32 %v4755_v46  ;;  %v4757_v48 = vmul.f32 1.442695, %v8065_v12  ;;  %v8069_v40 = vsub.f32 %v7940_v1, %v4656_v52 }
 0x75c   : > { %v4658_v50 = vpop.xlane.xlu1 %4657  ;;  %4809 = vadd.xlane.f32.xlu1 %v6744_v63 }
 0x75d   : > { %6747 = vpow2.f32 %v4757_v48  ;;  %v4751_v51 = vmul.f32 1.442695, %v8069_v40  ;;  %v8073_v17 = vsub.f32 %v7944_v4, %v4658_v50 }
 0x75f   : > { %6749 = vpow2.f32 %v4751_v51  ;;  %v4753_v42 = vmul.f32 1.442695, %v8073_v17 }
 0x761   : > { %6751 = vpow2.f32 %v4753_v42 }
 0x765   : > { %v6746_v6 = vpop.eup %6745 }
 0x766   : > { %v4668_v21 = vpop.xlane.xlu0 %4667  ;;  %4819 = vadd.xlane.f32.xlu0 %v6746_v6 }
 0x767   : > { %v6748_v30 = vpop.eup %6747  ;;  %v8077_v54 = vsub.f32 %v7949_v23, %v4668_v21 }
 0x768   : > { %v4670_v1 = vpop.xlane.xlu1 %4669  ;;  %4821 = vadd.xlane.f32.xlu1 %v6748_v30 }
 0x769   : > { %v6750_v47 = vpop.eup %6749  ;;  %v4763_v57 = vmul.f32 1.442695, %v8077_v54  ;;  %v8081_v62 = vsub.f32 %v7952_v36, %v4670_v1 }
 0x76a   : > { %v4664_v4 = vpop.xlane.xlu0 %4663  ;;  %4815 = vadd.xlane.f32.xlu0 %v6750_v47 }
 0x76b   : > { %v6752_v28 = vpop.eup %6751  ;;  %6753 = vpow2.f32 %v4763_v57  ;;  %v4765_v32 = vmul.f32 1.442695, %v8081_v62  ;;  %v8085_v55 = vsub.f32 %v7956_v22, %v4664_v4 }
 0x76c   : > { %v4666_v5 = vpop.xlane.xlu1 %4665  ;;  %4817 = vadd.xlane.f32.xlu1 %v6752_v28 }
 0x76d   : > { %6755 = vpow2.f32 %v4765_v32  ;;  %v4759_v23 = vmul.f32 1.442695, %v8085_v55  ;;  %v8089_v20 = vsub.f32 %v7960_v26, %v4666_v5 }
 0x76f   : > { %6757 = vpow2.f32 %v4759_v23  ;;  %v4761_v36 = vmul.f32 1.442695, %v8089_v20 }
 0x771   : > { %6759 = vpow2.f32 %v4761_v36 }
 0x775   : > { %v6754_v29 = vpop.eup %6753 }
 0x776   : > { %v4676_v0 = vpop.xlane.xlu0 %4675  ;;  %4827 = vadd.xlane.f32.xlu0 %v6754_v29 }
 0x777   : > { %v6756_v31 = vpop.eup %6755  ;;  %v8093_v41 = vsub.f32 %v7965_v59, %v4676_v0 }
 0x778   : > { %v4678_v22 = vpop.xlane.xlu1 %4677  ;;  %4829 = vadd.xlane.f32.xlu1 %v6756_v31 }
 0x779   : > { %v6758_v3 = vpop.eup %6757  ;;  %v4771_v53 = vmul.f32 1.442695, %v8093_v41  ;;  %v8097_v35 = vsub.f32 %v7968_v25, %v4678_v22 }
 0x77a   : > { %v4672_v26 = vpop.xlane.xlu0 %4671  ;;  %4823 = vadd.xlane.f32.xlu0 %v6758_v3 }
 0x77b   : > { %v6760_v13 = vpop.eup %6759  ;;  %6761 = vpow2.f32 %v4771_v53  ;;  %v4773_v27 = vmul.f32 1.442695, %v8097_v35  ;;  %v8101_v60 = vsub.f32 %v7972_v34, %v4672_v26 }
 0x77c   : > { %v4674_v43 = vpop.xlane.xlu1 %4673  ;;  %4825 = vadd.xlane.f32.xlu1 %v6760_v13 }
 0x77d   : > { %6763 = vpow2.f32 %v4773_v27  ;;  %v4767_v59 = vmul.f32 1.442695, %v8101_v60  ;;  %v8105_v46 = vsub.f32 %v7976_v61, %v4674_v43 }
 0x77f   : > { %6765 = vpow2.f32 %v4767_v59  ;;  %v4769_v25 = vmul.f32 1.442695, %v8105_v46 }
 0x781   : > { %6767 = vpow2.f32 %v4769_v25 }
 0x785   : > { %v6762_v52 = vpop.eup %6761 }
 0x786   : > { %v4684_v63 = vpop.xlane.xlu0 %4683  ;;  %4835 = vadd.xlane.f32.xlu0 %v6762_v52 }
 0x787   : > { %v6764_v48 = vpop.eup %6763  ;;  %v8109_v50 = vsub.f32 %v7981_v14, %v4684_v63 }
 0x788   : > { %v4686_v34 = vpop.xlane.xlu1 %4685  ;;  %4837 = vadd.xlane.f32.xlu1 %v6764_v48 }
 0x789   : > { %v6766_v51 = vpop.eup %6765  ;;  %v4779_v42 = vmul.f32 1.442695, %v8109_v50  ;;  %v8113_v6 = vsub.f32 %v7984_v9, %v4686_v34 }
 0x78a   : > { %v4680_v61 = vpop.xlane.xlu0 %4679  ;;  %4831 = vadd.xlane.f32.xlu0 %v6766_v51 }
 0x78b   : > { %v6768_v21 = vpop.eup %6767  ;;  %6769 = vpow2.f32 %v4779_v42  ;;  %v4781_v30 = vmul.f32 1.442695, %v8113_v6  ;;  %v8117_v1 = vsub.f32 %v7988_v19, %v4680_v61 }
 0x78c   : > { %v4682_v47 = vpop.xlane.xlu1 %4681  ;;  %4833 = vadd.xlane.f32.xlu1 %v6768_v21 }
 0x78d   : > { %6771 = vpow2.f32 %v4781_v30  ;;  %v4775_v14 = vmul.f32 1.442695, %v8117_v1  ;;  %v8121_v57 = vsub.f32 %v7992_v16, %v4682_v47 }
 0x78f   : > { %6773 = vpow2.f32 %v4775_v14  ;;  %v4777_v9 = vmul.f32 1.442695, %v8121_v57 }
 0x791   : > { %6775 = vpow2.f32 %v4777_v9 }
 0x795   : > { %v6770_v4 = vpop.eup %6769 }
 0x796   : > { %v4692_v28 = vpop.xlane.xlu0 %4691  ;;  %4843 = vadd.xlane.f32.xlu0 %v6770_v4 }
 0x797   : > { %v6772_v32 = vpop.eup %6771  ;;  %v8125_v5 = vsub.f32 %v7997_v7, %v4692_v28 }
 0x798   : > { %v4694_v19 = vpop.xlane.xlu1 %4693  ;;  %4845 = vadd.xlane.f32.xlu1 %v6772_v32 }
 0x799   : > { %v6774_v23 = vpop.eup %6773  ;;  %v4787_v36 = vmul.f32 1.442695, %v8125_v5  ;;  %v8129_v29 = vsub.f32 %v8000_v45, %v4694_v19 }
 0x79a   : > { %v4688_v16 = vpop.xlane.xlu0 %4687  ;;  %4839 = vadd.xlane.f32.xlu0 %v6774_v23 }
 0x79b   : > { %v6776_v0 = vpop.eup %6775  ;;  %6777 = vpow2.f32 %v4787_v36  ;;  %v4789_v31 = vmul.f32 1.442695, %v8129_v29  ;;  %v8133_v22 = vsub.f32 %v8004_v18, %v4688_v16 }
 0x79c   : > { %v4690_v3 = vpop.xlane.xlu1 %4689  ;;  %4841 = vadd.xlane.f32.xlu1 %v6776_v0 }
 0x79d   : > { %6779 = vpow2.f32 %v4789_v31  ;;  %v4783_v7 = vmul.f32 1.442695, %v8133_v22  ;;  %v8137_v53 = vsub.f32 %v8008_v33, %v4690_v3 }
 0x79f   : > { %6781 = vpow2.f32 %v4783_v7  ;;  %v4785_v45 = vmul.f32 1.442695, %v8137_v53 }
 0x7a1   : > { %6783 = vpow2.f32 %v4785_v45 }
 0x7a5   : > { %v6778_v26 = vpop.eup %6777 }
 0x7a6   : > { %4851 = vadd.xlane.f32.xlu0 %v6778_v26 }
 0x7a7   : > { %v6780_v13 = vpop.eup %6779  ;;  %v4696_v27 = vpop.xlane.xlu0 %4695 }
 0x7a8   : > { %v8141_v43 = vsub.f32 %v8013_v15, %v4696_v27  ;;  %4853 = vadd.xlane.f32.xlu1 %v6780_v13 }
 0x7a9   : > { %v6782_v18 = vpop.eup %6781  ;;  %v4698_v59 = vpop.xlane.xlu1 %4697 }
 0x7aa   : > { %v4791_v25 = vmul.f32 1.442695, %v8141_v43  ;;  %v8145_v52 = vsub.f32 %v8016_v10, %v4698_v59  ;;  %4847 = vadd.xlane.f32.xlu0 %v6782_v18 }
 0x7ab   : > { %v6784_v33 = vpop.eup %6783  ;;  %v4700_v63 = vpop.xlane.xlu0 %4699 }
 0x7ac   : > { %6785 = vpow2.f32 %v4791_v25  ;;  %v4793_v48 = vmul.f32 1.442695, %v8145_v52  ;;  %v8149_v34 = vsub.f32 %v8020_v58, %v4700_v63  ;;  %4849 = vadd.xlane.f32.xlu1 %v6784_v33 }
 0x7ad   : > { %v4702_v15 = vpop.xlane.xlu1 %4701 }
 0x7ae   : > { %6787 = vpow2.f32 %v4793_v48  ;;  %v4795_v51 = vmul.f32 1.442695, %v8149_v34  ;;  %v8153_v42 = vsub.f32 %v8024_v8, %v4702_v15 }
 0x7b0   : > { %6789 = vpow2.f32 %v4795_v51  ;;  %v4797_v10 = vmul.f32 1.442695, %v8153_v42 }
 0x7b2   : > { %6791 = vpow2.f32 %v4797_v10 }
 0x7b6   : > { %v6786_v61 = vpop.eup %6785 }
 0x7b7   : > { %4855 = vadd.xlane.f32.xlu0 %v6786_v61 }
 0x7b8   : > { %v6788_v21 = vpop.eup %6787 }
 0x7b9   : > { %4857 = vadd.xlane.f32.xlu1 %v6788_v21 }
 0x7ba   : > { %v6790_v30 = vpop.eup %6789 }
 0x7bb   : > { %4859 = vadd.xlane.f32.xlu0 %v6790_v30 }
 0x7bc   : > { %v6792_v58 = vpop.eup %6791 }
 0x7bd   : > { %4861 = vadd.xlane.f32.xlu1 %v6792_v58 }
 0x7d3   : > { %v4804_v47 = vpop.xlane.xlu0 %4803 }
 0x7d4   : > { %6793 = vlog2.f32 %v4804_v47 }
 0x7d7   : > { %v4800_v14 = vpop.xlane.xlu0 %4799  ;;  %v4806_v9 = vpop.xlane.xlu1 %4805 }
 0x7d8   : > { %6795 = vlog2.f32 %v4800_v14 }
 0x7d9   : > { %6797 = vlog2.f32 %v4806_v9 }
 0x7db   : > { %v4802_v8 = vpop.xlane.xlu1 %4801 }
 0x7dc   : > { %6799 = vlog2.f32 %v4802_v8 }
 0x7de   : > { %v6794_v4 = vpop.eup %6793 }
 0x7df   : > { %v4868_v28 = vmul.f32 0.6931472, %v6794_v4 }
 0x7e1   : > { %v4929_v32 = vsub.f32 %v8029_v11, %v4868_v28 }
 0x7e2   : > { %v6796_v19 = vpop.eup %6795 }
 0x7e3   : > { %v6798_v23 = vpop.eup %6797  ;;  %4961 = vst [vmem:[%s7103_s21 + $0x10] sm:$0xff] %v4929_v32  ;;  %v4864_v36 = vmul.f32 0.6931472, %v6796_v19  ;;  %v4812_v16 = vpop.xlane.xlu0 %4811 }
 0x7e4   : > { %v4870_v0 = vmul.f32 0.6931472, %v6798_v23  ;;  %6801 = vlog2.f32 %v4812_v16 }
 0x7e5   : > { %v4927_v31 = vsub.f32 %v8032_v49, %v4864_v36  ;;  %v4814_v3 = vpop.xlane.xlu1 %4813 }
 0x7e6   : > { %v6800_v7 = vpop.eup %6799  ;;  %v4930_v45 = vsub.f32 %v8037_v44, %v4870_v0  ;;  %6803 = vlog2.f32 %v4814_v3 }
 0x7e7   : > { %4959 = vst [vmem:[%s7103_s21] sm:$0xff] %v4927_v31  ;;  %v4866_v26 = vmul.f32 0.6931472, %v6800_v7  ;;  %v4808_v11 = vpop.xlane.xlu0 %4807 }
 0x7e8   : > { %4962 = vst [vmem:[%s7103_s21 + $0x18] sm:$0xff] %v4930_v45  ;;  %6805 = vlog2.f32 %v4808_v11 }
 0x7e9   : > { %v4928_v13 = vsub.f32 %v8040_v38, %v4866_v26  ;;  %v4810_v27 = vpop.xlane.xlu1 %4809 }
 0x7ea   : > { %6807 = vlog2.f32 %v4810_v27 }
 0x7eb   : > { %4960 = vst [vmem:[%s7103_s21 + $0x8] sm:$0xff] %v4928_v13 }
 0x7ee   : > { %v6802_v18 = vpop.eup %6801 }
 0x7ef   : > { %v4876_v59 = vmul.f32 0.6931472, %v6802_v18 }
 0x7f0   : > { %v6804_v49 = vpop.eup %6803 }
 0x7f1   : > { %v4933_v25 = vsub.f32 %v8045_v39, %v4876_v59  ;;  %v4878_v44 = vmul.f32 0.6931472, %v6804_v49 }
 0x7f2   : > { %v6806_v33 = vpop.eup %6805 }
 0x7f3   : > { %4965 = vst [vmem:[%s7103_s21 + $0x30] sm:$0xff] %v4933_v25  ;;  %v4934_v63 = vsub.f32 %v8049_v37, %v4878_v44  ;;  %v4872_v48 = vmul.f32 0.6931472, %v6806_v33  ;;  %v4820_v15 = vpop.xlane.xlu0 %4819 }
 0x7f4   : > { %v6808_v51 = vpop.eup %6807  ;;  %6809 = vlog2.f32 %v4820_v15 }
 0x7f5   : > { %4966 = vst [vmem:[%s7103_s21 + $0x38] sm:$0xff] %v4934_v63  ;;  %v4931_v38 = vsub.f32 %v8053_v24, %v4872_v48  ;;  %v4874_v10 = vmul.f32 0.6931472, %v6808_v51  ;;  %v4822_v61 = vpop.xlane.xlu1 %4821 }
 0x7f6   : > { %6811 = vlog2.f32 %v4822_v61 }
 0x7f7   : > { %4963 = vst [vmem:[%s7103_s21 + $0x20] sm:$0xff] %v4931_v38  ;;  %v4932_v39 = vsub.f32 %v8057_v2, %v4874_v10  ;;  %v4816_v21 = vpop.xlane.xlu0 %4815 }
 0x7f8   : > { %6813 = vlog2.f32 %v4816_v21 }
 0x7f9   : > { %4964 = vst [vmem:[%s7103_s21 + $0x28] sm:$0xff] %v4932_v39  ;;  %v4818_v30 = vpop.xlane.xlu1 %4817 }
 0x7fa   : > { %6815 = vlog2.f32 %v4818_v30 }
 0x7fe   : > { %v6810_v37 = vpop.eup %6809 }
 0x7ff   : > { %v4884_v58 = vmul.f32 0.6931472, %v6810_v37 }
 0x800   : > { %v6812_v47 = vpop.eup %6811 }
 0x801   : > { %v4937_v14 = vsub.f32 %v8061_v56, %v4884_v58  ;;  %v4886_v24 = vmul.f32 0.6931472, %v6812_v47 }
 0x802   : > { %v6814_v9 = vpop.eup %6813 }
 0x803   : > { %4969 = vst [vmem:[%s7103_s21 + $0x50] sm:$0xff] %v4937_v14  ;;  %v4938_v8 = vsub.f32 %v8065_v12, %v4886_v24  ;;  %v4880_v4 = vmul.f32 0.6931472, %v6814_v9  ;;  %v4828_v2 = vpop.xlane.xlu0 %4827 }
 0x804   : > { %v6816_v28 = vpop.eup %6815  ;;  %6817 = vlog2.f32 %v4828_v2 }
 0x805   : > { %4970 = vst [vmem:[%s7103_s21 + $0x58] sm:$0xff] %v4938_v8  ;;  %v4935_v32 = vsub.f32 %v8069_v40, %v4880_v4  ;;  %v4882_v19 = vmul.f32 0.6931472, %v6816_v28  ;;  %v4830_v23 = vpop.xlane.xlu1 %4829 }
 0x806   : > { %6819 = vlog2.f32 %v4830_v23 }
 0x807   : > { %4967 = vst [vmem:[%s7103_s21 + $0x40] sm:$0xff] %v4935_v32  ;;  %v4936_v56 = vsub.f32 %v8073_v17, %v4882_v19  ;;  %v4824_v36 = vpop.xlane.xlu0 %4823 }
 0x808   : > { %6821 = vlog2.f32 %v4824_v36 }
 0x809   : > { %4968 = vst [vmem:[%s7103_s21 + $0x48] sm:$0xff] %v4936_v56  ;;  %v4826_v16 = vpop.xlane.xlu1 %4825 }
 0x80a   : > { %6823 = vlog2.f32 %v4826_v16 }
 0x80e   : > { %v6818_v12 = vpop.eup %6817 }
 0x80f   : > { %v4892_v0 = vmul.f32 0.6931472, %v6818_v12 }
 0x810   : > { %v6820_v31 = vpop.eup %6819 }
 0x811   : > { %v4941_v3 = vsub.f32 %v8077_v54, %v4892_v0  ;;  %v4894_v40 = vmul.f32 0.6931472, %v6820_v31 }
 0x812   : > { %v6822_v7 = vpop.eup %6821 }
 0x813   : > { %4973 = vst [vmem:[%s7103_s21 + $0x70] sm:$0xff] %v4941_v3  ;;  %v4942_v45 = vsub.f32 %v8081_v62, %v4894_v40  ;;  %v4888_v26 = vmul.f32 0.6931472, %v6822_v7  ;;  %v4836_v17 = vpop.xlane.xlu0 %4835 }
 0x814   : > { %v6824_v11 = vpop.eup %6823  ;;  %6825 = vlog2.f32 %v4836_v17 }
 0x815   : > { %4974 = vst [vmem:[%s7103_s21 + $0x78] sm:$0xff] %v4942_v45  ;;  %v4939_v13 = vsub.f32 %v8085_v55, %v4888_v26  ;;  %v4890_v27 = vmul.f32 0.6931472, %v6824_v11  ;;  %v4838_v18 = vpop.xlane.xlu1 %4837 }
 0x816   : > { %6827 = vlog2.f32 %v4838_v18 }
 0x817   : > { %4971 = vst [vmem:[%s7103_s21 + $0x60] sm:$0xff] %v4939_v13  ;;  %v4940_v54 = vsub.f32 %v8089_v20, %v4890_v27  ;;  %v4832_v59 = vpop.xlane.xlu0 %4831 }
 0x818   : > { %6829 = vlog2.f32 %v4832_v59 }
 0x819   : > { %4972 = vst [vmem:[%s7103_s21 + $0x68] sm:$0xff] %v4940_v54  ;;  %v4834_v49 = vpop.xlane.xlu1 %4833 }
 0x81a   : > { %6831 = vlog2.f32 %v4834_v49 }
 0x81e   : > { %v6826_v62 = vpop.eup %6825 }
 0x81f   : > { %v4900_v25 = vmul.f32 0.6931472, %v6826_v62 }
 0x820   : > { %v6828_v44 = vpop.eup %6827 }
 0x821   : > { %v4945_v33 = vsub.f32 %v8093_v41, %v4900_v25  ;;  %v4902_v55 = vmul.f32 0.6931472, %v6828_v44 }
 0x822   : > { %v6830_v63 = vpop.eup %6829 }
 0x823   : > { %4977 = vst [vmem:[%s7103_s21 + $0x90] sm:$0xff] %v4945_v33  ;;  %v4946_v48 = vsub.f32 %v8097_v35, %v4902_v55  ;;  %v4896_v15 = vmul.f32 0.6931472, %v6830_v63  ;;  %v4844_v20 = vpop.xlane.xlu0 %4843 }
 0x824   : > { %v6832_v51 = vpop.eup %6831  ;;  %6833 = vlog2.f32 %v4844_v20 }
 0x825   : > { %4978 = vst [vmem:[%s7103_s21 + $0x98] sm:$0xff] %v4946_v48  ;;  %v4943_v38 = vsub.f32 %v8101_v60, %v4896_v15  ;;  %v4898_v10 = vmul.f32 0.6931472, %v6832_v51  ;;  %v4846_v61 = vpop.xlane.xlu1 %4845 }
 0x826   : > { %6835 = vlog2.f32 %v4846_v61 }
 0x827   : > { %4975 = vst [vmem:[%s7103_s21 + $0x80] sm:$0xff] %v4943_v38  ;;  %v4944_v41 = vsub.f32 %v8105_v46, %v4898_v10  ;;  %v4840_v39 = vpop.xlane.xlu0 %4839 }
 0x828   : > { %6837 = vlog2.f32 %v4840_v39 }
 0x829   : > { %4976 = vst [vmem:[%s7103_s21 + $0x88] sm:$0xff] %v4944_v41  ;;  %v4842_v21 = vpop.xlane.xlu1 %4841 }
 0x82a   : > { %6839 = vlog2.f32 %v4842_v21 }
 0x82e   : > { %v6834_v35 = vpop.eup %6833 }
 0x82f   : > { %v4908_v30 = vmul.f32 0.6931472, %v6834_v35 }
 0x830   : > { %v6836_v37 = vpop.eup %6835 }
 0x831   : > { %v4949_v58 = vsub.f32 %v8109_v50, %v4908_v30  ;;  %v4910_v60 = vmul.f32 0.6931472, %v6836_v37 }
 0x832   : > { %v6838_v47 = vpop.eup %6837 }
 0x833   : > { %4981 = vst [vmem:[%s7103_s21 + $0xb0] sm:$0xff] %v4949_v58  ;;  %v4950_v14 = vsub.f32 %v8113_v6, %v4910_v60  ;;  %v4904_v24 = vmul.f32 0.6931472, %v6838_v47  ;;  %v4852_v46 = vpop.xlane.xlu0 %4851 }
 0x834   : > { %v6840_v9 = vpop.eup %6839  ;;  %6841 = vlog2.f32 %v4852_v46 }
 0x835   : > { %4982 = vst [vmem:[%s7103_s21 + $0xb8] sm:$0xff] %v4950_v14  ;;  %v4947_v8 = vsub.f32 %v8117_v1, %v4904_v24  ;;  %v4906_v4 = vmul.f32 0.6931472, %v6840_v9  ;;  %v4854_v2 = vpop.xlane.xlu1 %4853 }
 0x836   : > { %6843 = vlog2.f32 %v4854_v2 }
 0x837   : > { %4979 = vst [vmem:[%s7103_s21 + $0xa0] sm:$0xff] %v4947_v8  ;;  %v4948_v50 = vsub.f32 %v8121_v57, %v4906_v4  ;;  %v4848_v28 = vpop.xlane.xlu0 %4847 }
 0x838   : > { %6845 = vlog2.f32 %v4848_v28 }
 0x839   : > { %4980 = vst [vmem:[%s7103_s21 + $0xa8] sm:$0xff] %v4948_v50  ;;  %v4850_v32 = vpop.xlane.xlu1 %4849 }
 0x83a   : > { %6847 = vlog2.f32 %v4850_v32 }
 0x83e   : > { %v6842_v6 = vpop.eup %6841 }
 0x83f   : > { %v4916_v19 = vmul.f32 0.6931472, %v6842_v6 }
 0x840   : > { %v6844_v23 = vpop.eup %6843 }
 0x841   : > { %v4953_v56 = vsub.f32 %v8125_v5, %v4916_v19  ;;  %v4918_v1 = vmul.f32 0.6931472, %v6844_v23 }
 0x842   : > { %v6846_v36 = vpop.eup %6845 }
 0x843   : > { %4985 = vst [vmem:[%s7103_s21 + $0xd0] sm:$0xff] %v4953_v56  ;;  %v4954_v16 = vsub.f32 %v8129_v29, %v4918_v1  ;;  %v4912_v12 = vmul.f32 0.6931472, %v6846_v36 }
 0x844   : > { %v6848_v57 = vpop.eup %6847  ;;  %v4856_v0 = vpop.xlane.xlu0 %4855 }
 0x845   : > { %4986 = vst [vmem:[%s7103_s21 + $0xd8] sm:$0xff] %v4954_v16  ;;  %v4951_v31 = vsub.f32 %v8133_v22, %v4912_v12  ;;  %v4914_v3 = vmul.f32 0.6931472, %v6848_v57  ;;  %6849 = vlog2.f32 %v4856_v0 }
 0x846   : > { %v4858_v40 = vpop.xlane.xlu1 %4857 }
 0x847   : > { %4983 = vst [vmem:[%s7103_s21 + $0xc0] sm:$0xff] %v4951_v31  ;;  %v4952_v7 = vsub.f32 %v8137_v53, %v4914_v3  ;;  %6851 = vlog2.f32 %v4858_v40 }
 0x848   : > { %v4860_v5 = vpop.xlane.xlu0 %4859 }
 0x849   : > { %4984 = vst [vmem:[%s7103_s21 + $0xc8] sm:$0xff] %v4952_v7  ;;  %6853 = vlog2.f32 %v4860_v5 }
 0x84a   : > { %v4862_v29 = vpop.xlane.xlu1 %4861 }
 0x84b   : > { %6855 = vlog2.f32 %v4862_v29 }
 0x84f   : > { %v6850_v45 = vpop.eup %6849 }
 0x850   : > { %v4920_v26 = vmul.f32 0.6931472, %v6850_v45 }
 0x851   : > { %v6852_v22 = vpop.eup %6851 }
 0x852   : > { %v4955_v17 = vsub.f32 %v8141_v43, %v4920_v26  ;;  %v4922_v11 = vmul.f32 0.6931472, %v6852_v22 }
 0x853   : > { %v6854_v13 = vpop.eup %6853 }
 0x854   : > { %4987 = vst [vmem:[%s7103_s21 + $0xe0] sm:$0xff] %v4955_v17  ;;  %v4956_v53 = vsub.f32 %v8145_v52, %v4922_v11  ;;  %v4924_v27 = vmul.f32 0.6931472, %v6854_v13 }
 0x855   : > { %v6856_v18 = vpop.eup %6855 }
 0x856   : > { %4988 = vst [vmem:[%s7103_s21 + $0xe8] sm:$0xff] %v4956_v53  ;;  %v4957_v54 = vsub.f32 %v8149_v34, %v4924_v27  ;;  %v4926_v59 = vmul.f32 0.6931472, %v6856_v18 }
 0x858   : > { %4989 = vst [vmem:[%s7103_s21 + $0xf0] sm:$0xff] %v4957_v54  ;;  %v4958_v43 = vsub.f32 %v8153_v42, %v4926_v59 }
 0x85a   : > { %4990 = vst [vmem:[%s7103_s21 + $0xf8] sm:$0xff] %v4958_v43 }
 0x85b   : > { %6898 = shalt.err (!%p6895_p7)
}
 0x85c   : > { %s6899_s11 = scalar_lea.hbm %s8222_s12, 4096  ;;  %s6903_s28 = scalar_lea.hbm %s8282_s10, 8192 }
 0x85d   : > { %p6900_p8 = scmp.ne.s32.totalorder %s8222_s12, %s6899_s11  ;;  %p6904_p2 = scmp.lt.u32.totalorder %s8222_s12, %s8282_s10 }
 0x85e   : > { %p6905_p1 = scmp.lt.u32.totalorder %s6903_s28, %s6899_s11  ;;  %p6907_p6 = scmp.lt.u32.totalorder %s6899_s11, %s8222_s12 }
 0x85f   : > { %p6901_p12 = pnand %p6900_p8, %p8294_p9 }
 0x860   : > { %p6906_p5 = por %p6905_p1, %p6904_p2 }
 0x861   : > { %p6902_p0 = pneg %p6901_p12 }
 0x862   : > { %p6908_p10 = por %p6907_p6, %p6906_p5 }
 0x864   : > { %p6909_p11 = pnand %p6908_p10, %p6902_p0 }
 0x866   : > { %6912 = shalt.err (!%p6909_p11)
}
 0x867   : > { %s6958_s25 = smov 128   ;;  %s6959_s26 = smov 8  }
 0x868   : > { %6329 = dma.vmem_to_hbm [thread:$0]  (%p8294_p9), %s8224_s20, 4096, %s8222_s12, %s8231_s17, %s6958_s25, %s6958_s25, %s6959_s26  }
 0x869 PF: > { %p6341_p13 = scmp.ge.s32.totalorder %s6951_s16, 2  ;;  %s5020_s29 = sand.u32 1, %s6939_s13  }
 0x86a   : > { %p8295_p3 = scmp.ne.s32.totalorder %s8287_s24, 0  ;;  %s5021_s11 = scalar_lea.sflag [#allocation6], %s5020_s29 }
 0x86c   : > { %p6336_p4 = pnand %p6341_p13, %p8295_p3 }
 0x86e   : > { %6934 = dma.done.wait (!%p6336_p4), %s5021_s11, 4096  }
 0x86f   : > { %6936 = vsyncadd (!%p6336_p4), %s5021_s11, 4294963200  ;;  %p21_p7 = scmp.ge.s32.totalorder %s7040_s19, 4   ;;  %s8296_s13 = smov %s6943_s14 }
 0x870   : > { %s8297_s14 = smov %s6947_s15  ;;  %s8298_s15 = smov %s7051_s22 }
 0x871   : > { %s8299_s16 = smov %s7040_s19  ;;  %23 = sbr.rel (!%p21_p7) target bundleno = 4 (0x4), region = 104 }
 0x878   :  { %5026 = vsyncpa [#allocation5], 1 }
 0x879   :  { %5028 = vsyncpa [#allocation5 + $0x1], 1 }
 0x87a   :  { %5029 = vsyncpa [#allocation6], 1 }
 0x87b   :  { %5031 = vsyncpa [#allocation6 + $0x1], 1 }

</bundles_post_ra>
